<compile_context>
chip_gen: v7x
topology: tpu7x:2x2x1
jax: 0.10.0
libtpu: 0.0.40
codegen_flags: <defaults>
</compile_context>

<pallas_src>
import jax
import jax.numpy as jnp
from jax import lax
from jax.experimental import pallas as pl
from jax.experimental.pallas import tpu as pltpu

BN_EPS = 1e-5
_PAD_L = 8          # left margin inside the conv scratch (sublane-aligned pad)


# ---------------------------------------------------------------------------
# Kernel 1: ConvTranspose2d(k=2, s=2) as a matmul  +  BN1 partial statistics
# ---------------------------------------------------------------------------
def _upsample_stats_kernel(x_ref, skip_ref, w_ref, b_ref, g_ref,
                           y_ref, su_ref, qu_ref, ss_ref, qs_ref):
    H, W, inc = x_ref.shape[1], x_ref.shape[2], x_ref.shape[3]
    x2 = x_ref[0].reshape(H * W, inc)                       # free (W % 8 == 0)
    y2 = jnp.dot(x2, w_ref[...], preferred_element_type=jnp.float32) + b_ref[...]
    y_ref[...] = y2.reshape(1, H, W, w_ref.shape[1])

    # BN1 partial stats for the upsampled channels: columns are (kh,kw,co);
    # a tiny 0/1 matmul groups them back per-channel (no lane-split reshape).
    su_ref[...] = jnp.dot(jnp.sum(y2, axis=0, keepdims=True), g_ref[...],
                          preferred_element_type=jnp.float32).reshape(1, 1, -1)
    qu_ref[...] = jnp.dot(jnp.sum(y2 * y2, axis=0, keepdims=True), g_ref[...],
                          preferred_element_type=jnp.float32).reshape(1, 1, -1)

    # BN1 partial stats for the skip channels.
    Hc, Wc, skc = skip_ref.shape[1], skip_ref.shape[2], skip_ref.shape[3]
    sk2 = skip_ref[0].reshape(Hc * Wc, skc)
    ss_ref[...] = jnp.sum(sk2, axis=0, keepdims=True).reshape(1, 1, skc)
    qs_ref[...] = jnp.sum(sk2 * sk2, axis=0, keepdims=True).reshape(1, 1, skc)


# ---------------------------------------------------------------------------
# Kernel 2: BN1+ReLU -> 3x3 conv c1, fused 1x1 shortcut, BN2 partial stats
# ---------------------------------------------------------------------------
def _c1_shortcut_kernel(up_ref, skip_ref, a1u_ref, b1u_ref, a1s_ref, b1s_ref,
                        w1u_ref, w1s_ref, c1b_ref, wsu_ref, wss_ref, sb_ref,
                        h_ref, s_ref, s2_ref, q2_ref, pu_ref, ps_ref):
    Hc, Wc, inc = up_ref.shape[1], up_ref.shape[2], up_ref.shape[3]
    skc = skip_ref.shape[3]
    outc = h_ref.shape[3]

    up = up_ref[0]                       # raw (pre-BN) upsampled channels
    sk = skip_ref[0]                     # raw skip channels

    # Zero-padded BN1+ReLU'd conv input built in VMEM (no HBM pad / concat).
    # Interior is placed at sublane offset _PAD_L so all stores stay aligned.
    pu_ref[...] = jnp.zeros_like(pu_ref)
    ps_ref[...] = jnp.zeros_like(ps_ref)
    pu_ref[1:Hc + 1, _PAD_L:_PAD_L + Wc, :] = jnp.maximum(
        up * a1u_ref[...] + b1u_ref[...], 0.0)
    ps_ref[1:Hc + 1, _PAD_L:_PAD_L + Wc, :] = jnp.maximum(
        sk * a1s_ref[...] + b1s_ref[...], 0.0)
    pu = pu_ref[...]
    ps = ps_ref[...]

    # 3x3 conv c1: kw shifts hoisted (3 sublane slices), kh slices are free.
    acc = jnp.zeros((Hc * Wc, outc), jnp.float32)
    for kw in range(3):
        cu = pu[:, _PAD_L - 1 + kw:_PAD_L - 1 + kw + Wc, :]
        cs = ps[:, _PAD_L - 1 + kw:_PAD_L - 1 + kw + Wc, :]
        for kh in range(3):
            acc = acc + jnp.dot(cu[kh:kh + Hc].reshape(Hc * Wc, inc),
                                w1u_ref[kh, kw],
                                preferred_element_type=jnp.float32)
            acc = acc + jnp.dot(cs[kh:kh + Hc].reshape(Hc * Wc, skc),
                                w1s_ref[kh, kw],
                                preferred_element_type=jnp.float32)
    acc = acc + c1b_ref[...]
    h_ref[...] = acc.reshape(1, Hc, Wc, outc)

    # BN2 partial stats on the c1 output (saves a full re-read later).
    s2_ref[...] = jnp.sum(acc, axis=0, keepdims=True).reshape(1, 1, outc)
    q2_ref[...] = jnp.sum(acc * acc, axis=0, keepdims=True).reshape(1, 1, outc)

    # 1x1 shortcut conv on the raw concatenated input, fused here (the cat
    # tensor is never materialized; weights are pre-split per channel group).
    s = (jnp.dot(up.reshape(Hc * Wc, inc), wsu_ref[...],
                 preferred_element_type=jnp.float32)
         + jnp.dot(sk.reshape(Hc * Wc, skc), wss_ref[...],
                   preferred_element_type=jnp.float32)
         + sb_ref[...])
    s_ref[...] = s.reshape(1, Hc, Wc, outc)


# ---------------------------------------------------------------------------
# Kernel 3: BN2+ReLU -> 3x3 conv c2, residual add (shortcut) fused
# ---------------------------------------------------------------------------
def _c2_residual_kernel(h_ref, s_ref, a2_ref, b2_ref, w2_ref, c2b_ref,
                        o_ref, p_ref):
    Hc, Wc, cin = h_ref.shape[1], h_ref.shape[2], h_ref.shape[3]
    outc = o_ref.shape[3]

    p_ref[...] = jnp.zeros_like(p_ref)
    p_ref[1:Hc + 1, _PAD_L:_PAD_L + Wc, :] = jnp.maximum(
        h_ref[0] * a2_ref[...] + b2_ref[...], 0.0)
    pv = p_ref[...]

    acc = jnp.zeros((Hc * Wc, outc), jnp.float32)
    for kw in range(3):
        c = pv[:, _PAD_L - 1 + kw:_PAD_L - 1 + kw + Wc, :]
        for kh in range(3):
            acc = acc + jnp.dot(c[kh:kh + Hc].reshape(Hc * Wc, cin),
                                w2_ref[kh, kw],
                                preferred_element_type=jnp.float32)
    acc = acc + c2b_ref[...]
    acc = acc + s_ref[0].reshape(Hc * Wc, outc)              # residual add
    o_ref[...] = acc.reshape(1, Hc, Wc, outc)


# ---------------------------------------------------------------------------
# DecoderBlock forward (NCHW in / NCHW out)
# ---------------------------------------------------------------------------
def decoder_block_forward(params, inputs_nchw, skip_nchw):
    x = jnp.transpose(inputs_nchw, (0, 2, 3, 1)).astype(jnp.float32)   # NHWC
    skip = jnp.transpose(skip_nchw, (0, 2, 3, 1)).astype(jnp.float32)  # NHWC
    N, H, W, inc = x.shape
    Hc, Wc, outc = skip.shape[1], skip.shape[2], skip.shape[3]
    C1 = inc + outc
    M = N * Hc * Wc

    cp = pltpu.CompilerParams(
        dimension_semantics=("parallel",),        # batch axis -> v7x megacore
        vmem_limit_bytes=32 * 1024 * 1024)        # safe on v5e/v6e/v7x

    # --- K1: upsample matmul + BN1 partial stats ---------------------------
    # torch ConvTranspose2d weight (in, out, kh, kw) -> (in, kh*kw*out) matrix
    w_up = jnp.transpose(params["up_w"], (0, 2, 3, 1)).reshape(inc, 4 * inc)
    b_up = jnp.tile(params["up_b"], 4).reshape(1, 4 * inc)
    gmat = jnp.tile(jnp.eye(inc, dtype=jnp.float32), (4, 1))   # (4*inc, inc)

    y, su, qu, ss, qs = pl.pallas_call(
        _upsample_stats_kernel,
        out_shape=(jax.ShapeDtypeStruct((N, H, W, 4 * inc), jnp.float32),
                   jax.ShapeDtypeStruct((N, 1, inc), jnp.float32),
                   jax.ShapeDtypeStruct((N, 1, inc), jnp.float32),
                   jax.ShapeDtypeStruct((N, 1, outc), jnp.float32),
                   jax.ShapeDtypeStruct((N, 1, outc), jnp.float32)),
        grid=(N,),
        in_specs=[pl.BlockSpec((1, H, W, inc), lambda n: (n, 0, 0, 0)),
                  pl.BlockSpec((1, Hc, Wc, outc), lambda n: (n, 0, 0, 0)),
                  pl.BlockSpec((inc, 4 * inc), lambda n: (0, 0)),
                  pl.BlockSpec((1, 4 * inc), lambda n: (0, 0)),
                  pl.BlockSpec((4 * inc, inc), lambda n: (0, 0))],
        out_specs=(pl.BlockSpec((1, H, W, 4 * inc), lambda n: (n, 0, 0, 0)),
                   pl.BlockSpec((1, 1, inc), lambda n: (n, 0, 0)),
                   pl.BlockSpec((1, 1, inc), lambda n: (n, 0, 0)),
                   pl.BlockSpec((1, 1, outc), lambda n: (n, 0, 0)),
                   pl.BlockSpec((1, 1, outc), lambda n: (n, 0, 0))),
        compiler_params=cp,
    )(x, skip, w_up, b_up, gmat)

    # TODO(synk): the stride-2 interleave of the ConvTranspose output is still
    # one XLA reshape/transpose; folding it into the kernel needs strided
    # sublane/lane scatter and was left out for robustness.
    up = y.reshape(N, H, W, 2, 2, inc).transpose(0, 1, 3, 2, 4, 5) \
          .reshape(N, Hc, Wc, inc)

    # --- finalize BN1 (training-mode batch stats, biased var) --------------
    mean_u = jnp.sum(su, axis=(0, 1)) / M
    var_u = jnp.maximum(jnp.sum(qu, axis=(0, 1)) / M - mean_u * mean_u, 0.0)
    mean_s = jnp.sum(ss, axis=(0, 1)) / M
    var_s = jnp.maximum(jnp.sum(qs, axis=(0, 1)) / M - mean_s * mean_s, 0.0)
    g1, be1 = params["bn1_g"], params["bn1_b"]
    a1u = (g1[:inc] * lax.rsqrt(var_u + BN_EPS)).reshape(1, inc)
    b1u = (be1[:inc] - mean_u * a1u[0]).reshape(1, inc)
    a1s = (g1[inc:] * lax.rsqrt(var_s + BN_EPS)).reshape(1, outc)
    b1s = (be1[inc:] - mean_s * a1s[0]).reshape(1, outc)

    # conv / shortcut weights, pre-split per channel group (up | skip)
    w1 = jnp.transpose(params["c1_w"], (2, 3, 1, 0))        # OIHW -> HWIO
    w1u, w1s = w1[:, :, :inc, :], w1[:, :, inc:, :]
    c1b = params["c1_b"].reshape(1, outc)
    ws = jnp.transpose(params["s_w"].reshape(outc, C1))     # (C1, outc)
    wsu, wss = ws[:inc, :], ws[inc:, :]
    sb = params["s_b"].reshape(1, outc)

    # --- K2: BN1+ReLU + c1 + shortcut + BN2 partial stats -------------------
    h1c, s, s2, q2 = pl.pallas_call(
        _c1_shortcut_kernel,
        out_shape=(jax.ShapeDtypeStruct((N, Hc, Wc, outc), jnp.float32),
                   jax.ShapeDtypeStruct((N, Hc, Wc, outc), jnp.float32),
                   jax.ShapeDtypeStruct((N, 1, outc), jnp.float32),
                   jax.ShapeDtypeStruct((N, 1, outc), jnp.float32)),
        grid=(N,),
        in_specs=[pl.BlockSpec((1, Hc, Wc, inc), lambda n: (n, 0, 0, 0)),
                  pl.BlockSpec((1, Hc, Wc, outc), lambda n: (n, 0, 0, 0)),
                  pl.BlockSpec((1, inc), lambda n: (0, 0)),
                  pl.BlockSpec((1, inc), lambda n: (0, 0)),
                  pl.BlockSpec((1, outc), lambda n: (0, 0)),
                  pl.BlockSpec((1, outc), lambda n: (0, 0)),
                  pl.BlockSpec((3, 3, inc, outc), lambda n: (0, 0, 0, 0)),
                  pl.BlockSpec((3, 3, outc, outc), lambda n: (0, 0, 0, 0)),
                  pl.BlockSpec((1, outc), lambda n: (0, 0)),
                  pl.BlockSpec((inc, outc), lambda n: (0, 0)),
                  pl.BlockSpec((outc, outc), lambda n: (0, 0)),
                  pl.BlockSpec((1, outc), lambda n: (0, 0))],
        out_specs=(pl.BlockSpec((1, Hc, Wc, outc), lambda n: (n, 0, 0, 0)),
                   pl.BlockSpec((1, Hc, Wc, outc), lambda n: (n, 0, 0, 0)),
                   pl.BlockSpec((1, 1, outc), lambda n: (n, 0, 0)),
                   pl.BlockSpec((1, 1, outc), lambda n: (n, 0, 0))),
        scratch_shapes=[pltpu.VMEM((Hc + 2, Wc + 2 * _PAD_L, inc), jnp.float32),
                        pltpu.VMEM((Hc + 2, Wc + 2 * _PAD_L, outc), jnp.float32)],
        compiler_params=cp,
    )(up, skip, a1u, b1u, a1s, b1s, w1u, w1s, c1b, wsu, wss, sb)

    # --- finalize BN2 --------------------------------------------------------
    mean2 = jnp.sum(s2, axis=(0, 1)) / M
    var2 = jnp.maximum(jnp.sum(q2, axis=(0, 1)) / M - mean2 * mean2, 0.0)
    a2 = (params["bn2_g"] * lax.rsqrt(var2 + BN_EPS)).reshape(1, outc)
    b2 = (params["bn2_b"] - mean2 * a2[0]).reshape(1, outc)
    w2 = jnp.transpose(params["c2_w"], (2, 3, 1, 0))
    c2b = params["c2_b"].reshape(1, outc)

    # --- K3: BN2+ReLU + c2 + residual add ------------------------------------
    out = pl.pallas_call(
        _c2_residual_kernel,
        out_shape=jax.ShapeDtypeStruct((N, Hc, Wc, outc), jnp.float32),
        grid=(N,),
        in_specs=[pl.BlockSpec((1, Hc, Wc, outc), lambda n: (n, 0, 0, 0)),
                  pl.BlockSpec((1, Hc, Wc, outc), lambda n: (n, 0, 0, 0)),
                  pl.BlockSpec((1, outc), lambda n: (0, 0)),
                  pl.BlockSpec((1, outc), lambda n: (0, 0)),
                  pl.BlockSpec((3, 3, outc, outc), lambda n: (0, 0, 0, 0)),
                  pl.BlockSpec((1, outc), lambda n: (0, 0))],
        out_specs=pl.BlockSpec((1, Hc, Wc, outc), lambda n: (n, 0, 0, 0)),
        scratch_shapes=[pltpu.VMEM((Hc + 2, Wc + 2 * _PAD_L, outc), jnp.float32)],
        compiler_params=cp,
    )(h1c, s, a2, b2, w2, c2b)

    return jnp.transpose(out, (0, 3, 1, 2))                  # back to NCHW


# ---------------------------------------------------------------------------
# params + pure-JAX reference
# ---------------------------------------------------------------------------
def init_params(key, inc, outc):
    C1 = inc + outc
    ks = jax.random.split(key, 12)

    def nrm(k, shape, s=0.1):
        return (s * jax.random.normal(k, shape)).astype(jnp.float32)

    return dict(
        up_w=nrm(ks[0], (inc, inc, 2, 2)),        # ConvTranspose2d (in,out,kh,kw)
        up_b=nrm(ks[1], (inc,)),
        bn1_g=1.0 + nrm(ks[2], (C1,)),
        bn1_b=nrm(ks[3], (C1,)),
        c1_w=nrm(ks[4], (outc, C1, 3, 3)),        # Conv2d OIHW
        c1_b=nrm(ks[5], (outc,)),
        bn2_g=1.0 + nrm(ks[6], (outc,)),
        bn2_b=nrm(ks[7], (outc,)),
        c2_w=nrm(ks[8], (outc, outc, 3, 3)),
        c2_b=nrm(ks[9], (outc,)),
        s_w=nrm(ks[10], (outc, C1, 1, 1)),
        s_b=nrm(ks[11], (outc,)),
    )


def reference_forward(params, inputs, skip):
    """Pure-JAX NCHW reference mirroring the PyTorch forward."""
    up = jnp.einsum("ncij,cdhw->ndihjw", inputs, params["up_w"])
    N, d, H, _, W, _ = up.shape
    up = up.reshape(N, d, 2 * H, 2 * W) + params["up_b"][None, :, None, None]
    cat = jnp.concatenate([up, skip], axis=1)

    def bn_relu(x, g, b):
        mu = jnp.mean(x, axis=(0, 2, 3), keepdims=True)
        var = jnp.mean((x - mu) ** 2, axis=(0, 2, 3), keepdims=True)
        xn = (x - mu) / jnp.sqrt(var + BN_EPS)
        return jnp.maximum(xn * g[None, :, None, None] + b[None, :, None, None], 0.0)

    def conv(x, w, b, pad):
        y = lax.conv_general_dilated(x, w, (1, 1), pad,
                                     dimension_numbers=("NCHW", "OIHW", "NCHW"))
        return y + b[None, :, None, None]

    h = bn_relu(cat, params["bn1_g"], params["bn1_b"])
    h = conv(h, params["c1_w"], params["c1_b"], "SAME")
    h = bn_relu(h, params["bn2_g"], params["bn2_b"])
    h = conv(h, params["c2_w"], params["c2_b"], "SAME")
    s = conv(cat, params["s_w"], params["s_b"], "VALID")
    return h + s


if __name__ == "__main__":
    key = jax.random.PRNGKey(0)
    inc, outc = 8, 4
    N, H, W = 2, 8, 8
    k1, k2, k3 = jax.random.split(key, 3)
    inputs = jax.random.normal(k1, (N, inc, H, W), jnp.float32)
    skip = jax.random.normal(k2, (N, outc, 2 * H, 2 * W), jnp.float32)
    params = init_params(k3, inc, outc)

    fwd = jax.jit(decoder_block_forward)
    out = jax.block_until_ready(fwd(params, inputs, skip))
    ref = jax.block_until_ready(reference_forward(params, inputs, skip))

    assert out.shape == (N, outc, 2 * H, 2 * W), out.shape
    err = float(jnp.max(jnp.abs(out - ref)))
    assert err < 1e-3, f"max abs err {err}"
    print("KERNEL_OK")
</pallas_src>

<mosaic_0001>
module attributes {stable_mosaic.version = 11 : i64} {
  func.func @_upsample_stats_kernel(%arg0: i32, %arg1: memref<1x8x8x8xf32, #tpu.memory_space<vmem>>, %arg2: memref<1x16x16x4xf32, #tpu.memory_space<vmem>>, %arg3: memref<8x32xf32, #tpu.memory_space<vmem>>, %arg4: memref<1x32xf32, #tpu.memory_space<vmem>>, %arg5: memref<32x8xf32, #tpu.memory_space<vmem>>, %arg6: memref<1x8x8x32xf32, #tpu.memory_space<vmem>>, %arg7: memref<1x1x8xf32, #tpu.memory_space<vmem>>, %arg8: memref<1x1x8xf32, #tpu.memory_space<vmem>>, %arg9: memref<1x1x4xf32, #tpu.memory_space<vmem>>, %arg10: memref<1x1x4xf32, #tpu.memory_space<vmem>>) attributes {dimension_semantics = [#tpu.dimension_semantics<parallel>], iteration_bounds = array<i64: 2>, scalar_prefetch = 0 : i64, scratch_operands = 0 : i64, tpu.core_type = #tpu.core_type<tc>, window_params = [{transform_indices = @transform_0, window_bounds = array<i64: 1, 8, 8, 8>}, {transform_indices = @transform_1, window_bounds = array<i64: 1, 16, 16, 4>}, {pipeline_mode = #tpu.pipeline_mode<synchronous>, transform_indices = @transform_2, window_bounds = array<i64: 8, 32>}, {pipeline_mode = #tpu.pipeline_mode<synchronous>, transform_indices = @transform_3, window_bounds = array<i64: 1, 32>}, {pipeline_mode = #tpu.pipeline_mode<synchronous>, transform_indices = @transform_4, window_bounds = array<i64: 32, 8>}, {transform_indices = @transform_5, window_bounds = array<i64: 1, 8, 8, 32>}, {transform_indices = @transform_6, window_bounds = array<i64: 1, 1, 8>}, {transform_indices = @transform_7, window_bounds = array<i64: 1, 1, 8>}, {transform_indices = @transform_8, window_bounds = array<i64: 1, 1, 4>}, {transform_indices = @transform_9, window_bounds = array<i64: 1, 1, 4>}]} {
    %c0 = arith.constant 0 : index
    %c0_0 = arith.constant 0 : index
    %c0_1 = arith.constant 0 : index
    %c0_2 = arith.constant 0 : index
    %0 = vector.load %arg1[%c0, %c0_0, %c0_1, %c0_2] : memref<1x8x8x8xf32, #tpu.memory_space<vmem>>, vector<1x8x8x8xf32>
    %1 = vector.shape_cast %0 : vector<1x8x8x8xf32> to vector<8x8x8xf32>
    %2 = vector.shape_cast %1 : vector<8x8x8xf32> to vector<64x8xf32>
    %c0_3 = arith.constant 0 : index
    %c0_4 = arith.constant 0 : index
    %3 = vector.load %arg3[%c0_3, %c0_4] : memref<8x32xf32, #tpu.memory_space<vmem>>, vector<8x32xf32>
    %cst = arith.constant dense<0.000000e+00> : vector<64x32xf32>
    %4 = tpu.matmul %2, %3, %cst {dimension_numbers = #tpu.dot_dimension_numbers<[1], [0], [0], [1], [0, 0, 1, 1], [], []>} : vector<64x8xf32>, vector<8x32xf32>, vector<64x32xf32> -> vector<64x32xf32>
    %c0_5 = arith.constant 0 : index
    %c0_6 = arith.constant 0 : index
    %5 = vector.load %arg4[%c0_5, %c0_6] : memref<1x32xf32, #tpu.memory_space<vmem>>, vector<1x32xf32>
    %6 = vector.broadcast %5 : vector<1x32xf32> to vector<64x32xf32>
    %7 = arith.addf %4, %6 : vector<64x32xf32>
    %8 = vector.shape_cast %7 : vector<64x32xf32> to vector<1x8x8x32xf32>
    %c0_7 = arith.constant 0 : index
    %c0_8 = arith.constant 0 : index
    %c0_9 = arith.constant 0 : index
    %c0_10 = arith.constant 0 : index
    %9 = vector.load %arg6[%c0_7, %c0_8, %c0_9, %c0_10] : memref<1x8x8x32xf32, #tpu.memory_space<vmem>>, vector<1x8x8x32xf32>
    tpu.vector_store %arg6[%c0_7, %c0_8, %c0_9, %c0_10], %8 {strides = array<i32>} : memref<1x8x8x32xf32, #tpu.memory_space<vmem>>, vector<1x8x8x32xf32>,
    %cst_11 = arith.constant dense<0.000000e+00> : vector<32xf32>
    %10 = vector.multi_reduction <add>, %7, %cst_11 [0] : vector<64x32xf32> to vector<32xf32>
    %11 = vector.shape_cast %10 : vector<32xf32> to vector<1x32xf32>
    %c0_12 = arith.constant 0 : index
    %c0_13 = arith.constant 0 : index
    %12 = vector.load %arg5[%c0_12, %c0_13] : memref<32x8xf32, #tpu.memory_space<vmem>>, vector<32x8xf32>
    %cst_14 = arith.constant dense<0.000000e+00> : vector<1x8xf32>
    %13 = tpu.matmul %11, %12, %cst_14 {dimension_numbers = #tpu.dot_dimension_numbers<[1], [0], [0], [1], [0, 0, 1, 1], [], []>} : vector<1x32xf32>, vector<32x8xf32>, vector<1x8xf32> -> vector<1x8xf32>
    %14 = vector.shape_cast %13 : vector<1x8xf32> to vector<1x1x8xf32>
    %c0_15 = arith.constant 0 : index
    %c0_16 = arith.constant 0 : index
    %c0_17 = arith.constant 0 : index
    %15 = vector.load %arg7[%c0_15, %c0_16, %c0_17] : memref<1x1x8xf32, #tpu.memory_space<vmem>>, vector<1x1x8xf32>
    tpu.vector_store %arg7[%c0_15, %c0_16, %c0_17], %14 {strides = array<i32>} : memref<1x1x8xf32, #tpu.memory_space<vmem>>, vector<1x1x8xf32>,
    %16 = arith.mulf %7, %7 : vector<64x32xf32>
    %cst_18 = arith.constant dense<0.000000e+00> : vector<32xf32>
    %17 = vector.multi_reduction <add>, %16, %cst_18 [0] : vector<64x32xf32> to vector<32xf32>
    %18 = vector.shape_cast %17 : vector<32xf32> to vector<1x32xf32>
    %c0_19 = arith.constant 0 : index
    %c0_20 = arith.constant 0 : index
    %19 = vector.load %arg5[%c0_19, %c0_20] : memref<32x8xf32, #tpu.memory_space<vmem>>, vector<32x8xf32>
    %cst_21 = arith.constant dense<0.000000e+00> : vector<1x8xf32>
    %20 = tpu.matmul %18, %19, %cst_21 {dimension_numbers = #tpu.dot_dimension_numbers<[1], [0], [0], [1], [0, 0, 1, 1], [], []>} : vector<1x32xf32>, vector<32x8xf32>, vector<1x8xf32> -> vector<1x8xf32>
    %21 = vector.shape_cast %20 : vector<1x8xf32> to vector<1x1x8xf32>
    %c0_22 = arith.constant 0 : index
    %c0_23 = arith.constant 0 : index
    %c0_24 = arith.constant 0 : index
    %22 = vector.load %arg8[%c0_22, %c0_23, %c0_24] : memref<1x1x8xf32, #tpu.memory_space<vmem>>, vector<1x1x8xf32>
    tpu.vector_store %arg8[%c0_22, %c0_23, %c0_24], %21 {strides = array<i32>} : memref<1x1x8xf32, #tpu.memory_space<vmem>>, vector<1x1x8xf32>,
    %c0_25 = arith.constant 0 : index
    %c0_26 = arith.constant 0 : index
    %c0_27 = arith.constant 0 : index
    %c0_28 = arith.constant 0 : index
    %23 = vector.load %arg2[%c0_25, %c0_26, %c0_27, %c0_28] : memref<1x16x16x4xf32, #tpu.memory_space<vmem>>, vector<1x16x16x4xf32>
    %24 = vector.shape_cast %23 : vector<1x16x16x4xf32> to vector<16x16x4xf32>
    %25 = vector.shape_cast %24 : vector<16x16x4xf32> to vector<256x4xf32>
    %cst_29 = arith.constant dense<0.000000e+00> : vector<4xf32>
    %26 = vector.multi_reduction <add>, %25, %cst_29 [0] : vector<256x4xf32> to vector<4xf32>
    %27 = vector.shape_cast %26 : vector<4xf32> to vector<1x4xf32>
    %28 = vector.shape_cast %27 : vector<1x4xf32> to vector<1x1x4xf32>
    %c0_30 = arith.constant 0 : index
    %c0_31 = arith.constant 0 : index
    %c0_32 = arith.constant 0 : index
    %29 = vector.load %arg9[%c0_30, %c0_31, %c0_32] : memref<1x1x4xf32, #tpu.memory_space<vmem>>, vector<1x1x4xf32>
    tpu.vector_store %arg9[%c0_30, %c0_31, %c0_32], %28 {strides = array<i32>} : memref<1x1x4xf32, #tpu.memory_space<vmem>>, vector<1x1x4xf32>,
    %30 = arith.mulf %25, %25 : vector<256x4xf32>
    %cst_33 = arith.constant dense<0.000000e+00> : vector<4xf32>
    %31 = vector.multi_reduction <add>, %30, %cst_33 [0] : vector<256x4xf32> to vector<4xf32>
    %32 = vector.shape_cast %31 : vector<4xf32> to vector<1x4xf32>
    %33 = vector.shape_cast %32 : vector<1x4xf32> to vector<1x1x4xf32>
    %c0_34 = arith.constant 0 : index
    %c0_35 = arith.constant 0 : index
    %c0_36 = arith.constant 0 : index
    %34 = vector.load %arg10[%c0_34, %c0_35, %c0_36] : memref<1x1x4xf32, #tpu.memory_space<vmem>>, vector<1x1x4xf32>
    tpu.vector_store %arg10[%c0_34, %c0_35, %c0_36], %33 {strides = array<i32>} : memref<1x1x4xf32, #tpu.memory_space<vmem>>, vector<1x1x4xf32>,
    return
  }
  func.func @transform_0(%arg0: i32) -> (i32, i32, i32, i32) {
    %c0_i32 = arith.constant 0 : i32
    %c0_i32_0 = arith.constant 0 : i32
    %c0_i32_1 = arith.constant 0 : i32
    %c0_i32_2 = arith.constant 0 : i32
    return %arg0, %c0_i32, %c0_i32_0, %c0_i32_1 : i32, i32, i32, i32
  }
  func.func @transform_1(%arg0: i32) -> (i32, i32, i32, i32) {
    %c0_i32 = arith.constant 0 : i32
    %c0_i32_0 = arith.constant 0 : i32
    %c0_i32_1 = arith.constant 0 : i32
    %c0_i32_2 = arith.constant 0 : i32
    return %arg0, %c0_i32, %c0_i32_0, %c0_i32_1 : i32, i32, i32, i32
  }
  func.func @transform_2(%arg0: i32) -> (i32, i32) {
    %c0_i32 = arith.constant 0 : i32
    %c0_i32_0 = arith.constant 0 : i32
    %c0_i32_1 = arith.constant 0 : i32
    return %c0_i32, %c0_i32_0 : i32, i32
  }
  func.func @transform_3(%arg0: i32) -> (i32, i32) {
    %c0_i32 = arith.constant 0 : i32
    %c0_i32_0 = arith.constant 0 : i32
    %c0_i32_1 = arith.constant 0 : i32
    return %c0_i32, %c0_i32_0 : i32, i32
  }
  func.func @transform_4(%arg0: i32) -> (i32, i32) {
    %c0_i32 = arith.constant 0 : i32
    %c0_i32_0 = arith.constant 0 : i32
    %c0_i32_1 = arith.constant 0 : i32
    return %c0_i32, %c0_i32_0 : i32, i32
  }
  func.func @transform_5(%arg0: i32) -> (i32, i32, i32, i32) {
    %c0_i32 = arith.constant 0 : i32
    %c0_i32_0 = arith.constant 0 : i32
    %c0_i32_1 = arith.constant 0 : i32
    %c0_i32_2 = arith.constant 0 : i32
    return %arg0, %c0_i32, %c0_i32_0, %c0_i32_1 : i32, i32, i32, i32
  }
  func.func @transform_6(%arg0: i32) -> (i32, i32, i32) {
    %c0_i32 = arith.constant 0 : i32
    %c0_i32_0 = arith.constant 0 : i32
    %c0_i32_1 = arith.constant 0 : i32
    return %arg0, %c0_i32, %c0_i32_0 : i32, i32, i32
  }
  func.func @transform_7(%arg0: i32) -> (i32, i32, i32) {
    %c0_i32 = arith.constant 0 : i32
    %c0_i32_0 = arith.constant 0 : i32
    %c0_i32_1 = arith.constant 0 : i32
    return %arg0, %c0_i32, %c0_i32_0 : i32, i32, i32
  }
  func.func @transform_8(%arg0: i32) -> (i32, i32, i32) {
    %c0_i32 = arith.constant 0 : i32
    %c0_i32_0 = arith.constant 0 : i32
    %c0_i32_1 = arith.constant 0 : i32
    return %arg0, %c0_i32, %c0_i32_0 : i32, i32, i32
  }
  func.func @transform_9(%arg0: i32) -> (i32, i32, i32) {
    %c0_i32 = arith.constant 0 : i32
    %c0_i32_0 = arith.constant 0 : i32
    %c0_i32_1 = arith.constant 0 : i32
    return %arg0, %c0_i32, %c0_i32_0 : i32, i32, i32
  }
}

module attributes {stable_mosaic.version = 11 : i64} {
  func.func @_c1_shortcut_kernel(%arg0: i32, %arg1: memref<1x16x16x8xf32, #tpu.memory_space<vmem>>, %arg2: memref<1x16x16x4xf32, #tpu.memory_space<vmem>>, %arg3: memref<1x8xf32, #tpu.memory_space<vmem>>, %arg4: memref<1x8xf32, #tpu.memory_space<vmem>>, %arg5: memref<1x4xf32, #tpu.memory_space<vmem>>, %arg6: memref<1x4xf32, #tpu.memory_space<vmem>>, %arg7: memref<3x3x8x4xf32, #tpu.memory_space<vmem>>, %arg8: memref<3x3x4x4xf32, #tpu.memory_space<vmem>>, %arg9: memref<1x4xf32, #tpu.memory_space<vmem>>, %arg10: memref<8x4xf32, #tpu.memory_space<vmem>>, %arg11: memref<4x4xf32, #tpu.memory_space<vmem>>, %arg12: memref<1x4xf32, #tpu.memory_space<vmem>>, %arg13: memref<1x16x16x4xf32, #tpu.memory_space<vmem>>, %arg14: memref<1x16x16x4xf32, #tpu.memory_space<vmem>>, %arg15: memref<1x1x4xf32, #tpu.memory_space<vmem>>, %arg16: memref<1x1x4xf32, #tpu.memory_space<vmem>>, %arg17: memref<18x32x8xf32, #tpu.memory_space<vmem>>, %arg18: memref<18x32x4xf32, #tpu.memory_space<vmem>>) attributes {dimension_semantics = [#tpu.dimension_semantics<parallel>], iteration_bounds = array<i64: 2>, scalar_prefetch = 0 : i64, scratch_operands = 2 : i64, tpu.core_type = #tpu.core_type<tc>, window_params = [{transform_indices = @transform_0, window_bounds = array<i64: 1, 16, 16, 8>}, {transform_indices = @transform_1, window_bounds = array<i64: 1, 16, 16, 4>}, {pipeline_mode = #tpu.pipeline_mode<synchronous>, transform_indices = @transform_2, window_bounds = array<i64: 1, 8>}, {pipeline_mode = #tpu.pipeline_mode<synchronous>, transform_indices = @transform_3, window_bounds = array<i64: 1, 8>}, {pipeline_mode = #tpu.pipeline_mode<synchronous>, transform_indices = @transform_4, window_bounds = array<i64: 1, 4>}, {pipeline_mode = #tpu.pipeline_mode<synchronous>, transform_indices = @transform_5, window_bounds = array<i64: 1, 4>}, {pipeline_mode = #tpu.pipeline_mode<synchronous>, transform_indices = @transform_6, window_bounds = array<i64: 3, 3, 8, 4>}, {pipeline_mode = #tpu.pipeline_mode<synchronous>, transform_indices = @transform_7, window_bounds = array<i64: 3, 3, 4, 4>}, {pipeline_mode = #tpu.pipeline_mode<synchronous>, transform_indices = @transform_8, window_bounds = array<i64: 1, 4>}, {pipeline_mode = #tpu.pipeline_mode<synchronous>, transform_indices = @transform_9, window_bounds = array<i64: 8, 4>}, {pipeline_mode = #tpu.pipeline_mode<synchronous>, transform_indices = @transform_10, window_bounds = array<i64: 4, 4>}, {pipeline_mode = #tpu.pipeline_mode<synchronous>, transform_indices = @transform_11, window_bounds = array<i64: 1, 4>}, {transform_indices = @transform_12, window_bounds = array<i64: 1, 16, 16, 4>}, {transform_indices = @transform_13, window_bounds = array<i64: 1, 16, 16, 4>}, {transform_indices = @transform_14, window_bounds = array<i64: 1, 1, 4>}, {transform_indices = @transform_15, window_bounds = array<i64: 1, 1, 4>}]} {
    %c0 = arith.constant 0 : index
    %c0_0 = arith.constant 0 : index
    %c0_1 = arith.constant 0 : index
    %c0_2 = arith.constant 0 : index
    %0 = vector.load %arg1[%c0, %c0_0, %c0_1, %c0_2] : memref<1x16x16x8xf32, #tpu.memory_space<vmem>>, vector<1x16x16x8xf32>
    %1 = vector.shape_cast %0 : vector<1x16x16x8xf32> to vector<16x16x8xf32>
    %c0_3 = arith.constant 0 : index
    %c0_4 = arith.constant 0 : index
    %c0_5 = arith.constant 0 : index
    %c0_6 = arith.constant 0 : index
    %2 = vector.load %arg2[%c0_3, %c0_4, %c0_5, %c0_6] : memref<1x16x16x4xf32, #tpu.memory_space<vmem>>, vector<1x16x16x4xf32>
    %3 = vector.shape_cast %2 : vector<1x16x16x4xf32> to vector<16x16x4xf32>
    %cst = arith.constant 0.000000e+00 : f32
    %4 = vector.broadcast %cst : f32 to vector<18x32x8xf32>
    %c0_7 = arith.constant 0 : index
    %c0_8 = arith.constant 0 : index
    %c0_9 = arith.constant 0 : index
    %5 = vector.load %arg17[%c0_7, %c0_8, %c0_9] : memref<18x32x8xf32, #tpu.memory_space<vmem>>, vector<18x32x8xf32>
    tpu.vector_store %arg17[%c0_7, %c0_8, %c0_9], %4 {strides = array<i32>} : memref<18x32x8xf32, #tpu.memory_space<vmem>>, vector<18x32x8xf32>,
    %cst_10 = arith.constant 0.000000e+00 : f32
    %6 = vector.broadcast %cst_10 : f32 to vector<18x32x4xf32>
    %c0_11 = arith.constant 0 : index
    %c0_12 = arith.constant 0 : index
    %c0_13 = arith.constant 0 : index
    %7 = vector.load %arg18[%c0_11, %c0_12, %c0_13] : memref<18x32x4xf32, #tpu.memory_space<vmem>>, vector<18x32x4xf32>
    tpu.vector_store %arg18[%c0_11, %c0_12, %c0_13], %6 {strides = array<i32>} : memref<18x32x4xf32, #tpu.memory_space<vmem>>, vector<18x32x4xf32>,
    %c0_14 = arith.constant 0 : index
    %c0_15 = arith.constant 0 : index
    %8 = vector.load %arg3[%c0_14, %c0_15] : memref<1x8xf32, #tpu.memory_space<vmem>>, vector<1x8xf32>
    %9 = vector.shape_cast %8 : vector<1x8xf32> to vector<1x1x8xf32>
    %10 = vector.broadcast %9 : vector<1x1x8xf32> to vector<16x16x8xf32>
    %11 = arith.mulf %1, %10 : vector<16x16x8xf32>
    %c0_16 = arith.constant 0 : index
    %c0_17 = arith.constant 0 : index
    %12 = vector.load %arg4[%c0_16, %c0_17] : memref<1x8xf32, #tpu.memory_space<vmem>>, vector<1x8xf32>
    %13 = vector.shape_cast %12 : vector<1x8xf32> to vector<1x1x8xf32>
    %14 = vector.broadcast %13 : vector<1x1x8xf32> to vector<16x16x8xf32>
    %15 = arith.addf %11, %14 : vector<16x16x8xf32>
    %cst_18 = arith.constant 0.000000e+00 : f32
    %16 = vector.broadcast %cst_18 : f32 to vector<16x16x8xf32>
    %17 = arith.maximumf %15, %16 : vector<16x16x8xf32>
    %c1 = arith.constant 1 : index
    %c8 = arith.constant 8 : index
    %c0_19 = arith.constant 0 : index
    %18 = vector.load %arg17[%c1, %c8, %c0_19] : memref<18x32x8xf32, #tpu.memory_space<vmem>>, vector<16x16x8xf32>
    tpu.vector_store %arg17[%c1, %c8, %c0_19], %17 {strides = array<i32>} : memref<18x32x8xf32, #tpu.memory_space<vmem>>, vector<16x16x8xf32>,
    %c0_20 = arith.constant 0 : index
    %c0_21 = arith.constant 0 : index
    %19 = vector.load %arg5[%c0_20, %c0_21] : memref<1x4xf32, #tpu.memory_space<vmem>>, vector<1x4xf32>
    %20 = vector.shape_cast %19 : vector<1x4xf32> to vector<1x1x4xf32>
    %21 = vector.broadcast %20 : vector<1x1x4xf32> to vector<16x16x4xf32>
    %22 = arith.mulf %3, %21 : vector<16x16x4xf32>
    %c0_22 = arith.constant 0 : index
    %c0_23 = arith.constant 0 : index
    %23 = vector.load %arg6[%c0_22, %c0_23] : memref<1x4xf32, #tpu.memory_space<vmem>>, vector<1x4xf32>
    %24 = vector.shape_cast %23 : vector<1x4xf32> to vector<1x1x4xf32>
    %25 = vector.broadcast %24 : vector<1x1x4xf32> to vector<16x16x4xf32>
    %26 = arith.addf %22, %25 : vector<16x16x4xf32>
    %cst_24 = arith.constant 0.000000e+00 : f32
    %27 = vector.broadcast %cst_24 : f32 to vector<16x16x4xf32>
    %28 = arith.maximumf %26, %27 : vector<16x16x4xf32>
    %c1_25 = arith.constant 1 : index
    %c8_26 = arith.constant 8 : index
    %c0_27 = arith.constant 0 : index
    %29 = vector.load %arg18[%c1_25, %c8_26, %c0_27] : memref<18x32x4xf32, #tpu.memory_space<vmem>>, vector<16x16x4xf32>
    tpu.vector_store %arg18[%c1_25, %c8_26, %c0_27], %28 {strides = array<i32>} : memref<18x32x4xf32, #tpu.memory_space<vmem>>, vector<16x16x4xf32>,
    %c0_28 = arith.constant 0 : index
    %c0_29 = arith.constant 0 : index
    %c0_30 = arith.constant 0 : index
    %30 = vector.load %arg17[%c0_28, %c0_29, %c0_30] : memref<18x32x8xf32, #tpu.memory_space<vmem>>, vector<18x32x8xf32>
    %c0_31 = arith.constant 0 : index
    %c0_32 = arith.constant 0 : index
    %c0_33 = arith.constant 0 : index
    %31 = vector.load %arg18[%c0_31, %c0_32, %c0_33] : memref<18x32x4xf32, #tpu.memory_space<vmem>>, vector<18x32x4xf32>
    %cst_34 = arith.constant 0.000000e+00 : f32
    %32 = vector.broadcast %cst_34 : f32 to vector<256x4xf32>
    %33 = vector.extract_strided_slice %30 {offsets = [0, 7, 0], sizes = [18, 16, 8], strides = [1, 1, 1]} : vector<18x32x8xf32> to vector<18x16x8xf32>
    %34 = vector.extract_strided_slice %31 {offsets = [0, 7, 0], sizes = [18, 16, 4], strides = [1, 1, 1]} : vector<18x32x4xf32> to vector<18x16x4xf32>
    %35 = vector.extract_strided_slice %33 {offsets = [0, 0, 0], sizes = [16, 16, 8], strides = [1, 1, 1]} : vector<18x16x8xf32> to vector<16x16x8xf32>
    %36 = vector.shape_cast %35 : vector<16x16x8xf32> to vector<256x8xf32>
    %c0_35 = arith.constant 0 : index
    %c0_36 = arith.constant 0 : index
    %c0_37 = arith.constant 0 : index
    %c0_38 = arith.constant 0 : index
    %37 = vector.load %arg7[%c0_35, %c0_36, %c0_37, %c0_38] : memref<3x3x8x4xf32, #tpu.memory_space<vmem>>, vector<1x1x8x4xf32>
    %38 = vector.shape_cast %37 : vector<1x1x8x4xf32> to vector<8x4xf32>
    %cst_39 = arith.constant dense<0.000000e+00> : vector<256x4xf32>
    %39 = tpu.matmul %36, %38, %cst_39 {dimension_numbers = #tpu.dot_dimension_numbers<[1], [0], [0], [1], [0, 0, 1, 1], [], []>} : vector<256x8xf32>, vector<8x4xf32>, vector<256x4xf32> -> vector<256x4xf32>
    %40 = arith.addf %32, %39 : vector<256x4xf32>
    %41 = vector.extract_strided_slice %34 {offsets = [0, 0, 0], sizes = [16, 16, 4], strides = [1, 1, 1]} : vector<18x16x4xf32> to vector<16x16x4xf32>
    %42 = vector.shape_cast %41 : vector<16x16x4xf32> to vector<256x4xf32>
    %c0_40 = arith.constant 0 : index
    %c0_41 = arith.constant 0 : index
    %c0_42 = arith.constant 0 : index
    %c0_43 = arith.constant 0 : index
    %43 = vector.load %arg8[%c0_40, %c0_41, %c0_42, %c0_43] : memref<3x3x4x4xf32, #tpu.memory_space<vmem>>, vector<1x1x4x4xf32>
    %44 = vector.shape_cast %43 : vector<1x1x4x4xf32> to vector<4x4xf32>
    %cst_44 = arith.constant dense<0.000000e+00> : vector<256x4xf32>
    %45 = tpu.matmul %42, %44, %cst_44 {dimension_numbers = #tpu.dot_dimension_numbers<[1], [0], [0], [1], [0, 0, 1, 1], [], []>} : vector<256x4xf32>, vector<4x4xf32>, vector<256x4xf32> -> vector<256x4xf32>
    %46 = arith.addf %40, %45 : vector<256x4xf32>
    %47 = vector.extract_strided_slice %33 {offsets = [1, 0, 0], sizes = [16, 16, 8], strides = [1, 1, 1]} : vector<18x16x8xf32> to vector<16x16x8xf32>
    %48 = vector.shape_cast %47 : vector<16x16x8xf32> to vector<256x8xf32>
    %c1_45 = arith.constant 1 : index
    %c0_46 = arith.constant 0 : index
    %c0_47 = arith.constant 0 : index
    %c0_48 = arith.constant 0 : index
    %49 = vector.load %arg7[%c1_45, %c0_46, %c0_47, %c0_48] : memref<3x3x8x4xf32, #tpu.memory_space<vmem>>, vector<1x1x8x4xf32>
    %50 = vector.shape_cast %49 : vector<1x1x8x4xf32> to vector<8x4xf32>
    %cst_49 = arith.constant dense<0.000000e+00> : vector<256x4xf32>
    %51 = tpu.matmul %48, %50, %cst_49 {dimension_numbers = #tpu.dot_dimension_numbers<[1], [0], [0], [1], [0, 0, 1, 1], [], []>} : vector<256x8xf32>, vector<8x4xf32>, vector<256x4xf32> -> vector<256x4xf32>
    %52 = arith.addf %46, %51 : vector<256x4xf32>
    %53 = vector.extract_strided_slice %34 {offsets = [1, 0, 0], sizes = [16, 16, 4], strides = [1, 1, 1]} : vector<18x16x4xf32> to vector<16x16x4xf32>
    %54 = vector.shape_cast %53 : vector<16x16x4xf32> to vector<256x4xf32>
    %c1_50 = arith.constant 1 : index
    %c0_51 = arith.constant 0 : index
    %c0_52 = arith.constant 0 : index
    %c0_53 = arith.constant 0 : index
    %55 = vector.load %arg8[%c1_50, %c0_51, %c0_52, %c0_53] : memref<3x3x4x4xf32, #tpu.memory_space<vmem>>, vector<1x1x4x4xf32>
    %56 = vector.shape_cast %55 : vector<1x1x4x4xf32> to vector<4x4xf32>
    %cst_54 = arith.constant dense<0.000000e+00> : vector<256x4xf32>
    %57 = tpu.matmul %54, %56, %cst_54 {dimension_numbers = #tpu.dot_dimension_numbers<[1], [0], [0], [1], [0, 0, 1, 1], [], []>} : vector<256x4xf32>, vector<4x4xf32>, vector<256x4xf32> -> vector<256x4xf32>
    %58 = arith.addf %52, %57 : vector<256x4xf32>
    %59 = vector.extract_strided_slice %33 {offsets = [2, 0, 0], sizes = [16, 16, 8], strides = [1, 1, 1]} : vector<18x16x8xf32> to vector<16x16x8xf32>
    %60 = vector.shape_cast %59 : vector<16x16x8xf32> to vector<256x8xf32>
    %c2 = arith.constant 2 : index
    %c0_55 = arith.constant 0 : index
    %c0_56 = arith.constant 0 : index
    %c0_57 = arith.constant 0 : index
    %61 = vector.load %arg7[%c2, %c0_55, %c0_56, %c0_57] : memref<3x3x8x4xf32, #tpu.memory_space<vmem>>, vector<1x1x8x4xf32>
    %62 = vector.shape_cast %61 : vector<1x1x8x4xf32> to vector<8x4xf32>
    %cst_58 = arith.constant dense<0.000000e+00> : vector<256x4xf32>
    %63 = tpu.matmul %60, %62, %cst_58 {dimension_numbers = #tpu.dot_dimension_numbers<[1], [0], [0], [1], [0, 0, 1, 1], [], []>} : vector<256x8xf32>, vector<8x4xf32>, vector<256x4xf32> -> vector<256x4xf32>
    %64 = arith.addf %58, %63 : vector<256x4xf32>
    %65 = vector.extract_strided_slice %34 {offsets = [2, 0, 0], sizes = [16, 16, 4], strides = [1, 1, 1]} : vector<18x16x4xf32> to vector<16x16x4xf32>
    %66 = vector.shape_cast %65 : vector<16x16x4xf32> to vector<256x4xf32>
    %c2_59 = arith.constant 2 : index
    %c0_60 = arith.constant 0 : index
    %c0_61 = arith.constant 0 : index
    %c0_62 = arith.constant 0 : index
    %67 = vector.load %arg8[%c2_59, %c0_60, %c0_61, %c0_62] : memref<3x3x4x4xf32, #tpu.memory_space<vmem>>, vector<1x1x4x4xf32>
    %68 = vector.shape_cast %67 : vector<1x1x4x4xf32> to vector<4x4xf32>
    %cst_63 = arith.constant dense<0.000000e+00> : vector<256x4xf32>
    %69 = tpu.matmul %66, %68, %cst_63 {dimension_numbers = #tpu.dot_dimension_numbers<[1], [0], [0], [1], [0, 0, 1, 1], [], []>} : vector<256x4xf32>, vector<4x4xf32>, vector<256x4xf32> -> vector<256x4xf32>
    %70 = arith.addf %64, %69 : vector<256x4xf32>
    %71 = vector.extract_strided_slice %30 {offsets = [0, 8, 0], sizes = [18, 16, 8], strides = [1, 1, 1]} : vector<18x32x8xf32> to vector<18x16x8xf32>
    %72 = vector.extract_strided_slice %31 {offsets = [0, 8, 0], sizes = [18, 16, 4], strides = [1, 1, 1]} : vector<18x32x4xf32> to vector<18x16x4xf32>
    %73 = vector.extract_strided_slice %71 {offsets = [0, 0, 0], sizes = [16, 16, 8], strides = [1, 1, 1]} : vector<18x16x8xf32> to vector<16x16x8xf32>
    %74 = vector.shape_cast %73 : vector<16x16x8xf32> to vector<256x8xf32>
    %c0_64 = arith.constant 0 : index
    %c1_65 = arith.constant 1 : index
    %c0_66 = arith.constant 0 : index
    %c0_67 = arith.constant 0 : index
    %75 = vector.load %arg7[%c0_64, %c1_65, %c0_66, %c0_67] : memref<3x3x8x4xf32, #tpu.memory_space<vmem>>, vector<1x1x8x4xf32>
    %76 = vector.shape_cast %75 : vector<1x1x8x4xf32> to vector<8x4xf32>
    %cst_68 = arith.constant dense<0.000000e+00> : vector<256x4xf32>
    %77 = tpu.matmul %74, %76, %cst_68 {dimension_numbers = #tpu.dot_dimension_numbers<[1], [0], [0], [1], [0, 0, 1, 1], [], []>} : vector<256x8xf32>, vector<8x4xf32>, vector<256x4xf32> -> vector<256x4xf32>
    %78 = arith.addf %70, %77 : vector<256x4xf32>
    %79 = vector.extract_strided_slice %72 {offsets = [0, 0, 0], sizes = [16, 16, 4], strides = [1, 1, 1]} : vector<18x16x4xf32> to vector<16x16x4xf32>
    %80 = vector.shape_cast %79 : vector<16x16x4xf32> to vector<256x4xf32>
    %c0_69 = arith.constant 0 : index
    %c1_70 = arith.constant 1 : index
    %c0_71 = arith.constant 0 : index
    %c0_72 = arith.constant 0 : index
    %81 = vector.load %arg8[%c0_69, %c1_70, %c0_71, %c0_72] : memref<3x3x4x4xf32, #tpu.memory_space<vmem>>, vector<1x1x4x4xf32>
    %82 = vector.shape_cast %81 : vector<1x1x4x4xf32> to vector<4x4xf32>
    %cst_73 = arith.constant dense<0.000000e+00> : vector<256x4xf32>
    %83 = tpu.matmul %80, %82, %cst_73 {dimension_numbers = #tpu.dot_dimension_numbers<[1], [0], [0], [1], [0, 0, 1, 1], [], []>} : vector<256x4xf32>, vector<4x4xf32>, vector<256x4xf32> -> vector<256x4xf32>
    %84 = arith.addf %78, %83 : vector<256x4xf32>
    %85 = vector.extract_strided_slice %71 {offsets = [1, 0, 0], sizes = [16, 16, 8], strides = [1, 1, 1]} : vector<18x16x8xf32> to vector<16x16x8xf32>
    %86 = vector.shape_cast %85 : vector<16x16x8xf32> to vector<256x8xf32>
    %c1_74 = arith.constant 1 : index
    %c1_75 = arith.constant 1 : index
    %c0_76 = arith.constant 0 : index
    %c0_77 = arith.constant 0 : index
    %87 = vector.load %arg7[%c1_74, %c1_75, %c0_76, %c0_77] : memref<3x3x8x4xf32, #tpu.memory_space<vmem>>, vector<1x1x8x4xf32>
    %88 = vector.shape_cast %87 : vector<1x1x8x4xf32> to vector<8x4xf32>
    %cst_78 = arith.constant dense<0.000000e+00> : vector<256x4xf32>
    %89 = tpu.matmul %86, %88, %cst_78 {dimension_numbers = #tpu.dot_dimension_numbers<[1], [0], [0], [1], [0, 0, 1, 1], [], []>} : vector<256x8xf32>, vector<8x4xf32>, vector<256x4xf32> -> vector<256x4xf32>
    %90 = arith.addf %84, %89 : vector<256x4xf32>
    %91 = vector.extract_strided_slice %72 {offsets = [1, 0, 0], sizes = [16, 16, 4], strides = [1, 1, 1]} : vector<18x16x4xf32> to vector<16x16x4xf32>
    %92 = vector.shape_cast %91 : vector<16x16x4xf32> to vector<256x4xf32>
    %c1_79 = arith.constant 1 : index
    %c1_80 = arith.constant 1 : index
    %c0_81 = arith.constant 0 : index
    %c0_82 = arith.constant 0 : index
    %93 = vector.load %arg8[%c1_79, %c1_80, %c0_81, %c0_82] : memref<3x3x4x4xf32, #tpu.memory_space<vmem>>, vector<1x1x4x4xf32>
    %94 = vector.shape_cast %93 : vector<1x1x4x4xf32> to vector<4x4xf32>
    %cst_83 = arith.constant dense<0.000000e+00> : vector<256x4xf32>
    %95 = tpu.matmul %92, %94, %cst_83 {dimension_numbers = #tpu.dot_dimension_numbers<[1], [0], [0], [1], [0, 0, 1, 1], [], []>} : vector<256x4xf32>, vector<4x4xf32>, vector<256x4xf32> -> vector<256x4xf32>
    %96 = arith.addf %90, %95 : vector<256x4xf32>
    %97 = vector.extract_strided_slice %71 {offsets = [2, 0, 0], sizes = [16, 16, 8], strides = [1, 1, 1]} : vector<18x16x8xf32> to vector<16x16x8xf32>
    %98 = vector.shape_cast %97 : vector<16x16x8xf32> to vector<256x8xf32>
    %c2_84 = arith.constant 2 : index
    %c1_85 = arith.constant 1 : index
    %c0_86 = arith.constant 0 : index
    %c0_87 = arith.constant 0 : index
    %99 = vector.load %arg7[%c2_84, %c1_85, %c0_86, %c0_87] : memref<3x3x8x4xf32, #tpu.memory_space<vmem>>, vector<1x1x8x4xf32>
    %100 = vector.shape_cast %99 : vector<1x1x8x4xf32> to vector<8x4xf32>
    %cst_88 = arith.constant dense<0.000000e+00> : vector<256x4xf32>
    %101 = tpu.matmul %98, %100, %cst_88 {dimension_numbers = #tpu.dot_dimension_numbers<[1], [0], [0], [1], [0, 0, 1, 1], [], []>} : vector<256x8xf32>, vector<8x4xf32>, vector<256x4xf32> -> vector<256x4xf32>
    %102 = arith.addf %96, %101 : vector<256x4xf32>
    %103 = vector.extract_strided_slice %72 {offsets = [2, 0, 0], sizes = [16, 16, 4], strides = [1, 1, 1]} : vector<18x16x4xf32> to vector<16x16x4xf32>
    %104 = vector.shape_cast %103 : vector<16x16x4xf32> to vector<256x4xf32>
    %c2_89 = arith.constant 2 : index
    %c1_90 = arith.constant 1 : index
    %c0_91 = arith.constant 0 : index
    %c0_92 = arith.constant 0 : index
    %105 = vector.load %arg8[%c2_89, %c1_90, %c0_91, %c0_92] : memref<3x3x4x4xf32, #tpu.memory_space<vmem>>, vector<1x1x4x4xf32>
    %106 = vector.shape_cast %105 : vector<1x1x4x4xf32> to vector<4x4xf32>
    %cst_93 = arith.constant dense<0.000000e+00> : vector<256x4xf32>
    %107 = tpu.matmul %104, %106, %cst_93 {dimension_numbers = #tpu.dot_dimension_numbers<[1], [0], [0], [1], [0, 0, 1, 1], [], []>} : vector<256x4xf32>, vector<4x4xf32>, vector<256x4xf32> -> vector<256x4xf32>
    %108 = arith.addf %102, %107 : vector<256x4xf32>
    %109 = vector.extract_strided_slice %30 {offsets = [0, 9, 0], sizes = [18, 16, 8], strides = [1, 1, 1]} : vector<18x32x8xf32> to vector<18x16x8xf32>
    %110 = vector.extract_strided_slice %31 {offsets = [0, 9, 0], sizes = [18, 16, 4], strides = [1, 1, 1]} : vector<18x32x4xf32> to vector<18x16x4xf32>
    %111 = vector.extract_strided_slice %109 {offsets = [0, 0, 0], sizes = [16, 16, 8], strides = [1, 1, 1]} : vector<18x16x8xf32> to vector<16x16x8xf32>
    %112 = vector.shape_cast %111 : vector<16x16x8xf32> to vector<256x8xf32>
    %c0_94 = arith.constant 0 : index
    %c2_95 = arith.constant 2 : index
    %c0_96 = arith.constant 0 : index
    %c0_97 = arith.constant 0 : index
    %113 = vector.load %arg7[%c0_94, %c2_95, %c0_96, %c0_97] : memref<3x3x8x4xf32, #tpu.memory_space<vmem>>, vector<1x1x8x4xf32>
    %114 = vector.shape_cast %113 : vector<1x1x8x4xf32> to vector<8x4xf32>
    %cst_98 = arith.constant dense<0.000000e+00> : vector<256x4xf32>
    %115 = tpu.matmul %112, %114, %cst_98 {dimension_numbers = #tpu.dot_dimension_numbers<[1], [0], [0], [1], [0, 0, 1, 1], [], []>} : vector<256x8xf32>, vector<8x4xf32>, vector<256x4xf32> -> vector<256x4xf32>
    %116 = arith.addf %108, %115 : vector<256x4xf32>
    %117 = vector.extract_strided_slice %110 {offsets = [0, 0, 0], sizes = [16, 16, 4], strides = [1, 1, 1]} : vector<18x16x4xf32> to vector<16x16x4xf32>
    %118 = vector.shape_cast %117 : vector<16x16x4xf32> to vector<256x4xf32>
    %c0_99 = arith.constant 0 : index
    %c2_100 = arith.constant 2 : index
    %c0_101 = arith.constant 0 : index
    %c0_102 = arith.constant 0 : index
    %119 = vector.load %arg8[%c0_99, %c2_100, %c0_101, %c0_102] : memref<3x3x4x4xf32, #tpu.memory_space<vmem>>, vector<1x1x4x4xf32>
    %120 = vector.shape_cast %119 : vector<1x1x4x4xf32> to vector<4x4xf32>
    %cst_103 = arith.constant dense<0.000000e+00> : vector<256x4xf32>
    %121 = tpu.matmul %118, %120, %cst_103 {dimension_numbers = #tpu.dot_dimension_numbers<[1], [0], [0], [1], [0, 0, 1, 1], [], []>} : vector<256x4xf32>, vector<4x4xf32>, vector<256x4xf32> -> vector<256x4xf32>
    %122 = arith.addf %116, %121 : vector<256x4xf32>
    %123 = vector.extract_strided_slice %109 {offsets = [1, 0, 0], sizes = [16, 16, 8], strides = [1, 1, 1]} : vector<18x16x8xf32> to vector<16x16x8xf32>
    %124 = vector.shape_cast %123 : vector<16x16x8xf32> to vector<256x8xf32>
    %c1_104 = arith.constant 1 : index
    %c2_105 = arith.constant 2 : index
    %c0_106 = arith.constant 0 : index
    %c0_107 = arith.constant 0 : index
    %125 = vector.load %arg7[%c1_104, %c2_105, %c0_106, %c0_107] : memref<3x3x8x4xf32, #tpu.memory_space<vmem>>, vector<1x1x8x4xf32>
    %126 = vector.shape_cast %125 : vector<1x1x8x4xf32> to vector<8x4xf32>
    %cst_108 = arith.constant dense<0.000000e+00> : vector<256x4xf32>
    %127 = tpu.matmul %124, %126, %cst_108 {dimension_numbers = #tpu.dot_dimension_numbers<[1], [0], [0], [1], [0, 0, 1, 1], [], []>} : vector<256x8xf32>, vector<8x4xf32>, vector<256x4xf32> -> vector<256x4xf32>
    %128 = arith.addf %122, %127 : vector<256x4xf32>
    %129 = vector.extract_strided_slice %110 {offsets = [1, 0, 0], sizes = [16, 16, 4], strides = [1, 1, 1]} : vector<18x16x4xf32> to vector<16x16x4xf32>
    %130 = vector.shape_cast %129 : vector<16x16x4xf32> to vector<256x4xf32>
    %c1_109 = arith.constant 1 : index
    %c2_110 = arith.constant 2 : index
    %c0_111 = arith.constant 0 : index
    %c0_112 = arith.constant 0 : index
    %131 = vector.load %arg8[%c1_109, %c2_110, %c0_111, %c0_112] : memref<3x3x4x4xf32, #tpu.memory_space<vmem>>, vector<1x1x4x4xf32>
    %132 = vector.shape_cast %131 : vector<1x1x4x4xf32> to vector<4x4xf32>
    %cst_113 = arith.constant dense<0.000000e+00> : vector<256x4xf32>
    %133 = tpu.matmul %130, %132, %cst_113 {dimension_numbers = #tpu.dot_dimension_numbers<[1], [0], [0], [1], [0, 0, 1, 1], [], []>} : vector<256x4xf32>, vector<4x4xf32>, vector<256x4xf32> -> vector<256x4xf32>
    %134 = arith.addf %128, %133 : vector<256x4xf32>
    %135 = vector.extract_strided_slice %109 {offsets = [2, 0, 0], sizes = [16, 16, 8], strides = [1, 1, 1]} : vector<18x16x8xf32> to vector<16x16x8xf32>
    %136 = vector.shape_cast %135 : vector<16x16x8xf32> to vector<256x8xf32>
    %c2_114 = arith.constant 2 : index
    %c2_115 = arith.constant 2 : index
    %c0_116 = arith.constant 0 : index
    %c0_117 = arith.constant 0 : index
    %137 = vector.load %arg7[%c2_114, %c2_115, %c0_116, %c0_117] : memref<3x3x8x4xf32, #tpu.memory_space<vmem>>, vector<1x1x8x4xf32>
    %138 = vector.shape_cast %137 : vector<1x1x8x4xf32> to vector<8x4xf32>
    %cst_118 = arith.constant dense<0.000000e+00> : vector<256x4xf32>
    %139 = tpu.matmul %136, %138, %cst_118 {dimension_numbers = #tpu.dot_dimension_numbers<[1], [0], [0], [1], [0, 0, 1, 1], [], []>} : vector<256x8xf32>, vector<8x4xf32>, vector<256x4xf32> -> vector<256x4xf32>
    %140 = arith.addf %134, %139 : vector<256x4xf32>
    %141 = vector.extract_strided_slice %110 {offsets = [2, 0, 0], sizes = [16, 16, 4], strides = [1, 1, 1]} : vector<18x16x4xf32> to vector<16x16x4xf32>
    %142 = vector.shape_cast %141 : vector<16x16x4xf32> to vector<256x4xf32>
    %c2_119 = arith.constant 2 : index
    %c2_120 = arith.constant 2 : index
    %c0_121 = arith.constant 0 : index
    %c0_122 = arith.constant 0 : index
    %143 = vector.load %arg8[%c2_119, %c2_120, %c0_121, %c0_122] : memref<3x3x4x4xf32, #tpu.memory_space<vmem>>, vector<1x1x4x4xf32>
    %144 = vector.shape_cast %143 : vector<1x1x4x4xf32> to vector<4x4xf32>
    %cst_123 = arith.constant dense<0.000000e+00> : vector<256x4xf32>
    %145 = tpu.matmul %142, %144, %cst_123 {dimension_numbers = #tpu.dot_dimension_numbers<[1], [0], [0], [1], [0, 0, 1, 1], [], []>} : vector<256x4xf32>, vector<4x4xf32>, vector<256x4xf32> -> vector<256x4xf32>
    %146 = arith.addf %140, %145 : vector<256x4xf32>
    %c0_124 = arith.constant 0 : index
    %c0_125 = arith.constant 0 : index
    %147 = vector.load %arg9[%c0_124, %c0_125] : memref<1x4xf32, #tpu.memory_space<vmem>>, vector<1x4xf32>
    %148 = vector.broadcast %147 : vector<1x4xf32> to vector<256x4xf32>
    %149 = arith.addf %146, %148 : vector<256x4xf32>
    %150 = vector.shape_cast %149 : vector<256x4xf32> to vector<1x16x16x4xf32>
    %c0_126 = arith.constant 0 : index
    %c0_127 = arith.constant 0 : index
    %c0_128 = arith.constant 0 : index
    %c0_129 = arith.constant 0 : index
    %151 = vector.load %arg13[%c0_126, %c0_127, %c0_128, %c0_129] : memref<1x16x16x4xf32, #tpu.memory_space<vmem>>, vector<1x16x16x4xf32>
    tpu.vector_store %arg13[%c0_126, %c0_127, %c0_128, %c0_129], %150 {strides = array<i32>} : memref<1x16x16x4xf32, #tpu.memory_space<vmem>>, vector<1x16x16x4xf32>,
    %cst_130 = arith.constant dense<0.000000e+00> : vector<4xf32>
    %152 = vector.multi_reduction <add>, %149, %cst_130 [0] : vector<256x4xf32> to vector<4xf32>
    %153 = vector.shape_cast %152 : vector<4xf32> to vector<1x4xf32>
    %154 = vector.shape_cast %153 : vector<1x4xf32> to vector<1x1x4xf32>
    %c0_131 = arith.constant 0 : index
    %c0_132 = arith.constant 0 : index
    %c0_133 = arith.constant 0 : index
    %155 = vector.load %arg15[%c0_131, %c0_132, %c0_133] : memref<1x1x4xf32, #tpu.memory_space<vmem>>, vector<1x1x4xf32>
    tpu.vector_store %arg15[%c0_131, %c0_132, %c0_133], %154 {strides = array<i32>} : memref<1x1x4xf32, #tpu.memory_space<vmem>>, vector<1x1x4xf32>,
    %156 = arith.mulf %149, %149 : vector<256x4xf32>
    %cst_134 = arith.constant dense<0.000000e+00> : vector<4xf32>
    %157 = vector.multi_reduction <add>, %156, %cst_134 [0] : vector<256x4xf32> to vector<4xf32>
    %158 = vector.shape_cast %157 : vector<4xf32> to vector<1x4xf32>
    %159 = vector.shape_cast %158 : vector<1x4xf32> to vector<1x1x4xf32>
    %c0_135 = arith.constant 0 : index
    %c0_136 = arith.constant 0 : index
    %c0_137 = arith.constant 0 : index
    %160 = vector.load %arg16[%c0_135, %c0_136, %c0_137] : memref<1x1x4xf32, #tpu.memory_space<vmem>>, vector<1x1x4xf32>
    tpu.vector_store %arg16[%c0_135, %c0_136, %c0_137], %159 {strides = array<i32>} : memref<1x1x4xf32, #tpu.memory_space<vmem>>, vector<1x1x4xf32>,
    %161 = vector.shape_cast %1 : vector<16x16x8xf32> to vector<256x8xf32>
    %c0_138 = arith.constant 0 : index
    %c0_139 = arith.constant 0 : index
    %162 = vector.load %arg10[%c0_138, %c0_139] : memref<8x4xf32, #tpu.memory_space<vmem>>, vector<8x4xf32>
    %cst_140 = arith.constant dense<0.000000e+00> : vector<256x4xf32>
    %163 = tpu.matmul %161, %162, %cst_140 {dimension_numbers = #tpu.dot_dimension_numbers<[1], [0], [0], [1], [0, 0, 1, 1], [], []>} : vector<256x8xf32>, vector<8x4xf32>, vector<256x4xf32> -> vector<256x4xf32>
    %164 = vector.shape_cast %3 : vector<16x16x4xf32> to vector<256x4xf32>
    %c0_141 = arith.constant 0 : index
    %c0_142 = arith.constant 0 : index
    %165 = vector.load %arg11[%c0_141, %c0_142] : memref<4x4xf32, #tpu.memory_space<vmem>>, vector<4x4xf32>
    %cst_143 = arith.constant dense<0.000000e+00> : vector<256x4xf32>
    %166 = tpu.matmul %164, %165, %cst_143 {dimension_numbers = #tpu.dot_dimension_numbers<[1], [0], [0], [1], [0, 0, 1, 1], [], []>} : vector<256x4xf32>, vector<4x4xf32>, vector<256x4xf32> -> vector<256x4xf32>
    %167 = arith.addf %163, %166 : vector<256x4xf32>
    %c0_144 = arith.constant 0 : index
    %c0_145 = arith.constant 0 : index
    %168 = vector.load %arg12[%c0_144, %c0_145] : memref<1x4xf32, #tpu.memory_space<vmem>>, vector<1x4xf32>
    %169 = vector.broadcast %168 : vector<1x4xf32> to vector<256x4xf32>
    %170 = arith.addf %167, %169 : vector<256x4xf32>
    %171 = vector.shape_cast %170 : vector<256x4xf32> to vector<1x16x16x4xf32>
    %c0_146 = arith.constant 0 : index
    %c0_147 = arith.constant 0 : index
    %c0_148 = arith.constant 0 : index
    %c0_149 = arith.constant 0 : index
    %172 = vector.load %arg14[%c0_146, %c0_147, %c0_148, %c0_149] : memref<1x16x16x4xf32, #tpu.memory_space<vmem>>, vector<1x16x16x4xf32>
    tpu.vector_store %arg14[%c0_146, %c0_147, %c0_148, %c0_149], %171 {strides = array<i32>} : memref<1x16x16x4xf32, #tpu.memory_space<vmem>>, vector<1x16x16x4xf32>,
    return
  }
  func.func @transform_0(%arg0: i32) -> (i32, i32, i32, i32) {
    %c0_i32 = arith.constant 0 : i32
    %c0_i32_0 = arith.constant 0 : i32
    %c0_i32_1 = arith.constant 0 : i32
    %c0_i32_2 = arith.constant 0 : i32
    return %arg0, %c0_i32, %c0_i32_0, %c0_i32_1 : i32, i32, i32, i32
  }
  func.func @transform_1(%arg0: i32) -> (i32, i32, i32, i32) {
    %c0_i32 = arith.constant 0 : i32
    %c0_i32_0 = arith.constant 0 : i32
    %c0_i32_1 = arith.constant 0 : i32
    %c0_i32_2 = arith.constant 0 : i32
    return %arg0, %c0_i32, %c0_i32_0, %c0_i32_1 : i32, i32, i32, i32
  }
  func.func @transform_2(%arg0: i32) -> (i32, i32) {
    %c0_i32 = arith.constant 0 : i32
    %c0_i32_0 = arith.constant 0 : i32
    %c0_i32_1 = arith.constant 0 : i32
    return %c0_i32, %c0_i32_0 : i32, i32
  }
  func.func @transform_3(%arg0: i32) -> (i32, i32) {
    %c0_i32 = arith.constant 0 : i32
    %c0_i32_0 = arith.constant 0 : i32
    %c0_i32_1 = arith.constant 0 : i32
    return %c0_i32, %c0_i32_0 : i32, i32
  }
  func.func @transform_4(%arg0: i32) -> (i32, i32) {
    %c0_i32 = arith.constant 0 : i32
    %c0_i32_0 = arith.constant 0 : i32
    %c0_i32_1 = arith.constant 0 : i32
    return %c0_i32, %c0_i32_0 : i32, i32
  }
  func.func @transform_5(%arg0: i32) -> (i32, i32) {
    %c0_i32 = arith.constant 0 : i32
    %c0_i32_0 = arith.constant 0 : i32
    %c0_i32_1 = arith.constant 0 : i32
    return %c0_i32, %c0_i32_0 : i32, i32
  }
  func.func @transform_6(%arg0: i32) -> (i32, i32, i32, i32) {
    %c0_i32 = arith.constant 0 : i32
    %c0_i32_0 = arith.constant 0 : i32
    %c0_i32_1 = arith.constant 0 : i32
    %c0_i32_2 = arith.constant 0 : i32
    %c0_i32_3 = arith.constant 0 : i32
    return %c0_i32, %c0_i32_0, %c0_i32_1, %c0_i32_2 : i32, i32, i32, i32
  }
  func.func @transform_7(%arg0: i32) -> (i32, i32, i32, i32) {
    %c0_i32 = arith.constant 0 : i32
    %c0_i32_0 = arith.constant 0 : i32
    %c0_i32_1 = arith.constant 0 : i32
    %c0_i32_2 = arith.constant 0 : i32
    %c0_i32_3 = arith.constant 0 : i32
    return %c0_i32, %c0_i32_0, %c0_i32_1, %c0_i32_2 : i32, i32, i32, i32
  }
  func.func @transform_8(%arg0: i32) -> (i32, i32) {
    %c0_i32 = arith.constant 0 : i32
    %c0_i32_0 = arith.constant 0 : i32
    %c0_i32_1 = arith.constant 0 : i32
    return %c0_i32, %c0_i32_0 : i32, i32
  }
  func.func @transform_9(%arg0: i32) -> (i32, i32) {
    %c0_i32 = arith.constant 0 : i32
    %c0_i32_0 = arith.constant 0 : i32
    %c0_i32_1 = arith.constant 0 : i32
    return %c0_i32, %c0_i32_0 : i32, i32
  }
  func.func @transform_10(%arg0: i32) -> (i32, i32) {
    %c0_i32 = arith.constant 0 : i32
    %c0_i32_0 = arith.constant 0 : i32
    %c0_i32_1 = arith.constant 0 : i32
    return %c0_i32, %c0_i32_0 : i32, i32
  }
  func.func @transform_11(%arg0: i32) -> (i32, i32) {
    %c0_i32 = arith.constant 0 : i32
    %c0_i32_0 = arith.constant 0 : i32
    %c0_i32_1 = arith.constant 0 : i32
    return %c0_i32, %c0_i32_0 : i32, i32
  }
  func.func @transform_12(%arg0: i32) -> (i32, i32, i32, i32) {
    %c0_i32 = arith.constant 0 : i32
    %c0_i32_0 = arith.constant 0 : i32
    %c0_i32_1 = arith.constant 0 : i32
    %c0_i32_2 = arith.constant 0 : i32
    return %arg0, %c0_i32, %c0_i32_0, %c0_i32_1 : i32, i32, i32, i32
  }
  func.func @transform_13(%arg0: i32) -> (i32, i32, i32, i32) {
    %c0_i32 = arith.constant 0 : i32
    %c0_i32_0 = arith.constant 0 : i32
    %c0_i32_1 = arith.constant 0 : i32
    %c0_i32_2 = arith.constant 0 : i32
    return %arg0, %c0_i32, %c0_i32_0, %c0_i32_1 : i32, i32, i32, i32
  }
  func.func @transform_14(%arg0: i32) -> (i32, i32, i32) {
    %c0_i32 = arith.constant 0 : i32
    %c0_i32_0 = arith.constant 0 : i32
    %c0_i32_1 = arith.constant 0 : i32
    return %arg0, %c0_i32, %c0_i32_0 : i32, i32, i32
  }
  func.func @transform_15(%arg0: i32) -> (i32, i32, i32) {
    %c0_i32 = arith.constant 0 : i32
    %c0_i32_0 = arith.constant 0 : i32
    %c0_i32_1 = arith.constant 0 : i32
    return %arg0, %c0_i32, %c0_i32_0 : i32, i32, i32
  }
}

module attributes {stable_mosaic.version = 11 : i64} {
  func.func @_c2_residual_kernel(%arg0: i32, %arg1: memref<1x16x16x4xf32, #tpu.memory_space<vmem>>, %arg2: memref<1x16x16x4xf32, #tpu.memory_space<vmem>>, %arg3: memref<1x4xf32, #tpu.memory_space<vmem>>, %arg4: memref<1x4xf32, #tpu.memory_space<vmem>>, %arg5: memref<3x3x4x4xf32, #tpu.memory_space<vmem>>, %arg6: memref<1x4xf32, #tpu.memory_space<vmem>>, %arg7: memref<1x16x16x4xf32, #tpu.memory_space<vmem>>, %arg8: memref<18x32x4xf32, #tpu.memory_space<vmem>>) attributes {dimension_semantics = [#tpu.dimension_semantics<parallel>], iteration_bounds = array<i64: 2>, scalar_prefetch = 0 : i64, scratch_operands = 1 : i64, tpu.core_type = #tpu.core_type<tc>, window_params = [{transform_indices = @transform_0, window_bounds = array<i64: 1, 16, 16, 4>}, {transform_indices = @transform_1, window_bounds = array<i64: 1, 16, 16, 4>}, {pipeline_mode = #tpu.pipeline_mode<synchronous>, transform_indices = @transform_2, window_bounds = array<i64: 1, 4>}, {pipeline_mode = #tpu.pipeline_mode<synchronous>, transform_indices = @transform_3, window_bounds = array<i64: 1, 4>}, {pipeline_mode = #tpu.pipeline_mode<synchronous>, transform_indices = @transform_4, window_bounds = array<i64: 3, 3, 4, 4>}, {pipeline_mode = #tpu.pipeline_mode<synchronous>, transform_indices = @transform_5, window_bounds = array<i64: 1, 4>}, {transform_indices = @transform_6, window_bounds = array<i64: 1, 16, 16, 4>}]} {
    %cst = arith.constant 0.000000e+00 : f32
    %0 = vector.broadcast %cst : f32 to vector<18x32x4xf32>
    %c0 = arith.constant 0 : index
    %c0_0 = arith.constant 0 : index
    %c0_1 = arith.constant 0 : index
    %1 = vector.load %arg8[%c0, %c0_0, %c0_1] : memref<18x32x4xf32, #tpu.memory_space<vmem>>, vector<18x32x4xf32>
    tpu.vector_store %arg8[%c0, %c0_0, %c0_1], %0 {strides = array<i32>} : memref<18x32x4xf32, #tpu.memory_space<vmem>>, vector<18x32x4xf32>,
    %c0_2 = arith.constant 0 : index
    %c0_3 = arith.constant 0 : index
    %c0_4 = arith.constant 0 : index
    %c0_5 = arith.constant 0 : index
    %2 = vector.load %arg1[%c0_2, %c0_3, %c0_4, %c0_5] : memref<1x16x16x4xf32, #tpu.memory_space<vmem>>, vector<1x16x16x4xf32>
    %3 = vector.shape_cast %2 : vector<1x16x16x4xf32> to vector<16x16x4xf32>
    %c0_6 = arith.constant 0 : index
    %c0_7 = arith.constant 0 : index
    %4 = vector.load %arg3[%c0_6, %c0_7] : memref<1x4xf32, #tpu.memory_space<vmem>>, vector<1x4xf32>
    %5 = vector.shape_cast %4 : vector<1x4xf32> to vector<1x1x4xf32>
    %6 = vector.broadcast %5 : vector<1x1x4xf32> to vector<16x16x4xf32>
    %7 = arith.mulf %3, %6 : vector<16x16x4xf32>
    %c0_8 = arith.constant 0 : index
    %c0_9 = arith.constant 0 : index
    %8 = vector.load %arg4[%c0_8, %c0_9] : memref<1x4xf32, #tpu.memory_space<vmem>>, vector<1x4xf32>
    %9 = vector.shape_cast %8 : vector<1x4xf32> to vector<1x1x4xf32>
    %10 = vector.broadcast %9 : vector<1x1x4xf32> to vector<16x16x4xf32>
    %11 = arith.addf %7, %10 : vector<16x16x4xf32>
    %cst_10 = arith.constant 0.000000e+00 : f32
    %12 = vector.broadcast %cst_10 : f32 to vector<16x16x4xf32>
    %13 = arith.maximumf %11, %12 : vector<16x16x4xf32>
    %c1 = arith.constant 1 : index
    %c8 = arith.constant 8 : index
    %c0_11 = arith.constant 0 : index
    %14 = vector.load %arg8[%c1, %c8, %c0_11] : memref<18x32x4xf32, #tpu.memory_space<vmem>>, vector<16x16x4xf32>
    tpu.vector_store %arg8[%c1, %c8, %c0_11], %13 {strides = array<i32>} : memref<18x32x4xf32, #tpu.memory_space<vmem>>, vector<16x16x4xf32>,
    %c0_12 = arith.constant 0 : index
    %c0_13 = arith.constant 0 : index
    %c0_14 = arith.constant 0 : index
    %15 = vector.load %arg8[%c0_12, %c0_13, %c0_14] : memref<18x32x4xf32, #tpu.memory_space<vmem>>, vector<18x32x4xf32>
    %cst_15 = arith.constant 0.000000e+00 : f32
    %16 = vector.broadcast %cst_15 : f32 to vector<256x4xf32>
    %17 = vector.extract_strided_slice %15 {offsets = [0, 7, 0], sizes = [18, 16, 4], strides = [1, 1, 1]} : vector<18x32x4xf32> to vector<18x16x4xf32>
    %18 = vector.extract_strided_slice %17 {offsets = [0, 0, 0], sizes = [16, 16, 4], strides = [1, 1, 1]} : vector<18x16x4xf32> to vector<16x16x4xf32>
    %19 = vector.shape_cast %18 : vector<16x16x4xf32> to vector<256x4xf32>
    %c0_16 = arith.constant 0 : index
    %c0_17 = arith.constant 0 : index
    %c0_18 = arith.constant 0 : index
    %c0_19 = arith.constant 0 : index
    %20 = vector.load %arg5[%c0_16, %c0_17, %c0_18, %c0_19] : memref<3x3x4x4xf32, #tpu.memory_space<vmem>>, vector<1x1x4x4xf32>
    %21 = vector.shape_cast %20 : vector<1x1x4x4xf32> to vector<4x4xf32>
    %cst_20 = arith.constant dense<0.000000e+00> : vector<256x4xf32>
    %22 = tpu.matmul %19, %21, %cst_20 {dimension_numbers = #tpu.dot_dimension_numbers<[1], [0], [0], [1], [0, 0, 1, 1], [], []>} : vector<256x4xf32>, vector<4x4xf32>, vector<256x4xf32> -> vector<256x4xf32>
    %23 = arith.addf %16, %22 : vector<256x4xf32>
    %24 = vector.extract_strided_slice %17 {offsets = [1, 0, 0], sizes = [16, 16, 4], strides = [1, 1, 1]} : vector<18x16x4xf32> to vector<16x16x4xf32>
    %25 = vector.shape_cast %24 : vector<16x16x4xf32> to vector<256x4xf32>
    %c1_21 = arith.constant 1 : index
    %c0_22 = arith.constant 0 : index
    %c0_23 = arith.constant 0 : index
    %c0_24 = arith.constant 0 : index
    %26 = vector.load %arg5[%c1_21, %c0_22, %c0_23, %c0_24] : memref<3x3x4x4xf32, #tpu.memory_space<vmem>>, vector<1x1x4x4xf32>
    %27 = vector.shape_cast %26 : vector<1x1x4x4xf32> to vector<4x4xf32>
    %cst_25 = arith.constant dense<0.000000e+00> : vector<256x4xf32>
    %28 = tpu.matmul %25, %27, %cst_25 {dimension_numbers = #tpu.dot_dimension_numbers<[1], [0], [0], [1], [0, 0, 1, 1], [], []>} : vector<256x4xf32>, vector<4x4xf32>, vector<256x4xf32> -> vector<256x4xf32>
    %29 = arith.addf %23, %28 : vector<256x4xf32>
    %30 = vector.extract_strided_slice %17 {offsets = [2, 0, 0], sizes = [16, 16, 4], strides = [1, 1, 1]} : vector<18x16x4xf32> to vector<16x16x4xf32>
    %31 = vector.shape_cast %30 : vector<16x16x4xf32> to vector<256x4xf32>
    %c2 = arith.constant 2 : index
    %c0_26 = arith.constant 0 : index
    %c0_27 = arith.constant 0 : index
    %c0_28 = arith.constant 0 : index
    %32 = vector.load %arg5[%c2, %c0_26, %c0_27, %c0_28] : memref<3x3x4x4xf32, #tpu.memory_space<vmem>>, vector<1x1x4x4xf32>
    %33 = vector.shape_cast %32 : vector<1x1x4x4xf32> to vector<4x4xf32>
    %cst_29 = arith.constant dense<0.000000e+00> : vector<256x4xf32>
    %34 = tpu.matmul %31, %33, %cst_29 {dimension_numbers = #tpu.dot_dimension_numbers<[1], [0], [0], [1], [0, 0, 1, 1], [], []>} : vector<256x4xf32>, vector<4x4xf32>, vector<256x4xf32> -> vector<256x4xf32>
    %35 = arith.addf %29, %34 : vector<256x4xf32>
    %36 = vector.extract_strided_slice %15 {offsets = [0, 8, 0], sizes = [18, 16, 4], strides = [1, 1, 1]} : vector<18x32x4xf32> to vector<18x16x4xf32>
    %37 = vector.extract_strided_slice %36 {offsets = [0, 0, 0], sizes = [16, 16, 4], strides = [1, 1, 1]} : vector<18x16x4xf32> to vector<16x16x4xf32>
    %38 = vector.shape_cast %37 : vector<16x16x4xf32> to vector<256x4xf32>
    %c0_30 = arith.constant 0 : index
    %c1_31 = arith.constant 1 : index
    %c0_32 = arith.constant 0 : index
    %c0_33 = arith.constant 0 : index
    %39 = vector.load %arg5[%c0_30, %c1_31, %c0_32, %c0_33] : memref<3x3x4x4xf32, #tpu.memory_space<vmem>>, vector<1x1x4x4xf32>
    %40 = vector.shape_cast %39 : vector<1x1x4x4xf32> to vector<4x4xf32>
    %cst_34 = arith.constant dense<0.000000e+00> : vector<256x4xf32>
    %41 = tpu.matmul %38, %40, %cst_34 {dimension_numbers = #tpu.dot_dimension_numbers<[1], [0], [0], [1], [0, 0, 1, 1], [], []>} : vector<256x4xf32>, vector<4x4xf32>, vector<256x4xf32> -> vector<256x4xf32>
    %42 = arith.addf %35, %41 : vector<256x4xf32>
    %43 = vector.extract_strided_slice %36 {offsets = [1, 0, 0], sizes = [16, 16, 4], strides = [1, 1, 1]} : vector<18x16x4xf32> to vector<16x16x4xf32>
    %44 = vector.shape_cast %43 : vector<16x16x4xf32> to vector<256x4xf32>
    %c1_35 = arith.constant 1 : index
    %c1_36 = arith.constant 1 : index
    %c0_37 = arith.constant 0 : index
    %c0_38 = arith.constant 0 : index
    %45 = vector.load %arg5[%c1_35, %c1_36, %c0_37, %c0_38] : memref<3x3x4x4xf32, #tpu.memory_space<vmem>>, vector<1x1x4x4xf32>
    %46 = vector.shape_cast %45 : vector<1x1x4x4xf32> to vector<4x4xf32>
    %cst_39 = arith.constant dense<0.000000e+00> : vector<256x4xf32>
    %47 = tpu.matmul %44, %46, %cst_39 {dimension_numbers = #tpu.dot_dimension_numbers<[1], [0], [0], [1], [0, 0, 1, 1], [], []>} : vector<256x4xf32>, vector<4x4xf32>, vector<256x4xf32> -> vector<256x4xf32>
    %48 = arith.addf %42, %47 : vector<256x4xf32>
    %49 = vector.extract_strided_slice %36 {offsets = [2, 0, 0], sizes = [16, 16, 4], strides = [1, 1, 1]} : vector<18x16x4xf32> to vector<16x16x4xf32>
    %50 = vector.shape_cast %49 : vector<16x16x4xf32> to vector<256x4xf32>
    %c2_40 = arith.constant 2 : index
    %c1_41 = arith.constant 1 : index
    %c0_42 = arith.constant 0 : index
    %c0_43 = arith.constant 0 : index
    %51 = vector.load %arg5[%c2_40, %c1_41, %c0_42, %c0_43] : memref<3x3x4x4xf32, #tpu.memory_space<vmem>>, vector<1x1x4x4xf32>
    %52 = vector.shape_cast %51 : vector<1x1x4x4xf32> to vector<4x4xf32>
    %cst_44 = arith.constant dense<0.000000e+00> : vector<256x4xf32>
    %53 = tpu.matmul %50, %52, %cst_44 {dimension_numbers = #tpu.dot_dimension_numbers<[1], [0], [0], [1], [0, 0, 1, 1], [], []>} : vector<256x4xf32>, vector<4x4xf32>, vector<256x4xf32> -> vector<256x4xf32>
    %54 = arith.addf %48, %53 : vector<256x4xf32>
    %55 = vector.extract_strided_slice %15 {offsets = [0, 9, 0], sizes = [18, 16, 4], strides = [1, 1, 1]} : vector<18x32x4xf32> to vector<18x16x4xf32>
    %56 = vector.extract_strided_slice %55 {offsets = [0, 0, 0], sizes = [16, 16, 4], strides = [1, 1, 1]} : vector<18x16x4xf32> to vector<16x16x4xf32>
    %57 = vector.shape_cast %56 : vector<16x16x4xf32> to vector<256x4xf32>
    %c0_45 = arith.constant 0 : index
    %c2_46 = arith.constant 2 : index
    %c0_47 = arith.constant 0 : index
    %c0_48 = arith.constant 0 : index
    %58 = vector.load %arg5[%c0_45, %c2_46, %c0_47, %c0_48] : memref<3x3x4x4xf32, #tpu.memory_space<vmem>>, vector<1x1x4x4xf32>
    %59 = vector.shape_cast %58 : vector<1x1x4x4xf32> to vector<4x4xf32>
    %cst_49 = arith.constant dense<0.000000e+00> : vector<256x4xf32>
    %60 = tpu.matmul %57, %59, %cst_49 {dimension_numbers = #tpu.dot_dimension_numbers<[1], [0], [0], [1], [0, 0, 1, 1], [], []>} : vector<256x4xf32>, vector<4x4xf32>, vector<256x4xf32> -> vector<256x4xf32>
    %61 = arith.addf %54, %60 : vector<256x4xf32>
    %62 = vector.extract_strided_slice %55 {offsets = [1, 0, 0], sizes = [16, 16, 4], strides = [1, 1, 1]} : vector<18x16x4xf32> to vector<16x16x4xf32>
    %63 = vector.shape_cast %62 : vector<16x16x4xf32> to vector<256x4xf32>
    %c1_50 = arith.constant 1 : index
    %c2_51 = arith.constant 2 : index
    %c0_52 = arith.constant 0 : index
    %c0_53 = arith.constant 0 : index
    %64 = vector.load %arg5[%c1_50, %c2_51, %c0_52, %c0_53] : memref<3x3x4x4xf32, #tpu.memory_space<vmem>>, vector<1x1x4x4xf32>
    %65 = vector.shape_cast %64 : vector<1x1x4x4xf32> to vector<4x4xf32>
    %cst_54 = arith.constant dense<0.000000e+00> : vector<256x4xf32>
    %66 = tpu.matmul %63, %65, %cst_54 {dimension_numbers = #tpu.dot_dimension_numbers<[1], [0], [0], [1], [0, 0, 1, 1], [], []>} : vector<256x4xf32>, vector<4x4xf32>, vector<256x4xf32> -> vector<256x4xf32>
    %67 = arith.addf %61, %66 : vector<256x4xf32>
    %68 = vector.extract_strided_slice %55 {offsets = [2, 0, 0], sizes = [16, 16, 4], strides = [1, 1, 1]} : vector<18x16x4xf32> to vector<16x16x4xf32>
    %69 = vector.shape_cast %68 : vector<16x16x4xf32> to vector<256x4xf32>
    %c2_55 = arith.constant 2 : index
    %c2_56 = arith.constant 2 : index
    %c0_57 = arith.constant 0 : index
    %c0_58 = arith.constant 0 : index
    %70 = vector.load %arg5[%c2_55, %c2_56, %c0_57, %c0_58] : memref<3x3x4x4xf32, #tpu.memory_space<vmem>>, vector<1x1x4x4xf32>
    %71 = vector.shape_cast %70 : vector<1x1x4x4xf32> to vector<4x4xf32>
    %cst_59 = arith.constant dense<0.000000e+00> : vector<256x4xf32>
    %72 = tpu.matmul %69, %71, %cst_59 {dimension_numbers = #tpu.dot_dimension_numbers<[1], [0], [0], [1], [0, 0, 1, 1], [], []>} : vector<256x4xf32>, vector<4x4xf32>, vector<256x4xf32> -> vector<256x4xf32>
    %73 = arith.addf %67, %72 : vector<256x4xf32>
    %c0_60 = arith.constant 0 : index
    %c0_61 = arith.constant 0 : index
    %74 = vector.load %arg6[%c0_60, %c0_61] : memref<1x4xf32, #tpu.memory_space<vmem>>, vector<1x4xf32>
    %75 = vector.broadcast %74 : vector<1x4xf32> to vector<256x4xf32>
    %76 = arith.addf %73, %75 : vector<256x4xf32>
    %c0_62 = arith.constant 0 : index
    %c0_63 = arith.constant 0 : index
    %c0_64 = arith.constant 0 : index
    %c0_65 = arith.constant 0 : index
    %77 = vector.load %arg2[%c0_62, %c0_63, %c0_64, %c0_65] : memref<1x16x16x4xf32, #tpu.memory_space<vmem>>, vector<1x16x16x4xf32>
    %78 = vector.shape_cast %77 : vector<1x16x16x4xf32> to vector<16x16x4xf32>
    %79 = vector.shape_cast %78 : vector<16x16x4xf32> to vector<256x4xf32>
    %80 = arith.addf %76, %79 : vector<256x4xf32>
    %81 = vector.shape_cast %80 : vector<256x4xf32> to vector<1x16x16x4xf32>
    %c0_66 = arith.constant 0 : index
    %c0_67 = arith.constant 0 : index
    %c0_68 = arith.constant 0 : index
    %c0_69 = arith.constant 0 : index
    %82 = vector.load %arg7[%c0_66, %c0_67, %c0_68, %c0_69] : memref<1x16x16x4xf32, #tpu.memory_space<vmem>>, vector<1x16x16x4xf32>
    tpu.vector_store %arg7[%c0_66, %c0_67, %c0_68, %c0_69], %81 {strides = array<i32>} : memref<1x16x16x4xf32, #tpu.memory_space<vmem>>, vector<1x16x16x4xf32>,
    return
  }
  func.func @transform_0(%arg0: i32) -> (i32, i32, i32, i32) {
    %c0_i32 = arith.constant 0 : i32
    %c0_i32_0 = arith.constant 0 : i32
    %c0_i32_1 = arith.constant 0 : i32
    %c0_i32_2 = arith.constant 0 : i32
    return %arg0, %c0_i32, %c0_i32_0, %c0_i32_1 : i32, i32, i32, i32
  }
  func.func @transform_1(%arg0: i32) -> (i32, i32, i32, i32) {
    %c0_i32 = arith.constant 0 : i32
    %c0_i32_0 = arith.constant 0 : i32
    %c0_i32_1 = arith.constant 0 : i32
    %c0_i32_2 = arith.constant 0 : i32
    return %arg0, %c0_i32, %c0_i32_0, %c0_i32_1 : i32, i32, i32, i32
  }
  func.func @transform_2(%arg0: i32) -> (i32, i32) {
    %c0_i32 = arith.constant 0 : i32
    %c0_i32_0 = arith.constant 0 : i32
    %c0_i32_1 = arith.constant 0 : i32
    return %c0_i32, %c0_i32_0 : i32, i32
  }
  func.func @transform_3(%arg0: i32) -> (i32, i32) {
    %c0_i32 = arith.constant 0 : i32
    %c0_i32_0 = arith.constant 0 : i32
    %c0_i32_1 = arith.constant 0 : i32
    return %c0_i32, %c0_i32_0 : i32, i32
  }
  func.func @transform_4(%arg0: i32) -> (i32, i32, i32, i32) {
    %c0_i32 = arith.constant 0 : i32
    %c0_i32_0 = arith.constant 0 : i32
    %c0_i32_1 = arith.constant 0 : i32
    %c0_i32_2 = arith.constant 0 : i32
    %c0_i32_3 = arith.constant 0 : i32
    return %c0_i32, %c0_i32_0, %c0_i32_1, %c0_i32_2 : i32, i32, i32, i32
  }
  func.func @transform_5(%arg0: i32) -> (i32, i32) {
    %c0_i32 = arith.constant 0 : i32
    %c0_i32_0 = arith.constant 0 : i32
    %c0_i32_1 = arith.constant 0 : i32
    return %c0_i32, %c0_i32_0 : i32, i32
  }
  func.func @transform_6(%arg0: i32) -> (i32, i32, i32, i32) {
    %c0_i32 = arith.constant 0 : i32
    %c0_i32_0 = arith.constant 0 : i32
    %c0_i32_1 = arith.constant 0 : i32
    %c0_i32_2 = arith.constant 0 : i32
    return %arg0, %c0_i32, %c0_i32_0, %c0_i32_1 : i32, i32, i32, i32
  }
}

</mosaic_0001>

<bundles_post_ra>
// kernel: tile.13
= control target key start
LH: loop header
LB: loop body
LE: loop exit
PB: predicated region body
PF: predicated region fallthrough
CT: control target
= control target key end

     0   :  { %s22_s0 = inlined_call_operand.vmem [shape: f32[8], index: 0, kind: input, shape index: {}]   ;;  %s23_s1 = inlined_call_operand.vmem [shape: f32[4,8], index: 1, kind: output, shape index: {}]  }
   0x1   :  { %v4_v0 = vld [vmem:[%s22_s0] ss:$0 sm:$0xff] }
   0x2   :  { %5 = vst [vmem:[%s23_s1] sm:$0xf] %v4_v0 }

// kernel: tile.14
= control target key start
LH: loop header
LB: loop body
LE: loop exit
PB: predicated region body
PF: predicated region fallthrough
CT: control target
= control target key end

     0   :  { %vm7_vm0 = vcmask 64512   ;;  %s37_s8 = smov 8   ;;  %s38_s9 = smov 16   ;;  %vm13_vm1 = vcmask 261312   ;;  %vm19_vm2 = vcmask 195712   ;;  %vm25_vm3 = vcmask 130112   ;;  %s55_s0 = inlined_call_operand.vmem [shape: f32[4,8], index: 0, kind: input, shape index: {}]   ;;  %s56_s1 = inlined_call_operand.vmem [shape: f32[1,32], index: 1, kind: output, shape index: {}]  }
   0x1   :  { %v4_v0 = vld [vmem:[%s55_s0] sm:$0xf]  ;;  %s36_s0 = smov 24  }
   0x2   :  { %5 = vst [vmem:[#allocation1] sm:$0xf] %v4_v0 }
   0x9   :  { %v10_v1 = vld [vmem:[#allocation1 + $0x3] sm:$0x1]   ;;  %v22_v2 = vld [vmem:[#allocation1 + $0x1] sm:$0x1]   ;;  %v6_v3 = vld [vmem:[#allocation1] sm:$0x1]  }
   0xa   :  { %11 = vrot.lane.b32.xlu0 %v10_v1, %s36_s0  ;;  %23 = vrot.lane.b32.xlu1 %v22_v2, %s37_s8  ;;  %v16_v4 = vld [vmem:[#allocation1 + $0x2] sm:$0x1]   ;;  %8 = vst.msk [vmem:[#allocation0] sm:$0x1] %vm7_vm0, %v6_v3  }
   0xe   :  { %17 = vrot.lane.b32.xlu0 %v16_v4, %s38_s9 }
  0x7c   :  { %v12_v5 = vpop.permute.xlu0 %11   ;;  %v24_v6 = vpop.permute.xlu1 %23  }
  0x7d   :  { %14 = vst.msk [vmem:[#allocation0] sm:$0x1] %vm13_vm1, %v12_v5  }
  0x80   :  { %v18_v7 = vpop.permute.xlu0 %17  }
  0x81   :  { %20 = vst.msk [vmem:[#allocation0] sm:$0x1] %vm19_vm2, %v18_v7  }
  0x82   :  { %26 = vst.msk [vmem:[#allocation0] sm:$0x1] %vm25_vm3, %v24_v6  }
  0x89   :  { %v30_v8 = vld [vmem:[#allocation0] sm:$0x1] }
  0x8a   :  { %32 = vst [vmem:[%s56_s1] sm:$0x1] %v30_v8 }

// kernel: decoder_block_forward.3
= control target key start
LH: loop header
LB: loop body
LE: loop exit
PB: predicated region body
PF: predicated region fallthrough
CT: control target
= control target key end

     0   :  { %s1287_s30 = smov 0   ;;  %s1519_s0 = inlined_call_operand.vmem [shape: f32[2,8,8,8], index: 0, kind: input, shape index: {}]   ;;  %s1520_s1 = inlined_call_operand.vmem [shape: f32[2,16,16,4], index: 1, kind: input, shape index: {}]   ;;  %s1521_s2 = inlined_call_operand.vmem [shape: f32[8,32], index: 2, kind: input, shape index: {}]   ;;  %s1522_s3 = inlined_call_operand.vmem [shape: f32[1,32], index: 3, kind: input, shape index: {}]   ;;  %s1523_s4 = inlined_call_operand.vmem [shape: f32[32,8], index: 4, kind: input, shape index: {}]   ;;  %s1524_s5 = inlined_call_operand.vmem [shape: f32[2,8,8,32], index: 5, kind: output, shape index: {0}]   ;;  %s1525_s6 = inlined_call_operand.vmem [shape: f32[2,1,8], index: 6, kind: output, shape index: {1}]   ;;  %s1526_s7 = inlined_call_operand.vmem [shape: f32[2,1,8], index: 7, kind: output, shape index: {2}]   ;;  %s1527_s8 = inlined_call_operand.vmem [shape: f32[2,1,4], index: 8, kind: output, shape index: {3}]   ;;  %s1528_s9 = inlined_call_operand.vmem [shape: f32[2,1,4], index: 9, kind: output, shape index: {4}]  }
   0x1 LB: > { %s1121_s10 = sadd.s32 4294967295, %s1232_s30   ;;  %p1125_p0 = scmp.ge.s32.totalorder %s1232_s30, 1  ;;  %s1232_s30 = sphi %s1287_s30, %s20_s30  }
   0x2   : > { %p306_p1 = scmp.lt.s32.totalorder %s1232_s30, 3 }
   0x4   : > { %p307_p2 = pnand %p1125_p0, %p306_p1 }
   0x5   : > { %v394_v0 = vld [vmem:[%s1521_s2] sm:$0xff] (!%p307_p2)  ;;  %p359_p3 = scmp.lt.s32.totalorder (!%p307_p2), %s1121_s10, 1  ;;  %vm402_vm0 = vcmask (!%p307_p2), 64512   ;;  %vm780_vm1 = vcmask (!%p307_p2), 31744   ;;  %vm850_vm2 = vcmask (!%p307_p2), 24576   ;;  %vm1235_vm3 = vmmov (!%p307_p2), 0  }
   0x6   : > { %310 = sbr.rel (%p307_p2) target bundleno = 485 (0x1e5), region = 40  ;;  %1167 = vmatprep.subr.mxu0 (!%p307_p2), %v394_v0  ;;  %vm532_vm4 = vcmask (!%p307_p2), 261120   ;;  %vm639_vm5 = vcmask (!%p307_p2), 57344  }
   0x7   : > { %1168 = vmatpush3.msra.mxu0 (!%p307_p2), %v394_v0 }
   0xd   : > { %s1530_s10 = smov (!%p359_p3, %s1121_s10), 1 }
   0xe   : > { %s1145_s13 = sshll.u32 %s1530_s10, 6  ;;  %s1146_s14 = sshll.u32 %s1530_s10, 8 }
   0xf   : > { %s1307_s17 = scalar_lea.vmem %s1519_s0, %s1145_s13  ;;  %s1312_s20 = scalar_lea.vmem %s1520_s1, %s1146_s14 }
  0x10   : > { %v386_v1 = vld [vmem:[%s1307_s17] sm:$0xff]  ;;  %v749_v3 = vld [vmem:[%s1312_s20 + $0x8] sm:$0xff]  ;;  %v750_v4 = vld [vmem:[%s1312_s20 + $0x10] sm:$0xff]  ;;  %s382_s23 = scalar_lea.vmem %s1527_s8, %s1530_s10  ;;  %s385_s26 = scalar_lea.vmem %s1528_s9, %s1530_s10 }
  0x11   : > { %v748_v2 = vld [vmem:[%s1312_s20] sm:$0xff]  ;;  %1169 = vmatprep.mubr.msk.f32.mxu0 %vm402_vm0, %v386_v1  ;;  %v782_v6 = vsel %vm780_vm1, %v749_v3, 0.0  ;;  %v751_v7 = vld [vmem:[%s1312_s20 + $0x18] sm:$0xff]  ;;  %v784_v9 = vsel %vm780_vm1, %v750_v4, 0.0  ;;  %v753_v14 = vld [vmem:[%s1312_s20 + $0x28] sm:$0xff]  ;;  %v853_v34 = vmul.f32 %v749_v3, %v749_v3  ;;  %v854_v35 = vmul.f32 %v750_v4, %v750_v4  ;;  %s1467_s21 = scalar_lea.vmem %s1524_s5, %s1145_s13 }
  0x12   : > { %v781_v5 = vsel %vm780_vm1, %v748_v2, 0.0  ;;  %v786_v10 = vsel %vm780_vm1, %v751_v7, 0.0  ;;  %v752_v11 = vld [vmem:[%s1312_s20 + $0x20] sm:$0xff]  ;;  %v790_v16 = vsel %vm780_vm1, %v753_v14, 0.0  ;;  %v754_v17 = vld [vmem:[%s1312_s20 + $0x30] sm:$0xff]  ;;  %v755_v20 = vld [vmem:[%s1312_s20 + $0x38] sm:$0xff]  ;;  %v852_v33 = vmul.f32 %v748_v2, %v748_v2 }
  0x13   : > { %v783_v8 = vadd.f32 %v782_v6, %v781_v5  ;;  %v788_v13 = vsel %vm780_vm1, %v752_v11, 0.0  ;;  %v792_v19 = vsel %vm780_vm1, %v754_v17, 0.0  ;;  %v794_v22 = vsel %vm780_vm1, %v755_v20, 0.0  ;;  %v387_v23 = vld [vmem:[%s1307_s17 + $0x8] sm:$0xff]  ;;  %v388_v24 = vld [vmem:[%s1307_s17 + $0x10] sm:$0xff]  ;;  %v756_v25 = vld [vmem:[%s1312_s20 + $0x40] sm:$0xff] }
  0x14   : > { %1170 = vmatmul.mubr.msk.f32.vlgmr.msra.gmra.mrb[0].mxu0 %vm402_vm0, %v387_v23  ;;  %v796_v27 = vsel %vm780_vm1, %v756_v25, 0.0  ;;  %v389_v28 = vld [vmem:[%s1307_s17 + $0x18] sm:$0xff]  ;;  %v757_v29 = vld [vmem:[%s1312_s20 + $0x48] sm:$0xff]  ;;  %v390_v31 = vld [vmem:[%s1307_s17 + $0x20] sm:$0xff]  ;;  %v855_v40 = vmul.f32 %v751_v7, %v751_v7  ;;  %v856_v45 = vmul.f32 %v752_v11, %v752_v11  ;;  %v884_v46 = vsel %vm780_vm1, %v852_v33, 0.0 }
  0x15   : > { %v785_v12 = vadd.f32 %v784_v9, %v783_v8  ;;  %1172 = vmatprep.mubr.msk.f32.mxu0 %vm402_vm0, %v388_v24  ;;  %v798_v32 = vsel %vm780_vm1, %v757_v29, 0.0  ;;  %v758_v36 = vld [vmem:[%s1312_s20 + $0x50] sm:$0xff]  ;;  %v759_v38 = vld [vmem:[%s1312_s20 + $0x58] sm:$0xff]  ;;  %v391_v41 = vld [vmem:[%s1307_s17 + $0x28] sm:$0xff]  ;;  %v885_v47 = vsel %vm780_vm1, %v853_v34, 0.0  ;;  %v887_v48 = vsel %vm780_vm1, %v854_v35, 0.0 }
  0x16   : > { %v800_v39 = vsel %vm780_vm1, %v758_v36, 0.0  ;;  %v802_v43 = vsel %vm780_vm1, %v759_v38, 0.0  ;;  %v392_v44 = vld [vmem:[%s1307_s17 + $0x30] sm:$0xff]  ;;  %v760_v49 = vld [vmem:[%s1312_s20 + $0x60] sm:$0xff]  ;;  %v886_v51 = vadd.f32 %v885_v47, %v884_v46  ;;  %v857_v53 = vmul.f32 %v753_v14, %v753_v14  ;;  %v393_v55 = vld [vmem:[%s1307_s17 + $0x38] sm:$0xff] }
  0x17   : > { %v787_v15 = vadd.f32 %v786_v10, %v785_v12  ;;  %v804_v52 = vsel %vm780_vm1, %v760_v49, 0.0  ;;  %v889_v54 = vsel %vm780_vm1, %v855_v40, 0.0  ;;  %v761_v56 = vld [vmem:[%s1312_s20 + $0x68] sm:$0xff]  ;;  %v858_v60 = vmul.f32 %v754_v17, %v754_v17  ;;  %v762_v62 = vld [vmem:[%s1312_s20 + $0x70] sm:$0xff]  ;;  %v763_v4 = vld [vmem:[%s1312_s20 + $0x78] sm:$0xff] }
  0x18   : > { %1173 = vmatmul.mubr.msk.f32.gmra.mrb[2].mxu0 %vm402_vm0, %v389_v28  ;;  %v888_v58 = vadd.f32 %v887_v48, %v886_v51  ;;  %v806_v59 = vsel %vm780_vm1, %v761_v56, 0.0  ;;  %v891_v61 = vsel %vm780_vm1, %v856_v45, 0.0  ;;  %v808_v1 = vsel %vm780_vm1, %v762_v62, 0.0  ;;  %v764_v10 = vld [vmem:[%s1312_s20 + $0x80] sm:$0xff]  ;;  %v767_v28 = vld [vmem:[%s1312_s20 + $0x98] sm:$0xff]  ;;  %v769_v40 = vld [vmem:[%s1312_s20 + $0xa8] sm:$0xff] }
  0x19   : > { %v789_v18 = vadd.f32 %v788_v13, %v787_v15  ;;  %1175 = vmatprep.mubr.msk.f32.mxu0 %vm402_vm0, %v390_v31  ;;  %v859_v2 = vmul.f32 %v755_v20, %v755_v20  ;;  %v893_v3 = vsel %vm780_vm1, %v857_v53, 0.0  ;;  %v810_v7 = vsel %vm780_vm1, %v763_v4, 0.0  ;;  %v768_v34 = vld [vmem:[%s1312_s20 + $0xa0] sm:$0xff]  ;;  %v770_v46 = vld [vmem:[%s1312_s20 + $0xb0] sm:$0xff] }
  0x1a   : > { %v890_v0 = vadd.f32 %v889_v54, %v888_v58  ;;  %v860_v8 = vmul.f32 %v756_v25, %v756_v25  ;;  %v895_v9 = vsel %vm780_vm1, %v858_v60, 0.0  ;;  %v812_v13 = vsel %vm780_vm1, %v764_v10, 0.0  ;;  %v772_v58 = vld [vmem:[%s1312_s20 + $0xc0] sm:$0xff] }
  0x1b   : > { %v791_v21 = vadd.f32 %v790_v16, %v789_v18  ;;  %v861_v14 = vmul.f32 %v757_v29, %v757_v29  ;;  %v897_v15 = vsel %vm780_vm1, %v859_v2, 0.0  ;;  %v765_v16 = vld [vmem:[%s1312_s20 + $0x88] sm:$0xff]  ;;  %v862_v20 = vmul.f32 %v758_v36, %v758_v36 }
  0x1c   : > { %1176 = vmatmul.mubr.msk.f32.gmra.mrb[4].mxu0 %vm402_vm0, %v391_v41  ;;  %v892_v6 = vadd.f32 %v891_v61, %v890_v0  ;;  %v818_v31 = vsel %vm780_vm1, %v767_v28, 0.0  ;;  %v828_v61 = vsel %vm780_vm1, %v772_v58, 0.0  ;;  %v773_v0 = vld [vmem:[%s1312_s20 + $0xc8] sm:$0xff] }
  0x1d   : > { %v793_v26 = vadd.f32 %v792_v19, %v791_v21  ;;  %1178 = vmatprep.mubr.msk.f32.mxu0 %vm402_vm0, %v392_v44  ;;  %v814_v19 = vsel %vm780_vm1, %v765_v16, 0.0  ;;  %v899_v21 = vsel %vm780_vm1, %v860_v8, 0.0  ;;  %v903_v33 = vsel %vm780_vm1, %v862_v20, 0.0 }
  0x1e   : > { %v894_v12 = vadd.f32 %v893_v3, %v892_v6  ;;  %v866_v44 = vmul.f32 %v762_v62, %v762_v62  ;;  %v869_v62 = vmul.f32 %v765_v16, %v765_v16  ;;  %v830_v3 = vsel %vm780_vm1, %v773_v0, 0.0  ;;  %v774_v6 = vld [vmem:[%s1312_s20 + $0xd0] sm:$0xff] }
  0x1f   : > { %v795_v30 = vadd.f32 %v794_v22, %v793_v26  ;;  %v766_v22 = vld [vmem:[%s1312_s20 + $0x90] sm:$0xff]  ;;  %v863_v26 = vmul.f32 %v759_v38, %v759_v38  ;;  %v872_v16 = vmul.f32 %v768_v34, %v768_v34 }
  0x20   : > { %1179 = vmatmul.mubr.msk.f32.gmra.mrb[6].mxu0 %vm402_vm0, %v393_v55  ;;  %v896_v18 = vadd.f32 %v895_v9, %v894_v12  ;;  %v816_v25 = vsel %vm780_vm1, %v766_v22, 0.0  ;;  %v832_v9 = vsel %vm780_vm1, %v774_v6, 0.0  ;;  %v775_v12 = vld [vmem:[%s1312_s20 + $0xd8] sm:$0xff] }
  0x21   : > { %v797_v37 = vadd.f32 %v796_v27, %v795_v30  ;;  %v901_v27 = vsel %vm780_vm1, %v861_v14, 0.0  ;;  %v905_v38 = vsel %vm780_vm1, %v863_v26, 0.0 }
  0x22   : > { %v898_v24 = vadd.f32 %v897_v15, %v896_v18  ;;  %v834_v15 = vsel %vm780_vm1, %v775_v12, 0.0  ;;  %v776_v18 = vld [vmem:[%s1312_s20 + $0xe0] sm:$0xff] }
  0x23   : > { %v799_v42 = vadd.f32 %v798_v32, %v797_v37  ;;  %v864_v32 = vmul.f32 %v760_v49, %v760_v49  ;;  %v820_v37 = vsel %vm780_vm1, %v768_v34, 0.0  ;;  %v824_v49 = vsel %vm780_vm1, %v770_v46, 0.0 }
  0x24   : > { %v900_v30 = vadd.f32 %v899_v21, %v898_v24  ;;  %v836_v21 = vsel %vm780_vm1, %v776_v18, 0.0  ;;  %v777_v24 = vld [vmem:[%s1312_s20 + $0xe8] sm:$0xff] }
  0x25   : > { %v801_v50 = vadd.f32 %v800_v39, %v799_v42  ;;  %v865_v39 = vmul.f32 %v761_v56, %v761_v56  ;;  %v907_v45 = vsel %vm780_vm1, %v864_v32, 0.0  ;;  %v868_v56 = vmul.f32 %v764_v10, %v764_v10 }
  0x26   : > { %v902_v36 = vadd.f32 %v901_v27, %v900_v30  ;;  %v871_v10 = vmul.f32 %v767_v28, %v767_v28  ;;  %v838_v27 = vsel %vm780_vm1, %v777_v24, 0.0  ;;  %v874_v28 = vmul.f32 %v770_v46, %v770_v46  ;;  %v778_v30 = vld [vmem:[%s1312_s20 + $0xf0] sm:$0xff] }
  0x27   : > { %v803_v57 = vadd.f32 %v802_v43, %v801_v50  ;;  %v822_v43 = vsel %vm780_vm1, %v769_v40, 0.0  ;;  %v867_v50 = vmul.f32 %v763_v4, %v763_v4  ;;  %v909_v51 = vsel %vm780_vm1, %v865_v39, 0.0 }
  0x28   : > { %v904_v42 = vadd.f32 %v903_v33, %v902_v36  ;;  %v870_v4 = vmul.f32 %v766_v22, %v766_v22  ;;  %v873_v22 = vmul.f32 %v769_v40, %v769_v40  ;;  %v840_v33 = vsel %vm780_vm1, %v778_v30, 0.0  ;;  %v779_v36 = vld [vmem:[%s1312_s20 + $0xf8] sm:$0xff] }
  0x29   : > { %v805_v63 = vadd.f32 %v804_v52, %v803_v57  ;;  %v771_v52 = vld [vmem:[%s1312_s20 + $0xb8] sm:$0xff]  ;;  %v911_v57 = vsel %vm780_vm1, %v866_v44, 0.0  ;;  %v876_v40 = vmul.f32 %v772_v58, %v772_v58  ;;  %v877_v44 = vmul.f32 %v773_v0, %v773_v0 }
  0x2a   : > { %v906_v48 = vadd.f32 %v905_v38, %v904_v42  ;;  %v826_v55 = vsel %vm780_vm1, %v771_v52, 0.0  ;;  %v875_v34 = vmul.f32 %v771_v52, %v771_v52  ;;  %v842_v38 = vsel %vm780_vm1, %v779_v36, 0.0 }
  0x2b   : > { %v807_v5 = vadd.f32 %v806_v59, %v805_v63  ;;  %v913_v63 = vsel %vm780_vm1, %v867_v50, 0.0  ;;  %v879_v52 = vmul.f32 %v775_v12, %v775_v12  ;;  %v882_v0 = vmul.f32 %v778_v30, %v778_v30 }
  0x2c   : > { %v908_v54 = vadd.f32 %v907_v45, %v906_v48  ;;  %v929_v45 = vsel %vm780_vm1, %v875_v34, 0.0  ;;  %v878_v48 = vmul.f32 %v774_v6, %v774_v6 }
  0x2d   : > { %v809_v11 = vadd.f32 %v808_v1, %v807_v5  ;;  %v915_v5 = vsel %vm780_vm1, %v868_v56, 0.0  ;;  %v880_v56 = vmul.f32 %v776_v18, %v776_v18 }
  0x2e   : > { %v910_v60 = vadd.f32 %v909_v51, %v908_v54 }
  0x2f   : > { %v811_v17 = vadd.f32 %v810_v7, %v809_v11  ;;  %v917_v11 = vsel %vm780_vm1, %v869_v62, 0.0 }
  0x30   : > { %v912_v2 = vadd.f32 %v911_v57, %v910_v60  ;;  %v935_v57 = vsel %vm780_vm1, %v878_v48, 0.0  ;;  %v881_v60 = vmul.f32 %v777_v24, %v777_v24  ;;  %v565_v24 = vld [vmem:[%s1523_s4 + $0x18] sm:$0xff] }
  0x31   : > { %v813_v23 = vadd.f32 %v812_v13, %v811_v17  ;;  %v919_v17 = vsel %vm780_vm1, %v870_v4, 0.0  ;;  %v883_v4 = vmul.f32 %v779_v36, %v779_v36 }
  0x32   : > { %v914_v8 = vadd.f32 %v913_v63, %v912_v2 }
  0x33   : > { %v815_v29 = vadd.f32 %v814_v19, %v813_v23  ;;  %v921_v23 = vsel %vm780_vm1, %v871_v10, 0.0  ;;  %v945_v10 = vsel %vm780_vm1, %v883_v4, 0.0 }
  0x34   : > { %v916_v14 = vadd.f32 %v915_v5, %v914_v8  ;;  %v941_v5 = vsel %vm780_vm1, %v881_v60, 0.0  ;;  %v943_v8 = vsel %vm780_vm1, %v882_v0, 0.0 }
  0x35   : > { %v817_v35 = vadd.f32 %v816_v25, %v815_v29  ;;  %v923_v29 = vsel %vm780_vm1, %v872_v16, 0.0 }
  0x36   : > { %v918_v20 = vadd.f32 %v917_v11, %v916_v14 }
  0x37   : > { %v819_v41 = vadd.f32 %v818_v31, %v817_v35  ;;  %v925_v35 = vsel %vm780_vm1, %v873_v22, 0.0  ;;  %v1234_v22 = vmov 0.0|0.0  }
  0x38   : > { %v920_v26 = vadd.f32 %v919_v17, %v918_v20  ;;  %v563_v20 = vld [vmem:[%s1523_s4 + $0x8] sm:$0xff]  ;;  %1203 = vmatprep.subr.bf16.mxu1 %v1234_v22 }
  0x39   : > { %v821_v47 = vadd.f32 %v820_v37, %v819_v41  ;;  %v927_v41 = vsel %vm780_vm1, %v874_v28, 0.0 }
  0x3a   : > { %v922_v32 = vadd.f32 %v921_v23, %v920_v26  ;;  %v564_v23 = vld [vmem:[%s1523_s4 + $0x10] sm:$0xff]  ;;  %v1236_v26 = vmov 0.0  }
  0x3b   : > { %v823_v53 = vadd.f32 %v822_v43, %v821_v47  ;;  %1189 = vmatprep.mubr.msk.f32.mxu1 %vm1235_vm3, %v1236_v26 }
  0x3c   : > { %v924_v39 = vadd.f32 %v923_v29, %v922_v32 }
  0x3d   : > { %v825_v59 = vadd.f32 %v824_v49, %v823_v53  ;;  %v931_v49 = vsel %vm780_vm1, %v876_v40, 0.0  ;;  %v933_v53 = vsel %vm780_vm1, %v877_v44, 0.0 }
  0x3e   : > { %v926_v43 = vadd.f32 %v925_v35, %v924_v39 }
  0x3f   : > { %v827_v1 = vadd.f32 %v826_v55, %v825_v59 }
  0x40   : > { %v928_v47 = vadd.f32 %v927_v41, %v926_v43 }
  0x41   : > { %v829_v7 = vadd.f32 %v828_v61, %v827_v1  ;;  %v937_v61 = vsel %vm780_vm1, %v879_v52, 0.0  ;;  %v939_v1 = vsel %vm780_vm1, %v880_v56, 0.0 }
  0x42   : > { %v930_v51 = vadd.f32 %v929_v45, %v928_v47 }
  0x43   : > { %v831_v13 = vadd.f32 %v830_v3, %v829_v7 }
  0x44   : > { %v932_v55 = vadd.f32 %v931_v49, %v930_v51 }
  0x45   : > { %v833_v19 = vadd.f32 %v832_v9, %v831_v13 }
  0x46   : > { %v934_v59 = vadd.f32 %v933_v53, %v932_v55 }
  0x47   : > { %v835_v25 = vadd.f32 %v834_v15, %v833_v19  ;;  %v562_v19 = vld [vmem:[%s1523_s4] sm:$0xff] }
  0x48   : > { %v936_v63 = vadd.f32 %v935_v57, %v934_v59 }
  0x49   : > { %v837_v31 = vadd.f32 %v836_v21, %v835_v25  ;;  %v1442_v21 = vpack.c.bf16 %v563_v20, %v562_v19  ;;  %v1453_v25 = vpack.c.bf16 %v565_v24, %v564_v23 }
  0x4a   : > { %v938_v3 = vadd.f32 %v937_v61, %v936_v63 }
  0x4b   : > { %v839_v37 = vadd.f32 %v838_v27, %v837_v31  ;;  %1205 = vmatpush3.bf16.msra.mxu1 %v1442_v21  ;;  %v1132_v27 = vld [vmem:[%s1522_s3] ss:$0 sm:$0xff] }
  0x4c   : > { %v940_v7 = vadd.f32 %v939_v1, %v938_v3  ;;  %1206 = vmatprep.subr.bf16.mxu1 %v1234_v22 }
  0x4d   : > { %v841_v42 = vadd.f32 %v840_v33, %v839_v37 }
  0x4e   : > { %v942_v9 = vadd.f32 %v941_v5, %v940_v7 }
  0x4f   : > { %v843_v46 = vadd.f32 %v842_v38, %v841_v42  ;;  %1208 = vmatpush3.bf16.msra.mxu1 %v1453_v25 }
  0x50   : > { %v944_v11 = vadd.f32 %v943_v8, %v942_v9  ;;  %1209 = vmatprep.subr.bf16.mxu1 %v1234_v22 }
  0x51   : > { %v844_v50 = vrot.slane %v843_v46, 4 }
  0x52   : > { %v946_v12 = vadd.f32 %v945_v10, %v944_v11 }
  0x53   : > { %v845_v54 = vadd.f32 %v844_v50, %v843_v46 }
  0x54   : > { %v947_v13 = vrot.slane %v946_v12, 4 }
  0x55   : > { %v846_v58 = vrot.slane %v845_v54, 2 }
  0x56   : > { %v948_v14 = vadd.f32 %v947_v13, %v946_v12 }
  0x57   : > { %v847_v62 = vadd.f32 %v846_v58, %v845_v54 }
  0x58   : > { %v949_v15 = vrot.slane %v948_v14, 2 }
  0x59   : > { %v848_v2 = vrot.slane %v847_v62, 1 }
  0x5a   : > { %v950_v16 = vadd.f32 %v949_v15, %v948_v14 }
  0x5b   : > { %v849_v6 = vadd.f32 %v848_v2, %v847_v62 }
  0x5c   : > { %v951_v17 = vrot.slane %v950_v16, 1 }
  0x5d   : > { %851 = vst.msk [vmem:[%s382_s23] sm:$0x1] %vm850_vm2, %v849_v6  ;;  %s376_s23 = scalar_lea.vmem %s1525_s6, %s1530_s10 }
  0x5e   : > { %v952_v18 = vadd.f32 %v951_v17, %v950_v16 }
  0x60   : > { %953 = vst.msk [vmem:[%s385_s26] sm:$0x1] %vm850_vm2, %v952_v18  ;;  %s379_s26 = scalar_lea.vmem %s1526_s7, %s1530_s10 }
  0xe7   : > { %v1171_v28 = vpop.f32.mrb[0].mxu0 }
  0xe8   : > { %v499_v29 = vadd.f32 %v1171_v28, %v1132_v27  ;;  %v493_v30 = vpop.f32.mrb[1].mxu0 }
  0xe9   : > { %v494_v31 = vadd.f32 %v1132_v27, %v493_v30 }
  0xea   : > { %534 = vst.msk [vmem:[%s1467_s21 + $0x8] sm:$0xff] %vm532_vm4, %v499_v29  ;;  %v542_v32 = vsel %vm532_vm4, %v499_v29, 0.0  ;;  %v642_v33 = vmul.f32 %v499_v29, %v499_v29 }
  0xeb   : > { %533 = vst.msk [vmem:[%s1467_s21] sm:$0xff] %vm532_vm4, %v494_v31  ;;  %v541_v34 = vsel %vm532_vm4, %v494_v31, 0.0  ;;  %v641_v35 = vmul.f32 %v494_v31, %v494_v31  ;;  %v1174_v36 = vpop.f32.mrb[2].mxu0 }
  0xec   : > { %v650_v37 = vsel %vm532_vm4, %v642_v33, 0.0  ;;  %v543_v39 = vadd.f32 %v542_v32, %v541_v34  ;;  %v509_v38 = vadd.f32 %v1174_v36, %v1132_v27  ;;  %v503_v40 = vpop.f32.mrb[3].mxu0 }
  0xed   : > { %v649_v41 = vsel %vm532_vm4, %v641_v35, 0.0  ;;  %v504_v42 = vadd.f32 %v1132_v27, %v503_v40 }
  0xee   : > { %v651_v43 = vadd.f32 %v650_v37, %v649_v41  ;;  %536 = vst.msk [vmem:[%s1467_s21 + $0x18] sm:$0xff] %vm532_vm4, %v509_v38  ;;  %v644_v44 = vmul.f32 %v509_v38, %v509_v38  ;;  %v546_v51 = vsel %vm532_vm4, %v509_v38, 0.0 }
  0xef   : > { %535 = vst.msk [vmem:[%s1467_s21 + $0x10] sm:$0xff] %vm532_vm4, %v504_v42  ;;  %v544_v45 = vsel %vm532_vm4, %v504_v42, 0.0  ;;  %v643_v46 = vmul.f32 %v504_v42, %v504_v42  ;;  %v1177_v47 = vpop.f32.mrb[4].mxu0 }
  0xf0   : > { %v545_v48 = vadd.f32 %v544_v45, %v543_v39  ;;  %v519_v49 = vadd.f32 %v1177_v47, %v1132_v27  ;;  %v513_v50 = vpop.f32.mrb[5].mxu0  ;;  %v654_v56 = vsel %vm532_vm4, %v644_v44, 0.0 }
  0xf1   : > { %v652_v52 = vsel %vm532_vm4, %v643_v46, 0.0  ;;  %v514_v53 = vadd.f32 %v1132_v27, %v513_v50 }
  0xf2   : > { %v653_v54 = vadd.f32 %v652_v52, %v651_v43  ;;  %538 = vst.msk [vmem:[%s1467_s21 + $0x28] sm:$0xff] %vm532_vm4, %v519_v49  ;;  %v547_v55 = vadd.f32 %v546_v51, %v545_v48  ;;  %v646_v57 = vmul.f32 %v519_v49, %v519_v49  ;;  %v550_v1 = vsel %vm532_vm4, %v519_v49, 0.0 }
  0xf3   : > { %537 = vst.msk [vmem:[%s1467_s21 + $0x20] sm:$0xff] %vm532_vm4, %v514_v53  ;;  %v548_v58 = vsel %vm532_vm4, %v514_v53, 0.0  ;;  %v645_v59 = vmul.f32 %v514_v53, %v514_v53  ;;  %v1180_v60 = vpop.f32.mrb[6].mxu0 }
  0xf4   : > { %v549_v61 = vadd.f32 %v548_v58, %v547_v55  ;;  %v655_v62 = vadd.f32 %v654_v56, %v653_v54  ;;  %v529_v63 = vadd.f32 %v1180_v60, %v1132_v27  ;;  %v523_v0 = vpop.f32.mrb[7].mxu0  ;;  %v658_v6 = vsel %vm532_vm4, %v646_v57, 0.0 }
  0xf5   : > { %v656_v2 = vsel %vm532_vm4, %v645_v59, 0.0  ;;  %v524_v3 = vadd.f32 %v1132_v27, %v523_v0 }
  0xf6   : > { %v657_v4 = vadd.f32 %v656_v2, %v655_v62  ;;  %540 = vst.msk [vmem:[%s1467_s21 + $0x38] sm:$0xff] %vm532_vm4, %v529_v63  ;;  %v551_v5 = vadd.f32 %v550_v1, %v549_v61  ;;  %v648_v7 = vmul.f32 %v529_v63, %v529_v63  ;;  %v554_v12 = vsel %vm532_vm4, %v529_v63, 0.0 }
  0xf7   : > { %539 = vst.msk [vmem:[%s1467_s21 + $0x30] sm:$0xff] %vm532_vm4, %v524_v3  ;;  %v552_v8 = vsel %vm532_vm4, %v524_v3, 0.0  ;;  %v647_v9 = vmul.f32 %v524_v3, %v524_v3 }
  0xf8   : > { %v553_v10 = vadd.f32 %v552_v8, %v551_v5  ;;  %v659_v11 = vadd.f32 %v658_v6, %v657_v4  ;;  %v662_v16 = vsel %vm532_vm4, %v648_v7, 0.0 }
  0xf9   : > { %v660_v13 = vsel %vm532_vm4, %v647_v9, 0.0 }
  0xfa   : > { %v555_v14 = vadd.f32 %v554_v12, %v553_v10  ;;  %v661_v15 = vadd.f32 %v660_v13, %v659_v11 }
  0xfc   : > { %v556_v17 = vrot.slane %v555_v14, 4  ;;  %v663_v18 = vadd.f32 %v662_v16, %v661_v15 }
  0xfe   : > { %v557_v19 = vadd.f32 %v556_v17, %v555_v14  ;;  %v664_v20 = vrot.slane %v663_v18, 4 }
 0x100   : > { %v665_v23 = vadd.f32 %v664_v20, %v663_v18  ;;  %v558_v24 = vrot.slane %v557_v19, 2 }
 0x102   : > { %v666_v27 = vrot.slane %v665_v23, 2  ;;  %v559_v28 = vadd.f32 %v558_v24, %v557_v19 }
 0x104   : > { %v560_v29 = vrot.slane %v559_v28, 1  ;;  %v667_v31 = vadd.f32 %v666_v27, %v665_v23 }
 0x106   : > { %v561_v30 = vadd.f32 %v560_v29, %v559_v28  ;;  %v668_v32 = vrot.slane %v667_v31, 1 }
 0x108   : > { %1190 = vmatmul.mubr.msk.f32.vlgmr.msra.gmra.mrb[0].mxu1 %vm532_vm4, %v561_v30  ;;  %v669_v33 = vadd.f32 %v668_v32, %v667_v31 }
 0x109   : > { %1211 = vmatpush3.bf16.msra.mxu1 %v1442_v21  ;;  %1200 = vmatprep.mubr.msk.f32.mxu1 %vm1235_vm3, %v1236_v26 }
 0x10a   : > { %1212 = vmatprep.subr.bf16.mxu1 %v1234_v22 }
 0x10d   : > { %1214 = vmatpush3.bf16.msra.mxu1 %v1453_v25 }
 0x110   : > { %1201 = vmatmul.mubr.msk.f32.vlgmr.msra.gmra.mrb[2].mxu1 %vm532_vm4, %v669_v33 }
 0x1db   : > { %v635_v34 = vpop.f32.mrb[0].mxu1 }
 0x1dc   : > { %640 = vst.msk [vmem:[%s376_s23] sm:$0x1] %vm639_vm5, %v635_v34  ;;  %v1191_v35 = vpop.f32.mrb[1].mxu1 }
 0x1e3   : > { %v743_v21 = vpop.f32.mrb[2].mxu1 }
 0x1e4   : > { %747 = vst.msk [vmem:[%s379_s26] sm:$0x1] %vm639_vm5, %v743_v21  ;;  %v1202_v22 = vpop.f32.mrb[3].mxu1 }
 0x1e5 PF: > { %s20_s30 = sadd.s32 1, %s1232_s30  }
 0x1e6   : > { %p17_p4 = scmp.ge.s32.totalorder %s20_s30, 4  }
 0x1e8   :  { %19 = sbr.rel (!%p17_p4) target bundleno = 1 (0x1), region = 121 }

// kernel: decoder_block_forward.5
= control target key start
LH: loop header
LB: loop body
LE: loop exit
PB: predicated region body
PF: predicated region fallthrough
CT: control target
= control target key end

     0   :  { %s4948_s21 = smov 0   ;;  %s6428_s0 = inlined_call_operand.vmem [shape: f32[2,16,16,4], index: 0, kind: input, shape index: {}]   ;;  %s6429_s1 = inlined_call_operand.vmem [shape: f32[2,16,16,4], index: 1, kind: input, shape index: {}]   ;;  %s6430_s2 = inlined_call_operand.vmem [shape: f32[1,4], index: 2, kind: input, shape index: {}]   ;;  %s6431_s3 = inlined_call_operand.vmem [shape: f32[1,4], index: 3, kind: input, shape index: {}]   ;;  %s6432_s4 = inlined_call_operand.vmem [shape: f32[3,3,4,4], index: 4, kind: input, shape index: {}]   ;;  %s6433_s5 = inlined_call_operand.vmem [shape: f32[1,4], index: 5, kind: input, shape index: {}]   ;;  %s6434_s6 = inlined_call_operand.vmem [shape: f32[2,16,16,4], index: 6, kind: output, shape index: {}]  }
   0x1 LB: > { %s3558_s22 = sadd.s32 4294967295, %s4910_s21   ;;  %p3562_p0 = scmp.ge.s32.totalorder %s4910_s21, 1  ;;  %s4910_s21 = sphi %s4948_s21, %s16_s21  }
   0x2   : > { %p222_p1 = scmp.lt.s32.totalorder %s4910_s21, 3 }
   0x4   : > { %p223_p2 = pnand %p3562_p0, %p222_p1 }
   0x6   : > { %226 = sbr.rel (%p223_p2) target bundleno = 566 (0x236), region = 44 }
   0xd   : > { %vm796_vm0 = vcmask 1043456   ;;  %v4959_v0 = vld [vmem:[%s6432_s4 + $0x10] sm:$0xf]  ;;  %p4963_p3 = scmp.lt.s32.totalorder %s3558_s22, 1  ;;  %vm272_vm1 = vcmask 31744   ;;  %v4912_v1 = vmov 0.0  }
   0xe   : > { %4379 = vmatprep.subr.msk.mxu0 %vm796_vm0, %v4959_v0  ;;  %278 = vst.msk [vmem:[#allocation2 + $0x28] sm:$0xff] %vm272_vm1, %v4912_v1  ;;  %273 = vst.msk [vmem:[#allocation2] sm:$0xff] %vm272_vm1, %v4912_v1  ;;  %v3571_v2 = vld [vmem:[%s6432_s4 + $0xc] sm:$0xf]  ;;  %v5126_v3 = vld [vmem:[%s6432_s4] sm:$0xf] }
   0xf   : > { %274 = vst.msk [vmem:[#allocation2 + $0x8] sm:$0xff] %vm272_vm1, %v4912_v1  ;;  %275 = vst.msk [vmem:[#allocation2 + $0x10] sm:$0xff] %vm272_vm1, %v4912_v1  ;;  %4380 = vmatpush3.msk.msra.mxu0 %vm796_vm0, %v4959_v0  ;;  %s6582_s22 = smov (!%p4963_p3, %s3558_s22), 1  ;;  %4179 = vmatprep.subr.msk.mxu1 %vm796_vm0, %v3571_v2  ;;  %v5131_v4 = vld [vmem:[%s6432_s4 + $0x1c] sm:$0xf]  ;;  %vm640_vm2 = vcmask 1040384  }
  0x10   : > { %276 = vst.msk [vmem:[#allocation2 + $0x18] sm:$0xff] %vm272_vm1, %v4912_v1  ;;  %277 = vst.msk [vmem:[#allocation2 + $0x20] sm:$0xff] %vm272_vm1, %v4912_v1  ;;  %4180 = vmatpush3.msk.msra.mxu1 %vm796_vm0, %v3571_v2  ;;  %4429 = vmatprep.subr.msk.mxu0 %vm796_vm0, %v5131_v4  ;;  %s5136_s8 = sshll.u32 %s6582_s22, 8  ;;  %v5141_v5 = vld [vmem:[%s6430_s2] ss:$0 sm:$0xff]  ;;  %vm2405_vm3 = vcmask 1046528  }
  0x11   : > { %279 = vst.msk [vmem:[#allocation2 + $0x30] sm:$0xff] %vm272_vm1, %v4912_v1  ;;  %280 = vst.msk [vmem:[#allocation2 + $0x38] sm:$0xff] %vm272_vm1, %v4912_v1  ;;  %4229 = vmatprep.subr.msk.mxu1 %vm796_vm0, %v5126_v3  ;;  %s5149_s13 = scalar_lea.vmem %s6428_s0, %s5136_s8  ;;  %v5154_v6 = vld [vmem:[%s6431_s3] ss:$0 sm:$0xff]  ;;  %s6276_s7 = scalar_lea.vmem %s6429_s1, %s5136_s8 }
  0x12   : > { %281 = vst.msk [vmem:[#allocation2 + $0x40] sm:$0xff] %vm272_vm1, %v4912_v1  ;;  %282 = vst.msk [vmem:[#allocation2 + $0x48] sm:$0xff] %vm272_vm1, %v4912_v1  ;;  %v345_v7 = vld [vmem:[%s5149_s13] sm:$0xff]  ;;  %v346_v8 = vld [vmem:[%s5149_s13 + $0x8] sm:$0xff] }
  0x13   : > { %283 = vst.msk [vmem:[#allocation2 + $0x50] sm:$0xff] %vm272_vm1, %v4912_v1  ;;  %284 = vst.msk [vmem:[#allocation2 + $0x58] sm:$0xff] %vm272_vm1, %v4912_v1  ;;  %v347_v9 = vld [vmem:[%s5149_s13 + $0x10] sm:$0xff]  ;;  %v384_v10 = vmul.f32 %v5141_v5, %v345_v7  ;;  %v385_v11 = vmul.f32 %v5141_v5, %v346_v8  ;;  %v348_v13 = vld [vmem:[%s5149_s13 + $0x18] sm:$0xff] }
  0x14   : > { %285 = vst.msk [vmem:[#allocation2 + $0x60] sm:$0xff] %vm272_vm1, %v4912_v1  ;;  %286 = vst.msk [vmem:[#allocation2 + $0x68] sm:$0xff] %vm272_vm1, %v4912_v1  ;;  %v386_v12 = vmul.f32 %v5141_v5, %v347_v9  ;;  %v349_v14 = vld [vmem:[%s5149_s13 + $0x20] sm:$0xff]  ;;  %v350_v15 = vld [vmem:[%s5149_s13 + $0x28] sm:$0xff]  ;;  %v387_v16 = vmul.f32 %v5141_v5, %v348_v13 }
  0x15   : > { %287 = vst.msk [vmem:[#allocation2 + $0x70] sm:$0xff] %vm272_vm1, %v4912_v1  ;;  %288 = vst.msk [vmem:[#allocation2 + $0x78] sm:$0xff] %vm272_vm1, %v4912_v1  ;;  %v388_v17 = vmul.f32 %v5141_v5, %v349_v14  ;;  %v389_v18 = vmul.f32 %v5141_v5, %v350_v15  ;;  %v423_v19 = vadd.f32 %v5154_v6, %v384_v10  ;;  %v351_v22 = vld [vmem:[%s5149_s13 + $0x30] sm:$0xff]  ;;  %v352_v26 = vld [vmem:[%s5149_s13 + $0x38] sm:$0xff] }
  0x16   : > { %289 = vst.msk [vmem:[#allocation2 + $0x80] sm:$0xff] %vm272_vm1, %v4912_v1  ;;  %290 = vst.msk [vmem:[#allocation2 + $0x88] sm:$0xff] %vm272_vm1, %v4912_v1  ;;  %v424_v20 = vadd.f32 %v5154_v6, %v385_v11  ;;  %v425_v21 = vadd.f32 %v5154_v6, %v386_v12  ;;  %v426_v23 = vadd.f32 %v5154_v6, %v387_v16  ;;  %v353_v27 = vld [vmem:[%s5149_s13 + $0x40] sm:$0xff]  ;;  %v354_v28 = vld [vmem:[%s5149_s13 + $0x48] sm:$0xff] }
  0x17   : > { %291 = vst.msk [vmem:[#allocation2 + $0x90] sm:$0xff] %vm272_vm1, %v4912_v1  ;;  %292 = vst.msk [vmem:[#allocation2 + $0x98] sm:$0xff] %vm272_vm1, %v4912_v1  ;;  %v427_v24 = vadd.f32 %v5154_v6, %v388_v17  ;;  %v428_v25 = vadd.f32 %v5154_v6, %v389_v18  ;;  %v455_v29 = vmax.f32 %v423_v19, 0.0  ;;  %v355_v32 = vld [vmem:[%s5149_s13 + $0x50] sm:$0xff]  ;;  %v356_v33 = vld [vmem:[%s5149_s13 + $0x58] sm:$0xff]  ;;  %v390_v37 = vmul.f32 %v5141_v5, %v351_v22 }
  0x18   : > { %293 = vst.msk [vmem:[#allocation2 + $0xa0] sm:$0xff] %vm272_vm1, %v4912_v1  ;;  %294 = vst.msk [vmem:[#allocation2 + $0xa8] sm:$0xff] %vm272_vm1, %v4912_v1  ;;  %v456_v30 = vmax.f32 %v424_v20, 0.0  ;;  %v457_v31 = vmax.f32 %v425_v21, 0.0  ;;  %v458_v34 = vmax.f32 %v426_v23, 0.0  ;;  %v391_v38 = vmul.f32 %v5141_v5, %v352_v26  ;;  %v357_v41 = vld [vmem:[%s5149_s13 + $0x60] sm:$0xff] }
  0x19   : > { %295 = vst.msk [vmem:[#allocation2 + $0xb0] sm:$0xff] %vm272_vm1, %v4912_v1  ;;  %296 = vst.msk [vmem:[#allocation2 + $0xb8] sm:$0xff] %vm272_vm1, %v4912_v1  ;;  %v459_v35 = vmax.f32 %v427_v24, 0.0  ;;  %v460_v36 = vmax.f32 %v428_v25, 0.0  ;;  %v392_v39 = vmul.f32 %v5141_v5, %v353_v27  ;;  %v393_v40 = vmul.f32 %v5141_v5, %v354_v28  ;;  %v358_v45 = vld [vmem:[%s5149_s13 + $0x68] sm:$0xff]  ;;  %v524_v49 = vld [vmem:[#allocation2 + $0x20] sm:$0xff] }
  0x1a   : > { %297 = vst.msk [vmem:[#allocation2 + $0xc0] sm:$0xff] %vm272_vm1, %v4912_v1  ;;  %298 = vst.msk [vmem:[#allocation2 + $0xc8] sm:$0xff] %vm272_vm1, %v4912_v1  ;;  %v429_v42 = vadd.f32 %v5154_v6, %v390_v37  ;;  %v394_v43 = vmul.f32 %v5141_v5, %v355_v32  ;;  %v395_v44 = vmul.f32 %v5141_v5, %v356_v33  ;;  %v359_v54 = vld [vmem:[%s5149_s13 + $0x70] sm:$0xff]  ;;  %v528_v55 = vld [vmem:[#allocation2 + $0x40] sm:$0xff]  ;;  %v646_v2 = vrot.slane %v524_v49, 7 }
  0x1b   : > { %299 = vst.msk [vmem:[#allocation2 + $0xd0] sm:$0xff] %vm272_vm1, %v4912_v1  ;;  %300 = vst.msk [vmem:[#allocation2 + $0xd8] sm:$0xff] %vm272_vm1, %v4912_v1  ;;  %v430_v46 = vadd.f32 %v5154_v6, %v391_v38  ;;  %v431_v47 = vadd.f32 %v5154_v6, %v392_v39  ;;  %v432_v48 = vadd.f32 %v5154_v6, %v393_v40  ;;  %v360_v60 = vld [vmem:[%s5149_s13 + $0x78] sm:$0xff]  ;;  %v361_v0 = vld [vmem:[%s5149_s13 + $0x80] sm:$0xff]  ;;  %v651_v13 = vrot.slane %v528_v55, 7 }
  0x1c   : > { %301 = vst.msk [vmem:[#allocation2 + $0xe0] sm:$0xff] %vm272_vm1, %v4912_v1  ;;  %302 = vst.msk [vmem:[#allocation2 + $0xe8] sm:$0xff] %vm272_vm1, %v4912_v1  ;;  %v461_v50 = vmax.f32 %v429_v42, 0.0  ;;  %v433_v51 = vadd.f32 %v5154_v6, %v394_v43  ;;  %v434_v52 = vadd.f32 %v5154_v6, %v395_v44  ;;  %v396_v53 = vmul.f32 %v5141_v5, %v357_v41  ;;  %v532_v7 = vld [vmem:[#allocation2 + $0x60] sm:$0xff]  ;;  %v5240_v26 = vld [vmem:[%s6432_s4 + $0x8] sm:$0xf] }
  0x1d   : > { %303 = vst.msk [vmem:[#allocation2 + $0xf0] sm:$0xff] %vm272_vm1, %v4912_v1  ;;  %304 = vst.msk [vmem:[#allocation2 + $0xf8] sm:$0xff] %vm272_vm1, %v4912_v1  ;;  %v462_v56 = vmax.f32 %v430_v46, 0.0  ;;  %v463_v57 = vmax.f32 %v431_v47, 0.0  ;;  %v464_v58 = vmax.f32 %v432_v48, 0.0  ;;  %v397_v59 = vmul.f32 %v5141_v5, %v358_v45  ;;  %v363_v32 = vld [vmem:[%s5149_s13 + $0x90] sm:$0xff] }
  0x1e   : > { %305 = vst.msk [vmem:[#allocation2 + $0x100] sm:$0xff] %vm272_vm1, %v4912_v1  ;;  %306 = vst.msk [vmem:[#allocation2 + $0x108] sm:$0xff] %vm272_vm1, %v4912_v1  ;;  %v465_v61 = vmax.f32 %v433_v51, 0.0  ;;  %v466_v62 = vmax.f32 %v434_v52, 0.0  ;;  %v435_v63 = vadd.f32 %v5154_v6, %v396_v53  ;;  %v398_v9 = vmul.f32 %v5141_v5, %v359_v54  ;;  %v5275_v39 = vld [vmem:[%s6432_s4 + $0x18] sm:$0xf] }
  0x1f   : > { %307 = vst.msk [vmem:[#allocation2 + $0x110] sm:$0xff] %vm272_vm1, %v4912_v1  ;;  %308 = vst.msk [vmem:[#allocation2 + $0x118] sm:$0xff] %vm272_vm1, %v4912_v1  ;;  %v436_v8 = vadd.f32 %v5154_v6, %v397_v59  ;;  %v399_v15 = vmul.f32 %v5141_v5, %v360_v60  ;;  %v400_v20 = vmul.f32 %v5141_v5, %v361_v0  ;;  %v656_v24 = vrot.slane %v532_v7, 7  ;;  %v5285_v42 = vld [vmem:[#allocation2 + $0xa0] sm:$0xff]  ;;  %v366_v53 = vld [vmem:[%s5149_s13 + $0xa8] sm:$0xff] }
  0x20   : > { %309 = vst.msk [vmem:[#allocation2 + $0x120] sm:$0xff] %vm272_vm1, %v4912_v1  ;;  %310 = vst.msk [vmem:[#allocation2 + $0x128] sm:$0xff] %vm272_vm1, %v4912_v1  ;;  %v467_v14 = vmax.f32 %v435_v63, 0.0  ;;  %v402_v44 = vmul.f32 %v5141_v5, %v363_v32  ;;  %v365_v52 = vld [vmem:[%s5149_s13 + $0xa0] sm:$0xff]  ;;  %v666_v55 = vrot.slane %v5285_v42, 7  ;;  %v368_v0 = vld [vmem:[%s5149_s13 + $0xb8] sm:$0xff] }
  0x21   : > { %311 = vst.msk [vmem:[#allocation2 + $0x130] sm:$0xff] %vm272_vm1, %v4912_v1  ;;  %312 = vst.msk [vmem:[#allocation2 + $0x138] sm:$0xff] %vm272_vm1, %v4912_v1  ;;  %v468_v25 = vmax.f32 %v436_v8, 0.0  ;;  %v439_v37 = vadd.f32 %v5154_v6, %v400_v20  ;;  %v404_v7 = vmul.f32 %v5141_v5, %v365_v52  ;;  %v405_v8 = vmul.f32 %v5141_v5, %v366_v53  ;;  %v371_v42 = vld [vmem:[%s5149_s13 + $0xd0] sm:$0xff] }
  0x22   : > { %313 = vst.msk [vmem:[#allocation2 + $0x140] sm:$0xff] %vm272_vm1, %v4912_v1  ;;  %314 = vst.msk [vmem:[#allocation2 + $0x148] sm:$0xff] %vm272_vm1, %v4912_v1 }
  0x23   : > { %315 = vst.msk [vmem:[#allocation2 + $0x150] sm:$0xff] %vm272_vm1, %v4912_v1  ;;  %316 = vst.msk [vmem:[#allocation2 + $0x158] sm:$0xff] %vm272_vm1, %v4912_v1  ;;  %v471_v49 = vmax.f32 %v439_v37, 0.0 }
  0x24   : > { %317 = vst.msk [vmem:[#allocation2 + $0x160] sm:$0xff] %vm272_vm1, %v4912_v1  ;;  %318 = vst.msk [vmem:[#allocation2 + $0x168] sm:$0xff] %vm272_vm1, %v4912_v1 }
  0x25   : > { %319 = vst.msk [vmem:[#allocation2 + $0x170] sm:$0xff] %vm272_vm1, %v4912_v1  ;;  %320 = vst.msk [vmem:[#allocation2 + $0x178] sm:$0xff] %vm272_vm1, %v4912_v1 }
  0x26   : > { %321 = vst.msk [vmem:[#allocation2 + $0x180] sm:$0xff] %vm272_vm1, %v4912_v1  ;;  %322 = vst.msk [vmem:[#allocation2 + $0x188] sm:$0xff] %vm272_vm1, %v4912_v1 }
  0x27   : > { %323 = vst.msk [vmem:[#allocation2 + $0x190] sm:$0xff] %vm272_vm1, %v4912_v1  ;;  %324 = vst.msk [vmem:[#allocation2 + $0x198] sm:$0xff] %vm272_vm1, %v4912_v1 }
  0x28   : > { %325 = vst.msk [vmem:[#allocation2 + $0x1a0] sm:$0xff] %vm272_vm1, %v4912_v1  ;;  %326 = vst.msk [vmem:[#allocation2 + $0x1a8] sm:$0xff] %vm272_vm1, %v4912_v1 }
  0x29   : > { %327 = vst.msk [vmem:[#allocation2 + $0x1b0] sm:$0xff] %vm272_vm1, %v4912_v1  ;;  %328 = vst.msk [vmem:[#allocation2 + $0x1b8] sm:$0xff] %vm272_vm1, %v4912_v1 }
  0x2a   : > { %329 = vst.msk [vmem:[#allocation2 + $0x1c0] sm:$0xff] %vm272_vm1, %v4912_v1  ;;  %330 = vst.msk [vmem:[#allocation2 + $0x1c8] sm:$0xff] %vm272_vm1, %v4912_v1 }
  0x2b   : > { %331 = vst.msk [vmem:[#allocation2 + $0x1d0] sm:$0xff] %vm272_vm1, %v4912_v1  ;;  %332 = vst.msk [vmem:[#allocation2 + $0x1d8] sm:$0xff] %vm272_vm1, %v4912_v1 }
  0x2c   : > { %333 = vst.msk [vmem:[#allocation2 + $0x1e0] sm:$0xff] %vm272_vm1, %v4912_v1  ;;  %334 = vst.msk [vmem:[#allocation2 + $0x1e8] sm:$0xff] %vm272_vm1, %v4912_v1 }
  0x2d   : > { %335 = vst.msk [vmem:[#allocation2 + $0x1f0] sm:$0xff] %vm272_vm1, %v4912_v1  ;;  %336 = vst.msk [vmem:[#allocation2 + $0x1f8] sm:$0xff] %vm272_vm1, %v4912_v1 }
  0x2e   : > { %337 = vst.msk [vmem:[#allocation2 + $0x200] sm:$0xff] %vm272_vm1, %v4912_v1  ;;  %338 = vst.msk [vmem:[#allocation2 + $0x208] sm:$0xff] %vm272_vm1, %v4912_v1 }
  0x2f   : > { %339 = vst.msk [vmem:[#allocation2 + $0x210] sm:$0xff] %vm272_vm1, %v4912_v1  ;;  %340 = vst.msk [vmem:[#allocation2 + $0x218] sm:$0xff] %vm272_vm1, %v4912_v1 }
  0x30   : > { %341 = vst.msk [vmem:[#allocation2 + $0x220] sm:$0xff] %vm272_vm1, %v4912_v1  ;;  %342 = vst.msk [vmem:[#allocation2 + $0x228] sm:$0xff] %vm272_vm1, %v4912_v1 }
  0x31   : > { %343 = vst.msk [vmem:[#allocation2 + $0x230] sm:$0xff] %vm272_vm1, %v4912_v1  ;;  %344 = vst.msk [vmem:[#allocation2 + $0x238] sm:$0xff] %vm272_vm1, %v4912_v1  ;;  %v362_v1 = vld [vmem:[%s5149_s13 + $0x88] sm:$0xff] }
  0x32   : > { %488 = vst.msk [vmem:[#allocation2 + $0x28] sm:$0xff] %vm272_vm1, %v455_v29  ;;  %489 = vst.msk [vmem:[#allocation2 + $0x30] sm:$0xff] %vm272_vm1, %v456_v30  ;;  %v401_v21 = vmul.f32 %v5141_v5, %v362_v1 }
  0x33   : > { %490 = vst.msk [vmem:[#allocation2 + $0x48] sm:$0xff] %vm272_vm1, %v457_v31  ;;  %491 = vst.msk [vmem:[#allocation2 + $0x50] sm:$0xff] %vm272_vm1, %v458_v34  ;;  %v437_v31 = vadd.f32 %v5154_v6, %v398_v9  ;;  %v536_v34 = vld [vmem:[#allocation2 + $0x80] sm:$0xff] }
  0x34   : > { %492 = vst.msk [vmem:[#allocation2 + $0x68] sm:$0xff] %vm272_vm1, %v459_v35  ;;  %493 = vst.msk [vmem:[#allocation2 + $0x70] sm:$0xff] %vm272_vm1, %v460_v36  ;;  %v438_v35 = vadd.f32 %v5154_v6, %v399_v15  ;;  %v440_v38 = vadd.f32 %v5154_v6, %v401_v21  ;;  %v661_v46 = vrot.slane %v536_v34, 7  ;;  %v369_v9 = vld [vmem:[%s5149_s13 + $0xc0] sm:$0xff]  ;;  %v443_v21 = vadd.f32 %v5154_v6, %v404_v7  ;;  %v375_v7 = vld [vmem:[%s5149_s13 + $0xf0] sm:$0xff] }
  0x35   : > { %494 = vst.msk [vmem:[#allocation2 + $0x88] sm:$0xff] %vm272_vm1, %v461_v50  ;;  %495 = vst.msk [vmem:[#allocation2 + $0x90] sm:$0xff] %vm272_vm1, %v462_v56  ;;  %v469_v36 = vmax.f32 %v437_v31, 0.0  ;;  %v364_v50 = vld [vmem:[%s5149_s13 + $0x98] sm:$0xff]  ;;  %v5312_v56 = vld [vmem:[#allocation2 + $0xc0] sm:$0xff]  ;;  %v408_v34 = vmul.f32 %v5141_v5, %v369_v9 }
  0x36   : > { %496 = vst.msk [vmem:[#allocation2 + $0xa8] sm:$0xff] %vm272_vm1, %v463_v57  ;;  %497 = vst.msk [vmem:[#allocation2 + $0xb0] sm:$0xff] %vm272_vm1, %v464_v58  ;;  %v470_v43 = vmax.f32 %v438_v35, 0.0  ;;  %v472_v51 = vmax.f32 %v440_v38, 0.0  ;;  %v441_v57 = vadd.f32 %v5154_v6, %v402_v44  ;;  %v367_v58 = vld [vmem:[%s5149_s13 + $0xb0] sm:$0xff]  ;;  %v403_v63 = vmul.f32 %v5141_v5, %v364_v50  ;;  %v370_v35 = vld [vmem:[%s5149_s13 + $0xc8] sm:$0xff] }
  0x37   : > { %498 = vst.msk [vmem:[#allocation2 + $0xc8] sm:$0xff] %vm272_vm1, %v465_v61  ;;  %499 = vst.msk [vmem:[#allocation2 + $0xd0] sm:$0xff] %vm272_vm1, %v466_v62  ;;  %v475_v37 = vmax.f32 %v443_v21, 0.0  ;;  %v409_v53 = vmul.f32 %v5141_v5, %v370_v35 }
  0x38   : > { %500 = vst.msk [vmem:[#allocation2 + $0xe8] sm:$0xff] %vm272_vm1, %v467_v14  ;;  %501 = vst.msk [vmem:[#allocation2 + $0xf0] sm:$0xff] %vm272_vm1, %v468_v25  ;;  %v671_v14 = vrot.slane %v5312_v56, 7  ;;  %v442_v15 = vadd.f32 %v5154_v6, %v403_v63 }
  0x39   : > { %v5213_v10 = vld [vmem:[#allocation2 + $0x28] sm:$0xff]  ;;  %v5215_v11 = vld [vmem:[#allocation2 + $0x30] sm:$0xff]  ;;  %502 = vst.msk [vmem:[#allocation2 + $0x108] sm:$0xff] %vm272_vm1, %v469_v36  ;;  %503 = vst.msk [vmem:[#allocation2 + $0x110] sm:$0xff] %vm272_vm1, %v470_v43 }
  0x3a   : > { %v5217_v12 = vld [vmem:[#allocation2 + $0x48] sm:$0xff]  ;;  %4381 = vmatprep.mubr.msk.f32.mxu0 %vm272_vm1, %v5213_v10  ;;  %v649_v16 = vrot.slane %v5215_v11, 7  ;;  %v647_v17 = vrot.slane %v5213_v10, 7  ;;  %v5226_v18 = vld [vmem:[#allocation2 + $0x50] sm:$0xff]  ;;  %504 = vst.msk [vmem:[#allocation2 + $0x128] sm:$0xff] %vm272_vm1, %v471_v49  ;;  %505 = vst.msk [vmem:[#allocation2 + $0x130] sm:$0xff] %vm272_vm1, %v472_v51 }
  0x3b   : > { %v5228_v19 = vld [vmem:[#allocation2 + $0x68] sm:$0xff]  ;;  %4382 = vmatmul.mubr.msk.f32.vlgmr.msra.gmra.mrb[0].mxu0 %vm272_vm1, %v5215_v11  ;;  %v652_v22 = vrot.slane %v5217_v12, 7  ;;  %v654_v23 = vrot.slane %v5226_v18, 7  ;;  %v5252_v29 = vld [vmem:[#allocation2 + $0x70] sm:$0xff]  ;;  %v474_v31 = vmax.f32 %v442_v15, 0.0  ;;  %v5378_v51 = vld [vmem:[#allocation2 + $0x100] sm:$0xff] }
  0x3c   : > { %v5243_v27 = vsel %vm640_vm2, %v646_v2, %v647_v17  ;;  %v5246_v28 = vsel %vm640_vm2, %v647_v17, %v649_v16  ;;  %4384 = vmatprep.mubr.msk.f32.mxu0 %vm272_vm1, %v5217_v12  ;;  %4430 = vmatpush3.msk.msra.mxu0 %vm796_vm0, %v5131_v4  ;;  %v657_v30 = vrot.slane %v5228_v19, 7  ;;  %v5266_v4 = vld [vmem:[#allocation2 + $0x88] sm:$0xff]  ;;  %v659_v41 = vrot.slane %v5252_v29, 7  ;;  %v5295_v45 = vld [vmem:[#allocation2 + $0x90] sm:$0xff]  ;;  %508 = vst.msk [vmem:[#allocation2 + $0x168] sm:$0xff] %vm272_vm1, %v475_v37 }
  0x3d   : > { %4181 = vmatprep.mubr.msk.f32.mxu1 %vm272_vm1, %v5243_v27  ;;  %v5260_v33 = vsel %vm640_vm2, %v651_v13, %v652_v22  ;;  %4479 = vmatprep.subr.msk.mxu0 %vm796_vm0, %v5240_v26  ;;  %v5282_v40 = vsel %vm640_vm2, %v652_v22, %v654_v23  ;;  %6499 = vst [vmem:[#allocation3_spill] sm:$0xff] %v5295_v45  ;;  %v662_v47 = vrot.slane %v5266_v4, 7  ;;  %v5298_v48 = vld [vmem:[#allocation2 + $0xa8] sm:$0xff]  ;;  %v5309_v54 = vld [vmem:[#allocation2 + $0xb0] sm:$0xff]  ;;  %v664_v60 = vrot.slane %v5295_v45, 7 }
  0x3e   : > { %4182 = vmatmul.mubr.msk.f32.vlgmr.msra.gmra.mrb[0].mxu1 %vm272_vm1, %v5246_v28  ;;  %6500 = vst [vmem:[#allocation4_spill] sm:$0xff] %v5298_v48  ;;  %6501 = vst [vmem:[#allocation5_spill] sm:$0xff] %v5309_v54  ;;  %v5322_v59 = vsel %vm640_vm2, %v657_v30, %v659_v41  ;;  %v667_v61 = vrot.slane %v5298_v48, 7  ;;  %v5326_v62 = vld [vmem:[#allocation2 + $0xc8] sm:$0xff]  ;;  %v473_v2 = vmax.f32 %v441_v57, 0.0  ;;  %v669_v13 = vrot.slane %v5309_v54, 7 }
  0x3f   : > { %4230 = vmatpush3.msk.msra.mxu1 %vm796_vm0, %v5126_v3  ;;  %4385 = vmatmul.mubr.msk.f32.gmra.mrb[2].mxu0 %vm272_vm1, %v5226_v18  ;;  %v5293_v3 = vsel %vm640_vm2, %v656_v24, %v657_v30  ;;  %6502 = vst [vmem:[#allocation6_spill] sm:$0xff] %v5326_v62  ;;  %v5334_v1 = vsel %vm640_vm2, %v661_v46, %v662_v47  ;;  %v5345_v17 = vld [vmem:[#allocation2 + $0xd0] sm:$0xff]  ;;  %v672_v20 = vrot.slane %v5326_v62, 7  ;;  %v5359_v25 = vld [vmem:[#allocation2 + $0xe8] sm:$0xff]  ;;  %v548_v30 = vld [vmem:[#allocation2 + $0xe0] sm:$0xff] }
  0x40   : > { %4184 = vmatprep.mubr.msk.f32.mxu1 %vm272_vm1, %v5260_v33  ;;  %4387 = vmatprep.mubr.msk.f32.mxu0 %vm272_vm1, %v5228_v19  ;;  %v406_v16 = vmul.f32 %v5141_v5, %v367_v58  ;;  %6503 = vst [vmem:[#allocation7_spill] sm:$0xff] %v5345_v17  ;;  %506 = vst.msk [vmem:[#allocation2 + $0x148] sm:$0xff] %vm272_vm1, %v473_v2  ;;  %v444_v22 = vadd.f32 %v5154_v6, %v405_v8  ;;  %v674_v43 = vrot.slane %v5345_v17, 7  ;;  %v5408_v9 = vld [vmem:[#allocation2 + $0x108] sm:$0xff]  ;;  %v5431_v35 = vld [vmem:[#allocation2 + $0x110] sm:$0xff] }
  0x41   : > { %4279 = vmatprep.subr.msk.mxu1 %vm796_vm0, %v5275_v39  ;;  %v407_v23 = vmul.f32 %v5141_v5, %v368_v0  ;;  %v5357_v24 = vsel %vm640_vm2, %v662_v47, %v664_v60  ;;  %6504 = vst [vmem:[#allocation8_spill] sm:$0xff] %v5359_v25  ;;  %v5367_v36 = vsel %vm640_vm2, %v666_v55, %v667_v61  ;;  %507 = vst.msk [vmem:[#allocation2 + $0x150] sm:$0xff] %vm272_vm1, %v474_v31  ;;  %v372_v47 = vld [vmem:[%s5149_s13 + $0xd8] sm:$0xff]  ;;  %v373_v55 = vld [vmem:[%s5149_s13 + $0xe0] sm:$0xff] }
  0x42   : > { %4185 = vmatmul.mubr.msk.f32.gmra.mrb[2].mxu1 %vm272_vm1, %v5282_v40  ;;  %v445_v32 = vadd.f32 %v5154_v6, %v406_v16  ;;  %v476_v38 = vmax.f32 %v444_v22, 0.0  ;;  %v447_v46 = vadd.f32 %v5154_v6, %v408_v34  ;;  %v676_v49 = vrot.slane %v548_v30, 7  ;;  %v374_v60 = vld [vmem:[%s5149_s13 + $0xe8] sm:$0xff]  ;;  %v5399_v0 = vld [vmem:[#allocation2 + $0xf0] sm:$0xff]  ;;  %6506 = vst [vmem:[#allocation10_spill] sm:$0xff] %v5408_v9  ;;  %v376_v16 = vld [vmem:[%s5149_s13 + $0xf8] sm:$0xff]  ;;  %s6292_s13 = scalar_lea.vmem %s6434_s6, %s5136_s8 }
  0x43   : > { %4388 = vmatmul.mubr.msk.f32.gmra.mrb[4].mxu0 %vm272_vm1, %v5252_v29  ;;  %4187 = vmatprep.mubr.msk.f32.mxu1 %vm272_vm1, %v5293_v3  ;;  %v446_v41 = vadd.f32 %v5154_v6, %v407_v23  ;;  %v677_v50 = vrot.slane %v5359_v25, 7  ;;  %v5389_v56 = vsel %vm640_vm2, %v667_v61, %v669_v13  ;;  %v410_v58 = vmul.f32 %v5141_v5, %v371_v42 }
  0x44   : > { %4390 = vmatprep.mubr.msk.f32.mxu0 %vm272_vm1, %v5266_v4  ;;  %v477_v44 = vmax.f32 %v445_v32, 0.0  ;;  %509 = vst.msk [vmem:[#allocation2 + $0x170] sm:$0xff] %vm272_vm1, %v476_v38  ;;  %v479_v57 = vmax.f32 %v447_v46, 0.0  ;;  %v5397_v63 = vsel %vm640_vm2, %v671_v14, %v672_v20  ;;  %6505 = vst [vmem:[#allocation9_spill] sm:$0xff] %v5399_v0  ;;  %v448_v61 = vadd.f32 %v5154_v6, %v409_v53 }
  0x45   : > { %v478_v52 = vmax.f32 %v446_v41, 0.0  ;;  %v411_v2 = vmul.f32 %v5141_v5, %v372_v47  ;;  %v5406_v8 = vsel %vm640_vm2, %v672_v20, %v674_v43  ;;  %v681_v13 = vrot.slane %v5378_v51, 7  ;;  %6507 = vst [vmem:[#allocation11_spill] sm:$0xff] %v5431_v35  ;;  %v556_v43 = vld [vmem:[#allocation2 + $0x120] sm:$0xff] }
  0x46   : > { %4188 = vmatmul.mubr.msk.f32.gmra.mrb[4].mxu1 %vm272_vm1, %v5322_v59  ;;  %510 = vst.msk [vmem:[#allocation2 + $0x188] sm:$0xff] %vm272_vm1, %v477_v44  ;;  %512 = vst.msk [vmem:[#allocation2 + $0x1a8] sm:$0xff] %vm272_vm1, %v479_v57  ;;  %v449_v14 = vadd.f32 %v5154_v6, %v410_v58  ;;  %v412_v15 = vmul.f32 %v5141_v5, %v373_v55  ;;  %v5418_v21 = vsel %vm640_vm2, %v676_v49, %v677_v50  ;;  %v5437_v44 = vld [vmem:[#allocation2 + $0x128] sm:$0xff]  ;;  %v5460_v58 = vld [vmem:[#allocation2 + $0x130] sm:$0xff] }
  0x47   : > { %4391 = vmatmul.mubr.msk.f32.gmra.mrb[6].mxu0 %vm272_vm1, %v5295_v45  ;;  %4190 = vmatprep.mubr.msk.f32.mxu1 %vm272_vm1, %v5334_v1  ;;  %511 = vst.msk [vmem:[#allocation2 + $0x190] sm:$0xff] %vm272_vm1, %v478_v52  ;;  %v480_v22 = vmax.f32 %v448_v61, 0.0  ;;  %v450_v20 = vadd.f32 %v5154_v6, %v411_v2  ;;  %v413_v23 = vmul.f32 %v5141_v5, %v374_v60  ;;  %v679_v30 = vrot.slane %v5399_v0, 7  ;;  %v560_v60 = vld [vmem:[#allocation2 + $0x140] sm:$0xff]  ;;  %v5463_v61 = vld [vmem:[#allocation2 + $0x148] sm:$0xff] }
  0x48   : > { %4393 = vmatprep.mubr.msk.f32.mxu0 %vm272_vm1, %v5298_v48  ;;  %v481_v31 = vmax.f32 %v449_v14, 0.0  ;;  %v451_v32 = vadd.f32 %v5154_v6, %v412_v15  ;;  %v414_v34 = vmul.f32 %v5141_v5, %v375_v7  ;;  %v682_v37 = vrot.slane %v5408_v9, 7  ;;  %6508 = vst [vmem:[#allocation12_spill] sm:$0xff] %v5437_v44  ;;  %6509 = vst [vmem:[#allocation13_spill] sm:$0xff] %v5460_v58 }
  0x49   : > { %513 = vst.msk [vmem:[#allocation2 + $0x1b0] sm:$0xff] %vm272_vm1, %v480_v22  ;;  %v482_v38 = vmax.f32 %v450_v20, 0.0  ;;  %v452_v41 = vadd.f32 %v5154_v6, %v413_v23  ;;  %v415_v42 = vmul.f32 %v5141_v5, %v376_v16  ;;  %v5450_v5 = vsel %vm640_vm2, %v677_v50, %v679_v30  ;;  %6510 = vst [vmem:[#allocation14_spill] sm:$0xff] %v5463_v61  ;;  %v5483_v16 = vld [vmem:[#allocation2 + $0x150] sm:$0xff]  ;;  %v564_v22 = vld [vmem:[#allocation2 + $0x160] sm:$0xff] }
  0x4a   : > { %4191 = vmatmul.mubr.msk.f32.gmra.mrb[6].mxu1 %vm272_vm1, %v5357_v24  ;;  %514 = vst.msk [vmem:[#allocation2 + $0x1c8] sm:$0xff] %vm272_vm1, %v481_v31  ;;  %v483_v46 = vmax.f32 %v451_v32, 0.0  ;;  %v453_v47 = vadd.f32 %v5154_v6, %v414_v34  ;;  %v684_v52 = vrot.slane %v5431_v35, 7  ;;  %v5457_v55 = vsel %vm640_vm2, %v681_v13, %v682_v37  ;;  %6511 = vst [vmem:[#allocation15_spill] sm:$0xff] %v5483_v16  ;;  %v5485_v20 = vld [vmem:[#allocation2 + $0x168] sm:$0xff] }
  0x4b   : > { %4394 = vmatmul.mubr.msk.f32.gmra.mrb[8].mxu0 %vm272_vm1, %v5309_v54  ;;  %4193 = vmatprep.mubr.msk.f32.mxu1 %vm272_vm1, %v5367_v36  ;;  %515 = vst.msk [vmem:[#allocation2 + $0x1d0] sm:$0xff] %vm272_vm1, %v482_v38  ;;  %v484_v49 = vmax.f32 %v452_v41, 0.0  ;;  %v454_v51 = vadd.f32 %v5154_v6, %v415_v42  ;;  %v686_v6 = vrot.slane %v556_v43, 7  ;;  %v687_v57 = vrot.slane %v5437_v44, 7  ;;  %v5492_v23 = vld [vmem:[%s6432_s4 + $0x14] sm:$0xf] }
  0x4c   : > { %4396 = vmatprep.mubr.msk.f32.mxu0 %vm272_vm1, %v5326_v62  ;;  %516 = vst.msk [vmem:[#allocation2 + $0x1e8] sm:$0xff] %vm272_vm1, %v483_v46  ;;  %v485_v53 = vmax.f32 %v453_v47, 0.0  ;;  %v5474_v2 = vsel %vm640_vm2, %v682_v37, %v684_v52  ;;  %v689_v7 = vrot.slane %v5460_v58, 7  ;;  %v691_v14 = vrot.slane %v560_v60, 7  ;;  %v5510_v38 = vld [vmem:[#allocation2 + $0x170] sm:$0xff]  ;;  %v568_v41 = vld [vmem:[#allocation2 + $0x180] sm:$0xff] }
  0x4d   : > { %517 = vst.msk [vmem:[#allocation2 + $0x1f0] sm:$0xff] %vm272_vm1, %v484_v49  ;;  %v486_v50 = vmax.f32 %v454_v51, 0.0  ;;  %v5480_v13 = vsel %vm640_vm2, %v686_v6, %v687_v57  ;;  %v692_v15 = vrot.slane %v5463_v61, 7  ;;  %v694_v31 = vrot.slane %v5483_v16, 7  ;;  %v5512_v42 = vld [vmem:[#allocation2 + $0x188] sm:$0xff]  ;;  %v572_v52 = vld [vmem:[#allocation2 + $0x1a0] sm:$0xff] }
  0x4e   : > { %4194 = vmatmul.mubr.msk.f32.gmra.mrb[8].mxu1 %vm272_vm1, %v5389_v56  ;;  %518 = vst.msk [vmem:[#allocation2 + $0x208] sm:$0xff] %vm272_vm1, %v485_v53  ;;  %v5499_v30 = vsel %vm640_vm2, %v687_v57, %v689_v7  ;;  %v696_v34 = vrot.slane %v564_v22, 7  ;;  %v697_v37 = vrot.slane %v5485_v20, 7  ;;  %v699_v43 = vrot.slane %v5510_v38, 7  ;;  %v5532_v51 = vld [vmem:[#allocation2 + $0x190] sm:$0xff]  ;;  %v5534_v53 = vld [vmem:[#allocation2 + $0x1a8] sm:$0xff] }
  0x4f   : > { %4397 = vmatmul.mubr.msk.f32.gmra.mrb[10].mxu0 %vm272_vm1, %v5345_v17  ;;  %4196 = vmatprep.mubr.msk.f32.mxu1 %vm272_vm1, %v5397_v63  ;;  %519 = vst.msk [vmem:[#allocation2 + $0x210] sm:$0xff] %vm272_vm1, %v486_v50  ;;  %v5507_v32 = vsel %vm640_vm2, %v691_v14, %v692_v15  ;;  %v701_v47 = vrot.slane %v568_v41, 7  ;;  %v702_v49 = vrot.slane %v5512_v42, 7  ;;  %v704_v57 = vrot.slane %v5532_v51, 7 }
  0x50   : > { %4399 = vmatprep.mubr.msk.f32.mxu0 %vm272_vm1, %v5359_v25  ;;  %v5529_v46 = vsel %vm640_vm2, %v696_v34, %v697_v37  ;;  %v5543_v6 = vsel %vm640_vm2, %v697_v37, %v699_v43  ;;  %v706_v60 = vrot.slane %v572_v52, 7  ;;  %v707_v7 = vrot.slane %v5534_v53, 7  ;;  %v5552_v14 = vld [vmem:[#allocation2 + $0x1b0] sm:$0xff]  ;;  %v580_v52 = vld [vmem:[#allocation2 + $0x1e0] sm:$0xff] }
  0x51   : > { %6513 = vst [vmem:[#allocation17_spill] sm:$0xff] %v5529_v46  ;;  %6514 = vst [vmem:[#allocation18_spill] sm:$0xff] %v5543_v6  ;;  %v5549_v50 = vsel %vm640_vm2, %v701_v47, %v702_v49  ;;  %v5554_v22 = vld [vmem:[#allocation2 + $0x1c8] sm:$0xff]  ;;  %v709_v34 = vrot.slane %v5552_v14, 7 }
  0x52   : > { %4197 = vmatmul.mubr.msk.f32.gmra.mrb[10].mxu1 %vm272_vm1, %v5406_v8  ;;  %6515 = vst [vmem:[#allocation19_spill] sm:$0xff] %v5549_v50  ;;  %v5569_v37 = vsel %vm640_vm2, %v706_v60, %v707_v7  ;;  %v712_v43 = vrot.slane %v5554_v22, 7  ;;  %v5572_v47 = vld [vmem:[#allocation2 + $0x1d0] sm:$0xff] }
  0x53   : > { %4400 = vmatmul.mubr.msk.f32.gmra.mrb[12].mxu0 %vm272_vm1, %v5399_v0  ;;  %4199 = vmatprep.mubr.msk.f32.mxu1 %vm272_vm1, %v5418_v21  ;;  %6517 = vst [vmem:[#allocation21_spill] sm:$0xff] %v5569_v37 }
  0x54   : > { %4402 = vmatprep.mubr.msk.f32.mxu0 %vm272_vm1, %v5408_v9 }
  0x56   : > { %4200 = vmatmul.mubr.msk.f32.gmra.mrb[12].mxu1 %vm272_vm1, %v5450_v5 }
  0x57   : > { %4403 = vmatmul.mubr.msk.f32.gmra.mrb[14].mxu0 %vm272_vm1, %v5431_v35  ;;  %4202 = vmatprep.mubr.msk.f32.mxu1 %vm272_vm1, %v5457_v55 }
  0x58   : > { %4431 = vmatprep.mubr.msk.f32.mxu0 %vm272_vm1, %v5217_v12 }
  0x5a   : > { %4203 = vmatmul.mubr.msk.f32.gmra.mrb[14].mxu1 %vm272_vm1, %v5474_v2 }
  0x5b   : > { %4432 = vmatmul.mubr.msk.f32.vlgmr.msra.gmra.mrb[0].mxu0 %vm272_vm1, %v5226_v18  ;;  %4205 = vmatprep.mubr.msk.f32.mxu1 %vm272_vm1, %v5480_v13 }
  0x5c   : > { %4434 = vmatprep.mubr.msk.f32.mxu0 %vm272_vm1, %v5228_v19  ;;  %4480 = vmatpush3.msk.msra.mxu0 %vm796_vm0, %v5240_v26  ;;  %v5523_v26 = vsel %vm640_vm2, %v692_v15, %v694_v31  ;;  %v576_v15 = vld [vmem:[#allocation2 + $0x1c0] sm:$0xff]  ;;  %v5563_v31 = vsel %vm640_vm2, %v702_v49, %v704_v57  ;;  %v5583_v49 = vsel %vm640_vm2, %v707_v7, %v709_v34  ;;  %v714_v57 = vrot.slane %v5572_v47, 7 }
  0x5d   : > { %4529 = vmatprep.subr.msk.mxu0 %vm796_vm0, %v5492_v23  ;;  %6512 = vst [vmem:[#allocation16_spill] sm:$0xff] %v5523_v26  ;;  %6516 = vst [vmem:[#allocation20_spill] sm:$0xff] %v5563_v31  ;;  %v711_v41 = vrot.slane %v576_v15, 7  ;;  %v716_v15 = vrot.slane %v580_v52, 7 }
  0x5e   : > { %4206 = vmatmul.mubr.msk.f32.gmra.mrb[16].mxu1 %vm272_vm1, %v5499_v30  ;;  %6518 = vst [vmem:[#allocation22_spill] sm:$0xff] %v5583_v49  ;;  %v5603_v7 = vsel %vm640_vm2, %v712_v43, %v714_v57  ;;  %v5620_v57 = vld [vmem:[#allocation2 + $0x230] sm:$0xff] }
  0x5f   : > { %4435 = vmatmul.mubr.msk.f32.gmra.mrb[2].mxu0 %vm272_vm1, %v5252_v29  ;;  %4208 = vmatprep.mubr.msk.f32.mxu1 %vm272_vm1, %v5507_v32  ;;  %v5589_v60 = vsel %vm640_vm2, %v711_v41, %v712_v43  ;;  %6521 = vst [vmem:[#allocation25_spill] sm:$0xff] %v5603_v7  ;;  %v5618_v43 = vld [vmem:[#allocation2 + $0x228] sm:$0xff]  ;;  %6526 = vst [vmem:[#allocation30_spill] sm:$0xff] %v5620_v57 }
  0x60   : > { %4437 = vmatprep.mubr.msk.f32.mxu0 %vm272_vm1, %v5266_v4  ;;  %6519 = vst [vmem:[#allocation23_spill] sm:$0xff] %v5589_v60  ;;  %6525 = vst [vmem:[#allocation29_spill] sm:$0xff] %v5618_v43 }
  0x62   : > { %4209 = vmatmul.mubr.msk.f32.gmra.mrb[18].mxu1 %vm272_vm1, %v5523_v26  ;;  %v5638_v26 = vld [vmem:[#allocation2 + $0x10] sm:$0xff] }
  0x63   : > { %4438 = vmatmul.mubr.msk.f32.gmra.mrb[4].mxu0 %vm272_vm1, %v5295_v45  ;;  %4211 = vmatprep.mubr.msk.f32.mxu1 %vm272_vm1, %v5529_v46  ;;  %6529 = vst [vmem:[#allocation33_spill] sm:$0xff] %v5638_v26 }
  0x64   : > { %4440 = vmatprep.mubr.msk.f32.mxu0 %vm272_vm1, %v5298_v48 }
  0x66   : > { %4212 = vmatmul.mubr.msk.f32.gmra.mrb[20].mxu1 %vm272_vm1, %v5543_v6  ;;  %v5574_v6 = vld [vmem:[#allocation2 + $0x1e8] sm:$0xff] }
  0x67   : > { %4441 = vmatmul.mubr.msk.f32.gmra.mrb[6].mxu0 %vm272_vm1, %v5309_v54  ;;  %4214 = vmatprep.mubr.msk.f32.mxu1 %vm272_vm1, %v5549_v50  ;;  %v5592_v50 = vld [vmem:[#allocation2 + $0x1f0] sm:$0xff] }
  0x68   : > { %4443 = vmatprep.mubr.msk.f32.mxu0 %vm272_vm1, %v5326_v62  ;;  %v5594_v62 = vld [vmem:[#allocation2 + $0x208] sm:$0xff]  ;;  %v719_v34 = vrot.slane %v5592_v50, 7 }
  0x69   : > { %6520 = vst [vmem:[#allocation24_spill] sm:$0xff] %v5594_v62 }
  0x6a   : > { %4215 = vmatmul.mubr.msk.f32.gmra.mrb[22].mxu1 %vm272_vm1, %v5563_v31  ;;  %v717_v31 = vrot.slane %v5574_v6, 7 }
  0x6b   : > { %4444 = vmatmul.mubr.msk.f32.gmra.mrb[8].mxu0 %vm272_vm1, %v5345_v17  ;;  %4217 = vmatprep.mubr.msk.f32.mxu1 %vm272_vm1, %v5569_v37  ;;  %v584_v17 = vld [vmem:[#allocation2 + $0x200] sm:$0xff]  ;;  %v5612_v37 = vld [vmem:[#allocation2 + $0x210] sm:$0xff] }
  0x6c   : > { %4446 = vmatprep.mubr.msk.f32.mxu0 %vm272_vm1, %v5359_v25  ;;  %v5609_v41 = vsel %vm640_vm2, %v716_v15, %v717_v31  ;;  %v725_v52 = vrot.slane %v584_v17, 7  ;;  %6523 = vst [vmem:[#allocation27_spill] sm:$0xff] %v5612_v37  ;;  %v5614_v25 = vld [vmem:[#allocation2 + $0x8] sm:$0xff]  ;;  %v5627_v17 = vsel %vm640_vm2, %v717_v31, %v719_v34  ;;  %v728_v15 = vrot.slane %v5612_v37, 7 }
  0x6d   : > { %6522 = vst [vmem:[#allocation26_spill] sm:$0xff] %v5609_v41  ;;  %6524 = vst [vmem:[#allocation28_spill] sm:$0xff] %v5614_v25 }
  0x6e   : > { %4218 = vmatmul.mubr.msk.f32.gmra.mrb[24].mxu1 %vm272_vm1, %v5583_v49  ;;  %v726_v49 = vrot.slane %v5594_v62, 7  ;;  %6527 = vst [vmem:[#allocation31_spill] sm:$0xff] %v5627_v17 }
  0x6f   : > { %4447 = vmatmul.mubr.msk.f32.gmra.mrb[10].mxu0 %vm272_vm1, %v5399_v0  ;;  %4220 = vmatprep.mubr.msk.f32.mxu1 %vm272_vm1, %v5589_v60  ;;  %v520_v0 = vld [vmem:[#allocation2] sm:$0xff]  ;;  %v1261_v60 = vrot.slane %v5618_v43, 7 }
  0x70   : > { %4449 = vmatprep.mubr.msk.f32.mxu0 %vm272_vm1, %v5408_v9  ;;  %v1263_v9 = vrot.slane %v5620_v57, 7  ;;  %v641_v46 = vrot.slane %v520_v0, 7  ;;  %v5647_v34 = vsel %vm640_vm2, %v726_v49, %v728_v15  ;;  %v644_v0 = vrot.slane %v5638_v26, 7  ;;  %v527_v15 = vld [vmem:[#allocation2 + $0x38] sm:$0xff] }
  0x71   : > { %6530 = vst [vmem:[#allocation34_spill] sm:$0xff] %v5647_v34 }
  0x72   : > { %4221 = vmatmul.mubr.msk.f32.gmra.mrb[26].mxu1 %vm272_vm1, %v5603_v7  ;;  %v5635_v7 = vsel %vm640_vm2, %v725_v52, %v726_v49  ;;  %v5651_v52 = vsel %vm640_vm2, %v1261_v60, %v1263_v9  ;;  %v5671_v9 = vld [vmem:[%s6432_s4 + $0x4] sm:$0xf] }
  0x73   : > { %4450 = vmatmul.mubr.msk.f32.gmra.mrb[12].mxu0 %vm272_vm1, %v5431_v35  ;;  %4223 = vmatprep.mubr.msk.f32.mxu1 %vm272_vm1, %v5609_v41  ;;  %6528 = vst [vmem:[#allocation32_spill] sm:$0xff] %v5635_v7  ;;  %v642_v35 = vrot.slane %v5614_v25, 7  ;;  %v588_v41 = vld [vmem:[#allocation2 + $0x220] sm:$0xff]  ;;  %6531 = vst [vmem:[#allocation35_spill] sm:$0xff] %v5651_v52  ;;  %v6544_v52 = vld [vmem:[#allocation21_spill] sm:$0xff] }
  0x74   : > { %4452 = vmatprep.mubr.msk.f32.mxu0 %vm272_vm1, %v5437_v44  ;;  %v1260_v31 = vrot.slane %v588_v41, 7 }
  0x75   : > { %v645_v49 = vsel %vm640_vm2, %v642_v35, %v644_v0  ;;  %v2414_v0 = vrot.slane %v527_v15, 1  ;;  %v2427_v15 = vrot.slane %v5295_v45, 1  ;;  %v6537_v45 = vld [vmem:[#allocation18_spill] sm:$0xff] }
  0x76   : > { %4224 = vmatmul.mubr.msk.f32.gmra.mrb[28].mxu1 %vm272_vm1, %v5627_v17  ;;  %v643_v17 = vsel %vm640_vm2, %v641_v46, %v642_v35  ;;  %v5657_v41 = vsel %vm640_vm2, %v1260_v31, %v1261_v60  ;;  %v2411_v46 = vrot.slane %v5213_v10, 1  ;;  %v2412_v60 = vrot.slane %v5215_v11, 1 }
  0x77   : > { %4453 = vmatmul.mubr.msk.f32.gmra.mrb[14].mxu0 %vm272_vm1, %v5460_v58  ;;  %4226 = vmatprep.mubr.msk.f32.mxu1 %vm272_vm1, %v5635_v7  ;;  %6532 = vst [vmem:[#allocation36_spill] sm:$0xff] %v5657_v41  ;;  %v2416_v11 = vrot.slane %v5217_v12, 1  ;;  %v6549_v7 = vld [vmem:[#allocation22_spill] sm:$0xff] }
  0x78   : > { %4455 = vmatprep.mubr.msk.f32.mxu0 %vm272_vm1, %v5463_v61  ;;  %v5737_v10 = vsel %vm2405_vm3, %v2411_v46, %v2412_v60  ;;  %v5756_v12 = vsel %vm2405_vm3, %v2412_v60, %v2414_v0  ;;  %v2422_v46 = vrot.slane %v5252_v29, 1  ;;  %v2426_v60 = vrot.slane %v5266_v4, 1 }
  0x7a   : > { %4227 = vmatmul.mubr.msk.f32.gmra.mrb[30].mxu1 %vm272_vm1, %v5647_v34  ;;  %v5793_v4 = vsel %vm2405_vm3, %v2426_v60, %v2427_v15  ;;  %v555_v34 = vld [vmem:[#allocation2 + $0x118] sm:$0xff] }
  0x7b   : > { %4456 = vmatmul.mubr.msk.f32.gmra.mrb[16].mxu0 %vm272_vm1, %v5483_v16  ;;  %4231 = vmatprep.mubr.msk.f32.mxu1 %vm272_vm1, %v643_v17 }
  0x7c   : > { %4458 = vmatprep.mubr.msk.f32.mxu0 %vm272_vm1, %v5485_v20 }
  0x7e   : > { %4232 = vmatmul.mubr.msk.f32.vlgmr.msra.gmra.mrb[0].mxu1 %vm272_vm1, %v645_v49  ;;  %v2417_v49 = vrot.slane %v5226_v18, 1 }
  0x7f   : > { %4280 = vmatpush3.msk.msra.mxu1 %vm796_vm0, %v5275_v39  ;;  %4459 = vmatmul.mubr.msk.f32.gmra.mrb[18].mxu0 %vm272_vm1, %v5510_v38  ;;  %v523_v39 = vld [vmem:[#allocation2 + $0x18] sm:$0xff] }
  0x80   : > { %4234 = vmatprep.mubr.msk.f32.mxu1 %vm272_vm1, %v5243_v27  ;;  %4461 = vmatprep.mubr.msk.f32.mxu0 %vm272_vm1, %v5512_v42  ;;  %v2406_v27 = vrot.slane %v5614_v25, 1  ;;  %v2409_v35 = vrot.slane %v523_v39, 1  ;;  %v5746_v39 = vld [vmem:[%s6432_s4 + $0x20] sm:$0xf]  ;;  %v6543_v25 = vld [vmem:[#allocation20_spill] sm:$0xff] }
  0x81   : > { %4329 = vmatprep.subr.msk.mxu1 %vm796_vm0, %v5671_v9 }
  0x82   : > { %4235 = vmatmul.mubr.msk.f32.gmra.mrb[2].mxu1 %vm272_vm1, %v5246_v28  ;;  %v2407_v28 = vrot.slane %v5638_v26, 1  ;;  %v551_v26 = vld [vmem:[#allocation2 + $0xf8] sm:$0xff] }
  0x83   : > { %4462 = vmatmul.mubr.msk.f32.gmra.mrb[20].mxu0 %vm272_vm1, %v5532_v51  ;;  %4237 = vmatprep.mubr.msk.f32.mxu1 %vm272_vm1, %v5260_v33 }
  0x84   : > { %4464 = vmatprep.mubr.msk.f32.mxu0 %vm272_vm1, %v5534_v53  ;;  %v2408_v17 = vsel %vm2405_vm3, %v2406_v27, %v2407_v28  ;;  %v2410_v31 = vsel %vm2405_vm3, %v2407_v28, %v2409_v35  ;;  %v531_v27 = vld [vmem:[#allocation2 + $0x58] sm:$0xff]  ;;  %v5759_v28 = vsel %vm2405_vm3, %v2416_v11, %v2417_v49  ;;  %v2421_v35 = vrot.slane %v5228_v19, 1 }
  0x85   : > { %v2419_v18 = vrot.slane %v531_v27, 1  ;;  %v2432_v27 = vrot.slane %v5309_v54, 1 }
  0x86   : > { %4238 = vmatmul.mubr.msk.f32.gmra.mrb[4].mxu1 %vm272_vm1, %v5282_v40 }
  0x87   : > { %4465 = vmatmul.mubr.msk.f32.gmra.mrb[22].mxu0 %vm272_vm1, %v5552_v14  ;;  %4240 = vmatprep.mubr.msk.f32.mxu1 %vm272_vm1, %v5293_v3  ;;  %v5774_v19 = vsel %vm2405_vm3, %v2417_v49, %v2419_v18  ;;  %v2431_v49 = vrot.slane %v5298_v48, 1  ;;  %v543_v18 = vld [vmem:[#allocation2 + $0xb8] sm:$0xff] }
  0x88   : > { %4467 = vmatprep.mubr.msk.f32.mxu0 %vm272_vm1, %v5554_v22  ;;  %v547_v48 = vld [vmem:[#allocation2 + $0xd8] sm:$0xff] }
  0x89   : > { %v5809_v60 = vsel %vm2405_vm3, %v2431_v49, %v2432_v27 }
  0x8a   : > { %4241 = vmatmul.mubr.msk.f32.gmra.mrb[6].mxu1 %vm272_vm1, %v5322_v59 }
  0x8b   : > { %4468 = vmatmul.mubr.msk.f32.gmra.mrb[24].mxu0 %vm272_vm1, %v5572_v47  ;;  %4243 = vmatprep.mubr.msk.f32.mxu1 %vm272_vm1, %v5334_v1 }
  0x8c   : > { %4470 = vmatprep.mubr.msk.f32.mxu0 %vm272_vm1, %v5574_v6 }
  0x8e   : > { %4244 = vmatmul.mubr.msk.f32.gmra.mrb[8].mxu1 %vm272_vm1, %v5357_v24 }
  0x8f   : > { %4471 = vmatmul.mubr.msk.f32.gmra.mrb[26].mxu0 %vm272_vm1, %v5592_v50  ;;  %4246 = vmatprep.mubr.msk.f32.mxu1 %vm272_vm1, %v5367_v36 }
  0x90   : > { %4473 = vmatprep.mubr.msk.f32.mxu0 %vm272_vm1, %v5594_v62 }
  0x92   : > { %4247 = vmatmul.mubr.msk.f32.gmra.mrb[10].mxu1 %vm272_vm1, %v5389_v56 }
  0x93   : > { %4474 = vmatmul.mubr.msk.f32.gmra.mrb[28].mxu0 %vm272_vm1, %v5612_v37  ;;  %4249 = vmatprep.mubr.msk.f32.mxu1 %vm272_vm1, %v5397_v63  ;;  %v6538_v37 = vld [vmem:[#allocation19_spill] sm:$0xff] }
  0x94   : > { %4476 = vmatprep.mubr.msk.f32.mxu0 %vm272_vm1, %v5618_v43  ;;  %v6536_v43 = vld [vmem:[#allocation7_spill] sm:$0xff] }
  0x95   : > { %v2437_v54 = vrot.slane %v6536_v43, 1 }
  0x96   : > { %4250 = vmatmul.mubr.msk.f32.gmra.mrb[12].mxu1 %vm272_vm1, %v5406_v8 }
  0x97   : > { %4477 = vmatmul.mubr.msk.f32.gmra.mrb[30].mxu0 %vm272_vm1, %v5620_v57  ;;  %4252 = vmatprep.mubr.msk.f32.mxu1 %vm272_vm1, %v5418_v21 }
  0x98   : > { %4481 = vmatprep.mubr.msk.f32.mxu0 %vm272_vm1, %v2408_v17  ;;  %v535_v17 = vld [vmem:[#allocation2 + $0x78] sm:$0xff] }
  0x99   : > { %v2424_v29 = vrot.slane %v535_v17, 1  ;;  %v6534_v17 = vld [vmem:[#allocation17_spill] sm:$0xff] }
  0x9a   : > { %4253 = vmatmul.mubr.msk.f32.gmra.mrb[14].mxu1 %vm272_vm1, %v5450_v5 }
  0x9b   : > { %4482 = vmatmul.mubr.msk.f32.vlgmr.msra.gmra.mrb[0].mxu0 %vm272_vm1, %v2410_v31  ;;  %4255 = vmatprep.mubr.msk.f32.mxu1 %vm272_vm1, %v5457_v55  ;;  %v539_v31 = vld [vmem:[#allocation2 + $0x98] sm:$0xff]  ;;  %v5790_v0 = vsel %vm2405_vm3, %v2422_v46, %v2424_v29  ;;  %v2434_v29 = vrot.slane %v543_v18, 1  ;;  %v6541_v18 = vld [vmem:[#allocation8_spill] sm:$0xff] }
  0x9c   : > { %4484 = vmatprep.mubr.msk.f32.mxu0 %vm272_vm1, %v5737_v10  ;;  %4530 = vmatpush3.msk.msra.mxu0 %vm796_vm0, %v5492_v23  ;;  %v5777_v23 = vsel %vm2405_vm3, %v2421_v35, %v2422_v46  ;;  %v2429_v11 = vrot.slane %v539_v31, 1  ;;  %v6533_v35 = vld [vmem:[#allocation16_spill] sm:$0xff]  ;;  %v6535_v31 = vld [vmem:[#allocation6_spill] sm:$0xff]  ;;  %v2441_v43 = vrot.slane %v6541_v18, 1  ;;  %v6548_v18 = vld [vmem:[#allocation11_spill] sm:$0xff] }
  0x9d   : > { %4579 = vmatprep.subr.msk.mxu0 %vm796_vm0, %v5746_v39  ;;  %v2436_v57 = vrot.slane %v6535_v31, 1  ;;  %v6542_v31 = vld [vmem:[#allocation9_spill] sm:$0xff]  ;;  %v2447_v41 = vrot.slane %v6548_v18, 1  ;;  %v2452_v18 = vrot.slane %v5460_v58, 1  ;;  %v2457_v58 = vrot.slane %v5483_v16, 1 }
  0x9e   : > { %4256 = vmatmul.mubr.msk.f32.gmra.mrb[16].mxu1 %vm272_vm1, %v5474_v2  ;;  %v5806_v46 = vsel %vm2405_vm3, %v2427_v15, %v2429_v11  ;;  %v5822_v15 = vsel %vm2405_vm3, %v2432_v27, %v2434_v29  ;;  %v2439_v11 = vrot.slane %v547_v48, 1  ;;  %v2442_v62 = vrot.slane %v6542_v31, 1  ;;  %v6547_v29 = vld [vmem:[#allocation10_spill] sm:$0xff] }
  0x9f   : > { %4485 = vmatmul.mubr.msk.f32.gmra.mrb[2].mxu0 %vm272_vm1, %v5756_v12  ;;  %4258 = vmatprep.mubr.msk.f32.mxu1 %vm272_vm1, %v5480_v13  ;;  %6539 = vst [vmem:[#allocation16_spill] sm:$0xff] %v5822_v15  ;;  %v5825_v49 = vsel %vm2405_vm3, %v2436_v57, %v2437_v54  ;;  %v2444_v57 = vrot.slane %v551_v26, 1  ;;  %v2446_v31 = vrot.slane %v6547_v29, 1  ;;  %v2449_v26 = vrot.slane %v555_v34, 1  ;;  %v559_v29 = vld [vmem:[#allocation2 + $0x138] sm:$0xff] }
  0xa0   : > { %4487 = vmatprep.mubr.msk.f32.mxu0 %vm272_vm1, %v5759_v28  ;;  %6540 = vst [vmem:[#allocation17_spill] sm:$0xff] %v5825_v49  ;;  %v5838_v48 = vsel %vm2405_vm3, %v2437_v54, %v2439_v11  ;;  %v5841_v27 = vsel %vm2405_vm3, %v2441_v43, %v2442_v62  ;;  %v2451_v11 = vrot.slane %v5437_v44, 1  ;;  %v2454_v34 = vrot.slane %v559_v29, 1  ;;  %v563_v44 = vld [vmem:[#allocation2 + $0x158] sm:$0xff] }
  0xa1   : > { %6545 = vst [vmem:[#allocation18_spill] sm:$0xff] %v5838_v48  ;;  %6546 = vst [vmem:[#allocation19_spill] sm:$0xff] %v5841_v27  ;;  %v5854_v54 = vsel %vm2405_vm3, %v2442_v62, %v2444_v57  ;;  %v5857_v43 = vsel %vm2405_vm3, %v2446_v31, %v2447_v41  ;;  %v5870_v62 = vsel %vm2405_vm3, %v2447_v41, %v2449_v26  ;;  %v2456_v57 = vrot.slane %v5463_v61, 1  ;;  %v567_v61 = vld [vmem:[#allocation2 + $0x178] sm:$0xff] }
  0xa2   : > { %4259 = vmatmul.mubr.msk.f32.gmra.mrb[18].mxu1 %vm272_vm1, %v5499_v30  ;;  %v5873_v31 = vsel %vm2405_vm3, %v2451_v11, %v2452_v18  ;;  %v5886_v41 = vsel %vm2405_vm3, %v2452_v18, %v2454_v34  ;;  %v2459_v29 = vrot.slane %v563_v44, 1  ;;  %v2461_v11 = vrot.slane %v5485_v20, 1  ;;  %v571_v34 = vld [vmem:[#allocation2 + $0x198] sm:$0xff] }
  0xa3   : > { %4488 = vmatmul.mubr.msk.f32.gmra.mrb[4].mxu0 %vm272_vm1, %v5774_v19  ;;  %4261 = vmatprep.mubr.msk.f32.mxu1 %vm272_vm1, %v5507_v32  ;;  %v5889_v26 = vsel %vm2405_vm3, %v2456_v57, %v2457_v58  ;;  %v2462_v16 = vrot.slane %v5510_v38, 1  ;;  %v2464_v44 = vrot.slane %v567_v61, 1  ;;  %v5914_v57 = vld [vmem:[%s6432_s4 + $0x10] sm:$0xf] }
  0xa4   : > { %4490 = vmatprep.mubr.msk.f32.mxu0 %vm272_vm1, %v5777_v23 }
  0xa5   : > { %v5907_v18 = vsel %vm2405_vm3, %v2461_v11, %v2462_v16  ;;  %v575_v11 = vld [vmem:[#allocation2 + $0x1b8] sm:$0xff] }
  0xa6   : > { %4262 = vmatmul.mubr.msk.f32.gmra.mrb[20].mxu1 %vm272_vm1, %v6533_v35 }
  0xa7   : > { %4491 = vmatmul.mubr.msk.f32.gmra.mrb[6].mxu0 %vm272_vm1, %v5790_v0  ;;  %4264 = vmatprep.mubr.msk.f32.mxu1 %vm272_vm1, %v6534_v17 }
  0xa8   : > { %4493 = vmatprep.mubr.msk.f32.mxu0 %vm272_vm1, %v5793_v4 }
  0xaa   : > { %4265 = vmatmul.mubr.msk.f32.gmra.mrb[22].mxu1 %vm272_vm1, %v6537_v45 }
  0xab   : > { %4494 = vmatmul.mubr.msk.f32.gmra.mrb[8].mxu0 %vm272_vm1, %v5806_v46  ;;  %4267 = vmatprep.mubr.msk.f32.mxu1 %vm272_vm1, %v6538_v37 }
  0xac   : > { %4496 = vmatprep.mubr.msk.f32.mxu0 %vm272_vm1, %v5809_v60 }
  0xae   : > { %4268 = vmatmul.mubr.msk.f32.gmra.mrb[24].mxu1 %vm272_vm1, %v6543_v25 }
  0xaf   : > { %4497 = vmatmul.mubr.msk.f32.gmra.mrb[10].mxu0 %vm272_vm1, %v5822_v15  ;;  %4270 = vmatprep.mubr.msk.f32.mxu1 %vm272_vm1, %v6544_v52  ;;  %v6550_v15 = vld [vmem:[#allocation23_spill] sm:$0xff] }
  0xb0   : > { %4499 = vmatprep.mubr.msk.f32.mxu0 %vm272_vm1, %v5825_v49  ;;  %v6551_v49 = vld [vmem:[#allocation25_spill] sm:$0xff] }
  0xb2   : > { %4271 = vmatmul.mubr.msk.f32.gmra.mrb[26].mxu1 %vm272_vm1, %v6549_v7 }
  0xb3   : > { %4500 = vmatmul.mubr.msk.f32.gmra.mrb[12].mxu0 %vm272_vm1, %v5838_v48  ;;  %4273 = vmatprep.mubr.msk.f32.mxu1 %vm272_vm1, %v6550_v15  ;;  %v6552_v48 = vld [vmem:[#allocation26_spill] sm:$0xff] }
  0xb4   : > { %4502 = vmatprep.mubr.msk.f32.mxu0 %vm272_vm1, %v5841_v27  ;;  %v6553_v27 = vld [vmem:[#allocation31_spill] sm:$0xff] }
  0xb6   : > { %4274 = vmatmul.mubr.msk.f32.gmra.mrb[28].mxu1 %vm272_vm1, %v6551_v49 }
  0xb7   : > { %4503 = vmatmul.mubr.msk.f32.gmra.mrb[14].mxu0 %vm272_vm1, %v5854_v54  ;;  %4276 = vmatprep.mubr.msk.f32.mxu1 %vm272_vm1, %v6552_v48 }
  0xb8   : > { %4505 = vmatprep.mubr.msk.f32.mxu0 %vm272_vm1, %v5857_v43 }
  0xba   : > { %4277 = vmatmul.mubr.msk.f32.gmra.mrb[30].mxu1 %vm272_vm1, %v6553_v27 }
  0xbb   : > { %4506 = vmatmul.mubr.msk.f32.gmra.mrb[16].mxu0 %vm272_vm1, %v5870_v62  ;;  %4281 = vmatprep.mubr.msk.f32.mxu1 %vm272_vm1, %v5260_v33  ;;  %v5904_v33 = vsel %vm2405_vm3, %v2457_v58, %v2459_v29  ;;  %v2469_v58 = vrot.slane %v571_v34, 1  ;;  %v2471_v29 = vrot.slane %v5534_v53, 1  ;;  %v579_v34 = vld [vmem:[#allocation2 + $0x1d8] sm:$0xff] }
  0xbc   : > { %4508 = vmatprep.mubr.msk.f32.mxu0 %vm272_vm1, %v5873_v31 }
  0xbe   : > { %4282 = vmatmul.mubr.msk.f32.vlgmr.msra.gmra.mrb[0].mxu1 %vm272_vm1, %v5282_v40  ;;  %v2466_v40 = vrot.slane %v5512_v42, 1 }
  0xbf   : > { %4330 = vmatpush3.msk.msra.mxu1 %vm796_vm0, %v5671_v9  ;;  %4509 = vmatmul.mubr.msk.f32.gmra.mrb[18].mxu0 %vm272_vm1, %v5886_v41  ;;  %v2467_v9 = vrot.slane %v5532_v51, 1 }
  0xc0   : > { %4284 = vmatprep.mubr.msk.f32.mxu1 %vm272_vm1, %v5293_v3  ;;  %4511 = vmatprep.mubr.msk.f32.mxu0 %vm272_vm1, %v5889_v26  ;;  %v5927_v3 = vsel %vm2405_vm3, %v2462_v16, %v2464_v44  ;;  %v2474_v16 = vrot.slane %v575_v11, 1  ;;  %v583_v11 = vld [vmem:[#allocation2 + $0x1f8] sm:$0xff] }
  0xc1   : > { %4629 = vmatprep.subr.msk.mxu1 %vm796_vm0, %v5914_v57  ;;  %v5930_v61 = vsel %vm2405_vm3, %v2466_v40, %v2467_v9  ;;  %v2476_v40 = vrot.slane %v5554_v22, 1 }
  0xc2   : > { %4285 = vmatmul.mubr.msk.f32.gmra.mrb[2].mxu1 %vm272_vm1, %v5322_v59  ;;  %v2472_v59 = vrot.slane %v5552_v14, 1 }
  0xc3   : > { %4512 = vmatmul.mubr.msk.f32.gmra.mrb[20].mxu0 %vm272_vm1, %v5904_v33  ;;  %4287 = vmatprep.mubr.msk.f32.mxu1 %vm272_vm1, %v5334_v1  ;;  %v5943_v1 = vsel %vm2405_vm3, %v2467_v9, %v2469_v58  ;;  %v2479_v9 = vrot.slane %v579_v34, 1 }
  0xc4   : > { %4514 = vmatprep.mubr.msk.f32.mxu0 %vm272_vm1, %v5907_v18  ;;  %v5946_v44 = vsel %vm2405_vm3, %v2471_v29, %v2472_v59  ;;  %v2481_v29 = vrot.slane %v5574_v6, 1 }
  0xc6   : > { %4288 = vmatmul.mubr.msk.f32.gmra.mrb[4].mxu1 %vm272_vm1, %v5357_v24  ;;  %v2477_v24 = vrot.slane %v5572_v47, 1 }
  0xc7   : > { %4515 = vmatmul.mubr.msk.f32.gmra.mrb[22].mxu0 %vm272_vm1, %v5927_v3  ;;  %4290 = vmatprep.mubr.msk.f32.mxu1 %vm272_vm1, %v5367_v36  ;;  %v5959_v36 = vsel %vm2405_vm3, %v2472_v59, %v2474_v16  ;;  %v2484_v59 = vrot.slane %v583_v11, 1 }
  0xc8   : > { %4517 = vmatprep.mubr.msk.f32.mxu0 %vm272_vm1, %v5930_v61  ;;  %v5962_v58 = vsel %vm2405_vm3, %v2476_v40, %v2477_v24  ;;  %v6566_v40 = vld [vmem:[#allocation3_spill] sm:$0xff] }
  0xca   : > { %4291 = vmatmul.mubr.msk.f32.gmra.mrb[6].mxu1 %vm272_vm1, %v5389_v56  ;;  %v2482_v56 = vrot.slane %v5592_v50, 1 }
  0xcb   : > { %4518 = vmatmul.mubr.msk.f32.gmra.mrb[24].mxu0 %vm272_vm1, %v5943_v1  ;;  %4293 = vmatprep.mubr.msk.f32.mxu1 %vm272_vm1, %v5397_v63  ;;  %v5975_v63 = vsel %vm2405_vm3, %v2477_v24, %v2479_v9  ;;  %v6567_v24 = vld [vmem:[#allocation4_spill] sm:$0xff] }
  0xcc   : > { %4520 = vmatprep.mubr.msk.f32.mxu0 %vm272_vm1, %v5946_v44  ;;  %v5978_v16 = vsel %vm2405_vm3, %v2481_v29, %v2482_v56  ;;  %v6568_v29 = vld [vmem:[#allocation5_spill] sm:$0xff] }
  0xce   : > { %4294 = vmatmul.mubr.msk.f32.gmra.mrb[8].mxu1 %vm272_vm1, %v5406_v8  ;;  %v5989_v8 = vsel %vm2405_vm3, %v2482_v56, %v2484_v59  ;;  %v6569_v56 = vld [vmem:[#allocation6_spill] sm:$0xff]  ;;  %v6570_v59 = vld [vmem:[#allocation7_spill] sm:$0xff] }
  0xcf   : > { %4521 = vmatmul.mubr.msk.f32.gmra.mrb[26].mxu0 %vm272_vm1, %v5959_v36  ;;  %4296 = vmatprep.mubr.msk.f32.mxu1 %vm272_vm1, %v5418_v21  ;;  %v6555_v21 = vld [vmem:[#allocation17_spill] sm:$0xff] }
  0xd0   : > { %4523 = vmatprep.mubr.msk.f32.mxu0 %vm272_vm1, %v5962_v58 }
  0xd2   : > { %4297 = vmatmul.mubr.msk.f32.gmra.mrb[10].mxu1 %vm272_vm1, %v5450_v5  ;;  %v6557_v5 = vld [vmem:[#allocation19_spill] sm:$0xff] }
  0xd3   : > { %4524 = vmatmul.mubr.msk.f32.gmra.mrb[28].mxu0 %vm272_vm1, %v5975_v63  ;;  %4299 = vmatprep.mubr.msk.f32.mxu1 %vm272_vm1, %v5457_v55  ;;  %v6558_v55 = vld [vmem:[#allocation32_spill] sm:$0xff] }
  0xd4   : > { %4526 = vmatprep.mubr.msk.f32.mxu0 %vm272_vm1, %v5978_v16 }
  0xd6   : > { %4300 = vmatmul.mubr.msk.f32.gmra.mrb[12].mxu1 %vm272_vm1, %v5474_v2  ;;  %v6559_v2 = vld [vmem:[#allocation34_spill] sm:$0xff] }
  0xd7   : > { %4527 = vmatmul.mubr.msk.f32.gmra.mrb[30].mxu0 %vm272_vm1, %v5989_v8  ;;  %4302 = vmatprep.mubr.msk.f32.mxu1 %vm272_vm1, %v5480_v13  ;;  %v6560_v13 = vld [vmem:[#allocation36_spill] sm:$0xff] }
  0xd8   : > { %4531 = vmatprep.mubr.msk.f32.mxu0 %vm272_vm1, %v5737_v10  ;;  %v4899_v10 = vld [vmem:[#allocation2 + $0x48] sm:$0xff] }
  0xda   : > { %4303 = vmatmul.mubr.msk.f32.gmra.mrb[14].mxu1 %vm272_vm1, %v5499_v30  ;;  %v6561_v30 = vld [vmem:[#allocation35_spill] sm:$0xff] }
  0xdb   : > { %4532 = vmatmul.mubr.msk.f32.vlgmr.msra.gmra.mrb[0].mxu0 %vm272_vm1, %v5756_v12  ;;  %4305 = vmatprep.mubr.msk.f32.mxu1 %vm272_vm1, %v5507_v32  ;;  %v6562_v32 = vld [vmem:[#allocation28_spill] sm:$0xff] }
  0xdc   : > { %4534 = vmatprep.mubr.msk.f32.mxu0 %vm272_vm1, %v5759_v28  ;;  %4580 = vmatpush3.msk.msra.mxu0 %vm796_vm0, %v5746_v39  ;;  %v4900_v39 = vld [vmem:[#allocation2 + $0x50] sm:$0xff]  ;;  %v4901_v12 = vld [vmem:[#allocation2 + $0x68] sm:$0xff] }
  0xde   : > { %4306 = vmatmul.mubr.msk.f32.gmra.mrb[16].mxu1 %vm272_vm1, %v6533_v35  ;;  %v4902_v35 = vld [vmem:[#allocation2 + $0x70] sm:$0xff] }
  0xdf   : > { %4535 = vmatmul.mubr.msk.f32.gmra.mrb[2].mxu0 %vm272_vm1, %v5774_v19  ;;  %4308 = vmatprep.mubr.msk.f32.mxu1 %vm272_vm1, %v6534_v17  ;;  %v4903_v17 = vld [vmem:[#allocation2 + $0x88] sm:$0xff] }
  0xe0   : > { %4537 = vmatprep.mubr.msk.f32.mxu0 %vm272_vm1, %v5777_v23 }
  0xe2   : > { %4309 = vmatmul.mubr.msk.f32.gmra.mrb[18].mxu1 %vm272_vm1, %v6537_v45  ;;  %v6554_v45 = vld [vmem:[#allocation16_spill] sm:$0xff] }
  0xe3   : > { %4538 = vmatmul.mubr.msk.f32.gmra.mrb[4].mxu0 %vm272_vm1, %v5790_v0  ;;  %4311 = vmatprep.mubr.msk.f32.mxu1 %vm272_vm1, %v6538_v37  ;;  %v6563_v37 = vld [vmem:[#allocation33_spill] sm:$0xff] }
  0xe4   : > { %4540 = vmatprep.mubr.msk.f32.mxu0 %vm272_vm1, %v5793_v4 }
  0xe6   : > { %4312 = vmatmul.mubr.msk.f32.gmra.mrb[20].mxu1 %vm272_vm1, %v6543_v25  ;;  %v6556_v25 = vld [vmem:[#allocation18_spill] sm:$0xff] }
  0xe7   : > { %4541 = vmatmul.mubr.msk.f32.gmra.mrb[6].mxu0 %vm272_vm1, %v5806_v46  ;;  %4314 = vmatprep.mubr.msk.f32.mxu1 %vm272_vm1, %v6544_v52  ;;  %v4898_v52 = vld [vmem:[#allocation2 + $0x30] sm:$0xff] }
  0xe8   : > { %4543 = vmatprep.mubr.msk.f32.mxu0 %vm272_vm1, %v5809_v60 }
  0xea   : > { %4315 = vmatmul.mubr.msk.f32.gmra.mrb[22].mxu1 %vm272_vm1, %v6549_v7  ;;  %v4897_v7 = vld [vmem:[#allocation2 + $0x28] sm:$0xff] }
  0xeb   : > { %4544 = vmatmul.mubr.msk.f32.gmra.mrb[8].mxu0 %vm272_vm1, %v6554_v45  ;;  %4317 = vmatprep.mubr.msk.f32.mxu1 %vm272_vm1, %v6550_v15  ;;  %v6564_v15 = vld [vmem:[#allocation24_spill] sm:$0xff] }
  0xec   : > { %4546 = vmatprep.mubr.msk.f32.mxu0 %vm272_vm1, %v6555_v21 }
  0xee   : > { %4318 = vmatmul.mubr.msk.f32.gmra.mrb[24].mxu1 %vm272_vm1, %v6551_v49  ;;  %v2813_v49 = vrot.slane %v6564_v15, 1 }
  0xef   : > { %4547 = vmatmul.mubr.msk.f32.gmra.mrb[10].mxu0 %vm272_vm1, %v6556_v25  ;;  %4320 = vmatprep.mubr.msk.f32.mxu1 %vm272_vm1, %v6552_v48  ;;  %v6565_v48 = vld [vmem:[#allocation27_spill] sm:$0xff] }
  0xf0   : > { %4549 = vmatprep.mubr.msk.f32.mxu0 %vm272_vm1, %v6557_v5 }
  0xf2   : > { %4321 = vmatmul.mubr.msk.f32.gmra.mrb[26].mxu1 %vm272_vm1, %v6553_v27  ;;  %v2814_v27 = vrot.slane %v6565_v48, 1 }
  0xf3   : > { %4550 = vmatmul.mubr.msk.f32.gmra.mrb[12].mxu0 %vm272_vm1, %v5854_v54  ;;  %4323 = vmatprep.mubr.msk.f32.mxu1 %vm272_vm1, %v6558_v55  ;;  %v6571_v55 = vld [vmem:[#allocation8_spill] sm:$0xff] }
  0xf4   : > { %4552 = vmatprep.mubr.msk.f32.mxu0 %vm272_vm1, %v5857_v43  ;;  %v6111_v9 = vsel %vm2405_vm3, %v2813_v49, %v2814_v27 }
  0xf6   : > { %4324 = vmatmul.mubr.msk.f32.gmra.mrb[28].mxu1 %vm272_vm1, %v6559_v2  ;;  %v6572_v2 = vld [vmem:[#allocation9_spill] sm:$0xff] }
  0xf7   : > { %4553 = vmatmul.mubr.msk.f32.gmra.mrb[14].mxu0 %vm272_vm1, %v5870_v62  ;;  %4326 = vmatprep.mubr.msk.f32.mxu1 %vm272_vm1, %v6560_v13  ;;  %v6573_v13 = vld [vmem:[#allocation10_spill] sm:$0xff] }
  0xf8   : > { %4555 = vmatprep.mubr.msk.f32.mxu0 %vm272_vm1, %v5873_v31 }
  0xfa   : > { %4327 = vmatmul.mubr.msk.f32.gmra.mrb[30].mxu1 %vm272_vm1, %v6561_v30  ;;  %v6574_v30 = vld [vmem:[#allocation11_spill] sm:$0xff] }
  0xfb   : > { %4556 = vmatmul.mubr.msk.f32.gmra.mrb[16].mxu0 %vm272_vm1, %v5886_v41  ;;  %4331 = vmatprep.mubr.msk.f32.mxu1 %vm272_vm1, %v6562_v32  ;;  %v6575_v32 = vld [vmem:[#allocation12_spill] sm:$0xff] }
  0xfc   : > { %4558 = vmatprep.mubr.msk.f32.mxu0 %vm272_vm1, %v5889_v26 }
  0xfe   : > { %4332 = vmatmul.mubr.msk.f32.vlgmr.msra.gmra.mrb[0].mxu1 %vm272_vm1, %v6563_v37 }
  0xff   : > { %4630 = vmatpush3.msk.msra.mxu1 %vm796_vm0, %v5914_v57  ;;  %4559 = vmatmul.mubr.msk.f32.gmra.mrb[18].mxu0 %vm272_vm1, %v5904_v33  ;;  %v587_v57 = vld [vmem:[#allocation2 + $0x218] sm:$0xff] }
 0x100   : > { %4334 = vmatprep.mubr.msk.f32.mxu1 %vm272_vm1, %v4897_v7  ;;  %4561 = vmatprep.mubr.msk.f32.mxu0 %vm272_vm1, %v5907_v18  ;;  %v2816_v34 = vrot.slane %v587_v57, 1 }
 0x102   : > { %4335 = vmatmul.mubr.msk.f32.gmra.mrb[2].mxu1 %vm272_vm1, %v4898_v52  ;;  %v6122_v11 = vsel %vm2405_vm3, %v2814_v27, %v2816_v34 }
 0x103   : > { %4562 = vmatmul.mubr.msk.f32.gmra.mrb[20].mxu0 %vm272_vm1, %v5927_v3  ;;  %4337 = vmatprep.mubr.msk.f32.mxu1 %vm272_vm1, %v4899_v10  ;;  %v3398_v10 = vld [vmem:[%s6276_s7 + $0x18] sm:$0xff] }
 0x104   : > { %4564 = vmatprep.mubr.msk.f32.mxu0 %vm272_vm1, %v5930_v61 }
 0x106   : > { %4338 = vmatmul.mubr.msk.f32.gmra.mrb[4].mxu1 %vm272_vm1, %v4900_v39 }
 0x107   : > { %4565 = vmatmul.mubr.msk.f32.gmra.mrb[22].mxu0 %vm272_vm1, %v5943_v1  ;;  %4340 = vmatprep.mubr.msk.f32.mxu1 %vm272_vm1, %v4901_v12 }
 0x108   : > { %4567 = vmatprep.mubr.msk.f32.mxu0 %vm272_vm1, %v5946_v44 }
 0x10a   : > { %4341 = vmatmul.mubr.msk.f32.gmra.mrb[6].mxu1 %vm272_vm1, %v4902_v35  ;;  %v3397_v35 = vld [vmem:[%s6276_s7 + $0x10] sm:$0xff] }
 0x10b   : > { %4568 = vmatmul.mubr.msk.f32.gmra.mrb[24].mxu0 %vm272_vm1, %v5959_v36  ;;  %4343 = vmatprep.mubr.msk.f32.mxu1 %vm272_vm1, %v4903_v17 }
 0x10c   : > { %4570 = vmatprep.mubr.msk.f32.mxu0 %vm272_vm1, %v5962_v58 }
 0x10e   : > { %4344 = vmatmul.mubr.msk.f32.gmra.mrb[8].mxu1 %vm272_vm1, %v6566_v40  ;;  %v3400_v40 = vld [vmem:[%s6276_s7 + $0x28] sm:$0xff] }
 0x10f   : > { %4571 = vmatmul.mubr.msk.f32.gmra.mrb[26].mxu0 %vm272_vm1, %v5975_v63  ;;  %4346 = vmatprep.mubr.msk.f32.mxu1 %vm272_vm1, %v6567_v24 }
 0x110   : > { %4573 = vmatprep.mubr.msk.f32.mxu0 %vm272_vm1, %v5978_v16 }
 0x112   : > { %4347 = vmatmul.mubr.msk.f32.gmra.mrb[10].mxu1 %vm272_vm1, %v6568_v29 }
 0x113   : > { %4574 = vmatmul.mubr.msk.f32.gmra.mrb[28].mxu0 %vm272_vm1, %v5989_v8  ;;  %4349 = vmatprep.mubr.msk.f32.mxu1 %vm272_vm1, %v6569_v56 }
 0x114   : > { %4576 = vmatprep.mubr.msk.f32.mxu0 %vm272_vm1, %v6111_v9 }
 0x116   : > { %4350 = vmatmul.mubr.msk.f32.gmra.mrb[12].mxu1 %vm272_vm1, %v6570_v59 }
 0x117   : > { %4577 = vmatmul.mubr.msk.f32.gmra.mrb[30].mxu0 %vm272_vm1, %v6122_v11  ;;  %4352 = vmatprep.mubr.msk.f32.mxu1 %vm272_vm1, %v6571_v55 }
 0x118   : > { %4581 = vmatprep.mubr.msk.f32.mxu0 %vm272_vm1, %v5759_v28  ;;  %v6576_v28 = vld [vmem:[#allocation13_spill] sm:$0xff] }
 0x11a   : > { %4353 = vmatmul.mubr.msk.f32.gmra.mrb[14].mxu1 %vm272_vm1, %v6572_v2 }
 0x11b   : > { %4582 = vmatmul.mubr.msk.f32.vlgmr.msra.gmra.mrb[0].mxu0 %vm272_vm1, %v5774_v19  ;;  %4355 = vmatprep.mubr.msk.f32.mxu1 %vm272_vm1, %v6573_v13  ;;  %v6577_v19 = vld [vmem:[#allocation14_spill] sm:$0xff] }
 0x11c   : > { %4584 = vmatprep.mubr.msk.f32.mxu0 %vm272_vm1, %v5777_v23  ;;  %v6578_v23 = vld [vmem:[#allocation15_spill] sm:$0xff]  ;;  %v3402_v13 = vld [vmem:[%s6276_s7 + $0x38] sm:$0xff] }
 0x11e   : > { %4356 = vmatmul.mubr.msk.f32.gmra.mrb[16].mxu1 %vm272_vm1, %v6574_v30 }
 0x11f   : > { %4585 = vmatmul.mubr.msk.f32.gmra.mrb[2].mxu0 %vm272_vm1, %v5790_v0  ;;  %4358 = vmatprep.mubr.msk.f32.mxu1 %vm272_vm1, %v6575_v32  ;;  %v6580_v0 = vld [vmem:[#allocation30_spill] sm:$0xff] }
 0x120   : > { %4587 = vmatprep.mubr.msk.f32.mxu0 %vm272_vm1, %v5793_v4  ;;  %v3086_v4 = vrot.slane %v6580_v0, 1 }
 0x122   : > { %4359 = vmatmul.mubr.msk.f32.gmra.mrb[18].mxu1 %vm272_vm1, %v6576_v28 }
 0x123   : > { %4588 = vmatmul.mubr.msk.f32.gmra.mrb[4].mxu0 %vm272_vm1, %v5806_v46  ;;  %4361 = vmatprep.mubr.msk.f32.mxu1 %vm272_vm1, %v6577_v19 }
 0x124   : > { %4590 = vmatprep.mubr.msk.f32.mxu0 %vm272_vm1, %v5809_v60 }
 0x126   : > { %4362 = vmatmul.mubr.msk.f32.gmra.mrb[20].mxu1 %vm272_vm1, %v6578_v23 }
 0x127   : > { %4591 = vmatmul.mubr.msk.f32.gmra.mrb[6].mxu0 %vm272_vm1, %v6554_v45  ;;  %4364 = vmatprep.mubr.msk.f32.mxu1 %vm272_vm1, %v5485_v20  ;;  %v3395_v45 = vld [vmem:[%s6276_s7] sm:$0xff] }
 0x128   : > { %4593 = vmatprep.mubr.msk.f32.mxu0 %vm272_vm1, %v6555_v21 }
 0x12a   : > { %4365 = vmatmul.mubr.msk.f32.gmra.mrb[22].mxu1 %vm272_vm1, %v5510_v38 }
 0x12b   : > { %4594 = vmatmul.mubr.msk.f32.gmra.mrb[8].mxu0 %vm272_vm1, %v6556_v25  ;;  %4367 = vmatprep.mubr.msk.f32.mxu1 %vm272_vm1, %v5512_v42 }
 0x12c   : > { %4596 = vmatprep.mubr.msk.f32.mxu0 %vm272_vm1, %v6557_v5 }
 0x12e   : > { %4368 = vmatmul.mubr.msk.f32.gmra.mrb[24].mxu1 %vm272_vm1, %v5532_v51 }
 0x12f   : > { %4597 = vmatmul.mubr.msk.f32.gmra.mrb[10].mxu0 %vm272_vm1, %v5854_v54  ;;  %4370 = vmatprep.mubr.msk.f32.mxu1 %vm272_vm1, %v5534_v53 }
 0x130   : > { %4599 = vmatprep.mubr.msk.f32.mxu0 %vm272_vm1, %v5857_v43 }
 0x132   : > { %4371 = vmatmul.mubr.msk.f32.gmra.mrb[26].mxu1 %vm272_vm1, %v5552_v14 }
 0x133   : > { %4600 = vmatmul.mubr.msk.f32.gmra.mrb[12].mxu0 %vm272_vm1, %v5870_v62  ;;  %4373 = vmatprep.mubr.msk.f32.mxu1 %vm272_vm1, %v5554_v22 }
 0x134   : > { %4602 = vmatprep.mubr.msk.f32.mxu0 %vm272_vm1, %v5873_v31 }
 0x136   : > { %4374 = vmatmul.mubr.msk.f32.gmra.mrb[28].mxu1 %vm272_vm1, %v5572_v47 }
 0x137   : > { %4603 = vmatmul.mubr.msk.f32.gmra.mrb[14].mxu0 %vm272_vm1, %v5886_v41  ;;  %4376 = vmatprep.mubr.msk.f32.mxu1 %vm272_vm1, %v5574_v6 }
 0x138   : > { %4605 = vmatprep.mubr.msk.f32.mxu0 %vm272_vm1, %v5889_v26 }
 0x13a   : > { %4377 = vmatmul.mubr.msk.f32.gmra.mrb[30].mxu1 %vm272_vm1, %v5592_v50 }
 0x13b   : > { %4606 = vmatmul.mubr.msk.f32.gmra.mrb[16].mxu0 %vm272_vm1, %v5904_v33  ;;  %4405 = vmatprep.mubr.msk.f32.mxu1 %vm272_vm1, %v6575_v32 }
 0x13c   : > { %4608 = vmatprep.mubr.msk.f32.mxu0 %vm272_vm1, %v5907_v18 }
 0x13e   : > { %4406 = vmatmul.mubr.msk.f32.vlgmr.msra.gmra.mrb[16].mxu1 %vm272_vm1, %v6576_v28  ;;  %v3401_v28 = vld [vmem:[%s6276_s7 + $0x30] sm:$0xff] }
 0x13f   : > { %4609 = vmatmul.mubr.msk.f32.gmra.mrb[18].mxu0 %vm272_vm1, %v5927_v3  ;;  %4408 = vmatprep.mubr.msk.f32.mxu1 %vm272_vm1, %v6577_v19 }
 0x140   : > { %4611 = vmatprep.mubr.msk.f32.mxu0 %vm272_vm1, %v5930_v61 }
 0x142   : > { %4409 = vmatmul.mubr.msk.f32.gmra.mrb[18].mxu1 %vm272_vm1, %v6578_v23 }
 0x143   : > { %4612 = vmatmul.mubr.msk.f32.gmra.mrb[20].mxu0 %vm272_vm1, %v5943_v1  ;;  %4411 = vmatprep.mubr.msk.f32.mxu1 %vm272_vm1, %v5485_v20  ;;  %v6579_v20 = vld [vmem:[#allocation29_spill] sm:$0xff] }
 0x144   : > { %4614 = vmatprep.mubr.msk.f32.mxu0 %vm272_vm1, %v5946_v44  ;;  %v6283_v44 = vld [vmem:[%s6433_s5] ss:$0 sm:$0xff] }
 0x146   : > { %4412 = vmatmul.mubr.msk.f32.gmra.mrb[20].mxu1 %vm272_vm1, %v5510_v38  ;;  %v3085_v38 = vrot.slane %v6579_v20, 1 }
 0x147   : > { %4615 = vmatmul.mubr.msk.f32.gmra.mrb[22].mxu0 %vm272_vm1, %v5959_v36  ;;  %4414 = vmatprep.mubr.msk.f32.mxu1 %vm272_vm1, %v5512_v42  ;;  %v591_v42 = vld [vmem:[#allocation2 + $0x238] sm:$0xff] }
 0x148   : > { %4617 = vmatprep.mubr.msk.f32.mxu0 %vm272_vm1, %v5962_v58 }
 0x14a   : > { %4415 = vmatmul.mubr.msk.f32.gmra.mrb[22].mxu1 %vm272_vm1, %v5532_v51  ;;  %v3088_v51 = vrot.slane %v591_v42, 1  ;;  %v3404_v42 = vld [vmem:[%s6276_s7 + $0x48] sm:$0xff] }
 0x14b   : > { %4618 = vmatmul.mubr.msk.f32.gmra.mrb[24].mxu0 %vm272_vm1, %v5975_v63  ;;  %4417 = vmatprep.mubr.msk.f32.mxu1 %vm272_vm1, %v5534_v53  ;;  %v3087_v53 = vsel %vm2405_vm3, %v3085_v38, %v3086_v4  ;;  %v3396_v63 = vld [vmem:[%s6276_s7 + $0x8] sm:$0xff] }
 0x14c   : > { %4620 = vmatprep.mubr.msk.f32.mxu0 %vm272_vm1, %v5978_v16 }
 0x14e   : > { %4418 = vmatmul.mubr.msk.f32.gmra.mrb[24].mxu1 %vm272_vm1, %v5552_v14  ;;  %v3089_v14 = vsel %vm2405_vm3, %v3086_v4, %v3088_v51 }
 0x14f   : > { %4621 = vmatmul.mubr.msk.f32.gmra.mrb[26].mxu0 %vm272_vm1, %v5989_v8  ;;  %4420 = vmatprep.mubr.msk.f32.mxu1 %vm272_vm1, %v5554_v22 }
 0x150   : > { %4623 = vmatprep.mubr.msk.f32.mxu0 %vm272_vm1, %v6111_v9  ;;  %v3399_v9 = vld [vmem:[%s6276_s7 + $0x20] sm:$0xff] }
 0x152   : > { %4421 = vmatmul.mubr.msk.f32.gmra.mrb[26].mxu1 %vm272_vm1, %v5572_v47 }
 0x153   : > { %4624 = vmatmul.mubr.msk.f32.gmra.mrb[28].mxu0 %vm272_vm1, %v6122_v11  ;;  %4423 = vmatprep.mubr.msk.f32.mxu1 %vm272_vm1, %v5574_v6 }
 0x154   : > { %4626 = vmatprep.mubr.msk.f32.mxu0 %vm272_vm1, %v3087_v53 }
 0x156   : > { %4424 = vmatmul.mubr.msk.f32.gmra.mrb[28].mxu1 %vm272_vm1, %v5592_v50 }
 0x157   : > { %4627 = vmatmul.mubr.msk.f32.gmra.mrb[30].mxu0 %vm272_vm1, %v3089_v14  ;;  %4426 = vmatprep.mubr.msk.f32.mxu1 %vm272_vm1, %v6564_v15  ;;  %v3403_v14 = vld [vmem:[%s6276_s7 + $0x40] sm:$0xff] }
 0x15a   : > { %4427 = vmatmul.mubr.msk.f32.gmra.mrb[30].mxu1 %vm272_vm1, %v6565_v48 }
 0x1d1   : > { %v4333_v22 = vpop.f32.mrb[0].mxu1 }
 0x1d2   : > { %v1666_v47 = vpop.f32.mrb[1].mxu1 }
 0x1d5   : > { %v4336_v46 = vpop.f32.mrb[2].mxu1 }
 0x1d6   : > { %v1676_v6 = vpop.f32.mrb[3].mxu1 }
 0x1d9   : > { %v4339_v60 = vpop.f32.mrb[4].mxu1 }
 0x1da   : > { %v1686_v54 = vpop.f32.mrb[5].mxu1 }
 0x1dd   : > { %v4342_v43 = vpop.f32.mrb[6].mxu1 }
 0x1de   : > { %v1696_v62 = vpop.f32.mrb[7].mxu1 }
 0x1e1   : > { %v4345_v31 = vpop.f32.mrb[8].mxu1 }
 0x1e2   : > { %v1706_v41 = vpop.f32.mrb[9].mxu1 }
 0x1e5   : > { %v6262_v50 = vpop.f32.mrb[10].mxu1 }
 0x1e6   : > { %v6264_v26 = vpop.f32.mrb[11].mxu1 }
 0x1e9   : > { %v6266_v33 = vpop.f32.mrb[12].mxu1 }
 0x1ea   : > { %v6268_v18 = vpop.f32.mrb[13].mxu1 }
 0x1ed   : > { %v6270_v3 = vpop.f32.mrb[14].mxu1 }
 0x1ee   : > { %v6278_v61 = vpop.f32.mrb[15].mxu1  ;;  %v4583_v1 = vpop.f32.mrb[0].mxu0 }
 0x1ef   : > { %v4631_v36 = vadd.f32 %v4583_v1, %v4333_v22  ;;  %v3165_v58 = vpop.f32.mrb[1].mxu0 }
 0x1f0   : > { %v4632_v16 = vadd.f32 %v3165_v58, %v1666_v47 }
 0x1f1   : > { %v3364_v8 = vadd.f32 %v4631_v36, %v6283_v44 }
 0x1f2   : > { %v3363_v21 = vadd.f32 %v4632_v16, %v6283_v44  ;;  %v4586_v25 = vpop.f32.mrb[2].mxu0 }
 0x1f3   : > { %v3428_v5 = vadd.f32 %v3396_v63, %v3364_v8  ;;  %v4633_v37 = vadd.f32 %v4586_v25, %v4336_v46  ;;  %v3175_v7 = vpop.f32.mrb[3].mxu0  ;;  %v3408_v8 = vld [vmem:[%s6276_s7 + $0x68] sm:$0xff] }
 0x1f4   : > { %v3427_v52 = vadd.f32 %v3395_v45, %v3363_v21  ;;  %v4634_v39 = vadd.f32 %v3175_v7, %v1676_v6  ;;  %v3407_v21 = vld [vmem:[%s6276_s7 + $0x60] sm:$0xff] }
 0x1f5   : > { %3460 = vst.msk [vmem:[%s6292_s13 + $0x8] sm:$0xff] %vm272_vm1, %v3428_v5  ;;  %v3366_v12 = vadd.f32 %v4633_v37, %v6283_v44 }
 0x1f6   : > { %3459 = vst.msk [vmem:[%s6292_s13] sm:$0xff] %vm272_vm1, %v3427_v52  ;;  %v3365_v17 = vadd.f32 %v4634_v39, %v6283_v44  ;;  %v4589_v15 = vpop.f32.mrb[4].mxu0 }
 0x1f7   : > { %v3430_v49 = vadd.f32 %v3398_v10, %v3366_v12  ;;  %v4635_v48 = vadd.f32 %v4589_v15, %v4339_v60  ;;  %v3185_v27 = vpop.f32.mrb[5].mxu0  ;;  %v3410_v10 = vld [vmem:[%s6276_s7 + $0x78] sm:$0xff]  ;;  %v3409_v12 = vld [vmem:[%s6276_s7 + $0x70] sm:$0xff] }
 0x1f8   : > { %v3429_v57 = vadd.f32 %v3397_v35, %v3365_v17  ;;  %v4636_v24 = vadd.f32 %v3185_v27, %v1686_v54 }
 0x1f9   : > { %3462 = vst.msk [vmem:[%s6292_s13 + $0x18] sm:$0xff] %vm272_vm1, %v3430_v49  ;;  %v3368_v34 = vadd.f32 %v4635_v48, %v6283_v44 }
 0x1fa   : > { %3461 = vst.msk [vmem:[%s6292_s13 + $0x10] sm:$0xff] %vm272_vm1, %v3429_v57  ;;  %v3367_v29 = vadd.f32 %v4636_v24, %v6283_v44  ;;  %v4592_v56 = vpop.f32.mrb[6].mxu0 }
 0x1fb   : > { %v3432_v11 = vadd.f32 %v3400_v40, %v3368_v34  ;;  %v4637_v59 = vadd.f32 %v4592_v56, %v4342_v43  ;;  %v3195_v55 = vpop.f32.mrb[7].mxu0  ;;  %v3406_v43 = vld [vmem:[%s6276_s7 + $0x58] sm:$0xff]  ;;  %v3412_v40 = vld [vmem:[%s6276_s7 + $0x88] sm:$0xff] }
 0x1fc   : > { %v3431_v2 = vadd.f32 %v3399_v9, %v3367_v29  ;;  %v4638_v30 = vadd.f32 %v3195_v55, %v1696_v62  ;;  %v3411_v29 = vld [vmem:[%s6276_s7 + $0x80] sm:$0xff] }
 0x1fd   : > { %3464 = vst.msk [vmem:[%s6292_s13 + $0x28] sm:$0xff] %vm272_vm1, %v3432_v11  ;;  %v3370_v32 = vadd.f32 %v4637_v59, %v6283_v44 }
 0x1fe   : > { %3463 = vst.msk [vmem:[%s6292_s13 + $0x20] sm:$0xff] %vm272_vm1, %v3431_v2  ;;  %v3369_v19 = vadd.f32 %v4638_v30, %v6283_v44  ;;  %v4595_v23 = vpop.f32.mrb[8].mxu0 }
 0x1ff   : > { %v3434_v20 = vadd.f32 %v3402_v13, %v3370_v32  ;;  %v4639_v38 = vadd.f32 %v4595_v23, %v4345_v31  ;;  %v3205_v0 = vpop.f32.mrb[9].mxu0  ;;  %v3414_v32 = vld [vmem:[%s6276_s7 + $0x98] sm:$0xff] }
 0x200   : > { %v3433_v4 = vadd.f32 %v3401_v28, %v3369_v19  ;;  %v4640_v51 = vadd.f32 %v3205_v0, %v1706_v41  ;;  %v3405_v41 = vld [vmem:[%s6276_s7 + $0x50] sm:$0xff] }
 0x201   : > { %3466 = vst.msk [vmem:[%s6292_s13 + $0x38] sm:$0xff] %vm272_vm1, %v3434_v20  ;;  %v3372_v53 = vadd.f32 %v4639_v38, %v6283_v44  ;;  %v3413_v20 = vld [vmem:[%s6276_s7 + $0x90] sm:$0xff] }
 0x202   : > { %3465 = vst.msk [vmem:[%s6292_s13 + $0x30] sm:$0xff] %vm272_vm1, %v3433_v4  ;;  %v3371_v22 = vadd.f32 %v4640_v51, %v6283_v44  ;;  %v4598_v47 = vpop.f32.mrb[10].mxu0 }
 0x203   : > { %v3436_v46 = vadd.f32 %v3404_v42, %v3372_v53  ;;  %v4641_v6 = vadd.f32 %v4598_v47, %v6262_v50  ;;  %v3215_v60 = vpop.f32.mrb[11].mxu0 }
 0x204   : > { %v3435_v54 = vadd.f32 %v3403_v14, %v3371_v22  ;;  %v4642_v62 = vadd.f32 %v3215_v60, %v6264_v26  ;;  %v3416_v22 = vld [vmem:[%s6276_s7 + $0xa8] sm:$0xff]  ;;  %v3415_v60 = vld [vmem:[%s6276_s7 + $0xa0] sm:$0xff] }
 0x205   : > { %3468 = vst.msk [vmem:[%s6292_s13 + $0x48] sm:$0xff] %vm272_vm1, %v3436_v46  ;;  %v3374_v31 = vadd.f32 %v4641_v6, %v6283_v44 }
 0x206   : > { %3467 = vst.msk [vmem:[%s6292_s13 + $0x40] sm:$0xff] %vm272_vm1, %v3435_v54  ;;  %v3373_v1 = vadd.f32 %v4642_v62, %v6283_v44  ;;  %v4601_v36 = vpop.f32.mrb[12].mxu0 }
 0x207   : > { %v3438_v58 = vadd.f32 %v3406_v43, %v3374_v31  ;;  %v4643_v50 = vadd.f32 %v4601_v36, %v6266_v33  ;;  %v3225_v63 = vpop.f32.mrb[13].mxu0 }
 0x208   : > { %v3437_v16 = vadd.f32 %v3405_v41, %v3373_v1  ;;  %v4644_v26 = vadd.f32 %v3225_v63, %v6268_v18 }
 0x209   : > { %3470 = vst.msk [vmem:[%s6292_s13 + $0x58] sm:$0xff] %vm272_vm1, %v3438_v58  ;;  %v3376_v45 = vadd.f32 %v4643_v50, %v6283_v44  ;;  %v3418_v58 = vld [vmem:[%s6276_s7 + $0xb8] sm:$0xff] }
 0x20a   : > { %3469 = vst.msk [vmem:[%s6292_s13 + $0x50] sm:$0xff] %vm272_vm1, %v3437_v16  ;;  %v3375_v25 = vadd.f32 %v4644_v26, %v6283_v44  ;;  %v4604_v5 = vpop.f32.mrb[14].mxu0 }
 0x20b   : > { %v3440_v33 = vadd.f32 %v3408_v8, %v3376_v45  ;;  %v4645_v37 = vadd.f32 %v4604_v5, %v6270_v3  ;;  %v3235_v7 = vpop.f32.mrb[15].mxu0  ;;  %v3417_v8 = vld [vmem:[%s6276_s7 + $0xb0] sm:$0xff] }
 0x20c   : > { %v3439_v52 = vadd.f32 %v3407_v21, %v3375_v25  ;;  %v4646_v18 = vadd.f32 %v3235_v7, %v6278_v61  ;;  %v3420_v7 = vld [vmem:[%s6276_s7 + $0xc8] sm:$0xff] }
 0x20d   : > { %3472 = vst.msk [vmem:[%s6292_s13 + $0x68] sm:$0xff] %vm272_vm1, %v3440_v33  ;;  %v3378_v39 = vadd.f32 %v4645_v37, %v6283_v44 }
 0x20e   : > { %3471 = vst.msk [vmem:[%s6292_s13 + $0x60] sm:$0xff] %vm272_vm1, %v3439_v52  ;;  %v3377_v35 = vadd.f32 %v4646_v18, %v6283_v44  ;;  %v4607_v17 = vpop.f32.mrb[16].mxu0 }
 0x20f   : > { %v3442_v15 = vadd.f32 %v3410_v10, %v3378_v39  ;;  %v3245_v3 = vpop.f32.mrb[17].mxu0  ;;  %v3419_v39 = vld [vmem:[%s6276_s7 + $0xc0] sm:$0xff] }
 0x210   : > { %v3441_v49 = vadd.f32 %v3409_v12, %v3377_v35 }
 0x211   : > { %3474 = vst.msk [vmem:[%s6292_s13 + $0x78] sm:$0xff] %vm272_vm1, %v3442_v15  ;;  %v4407_v48 = vpop.f32.mrb[16].mxu1 }
 0x212   : > { %3473 = vst.msk [vmem:[%s6292_s13 + $0x70] sm:$0xff] %vm272_vm1, %v3441_v49  ;;  %v4647_v61 = vadd.f32 %v4607_v17, %v4407_v48  ;;  %v2012_v27 = vpop.f32.mrb[17].mxu1  ;;  %v4610_v57 = vpop.f32.mrb[18].mxu0 }
 0x213   : > { %v4648_v24 = vadd.f32 %v3245_v3, %v2012_v27  ;;  %v3255_v34 = vpop.f32.mrb[19].mxu0 }
 0x214   : > { %v3380_v9 = vadd.f32 %v4647_v61, %v6283_v44  ;;  %v3422_v61 = vld [vmem:[%s6276_s7 + $0xd8] sm:$0xff] }
 0x215   : > { %v3379_v56 = vadd.f32 %v4648_v24, %v6283_v44  ;;  %v4410_v11 = vpop.f32.mrb[18].mxu1  ;;  %v3421_v24 = vld [vmem:[%s6276_s7 + $0xd0] sm:$0xff] }
 0x216   : > { %v3444_v59 = vadd.f32 %v3412_v40, %v3380_v9  ;;  %v4649_v55 = vadd.f32 %v4610_v57, %v4410_v11  ;;  %v2022_v2 = vpop.f32.mrb[19].mxu1  ;;  %v4613_v13 = vpop.f32.mrb[20].mxu0 }
 0x217   : > { %v3443_v30 = vadd.f32 %v3411_v29, %v3379_v56  ;;  %v4650_v28 = vadd.f32 %v3255_v34, %v2022_v2  ;;  %v3265_v19 = vpop.f32.mrb[21].mxu0  ;;  %v3424_v2 = vld [vmem:[%s6276_s7 + $0xe8] sm:$0xff] }
 0x218   : > { %3476 = vst.msk [vmem:[%s6292_s13 + $0x88] sm:$0xff] %vm272_vm1, %v3444_v59  ;;  %v3382_v23 = vadd.f32 %v4649_v55, %v6283_v44 }
 0x219   : > { %3475 = vst.msk [vmem:[%s6292_s13 + $0x80] sm:$0xff] %vm272_vm1, %v3443_v30  ;;  %v3381_v38 = vadd.f32 %v4650_v28, %v6283_v44  ;;  %v4413_v0 = vpop.f32.mrb[20].mxu1  ;;  %v3423_v28 = vld [vmem:[%s6276_s7 + $0xe0] sm:$0xff] }
 0x21a   : > { %v3446_v4 = vadd.f32 %v3414_v32, %v3382_v23  ;;  %v4651_v42 = vadd.f32 %v4613_v13, %v4413_v0  ;;  %v2032_v51 = vpop.f32.mrb[21].mxu1  ;;  %v4616_v53 = vpop.f32.mrb[22].mxu0 }
 0x21b   : > { %v3445_v14 = vadd.f32 %v3413_v20, %v3381_v38  ;;  %v4652_v47 = vadd.f32 %v3265_v19, %v2032_v51  ;;  %v3275_v46 = vpop.f32.mrb[23].mxu0 }
 0x21c   : > { %3478 = vst.msk [vmem:[%s6292_s13 + $0x98] sm:$0xff] %vm272_vm1, %v3446_v4  ;;  %v3384_v6 = vadd.f32 %v4651_v42, %v6283_v44  ;;  %v3426_v42 = vld [vmem:[%s6276_s7 + $0xf8] sm:$0xff] }
 0x21d   : > { %3477 = vst.msk [vmem:[%s6292_s13 + $0x90] sm:$0xff] %vm272_vm1, %v3445_v14  ;;  %v3383_v54 = vadd.f32 %v4652_v47, %v6283_v44  ;;  %v4416_v43 = vpop.f32.mrb[22].mxu1  ;;  %v3425_v14 = vld [vmem:[%s6276_s7 + $0xf0] sm:$0xff] }
 0x21e   : > { %v3448_v62 = vadd.f32 %v3416_v22, %v3384_v6  ;;  %v4653_v31 = vadd.f32 %v4616_v53, %v4416_v43  ;;  %v2042_v41 = vpop.f32.mrb[23].mxu1  ;;  %v4619_v1 = vpop.f32.mrb[24].mxu0 }
 0x21f   : > { %v3447_v36 = vadd.f32 %v3415_v60, %v3383_v54  ;;  %v4654_v50 = vadd.f32 %v3275_v46, %v2042_v41  ;;  %v3285_v63 = vpop.f32.mrb[25].mxu0 }
 0x220   : > { %3480 = vst.msk [vmem:[%s6292_s13 + $0xa8] sm:$0xff] %vm272_vm1, %v3448_v62  ;;  %v3386_v16 = vadd.f32 %v4653_v31, %v6283_v44 }
 0x221   : > { %3479 = vst.msk [vmem:[%s6292_s13 + $0xa0] sm:$0xff] %vm272_vm1, %v3447_v36  ;;  %v3385_v26 = vadd.f32 %v4654_v50, %v6283_v44  ;;  %v4419_v45 = vpop.f32.mrb[24].mxu1 }
 0x222   : > { %v3450_v21 = vadd.f32 %v3418_v58, %v3386_v16  ;;  %v4655_v25 = vadd.f32 %v4619_v1, %v4419_v45  ;;  %v2052_v5 = vpop.f32.mrb[25].mxu1  ;;  %v4622_v33 = vpop.f32.mrb[26].mxu0 }
 0x223   : > { %v3449_v37 = vadd.f32 %v3417_v8, %v3385_v26  ;;  %v4656_v52 = vadd.f32 %v3285_v63, %v2052_v5  ;;  %v3295_v10 = vpop.f32.mrb[27].mxu0 }
 0x224   : > { %3482 = vst.msk [vmem:[%s6292_s13 + $0xb8] sm:$0xff] %vm272_vm1, %v3450_v21  ;;  %v3388_v18 = vadd.f32 %v4655_v25, %v6283_v44 }
 0x225   : > { %3481 = vst.msk [vmem:[%s6292_s13 + $0xb0] sm:$0xff] %vm272_vm1, %v3449_v37  ;;  %v3387_v12 = vadd.f32 %v4656_v52, %v6283_v44  ;;  %v4422_v35 = vpop.f32.mrb[26].mxu1 }
 0x226   : > { %v3452_v17 = vadd.f32 %v3420_v7, %v3388_v18  ;;  %v4657_v15 = vadd.f32 %v4622_v33, %v4422_v35  ;;  %v2062_v3 = vpop.f32.mrb[27].mxu1  ;;  %v4625_v49 = vpop.f32.mrb[28].mxu0 }
 0x227   : > { %v3451_v48 = vadd.f32 %v3419_v39, %v3387_v12  ;;  %v4658_v27 = vadd.f32 %v3295_v10, %v2062_v3  ;;  %v3305_v57 = vpop.f32.mrb[29].mxu0 }
 0x228   : > { %3484 = vst.msk [vmem:[%s6292_s13 + $0xc8] sm:$0xff] %vm272_vm1, %v3452_v17  ;;  %v3390_v40 = vadd.f32 %v4657_v15, %v6283_v44 }
 0x229   : > { %3483 = vst.msk [vmem:[%s6292_s13 + $0xc0] sm:$0xff] %vm272_vm1, %v3451_v48  ;;  %v3389_v34 = vadd.f32 %v4658_v27, %v6283_v44  ;;  %v4425_v9 = vpop.f32.mrb[28].mxu1 }
 0x22a   : > { %v3454_v29 = vadd.f32 %v3422_v61, %v3390_v40  ;;  %v4659_v56 = vadd.f32 %v4625_v49, %v4425_v9  ;;  %v2072_v11 = vpop.f32.mrb[29].mxu1  ;;  %v4628_v59 = vpop.f32.mrb[30].mxu0 }
 0x22b   : > { %v3453_v55 = vadd.f32 %v3421_v24, %v3389_v34  ;;  %v4660_v13 = vadd.f32 %v3305_v57, %v2072_v11  ;;  %v3315_v30 = vpop.f32.mrb[31].mxu0 }
 0x22c   : > { %3486 = vst.msk [vmem:[%s6292_s13 + $0xd8] sm:$0xff] %vm272_vm1, %v3454_v29  ;;  %v3392_v32 = vadd.f32 %v4659_v56, %v6283_v44 }
 0x22d   : > { %3485 = vst.msk [vmem:[%s6292_s13 + $0xd0] sm:$0xff] %vm272_vm1, %v3453_v55  ;;  %v3391_v19 = vadd.f32 %v4660_v13, %v6283_v44  ;;  %v4428_v23 = vpop.f32.mrb[30].mxu1 }
 0x22e   : > { %v3456_v20 = vadd.f32 %v3424_v2, %v3392_v32  ;;  %v4661_v38 = vadd.f32 %v4628_v59, %v4428_v23  ;;  %v2082_v0 = vpop.f32.mrb[31].mxu1 }
 0x22f   : > { %v3455_v4 = vadd.f32 %v3423_v28, %v3391_v19  ;;  %v4662_v51 = vadd.f32 %v3315_v30, %v2082_v0 }
 0x230   : > { %3488 = vst.msk [vmem:[%s6292_s13 + $0xe8] sm:$0xff] %vm272_vm1, %v3456_v20  ;;  %v3394_v53 = vadd.f32 %v4661_v38, %v6283_v44 }
 0x231   : > { %3487 = vst.msk [vmem:[%s6292_s13 + $0xe0] sm:$0xff] %vm272_vm1, %v3455_v4  ;;  %v3393_v22 = vadd.f32 %v4662_v51, %v6283_v44 }
 0x232   : > { %v3458_v47 = vadd.f32 %v3426_v42, %v3394_v53 }
 0x233   : > { %v3457_v46 = vadd.f32 %v3425_v14, %v3393_v22 }
 0x234   : > { %3490 = vst.msk [vmem:[%s6292_s13 + $0xf8] sm:$0xff] %vm272_vm1, %v3458_v47 }
 0x235   : > { %3489 = vst.msk [vmem:[%s6292_s13 + $0xf0] sm:$0xff] %vm272_vm1, %v3457_v46 }
 0x236 PF: > { %s16_s21 = sadd.s32 1, %s4910_s21  }
 0x237   : > { %p13_p4 = scmp.ge.s32.totalorder %s16_s21, 4  }
 0x239   :  { %15 = sbr.rel (!%p13_p4) target bundleno = 1 (0x1), region = 86 }

// kernel: decoder_block_forward.4
= control target key start
LH: loop header
LB: loop body
LE: loop exit
PB: predicated region body
PF: predicated region fallthrough
CT: control target
= control target key end

     0   :  { %s11027_s18 = smov 0   ;;  %s14236_s0 = inlined_call_operand.vmem [shape: f32[2,16,16,8], index: 0, kind: input, shape index: {}]   ;;  %s14237_s1 = inlined_call_operand.vmem [shape: f32[2,16,16,4], index: 1, kind: input, shape index: {}]   ;;  %s14238_s2 = inlined_call_operand.vmem [shape: f32[1,8], index: 2, kind: input, shape index: {}]   ;;  %s14239_s3 = inlined_call_operand.vmem [shape: f32[1,8], index: 3, kind: input, shape index: {}]   ;;  %s14240_s4 = inlined_call_operand.vmem [shape: f32[1,4], index: 4, kind: input, shape index: {}]   ;;  %s14241_s5 = inlined_call_operand.vmem [shape: f32[1,4], index: 5, kind: input, shape index: {}]   ;;  %s14242_s6 = inlined_call_operand.vmem [shape: f32[3,3,8,4], index: 6, kind: input, shape index: {}]   ;;  %s14243_s7 = inlined_call_operand.vmem [shape: f32[3,3,4,4], index: 7, kind: input, shape index: {}]   ;;  %s14244_s8 = inlined_call_operand.vmem [shape: f32[1,4], index: 8, kind: input, shape index: {}]   ;;  %s14245_s9 = inlined_call_operand.vmem [shape: f32[8,4], index: 9, kind: input, shape index: {}]   ;;  %s14246_s10 = inlined_call_operand.vmem [shape: f32[4,4], index: 10, kind: input, shape index: {}]   ;;  %s14247_s11 = inlined_call_operand.vmem [shape: f32[1,4], index: 11, kind: input, shape index: {}]   ;;  %s14248_s12 = inlined_call_operand.vmem [shape: f32[2,16,16,4], index: 12, kind: output, shape index: {0}]   ;;  %s14249_s13 = inlined_call_operand.vmem [shape: f32[2,16,16,4], index: 13, kind: output, shape index: {1}]   ;;  %s14250_s14 = inlined_call_operand.vmem [shape: f32[2,1,4], index: 14, kind: output, shape index: {2}]   ;;  %s14251_s15 = inlined_call_operand.vmem [shape: f32[2,1,4], index: 15, kind: output, shape index: {3}]  }
   0x1 LB: > { %s7858_s19 = sadd.s32 4294967295, %s10944_s18   ;;  %p7862_p0 = scmp.ge.s32.totalorder %s10944_s18, 1  ;;  %s10944_s18 = sphi %s11027_s18, %s26_s18  }
   0x2   : > { %p454_p1 = scmp.lt.s32.totalorder %s10944_s18, 3 }
   0x4   : > { %p455_p2 = pnand %p7862_p0, %p454_p1 }
   0x6   : > { %458 = sbr.rel (%p455_p2) target bundleno = 972 (0x3cc), region = 68 }
   0xd   : > { %v11038_v0 = vld [vmem:[%s14243_s7] sm:$0xf]  ;;  %vm1507_vm0 = vcmask 1043456   ;;  %vm681_vm1 = vcmask 31744   ;;  %v10946_v2 = vmov 0.0   ;;  %p11194_p3 = scmp.lt.s32.totalorder %s7858_s19, 1 }
   0xe   : > { %v11043_v1 = vld [vmem:[%s14242_s6 + $0x20] sm:$0xff]  ;;  %9209 = vmatprep.subr.msk.mxu1 %vm1507_vm0, %v11038_v0  ;;  %682 = vst.msk [vmem:[#allocation3] sm:$0xff] %vm681_vm1, %v10946_v2  ;;  %683 = vst.msk [vmem:[#allocation3 + $0x8] sm:$0xff] %vm681_vm1, %v10946_v2  ;;  %vm608_vm2 = vcmask 64512   ;;  %v11353_v4 = vld [vmem:[%s14243_s7 + $0x10] sm:$0xf] }
   0xf   : > { %9609 = vmatprep.subr.mxu0 %v11043_v1  ;;  %684 = vst.msk [vmem:[#allocation3 + $0x10] sm:$0xff] %vm681_vm1, %v10946_v2  ;;  %685 = vst.msk [vmem:[#allocation3 + $0x18] sm:$0xff] %vm681_vm1, %v10946_v2  ;;  %v11201_v3 = vld [vmem:[%s14242_s6] sm:$0xff]  ;;  %9210 = vmatpush3.msk.msra.mxu1 %vm1507_vm0, %v11038_v0  ;;  %s14729_s19 = smov (!%p11194_p3, %s7858_s19), 1  ;;  %vm1232_vm3 = vcmask 1040384   ;;  %v7940_v40 = vld [vmem:[%s14242_s6 + $0x18] sm:$0xff] }
  0x10   : > { %686 = vst.msk [vmem:[#allocation3 + $0x20] sm:$0xff] %vm681_vm1, %v10946_v2  ;;  %687 = vst.msk [vmem:[#allocation3 + $0x28] sm:$0xff] %vm681_vm1, %v10946_v2  ;;  %9610 = vmatpush3.msra.mxu0 %v11043_v1  ;;  %9259 = vmatprep.subr.mxu1 %v11201_v3  ;;  %s11365_s29 = sshll.u32 %s14729_s19, 8  ;;  %v11370_v5 = vld [vmem:[%s14238_s2] ss:$0 sm:$0xff]  ;;  %vm4838_vm4 = vcmask 1046528   ;;  %s540_s27 = scalar_lea.vmem %s14250_s14, %s14729_s19 }
  0x11   : > { %688 = vst.msk [vmem:[#allocation3 + $0x30] sm:$0xff] %vm681_vm1, %v10946_v2  ;;  %689 = vst.msk [vmem:[#allocation3 + $0x38] sm:$0xff] %vm681_vm1, %v10946_v2  ;;  %9659 = vmatprep.subr.msk.mxu0 %vm1507_vm0, %v11353_v4  ;;  %v11375_v6 = vld [vmem:[%s14240_s4] ss:$0 sm:$0xff]  ;;  %s11381_s23 = scalar_lea.vmem %s14236_s0, %s11365_s29  ;;  %s11392_s28 = scalar_lea.vmem %s14237_s1, %s11365_s29  ;;  %vm6886_vm5 = vcmask 24576  }
  0x12   : > { %690 = vst.msk [vmem:[#allocation3 + $0x40] sm:$0xff] %vm681_vm1, %v10946_v2  ;;  %691 = vst.msk [vmem:[#allocation3 + $0x48] sm:$0xff] %vm681_vm1, %v10946_v2  ;;  %v11386_v7 = vld [vmem:[%s14239_s3] ss:$0 sm:$0xff]  ;;  %v545_v10 = vld [vmem:[%s11381_s23 + $0x8] sm:$0xff]  ;;  %s13933_s21 = scalar_lea.vmem %s14249_s13, %s11365_s29  ;;  %s13940_s25 = scalar_lea.vmem %s14248_s12, %s11365_s29 }
  0x13   : > { %692 = vst.msk [vmem:[#allocation3 + $0x50] sm:$0xff] %vm681_vm1, %v10946_v2  ;;  %693 = vst.msk [vmem:[#allocation3 + $0x58] sm:$0xff] %vm681_vm1, %v10946_v2  ;;  %v11397_v8 = vld [vmem:[%s14241_s5] ss:$0 sm:$0xff]  ;;  %v762_v16 = vmul.f32 %v11370_v5, %v545_v10  ;;  %v577_v21 = vld [vmem:[%s11392_s28 + $0x8] sm:$0xff]  ;;  %s543_s30 = scalar_lea.vmem %s14251_s15, %s14729_s19 }
  0x14   : > { %694 = vst.msk [vmem:[#allocation3 + $0x60] sm:$0xff] %vm681_vm1, %v10946_v2  ;;  %695 = vst.msk [vmem:[#allocation3 + $0x68] sm:$0xff] %vm681_vm1, %v10946_v2  ;;  %v544_v9 = vld [vmem:[%s11381_s23] sm:$0xff]  ;;  %v546_v22 = vld [vmem:[%s11381_s23 + $0x10] sm:$0xff]  ;;  %v905_v30 = vmul.f32 %v11375_v6, %v577_v21 }
  0x15   : > { %696 = vst.msk [vmem:[#allocation3 + $0x70] sm:$0xff] %vm681_vm1, %v10946_v2  ;;  %697 = vst.msk [vmem:[#allocation3 + $0x78] sm:$0xff] %vm681_vm1, %v10946_v2  ;;  %v576_v11 = vld [vmem:[%s11392_s28] sm:$0xff]  ;;  %v1113_v13 = vld [vmem:[#allocation3 + $0x8] sm:$0xff]  ;;  %v761_v15 = vmul.f32 %v11370_v5, %v544_v9  ;;  %v801_v24 = vadd.f32 %v11386_v7, %v762_v16  ;;  %v763_v31 = vmul.f32 %v11370_v5, %v546_v22 }
  0x16   : > { %698 = vst.msk [vmem:[#allocation3 + $0x80] sm:$0xff] %vm681_vm1, %v10946_v2  ;;  %699 = vst.msk [vmem:[#allocation3 + $0x88] sm:$0xff] %vm681_vm1, %v10946_v2  ;;  %v1112_v12 = vld [vmem:[#allocation3] sm:$0xff]  ;;  %v1114_v14 = vld [vmem:[#allocation3 + $0x10] sm:$0xff]  ;;  %v904_v17 = vmul.f32 %v11375_v6, %v576_v11  ;;  %v1363_v19 = vrot.slane %v1113_v13, 7  ;;  %v944_v41 = vadd.f32 %v11397_v8, %v905_v30 }
  0x17   : > { %700 = vst.msk [vmem:[#allocation3 + $0x90] sm:$0xff] %vm681_vm1, %v10946_v2  ;;  %701 = vst.msk [vmem:[#allocation3 + $0x98] sm:$0xff] %vm681_vm1, %v10946_v2  ;;  %v1362_v18 = vrot.slane %v1112_v12, 7  ;;  %v1365_v20 = vrot.slane %v1114_v14, 7  ;;  %v800_v23 = vadd.f32 %v11386_v7, %v761_v15  ;;  %v547_v26 = vld [vmem:[%s11381_s23 + $0x18] sm:$0xff]  ;;  %v578_v27 = vld [vmem:[%s11392_s28 + $0x10] sm:$0xff]  ;;  %v802_v42 = vadd.f32 %v11386_v7, %v763_v31 }
  0x18   : > { %702 = vst.msk [vmem:[#allocation3 + $0xa0] sm:$0xff] %vm681_vm1, %v10946_v2  ;;  %703 = vst.msk [vmem:[#allocation3 + $0xa8] sm:$0xff] %vm681_vm1, %v10946_v2  ;;  %v943_v25 = vadd.f32 %v11397_v8, %v904_v17  ;;  %v579_v32 = vld [vmem:[%s11392_s28 + $0x18] sm:$0xff]  ;;  %v548_v33 = vld [vmem:[%s11381_s23 + $0x20] sm:$0xff]  ;;  %v833_v36 = vmax.f32 %v801_v24, 0.0  ;;  %v764_v38 = vmul.f32 %v11370_v5, %v547_v26  ;;  %v906_v43 = vmul.f32 %v11375_v6, %v578_v27 }
  0x19   : > { %704 = vst.msk [vmem:[#allocation3 + $0xb0] sm:$0xff] %vm681_vm1, %v10946_v2  ;;  %705 = vst.msk [vmem:[#allocation3 + $0xb8] sm:$0xff] %vm681_vm1, %v10946_v2  ;;  %v1364_v28 = vsel %vm1232_vm3, %v1362_v18, %v1363_v19  ;;  %v1366_v29 = vsel %vm1232_vm3, %v1363_v19, %v1365_v20  ;;  %v549_v34 = vld [vmem:[%s11381_s23 + $0x28] sm:$0xff]  ;;  %v832_v35 = vmax.f32 %v800_v23, 0.0  ;;  %v580_v39 = vld [vmem:[%s11392_s28 + $0x20] sm:$0xff]  ;;  %v907_v45 = vmul.f32 %v11375_v6, %v579_v32 }
  0x1a   : > { %706 = vst.msk [vmem:[#allocation3 + $0xc0] sm:$0xff] %vm681_vm1, %v10946_v2  ;;  %707 = vst.msk [vmem:[#allocation3 + $0xc8] sm:$0xff] %vm681_vm1, %v10946_v2  ;;  %9211 = vmatprep.mubr.msk.f32.mxu1 %vm681_vm1, %v1364_v28  ;;  %v975_v37 = vmax.f32 %v943_v25, 0.0  ;;  %v803_v44 = vadd.f32 %v11386_v7, %v764_v38  ;;  %v765_v46 = vmul.f32 %v11370_v5, %v548_v33  ;;  %v581_v48 = vld [vmem:[%s11392_s28 + $0x28] sm:$0xff]  ;;  %v976_v49 = vmax.f32 %v944_v41, 0.0  ;;  %v550_v53 = vld [vmem:[%s11381_s23 + $0x30] sm:$0xff] }
  0x1b   : > { %708 = vst.msk [vmem:[#allocation3 + $0xd0] sm:$0xff] %vm681_vm1, %v10946_v2  ;;  %709 = vst.msk [vmem:[#allocation3 + $0xd8] sm:$0xff] %vm681_vm1, %v10946_v2  ;;  %9212 = vmatmul.mubr.msk.f32.vlgmr.msra.gmra.mrb[0].mxu1 %vm681_vm1, %v1366_v29  ;;  %v766_v47 = vmul.f32 %v11370_v5, %v549_v34  ;;  %v834_v50 = vmax.f32 %v802_v42, 0.0  ;;  %v945_v51 = vadd.f32 %v11397_v8, %v906_v43  ;;  %v551_v58 = vld [vmem:[%s11381_s23 + $0x38] sm:$0xff]  ;;  %v582_v59 = vld [vmem:[%s11392_s28 + $0x30] sm:$0xff] }
  0x1c   : > { %710 = vst.msk [vmem:[#allocation3 + $0xe0] sm:$0xff] %vm681_vm1, %v10946_v2  ;;  %711 = vst.msk [vmem:[#allocation3 + $0xe8] sm:$0xff] %vm681_vm1, %v10946_v2  ;;  %9260 = vmatpush3.msra.mxu1 %v11201_v3  ;;  %v908_v52 = vmul.f32 %v11375_v6, %v580_v39  ;;  %v835_v54 = vmax.f32 %v803_v44, 0.0  ;;  %v946_v55 = vadd.f32 %v11397_v8, %v907_v45  ;;  %v1116_v60 = vld [vmem:[#allocation3 + $0x20] sm:$0xff]  ;;  %v583_v0 = vld [vmem:[%s11392_s28 + $0x38] sm:$0xff] }
  0x1d   : > { %712 = vst.msk [vmem:[#allocation3 + $0xf0] sm:$0xff] %vm681_vm1, %v10946_v2  ;;  %713 = vst.msk [vmem:[#allocation3 + $0xf8] sm:$0xff] %vm681_vm1, %v10946_v2  ;;  %9309 = vmatprep.subr.mxu1 %v7940_v40  ;;  %v804_v56 = vadd.f32 %v11386_v7, %v765_v46  ;;  %v805_v57 = vadd.f32 %v11386_v7, %v766_v47  ;;  %v977_v61 = vmax.f32 %v945_v51, 0.0  ;;  %v552_v1 = vld [vmem:[%s11381_s23 + $0x40] sm:$0xff]  ;;  %v553_v11 = vld [vmem:[%s11381_s23 + $0x48] sm:$0xff]  ;;  %v1367_v17 = vrot.slane %v1116_v60, 7 }
  0x1e   : > { %714 = vst.msk [vmem:[#allocation3 + $0x100] sm:$0xff] %vm681_vm1, %v10946_v2  ;;  %715 = vst.msk [vmem:[#allocation3 + $0x108] sm:$0xff] %vm681_vm1, %v10946_v2  ;;  %v947_v62 = vadd.f32 %v11397_v8, %v908_v52  ;;  %v909_v63 = vmul.f32 %v11375_v6, %v581_v48  ;;  %v767_v10 = vmul.f32 %v11370_v5, %v550_v53  ;;  %v11456_v12 = vld [vmem:[#allocation3 + $0x40] sm:$0xff]  ;;  %v585_v31 = vld [vmem:[%s11392_s28 + $0x48] sm:$0xff] }
  0x1f   : > { %716 = vst.msk [vmem:[#allocation3 + $0x110] sm:$0xff] %vm681_vm1, %v10946_v2  ;;  %717 = vst.msk [vmem:[#allocation3 + $0x118] sm:$0xff] %vm681_vm1, %v10946_v2  ;;  %v836_v3 = vmax.f32 %v804_v56, 0.0  ;;  %v837_v9 = vmax.f32 %v805_v57, 0.0  ;;  %v768_v15 = vmul.f32 %v11370_v5, %v551_v58  ;;  %v910_v16 = vmul.f32 %v11375_v6, %v582_v59  ;;  %v584_v21 = vld [vmem:[%s11392_s28 + $0x40] sm:$0xff]  ;;  %v11487_v32 = vld [vmem:[%s14242_s6 + $0x38] sm:$0xff] }
  0x20   : > { %718 = vst.msk [vmem:[#allocation3 + $0x120] sm:$0xff] %vm681_vm1, %v10946_v2  ;;  %719 = vst.msk [vmem:[#allocation3 + $0x128] sm:$0xff] %vm681_vm1, %v10946_v2  ;;  %v979_v13 = vmax.f32 %v947_v62, 0.0  ;;  %v948_v14 = vadd.f32 %v11397_v8, %v909_v63  ;;  %v806_v18 = vadd.f32 %v11386_v7, %v767_v10  ;;  %v911_v19 = vmul.f32 %v11375_v6, %v583_v0  ;;  %v11481_v30 = vld [vmem:[#allocation3 + $0x60] sm:$0xff]  ;;  %v554_v43 = vld [vmem:[%s11381_s23 + $0x50] sm:$0xff] }
  0x21   : > { %720 = vst.msk [vmem:[#allocation3 + $0x130] sm:$0xff] %vm681_vm1, %v10946_v2  ;;  %721 = vst.msk [vmem:[#allocation3 + $0x138] sm:$0xff] %vm681_vm1, %v10946_v2  ;;  %v769_v20 = vmul.f32 %v11370_v5, %v552_v1  ;;  %v807_v26 = vadd.f32 %v11386_v7, %v768_v15  ;;  %v949_v27 = vadd.f32 %v11397_v8, %v910_v16  ;;  %v1372_v29 = vrot.slane %v11456_v12, 7  ;;  %v555_v48 = vld [vmem:[%s11381_s23 + $0x58] sm:$0xff]  ;;  %v11535_v59 = vld [vmem:[#allocation3 + $0x80] sm:$0xff] }
  0x22   : > { %722 = vst.msk [vmem:[#allocation3 + $0x140] sm:$0xff] %vm681_vm1, %v10946_v2  ;;  %723 = vst.msk [vmem:[#allocation3 + $0x148] sm:$0xff] %vm681_vm1, %v10946_v2  ;;  %v980_v25 = vmax.f32 %v948_v14, 0.0  ;;  %v770_v28 = vmul.f32 %v11370_v5, %v553_v11  ;;  %v838_v34 = vmax.f32 %v806_v18, 0.0  ;;  %v950_v39 = vadd.f32 %v11397_v8, %v911_v19  ;;  %v556_v14 = vld [vmem:[%s11381_s23 + $0x60] sm:$0xff]  ;;  %v557_v15 = vld [vmem:[%s11381_s23 + $0x68] sm:$0xff] }
  0x23   : > { %724 = vst.msk [vmem:[#allocation3 + $0x150] sm:$0xff] %vm681_vm1, %v10946_v2  ;;  %725 = vst.msk [vmem:[#allocation3 + $0x158] sm:$0xff] %vm681_vm1, %v10946_v2  ;;  %v808_v40 = vadd.f32 %v11386_v7, %v769_v20  ;;  %v912_v42 = vmul.f32 %v11375_v6, %v584_v21  ;;  %v1377_v46 = vrot.slane %v11481_v30, 7  ;;  %v913_v47 = vmul.f32 %v11375_v6, %v585_v31  ;;  %v588_v21 = vld [vmem:[%s11392_s28 + $0x60] sm:$0xff]  ;;  %v589_v30 = vld [vmem:[%s11392_s28 + $0x68] sm:$0xff] }
  0x24   : > { %726 = vst.msk [vmem:[#allocation3 + $0x160] sm:$0xff] %vm681_vm1, %v10946_v2  ;;  %727 = vst.msk [vmem:[#allocation3 + $0x168] sm:$0xff] %vm681_vm1, %v10946_v2  ;;  %v809_v41 = vadd.f32 %v11386_v7, %v770_v28  ;;  %v982_v51 = vmax.f32 %v950_v39, 0.0  ;;  %v1382_v18 = vrot.slane %v11535_v59, 7  ;;  %v558_v31 = vld [vmem:[%s11381_s23 + $0x70] sm:$0xff] }
  0x25   : > { %728 = vst.msk [vmem:[#allocation3 + $0x170] sm:$0xff] %vm681_vm1, %v10946_v2  ;;  %729 = vst.msk [vmem:[#allocation3 + $0x178] sm:$0xff] %vm681_vm1, %v10946_v2  ;;  %v840_v52 = vmax.f32 %v808_v40, 0.0  ;;  %v952_v60 = vadd.f32 %v11397_v8, %v913_v47  ;;  %v773_v40 = vmul.f32 %v11370_v5, %v556_v14 }
  0x26   : > { %730 = vst.msk [vmem:[#allocation3 + $0x180] sm:$0xff] %vm681_vm1, %v10946_v2  ;;  %731 = vst.msk [vmem:[#allocation3 + $0x188] sm:$0xff] %vm681_vm1, %v10946_v2  ;;  %v841_v53 = vmax.f32 %v809_v41, 0.0  ;;  %v774_v41 = vmul.f32 %v11370_v5, %v557_v15 }
  0x27   : > { %732 = vst.msk [vmem:[#allocation3 + $0x190] sm:$0xff] %vm681_vm1, %v10946_v2  ;;  %733 = vst.msk [vmem:[#allocation3 + $0x198] sm:$0xff] %vm681_vm1, %v10946_v2  ;;  %v984_v12 = vmax.f32 %v952_v60, 0.0  ;;  %v11623_v60 = vld [vmem:[#allocation3 + $0xc0] sm:$0xff] }
  0x28   : > { %734 = vst.msk [vmem:[#allocation3 + $0x1a0] sm:$0xff] %vm681_vm1, %v10946_v2  ;;  %735 = vst.msk [vmem:[#allocation3 + $0x1a8] sm:$0xff] %vm681_vm1, %v10946_v2 }
  0x29   : > { %736 = vst.msk [vmem:[#allocation3 + $0x1b0] sm:$0xff] %vm681_vm1, %v10946_v2  ;;  %737 = vst.msk [vmem:[#allocation3 + $0x1b8] sm:$0xff] %vm681_vm1, %v10946_v2 }
  0x2a   : > { %738 = vst.msk [vmem:[#allocation3 + $0x1c0] sm:$0xff] %vm681_vm1, %v10946_v2  ;;  %739 = vst.msk [vmem:[#allocation3 + $0x1c8] sm:$0xff] %vm681_vm1, %v10946_v2 }
  0x2b   : > { %740 = vst.msk [vmem:[#allocation3 + $0x1d0] sm:$0xff] %vm681_vm1, %v10946_v2  ;;  %741 = vst.msk [vmem:[#allocation3 + $0x1d8] sm:$0xff] %vm681_vm1, %v10946_v2 }
  0x2c   : > { %742 = vst.msk [vmem:[#allocation3 + $0x1e0] sm:$0xff] %vm681_vm1, %v10946_v2  ;;  %743 = vst.msk [vmem:[#allocation3 + $0x1e8] sm:$0xff] %vm681_vm1, %v10946_v2 }
  0x2d   : > { %744 = vst.msk [vmem:[#allocation3 + $0x1f0] sm:$0xff] %vm681_vm1, %v10946_v2  ;;  %745 = vst.msk [vmem:[#allocation3 + $0x1f8] sm:$0xff] %vm681_vm1, %v10946_v2 }
  0x2e   : > { %746 = vst.msk [vmem:[#allocation3 + $0x200] sm:$0xff] %vm681_vm1, %v10946_v2  ;;  %747 = vst.msk [vmem:[#allocation3 + $0x208] sm:$0xff] %vm681_vm1, %v10946_v2 }
  0x2f   : > { %748 = vst.msk [vmem:[#allocation3 + $0x210] sm:$0xff] %vm681_vm1, %v10946_v2  ;;  %749 = vst.msk [vmem:[#allocation3 + $0x218] sm:$0xff] %vm681_vm1, %v10946_v2 }
  0x30   : > { %750 = vst.msk [vmem:[#allocation3 + $0x220] sm:$0xff] %vm681_vm1, %v10946_v2  ;;  %751 = vst.msk [vmem:[#allocation3 + $0x228] sm:$0xff] %vm681_vm1, %v10946_v2 }
  0x31   : > { %752 = vst.msk [vmem:[#allocation3 + $0x230] sm:$0xff] %vm681_vm1, %v10946_v2  ;;  %753 = vst.msk [vmem:[#allocation3 + $0x238] sm:$0xff] %vm681_vm1, %v10946_v2 }
  0x32   : > { %614 = vst.msk [vmem:[#allocation2 + $0x28] sm:$0xff] %vm608_vm2, %v10946_v2  ;;  %609 = vst.msk [vmem:[#allocation2] sm:$0xff] %vm608_vm2, %v10946_v2 }
  0x33   : > { %610 = vst.msk [vmem:[#allocation2 + $0x8] sm:$0xff] %vm608_vm2, %v10946_v2  ;;  %611 = vst.msk [vmem:[#allocation2 + $0x10] sm:$0xff] %vm608_vm2, %v10946_v2 }
  0x34   : > { %612 = vst.msk [vmem:[#allocation2 + $0x18] sm:$0xff] %vm608_vm2, %v10946_v2  ;;  %613 = vst.msk [vmem:[#allocation2 + $0x20] sm:$0xff] %vm608_vm2, %v10946_v2 }
  0x35   : > { %615 = vst.msk [vmem:[#allocation2 + $0x30] sm:$0xff] %vm608_vm2, %v10946_v2  ;;  %616 = vst.msk [vmem:[#allocation2 + $0x38] sm:$0xff] %vm608_vm2, %v10946_v2 }
  0x36   : > { %617 = vst.msk [vmem:[#allocation2 + $0x40] sm:$0xff] %vm608_vm2, %v10946_v2  ;;  %618 = vst.msk [vmem:[#allocation2 + $0x48] sm:$0xff] %vm608_vm2, %v10946_v2 }
  0x37   : > { %619 = vst.msk [vmem:[#allocation2 + $0x50] sm:$0xff] %vm608_vm2, %v10946_v2  ;;  %620 = vst.msk [vmem:[#allocation2 + $0x58] sm:$0xff] %vm608_vm2, %v10946_v2 }
  0x38   : > { %621 = vst.msk [vmem:[#allocation2 + $0x60] sm:$0xff] %vm608_vm2, %v10946_v2  ;;  %622 = vst.msk [vmem:[#allocation2 + $0x68] sm:$0xff] %vm608_vm2, %v10946_v2 }
  0x39   : > { %623 = vst.msk [vmem:[#allocation2 + $0x70] sm:$0xff] %vm608_vm2, %v10946_v2  ;;  %624 = vst.msk [vmem:[#allocation2 + $0x78] sm:$0xff] %vm608_vm2, %v10946_v2 }
  0x3a   : > { %625 = vst.msk [vmem:[#allocation2 + $0x80] sm:$0xff] %vm608_vm2, %v10946_v2  ;;  %626 = vst.msk [vmem:[#allocation2 + $0x88] sm:$0xff] %vm608_vm2, %v10946_v2 }
  0x3b   : > { %627 = vst.msk [vmem:[#allocation2 + $0x90] sm:$0xff] %vm608_vm2, %v10946_v2  ;;  %628 = vst.msk [vmem:[#allocation2 + $0x98] sm:$0xff] %vm608_vm2, %v10946_v2 }
  0x3c   : > { %629 = vst.msk [vmem:[#allocation2 + $0xa0] sm:$0xff] %vm608_vm2, %v10946_v2  ;;  %630 = vst.msk [vmem:[#allocation2 + $0xa8] sm:$0xff] %vm608_vm2, %v10946_v2 }
  0x3d   : > { %631 = vst.msk [vmem:[#allocation2 + $0xb0] sm:$0xff] %vm608_vm2, %v10946_v2  ;;  %632 = vst.msk [vmem:[#allocation2 + $0xb8] sm:$0xff] %vm608_vm2, %v10946_v2 }
  0x3e   : > { %633 = vst.msk [vmem:[#allocation2 + $0xc0] sm:$0xff] %vm608_vm2, %v10946_v2  ;;  %634 = vst.msk [vmem:[#allocation2 + $0xc8] sm:$0xff] %vm608_vm2, %v10946_v2 }
  0x3f   : > { %635 = vst.msk [vmem:[#allocation2 + $0xd0] sm:$0xff] %vm608_vm2, %v10946_v2  ;;  %636 = vst.msk [vmem:[#allocation2 + $0xd8] sm:$0xff] %vm608_vm2, %v10946_v2 }
  0x40   : > { %637 = vst.msk [vmem:[#allocation2 + $0xe0] sm:$0xff] %vm608_vm2, %v10946_v2  ;;  %638 = vst.msk [vmem:[#allocation2 + $0xe8] sm:$0xff] %vm608_vm2, %v10946_v2 }
  0x41   : > { %639 = vst.msk [vmem:[#allocation2 + $0xf0] sm:$0xff] %vm608_vm2, %v10946_v2  ;;  %640 = vst.msk [vmem:[#allocation2 + $0xf8] sm:$0xff] %vm608_vm2, %v10946_v2 }
  0x42   : > { %641 = vst.msk [vmem:[#allocation2 + $0x100] sm:$0xff] %vm608_vm2, %v10946_v2  ;;  %642 = vst.msk [vmem:[#allocation2 + $0x108] sm:$0xff] %vm608_vm2, %v10946_v2 }
  0x43   : > { %643 = vst.msk [vmem:[#allocation2 + $0x110] sm:$0xff] %vm608_vm2, %v10946_v2  ;;  %644 = vst.msk [vmem:[#allocation2 + $0x118] sm:$0xff] %vm608_vm2, %v10946_v2 }
  0x44   : > { %645 = vst.msk [vmem:[#allocation2 + $0x120] sm:$0xff] %vm608_vm2, %v10946_v2  ;;  %646 = vst.msk [vmem:[#allocation2 + $0x128] sm:$0xff] %vm608_vm2, %v10946_v2 }
  0x45   : > { %647 = vst.msk [vmem:[#allocation2 + $0x130] sm:$0xff] %vm608_vm2, %v10946_v2  ;;  %648 = vst.msk [vmem:[#allocation2 + $0x138] sm:$0xff] %vm608_vm2, %v10946_v2 }
  0x46   : > { %649 = vst.msk [vmem:[#allocation2 + $0x140] sm:$0xff] %vm608_vm2, %v10946_v2  ;;  %650 = vst.msk [vmem:[#allocation2 + $0x148] sm:$0xff] %vm608_vm2, %v10946_v2 }
  0x47   : > { %651 = vst.msk [vmem:[#allocation2 + $0x150] sm:$0xff] %vm608_vm2, %v10946_v2  ;;  %652 = vst.msk [vmem:[#allocation2 + $0x158] sm:$0xff] %vm608_vm2, %v10946_v2 }
  0x48   : > { %653 = vst.msk [vmem:[#allocation2 + $0x160] sm:$0xff] %vm608_vm2, %v10946_v2  ;;  %654 = vst.msk [vmem:[#allocation2 + $0x168] sm:$0xff] %vm608_vm2, %v10946_v2 }
  0x49   : > { %655 = vst.msk [vmem:[#allocation2 + $0x170] sm:$0xff] %vm608_vm2, %v10946_v2  ;;  %656 = vst.msk [vmem:[#allocation2 + $0x178] sm:$0xff] %vm608_vm2, %v10946_v2 }
  0x4a   : > { %657 = vst.msk [vmem:[#allocation2 + $0x180] sm:$0xff] %vm608_vm2, %v10946_v2  ;;  %658 = vst.msk [vmem:[#allocation2 + $0x188] sm:$0xff] %vm608_vm2, %v10946_v2 }
  0x4b   : > { %659 = vst.msk [vmem:[#allocation2 + $0x190] sm:$0xff] %vm608_vm2, %v10946_v2  ;;  %660 = vst.msk [vmem:[#allocation2 + $0x198] sm:$0xff] %vm608_vm2, %v10946_v2 }
  0x4c   : > { %661 = vst.msk [vmem:[#allocation2 + $0x1a0] sm:$0xff] %vm608_vm2, %v10946_v2  ;;  %662 = vst.msk [vmem:[#allocation2 + $0x1a8] sm:$0xff] %vm608_vm2, %v10946_v2 }
  0x4d   : > { %663 = vst.msk [vmem:[#allocation2 + $0x1b0] sm:$0xff] %vm608_vm2, %v10946_v2  ;;  %664 = vst.msk [vmem:[#allocation2 + $0x1b8] sm:$0xff] %vm608_vm2, %v10946_v2 }
  0x4e   : > { %665 = vst.msk [vmem:[#allocation2 + $0x1c0] sm:$0xff] %vm608_vm2, %v10946_v2  ;;  %666 = vst.msk [vmem:[#allocation2 + $0x1c8] sm:$0xff] %vm608_vm2, %v10946_v2 }
  0x4f   : > { %667 = vst.msk [vmem:[#allocation2 + $0x1d0] sm:$0xff] %vm608_vm2, %v10946_v2  ;;  %668 = vst.msk [vmem:[#allocation2 + $0x1d8] sm:$0xff] %vm608_vm2, %v10946_v2 }
  0x50   : > { %669 = vst.msk [vmem:[#allocation2 + $0x1e0] sm:$0xff] %vm608_vm2, %v10946_v2  ;;  %670 = vst.msk [vmem:[#allocation2 + $0x1e8] sm:$0xff] %vm608_vm2, %v10946_v2 }
  0x51   : > { %671 = vst.msk [vmem:[#allocation2 + $0x1f0] sm:$0xff] %vm608_vm2, %v10946_v2  ;;  %672 = vst.msk [vmem:[#allocation2 + $0x1f8] sm:$0xff] %vm608_vm2, %v10946_v2 }
  0x52   : > { %673 = vst.msk [vmem:[#allocation2 + $0x200] sm:$0xff] %vm608_vm2, %v10946_v2  ;;  %674 = vst.msk [vmem:[#allocation2 + $0x208] sm:$0xff] %vm608_vm2, %v10946_v2 }
  0x53   : > { %675 = vst.msk [vmem:[#allocation2 + $0x210] sm:$0xff] %vm608_vm2, %v10946_v2  ;;  %676 = vst.msk [vmem:[#allocation2 + $0x218] sm:$0xff] %vm608_vm2, %v10946_v2 }
  0x54   : > { %677 = vst.msk [vmem:[#allocation2 + $0x220] sm:$0xff] %vm608_vm2, %v10946_v2  ;;  %678 = vst.msk [vmem:[#allocation2 + $0x228] sm:$0xff] %vm608_vm2, %v10946_v2 }
  0x55   : > { %679 = vst.msk [vmem:[#allocation2 + $0x230] sm:$0xff] %vm608_vm2, %v10946_v2  ;;  %680 = vst.msk [vmem:[#allocation2 + $0x238] sm:$0xff] %vm608_vm2, %v10946_v2  ;;  %v978_v2 = vmax.f32 %v946_v55, 0.0 }
  0x56   : > { %865 = vst.msk [vmem:[#allocation2 + $0x28] sm:$0xff] %vm608_vm2, %v832_v35  ;;  %866 = vst.msk [vmem:[#allocation2 + $0x30] sm:$0xff] %vm608_vm2, %v833_v36  ;;  %v839_v35 = vmax.f32 %v807_v26, 0.0  ;;  %v981_v36 = vmax.f32 %v949_v27, 0.0  ;;  %v11579_v27 = vld [vmem:[#allocation3 + $0xa0] sm:$0xff] }
  0x57   : > { %1008 = vst.msk [vmem:[#allocation3 + $0x28] sm:$0xff] %vm681_vm1, %v975_v37  ;;  %1009 = vst.msk [vmem:[#allocation3 + $0x30] sm:$0xff] %vm681_vm1, %v976_v49  ;;  %v586_v49 = vld [vmem:[%s11392_s28 + $0x50] sm:$0xff]  ;;  %v1387_v47 = vrot.slane %v11579_v27, 7 }
  0x58   : > { %867 = vst.msk [vmem:[#allocation2 + $0x48] sm:$0xff] %vm608_vm2, %v834_v50  ;;  %868 = vst.msk [vmem:[#allocation2 + $0x50] sm:$0xff] %vm608_vm2, %v835_v54  ;;  %v951_v54 = vadd.f32 %v11397_v8, %v912_v42 }
  0x59   : > { %1010 = vst.msk [vmem:[#allocation3 + $0x48] sm:$0xff] %vm681_vm1, %v977_v61  ;;  %1011 = vst.msk [vmem:[#allocation3 + $0x50] sm:$0xff] %vm681_vm1, %v978_v2  ;;  %v771_v61 = vmul.f32 %v11370_v5, %v554_v43  ;;  %v772_v2 = vmul.f32 %v11370_v5, %v555_v48  ;;  %v812_v48 = vadd.f32 %v11386_v7, %v773_v40  ;;  %v11660_v40 = vld [vmem:[#allocation3 + $0xe0] sm:$0xff] }
  0x5a   : > { %869 = vst.msk [vmem:[#allocation2 + $0x68] sm:$0xff] %vm608_vm2, %v836_v3  ;;  %870 = vst.msk [vmem:[#allocation2 + $0x70] sm:$0xff] %vm608_vm2, %v837_v9  ;;  %v983_v1 = vmax.f32 %v951_v54, 0.0  ;;  %v914_v3 = vmul.f32 %v11375_v6, %v586_v49  ;;  %v587_v9 = vld [vmem:[%s11392_s28 + $0x58] sm:$0xff]  ;;  %v813_v49 = vadd.f32 %v11386_v7, %v774_v41 }
  0x5b   : > { %1012 = vst.msk [vmem:[#allocation3 + $0x68] sm:$0xff] %vm681_vm1, %v979_v13  ;;  %1013 = vst.msk [vmem:[#allocation3 + $0x70] sm:$0xff] %vm681_vm1, %v980_v25  ;;  %v810_v13 = vadd.f32 %v11386_v7, %v771_v61  ;;  %v811_v19 = vadd.f32 %v11386_v7, %v772_v2 }
  0x5c   : > { %871 = vst.msk [vmem:[#allocation2 + $0x88] sm:$0xff] %vm608_vm2, %v838_v34  ;;  %872 = vst.msk [vmem:[#allocation2 + $0x90] sm:$0xff] %vm608_vm2, %v839_v35  ;;  %v953_v20 = vadd.f32 %v11397_v8, %v914_v3 }
  0x5d   : > { %v11468_v22 = vld [vmem:[#allocation2 + $0x28] sm:$0xff]  ;;  %v11470_v23 = vld [vmem:[#allocation2 + $0x30] sm:$0xff]  ;;  %1014 = vst.msk [vmem:[#allocation3 + $0x88] sm:$0xff] %vm681_vm1, %v981_v36  ;;  %1015 = vst.msk [vmem:[#allocation3 + $0x90] sm:$0xff] %vm681_vm1, %v982_v51  ;;  %v842_v28 = vmax.f32 %v810_v13, 0.0  ;;  %v843_v36 = vmax.f32 %v811_v19, 0.0  ;;  %v917_v51 = vmul.f32 %v11375_v6, %v589_v30 }
  0x5e   : > { %v11472_v24 = vld [vmem:[#allocation3 + $0x28] sm:$0xff]  ;;  %9611 = vmatprep.mubr.msk.f32.mxu0 %vm608_vm2, %v11468_v22  ;;  %v11495_v37 = vld [vmem:[#allocation3 + $0x30] sm:$0xff]  ;;  %873 = vst.msk [vmem:[#allocation2 + $0xa8] sm:$0xff] %vm608_vm2, %v840_v52  ;;  %874 = vst.msk [vmem:[#allocation2 + $0xb0] sm:$0xff] %vm608_vm2, %v841_v53  ;;  %v985_v39 = vmax.f32 %v953_v20, 0.0  ;;  %v1392_v30 = vrot.slane %v11623_v60, 7 }
  0x5f   : > { %9612 = vmatmul.mubr.msk.f32.vlgmr.msra.gmra.mrb[0].mxu0 %vm608_vm2, %v11470_v23  ;;  %v1368_v33 = vrot.slane %v11472_v24, 7  ;;  %v11497_v38 = vld [vmem:[#allocation2 + $0x48] sm:$0xff]  ;;  %v11510_v45 = vld [vmem:[#allocation2 + $0x50] sm:$0xff]  ;;  %1016 = vst.msk [vmem:[#allocation3 + $0xa8] sm:$0xff] %vm681_vm1, %v983_v1  ;;  %1017 = vst.msk [vmem:[#allocation3 + $0xb0] sm:$0xff] %vm681_vm1, %v984_v12  ;;  %v775_v1 = vmul.f32 %v11370_v5, %v558_v31  ;;  %v956_v12 = vadd.f32 %v11397_v8, %v917_v51 }
  0x60   : > { %9660 = vmatpush3.msk.msra.mxu0 %vm1507_vm0, %v11353_v4  ;;  %v1370_v4 = vrot.slane %v11495_v37, 7  ;;  %9614 = vmatprep.mubr.msk.f32.mxu0 %vm608_vm2, %v11497_v38  ;;  %v11522_v50 = vld [vmem:[#allocation3 + $0x48] sm:$0xff]  ;;  %v11531_v57 = vld [vmem:[#allocation3 + $0x50] sm:$0xff]  ;;  %875 = vst.msk [vmem:[#allocation2 + $0xc8] sm:$0xff] %vm608_vm2, %v842_v28  ;;  %876 = vst.msk [vmem:[#allocation2 + $0xd0] sm:$0xff] %vm608_vm2, %v843_v36 }
  0x61   : > { %v11505_v44 = vsel %vm1232_vm3, %v1367_v17, %v1368_v33  ;;  %9709 = vmatprep.subr.mxu0 %v11487_v32  ;;  %v1373_v56 = vrot.slane %v11522_v50, 7  ;;  %v11533_v58 = vld [vmem:[#allocation2 + $0x68] sm:$0xff]  ;;  %v1375_v62 = vrot.slane %v11531_v57, 7  ;;  %v11544_v63 = vld [vmem:[#allocation2 + $0x70] sm:$0xff]  ;;  %1018 = vst.msk [vmem:[#allocation3 + $0xc8] sm:$0xff] %vm681_vm1, %v985_v39  ;;  %v559_v52 = vld [vmem:[%s11381_s23 + $0x78] sm:$0xff] }
  0x62   : > { %14444 = vst [vmem:[#allocation4_spill] sm:$0xff] %v11505_v44  ;;  %9214 = vmatprep.mubr.msk.f32.mxu1 %vm681_vm1, %v11505_v44  ;;  %v11526_v55 = vsel %vm1232_vm3, %v1368_v33, %v1370_v4  ;;  %v11546_v0 = vld [vmem:[#allocation3 + $0x68] sm:$0xff]  ;;  %v11566_v17 = vld [vmem:[#allocation3 + $0x70] sm:$0xff]  ;;  %v591_v13 = vld [vmem:[%s11392_s28 + $0x78] sm:$0xff]  ;;  %v776_v19 = vmul.f32 %v11370_v5, %v559_v52  ;;  %v988_v31 = vmax.f32 %v956_v12, 0.0 }
  0x63   : > { %14445 = vst [vmem:[#allocation5_spill] sm:$0xff] %v11526_v55  ;;  %9615 = vmatmul.mubr.msk.f32.gmra.mrb[2].mxu0 %vm608_vm2, %v11510_v45  ;;  %9215 = vmatmul.mubr.msk.f32.gmra.mrb[2].mxu1 %vm681_vm1, %v11526_v55  ;;  %v11555_v10 = vsel %vm1232_vm3, %v1372_v29, %v1373_v56  ;;  %v1378_v11 = vrot.slane %v11546_v0, 7  ;;  %v11564_v16 = vsel %vm1232_vm3, %v1373_v56, %v1375_v62  ;;  %v1380_v26 = vrot.slane %v11566_v17, 7  ;;  %v11587_v33 = vld [vmem:[#allocation2 + $0x88] sm:$0xff]  ;;  %v11589_v34 = vld [vmem:[#allocation2 + $0x90] sm:$0xff]  ;;  %v592_v36 = vld [vmem:[%s11392_s28 + $0x80] sm:$0xff] }
  0x64   : > { %9617 = vmatprep.mubr.msk.f32.mxu0 %vm608_vm2, %v11533_v58  ;;  %14446 = vst [vmem:[#allocation6_spill] sm:$0xff] %v11555_v10  ;;  %9217 = vmatprep.mubr.msk.f32.mxu1 %vm681_vm1, %v11555_v10  ;;  %14447 = vst [vmem:[#allocation7_spill] sm:$0xff] %v11564_v16  ;;  %v915_v29 = vmul.f32 %v11375_v6, %v587_v9  ;;  %v11591_v35 = vld [vmem:[#allocation3 + $0x88] sm:$0xff]  ;;  %v590_v53 = vld [vmem:[%s11392_s28 + $0x70] sm:$0xff]  ;;  %v844_v9 = vmax.f32 %v812_v48, 0.0 }
  0x65   : > { %v11576_v25 = vsel %vm1232_vm3, %v1377_v46, %v1378_v11  ;;  %v11598_v42 = vsel %vm1232_vm3, %v1378_v11, %v1380_v26  ;;  %v1383_v43 = vrot.slane %v11591_v35, 7  ;;  %v916_v46 = vmul.f32 %v11375_v6, %v588_v21  ;;  %v11619_v56 = vld [vmem:[#allocation3 + $0x90] sm:$0xff]  ;;  %v11621_v59 = vld [vmem:[#allocation2 + $0xa8] sm:$0xff]  ;;  %v560_v21 = vld [vmem:[%s11381_s23 + $0x80] sm:$0xff]  ;;  %1021 = vst.msk [vmem:[#allocation3 + $0xf0] sm:$0xff] %vm681_vm1, %v988_v31 }
  0x66   : > { %14448 = vst [vmem:[#allocation8_spill] sm:$0xff] %v11576_v25  ;;  %14449 = vst [vmem:[#allocation9_spill] sm:$0xff] %v11598_v42  ;;  %v954_v4 = vadd.f32 %v11397_v8, %v915_v29  ;;  %v1385_v2 = vrot.slane %v11619_v56, 7  ;;  %v11632_v3 = vld [vmem:[#allocation2 + $0xb0] sm:$0xff]  ;;  %v845_v11 = vmax.f32 %v813_v49, 0.0  ;;  %v11638_v14 = vld [vmem:[#allocation3 + $0xa8] sm:$0xff]  ;;  %v918_v20 = vmul.f32 %v11375_v6, %v590_v53 }
  0x67   : > { %9618 = vmatmul.mubr.msk.f32.gmra.mrb[4].mxu0 %vm608_vm2, %v11544_v63  ;;  %9218 = vmatmul.mubr.msk.f32.gmra.mrb[4].mxu1 %vm681_vm1, %v11564_v16  ;;  %v11617_v54 = vsel %vm1232_vm3, %v1382_v18, %v1383_v43  ;;  %v955_v62 = vadd.f32 %v11397_v8, %v916_v46  ;;  %v814_v18 = vadd.f32 %v11386_v7, %v775_v1  ;;  %v561_v26 = vld [vmem:[%s11381_s23 + $0x88] sm:$0xff]  ;;  %v1388_v28 = vrot.slane %v11638_v14, 7  ;;  %v11650_v29 = vld [vmem:[#allocation3 + $0xb0] sm:$0xff]  ;;  %v11691_v12 = vld [vmem:[#allocation3 + $0x100] sm:$0xff] }
  0x68   : > { %9220 = vmatprep.mubr.msk.f32.mxu1 %vm681_vm1, %v11576_v25  ;;  %9620 = vmatprep.mubr.msk.f32.mxu0 %vm608_vm2, %v11587_v33  ;;  %14450 = vst [vmem:[#allocation10_spill] sm:$0xff] %v11617_v54  ;;  %v986_v61 = vmax.f32 %v954_v4, 0.0  ;;  %v11647_v27 = vsel %vm1232_vm3, %v1383_v43, %v1385_v2  ;;  %877 = vst.msk [vmem:[#allocation2 + $0xe8] sm:$0xff] %vm608_vm2, %v844_v9  ;;  %v1390_v39 = vrot.slane %v11650_v29, 7  ;;  %v11669_v48 = vld [vmem:[#allocation2 + $0xc8] sm:$0xff]  ;;  %v562_v60 = vld [vmem:[%s11381_s23 + $0x90] sm:$0xff] }
  0x69   : > { %v987_v15 = vmax.f32 %v955_v62, 0.0  ;;  %14451 = vst [vmem:[#allocation11_spill] sm:$0xff] %v11647_v27  ;;  %878 = vst.msk [vmem:[#allocation2 + $0xf0] sm:$0xff] %vm608_vm2, %v845_v11  ;;  %v846_v41 = vmax.f32 %v814_v18, 0.0  ;;  %v815_v43 = vadd.f32 %v11386_v7, %v776_v19  ;;  %v957_v4 = vadd.f32 %v11397_v8, %v918_v20  ;;  %v593_v53 = vld [vmem:[%s11392_s28 + $0x88] sm:$0xff]  ;;  %v594_v31 = vld [vmem:[%s11392_s28 + $0x90] sm:$0xff] }
  0x6a   : > { %1019 = vst.msk [vmem:[#allocation3 + $0xd0] sm:$0xff] %vm681_vm1, %v986_v61  ;;  %v11667_v46 = vsel %vm1232_vm3, %v1387_v47, %v1388_v28  ;;  %v919_v49 = vmul.f32 %v11375_v6, %v591_v13  ;;  %v777_v51 = vmul.f32 %v11370_v5, %v560_v21  ;;  %v778_v52 = vmul.f32 %v11370_v5, %v561_v26  ;;  %v11684_v47 = vld [vmem:[#allocation2 + $0xd0] sm:$0xff]  ;;  %v11686_v62 = vld [vmem:[#allocation3 + $0xc8] sm:$0xff]  ;;  %v600_v25 = vld [vmem:[%s11392_s28 + $0xc0] sm:$0xff] }
  0x6b   : > { %9621 = vmatmul.mubr.msk.f32.gmra.mrb[6].mxu0 %vm608_vm2, %v11589_v34  ;;  %9221 = vmatmul.mubr.msk.f32.gmra.mrb[6].mxu1 %vm681_vm1, %v11598_v42  ;;  %1020 = vst.msk [vmem:[#allocation3 + $0xe8] sm:$0xff] %vm681_vm1, %v987_v15  ;;  %14452 = vst [vmem:[#allocation12_spill] sm:$0xff] %v11667_v46  ;;  %v11680_v61 = vsel %vm1232_vm3, %v1388_v28, %v1390_v39  ;;  %v847_v1 = vmax.f32 %v815_v43, 0.0  ;;  %v989_v2 = vmax.f32 %v957_v4, 0.0  ;;  %v1393_v11 = vrot.slane %v11686_v62, 7  ;;  %v563_v28 = vld [vmem:[%s11381_s23 + $0x98] sm:$0xff] }
  0x6c   : > { %9623 = vmatprep.mubr.msk.f32.mxu0 %vm608_vm2, %v11621_v59  ;;  %9223 = vmatprep.mubr.msk.f32.mxu1 %vm681_vm1, %v11617_v54  ;;  %14453 = vst [vmem:[#allocation13_spill] sm:$0xff] %v11680_v61  ;;  %879 = vst.msk [vmem:[#allocation2 + $0x108] sm:$0xff] %vm608_vm2, %v846_v41  ;;  %v920_v9 = vmul.f32 %v11375_v6, %v592_v36  ;;  %v958_v13 = vadd.f32 %v11397_v8, %v919_v49  ;;  %v1397_v19 = vrot.slane %v11660_v40, 7  ;;  %v595_v36 = vld [vmem:[%s11392_s28 + $0x98] sm:$0xff]  ;;  %v568_v42 = vld [vmem:[%s11381_s23 + $0xc0] sm:$0xff] }
  0x6d   : > { %v816_v15 = vadd.f32 %v11386_v7, %v777_v51  ;;  %v817_v18 = vadd.f32 %v11386_v7, %v778_v52  ;;  %880 = vst.msk [vmem:[#allocation2 + $0x110] sm:$0xff] %vm608_vm2, %v847_v1  ;;  %v921_v21 = vmul.f32 %v11375_v6, %v593_v53  ;;  %v779_v26 = vmul.f32 %v11370_v5, %v562_v60  ;;  %v564_v1 = vld [vmem:[%s11381_s23 + $0xa0] sm:$0xff] }
  0x6e   : > { %1022 = vst.msk [vmem:[#allocation3 + $0x108] sm:$0xff] %vm681_vm1, %v989_v2  ;;  %v959_v20 = vadd.f32 %v11397_v8, %v920_v9  ;;  %v11710_v39 = vsel %vm1232_vm3, %v1392_v30, %v1393_v11  ;;  %v990_v41 = vmax.f32 %v958_v13, 0.0  ;;  %v1402_v9 = vrot.slane %v11691_v12, 7 }
  0x6f   : > { %9624 = vmatmul.mubr.msk.f32.gmra.mrb[8].mxu0 %vm608_vm2, %v11632_v3  ;;  %9224 = vmatmul.mubr.msk.f32.gmra.mrb[8].mxu1 %vm681_vm1, %v11647_v27  ;;  %14454 = vst [vmem:[#allocation14_spill] sm:$0xff] %v11710_v39  ;;  %v848_v43 = vmax.f32 %v816_v15, 0.0  ;;  %v849_v4 = vmax.f32 %v817_v18, 0.0  ;;  %v11717_v51 = vld [vmem:[#allocation2 + $0xe8] sm:$0xff]  ;;  %v960_v30 = vadd.f32 %v11397_v8, %v921_v21  ;;  %v818_v60 = vadd.f32 %v11386_v7, %v779_v26  ;;  %v596_v21 = vld [vmem:[%s11392_s28 + $0xa0] sm:$0xff] }
  0x70   : > { %9226 = vmatprep.mubr.msk.f32.mxu1 %vm681_vm1, %v11667_v46  ;;  %9626 = vmatprep.mubr.msk.f32.mxu0 %vm608_vm2, %v11669_v48  ;;  %v11719_v52 = vld [vmem:[#allocation2 + $0xf0] sm:$0xff]  ;;  %v991_v53 = vmax.f32 %v959_v20, 0.0  ;;  %1023 = vst.msk [vmem:[#allocation3 + $0x110] sm:$0xff] %vm681_vm1, %v990_v41  ;;  %v780_v13 = vmul.f32 %v11370_v5, %v563_v28  ;;  %v922_v15 = vmul.f32 %v11375_v6, %v594_v31  ;;  %v565_v20 = vld [vmem:[%s11381_s23 + $0xa8] sm:$0xff] }
  0x71   : > { %v11712_v40 = vld [vmem:[#allocation3 + $0xd0] sm:$0xff]  ;;  %881 = vst.msk [vmem:[#allocation2 + $0x128] sm:$0xff] %vm608_vm2, %v848_v43  ;;  %882 = vst.msk [vmem:[#allocation2 + $0x130] sm:$0xff] %vm608_vm2, %v849_v4  ;;  %v923_v18 = vmul.f32 %v11375_v6, %v595_v36  ;;  %v992_v43 = vmax.f32 %v960_v30, 0.0  ;;  %v850_v28 = vmax.f32 %v818_v60, 0.0  ;;  %v11751_v36 = vld [vmem:[#allocation3 + $0x120] sm:$0xff]  ;;  %v781_v60 = vmul.f32 %v11370_v5, %v564_v1 }
  0x72   : > { %v1395_v49 = vrot.slane %v11712_v40, 7  ;;  %v11726_v2 = vld [vmem:[#allocation3 + $0xe8] sm:$0xff]  ;;  %v11743_v41 = vld [vmem:[#allocation3 + $0xf0] sm:$0xff]  ;;  %1024 = vst.msk [vmem:[#allocation3 + $0x128] sm:$0xff] %vm681_vm1, %v991_v53  ;;  %v819_v4 = vadd.f32 %v11386_v7, %v780_v13  ;;  %v924_v13 = vmul.f32 %v11375_v6, %v596_v21 }
  0x73   : > { %9627 = vmatmul.mubr.msk.f32.gmra.mrb[10].mxu0 %vm608_vm2, %v11684_v47  ;;  %9227 = vmatmul.mubr.msk.f32.gmra.mrb[10].mxu1 %vm681_vm1, %v11680_v61  ;;  %v1398_v12 = vrot.slane %v11726_v2, 7  ;;  %v11749_v31 = vld [vmem:[#allocation2 + $0x108] sm:$0xff]  ;;  %v962_v53 = vadd.f32 %v11397_v8, %v923_v18  ;;  %1025 = vst.msk [vmem:[#allocation3 + $0x130] sm:$0xff] %vm681_vm1, %v992_v43  ;;  %v567_v61 = vld [vmem:[%s11381_s23 + $0xb8] sm:$0xff]  ;;  %v820_v21 = vadd.f32 %v11386_v7, %v781_v60  ;;  %v598_v60 = vld [vmem:[%s11392_s28 + $0xb0] sm:$0xff] }
  0x74   : > { %9229 = vmatprep.mubr.msk.f32.mxu1 %vm681_vm1, %v11710_v39  ;;  %9629 = vmatprep.mubr.msk.f32.mxu0 %vm608_vm2, %v11717_v51  ;;  %v11738_v26 = vsel %vm1232_vm3, %v1393_v11, %v1395_v49  ;;  %v1400_v11 = vrot.slane %v11743_v41, 7  ;;  %v961_v49 = vadd.f32 %v11397_v8, %v922_v15  ;;  %883 = vst.msk [vmem:[#allocation2 + $0x148] sm:$0xff] %vm608_vm2, %v850_v28  ;;  %v597_v39 = vld [vmem:[%s11392_s28 + $0xa8] sm:$0xff]  ;;  %v566_v15 = vld [vmem:[%s11381_s23 + $0xb0] sm:$0xff]  ;;  %v851_v28 = vmax.f32 %v819_v4, 0.0  ;;  %v11789_v4 = vld [vmem:[#allocation3 + $0x140] sm:$0xff] }
  0x75   : > { %14455 = vst [vmem:[#allocation15_spill] sm:$0xff] %v11738_v26  ;;  %v11757_v30 = vsel %vm1232_vm3, %v1397_v19, %v1398_v12  ;;  %v11774_v18 = vld [vmem:[#allocation2 + $0x110] sm:$0xff]  ;;  %v11776_v43 = vld [vmem:[#allocation3 + $0x108] sm:$0xff]  ;;  %v994_v1 = vmax.f32 %v962_v53, 0.0  ;;  %v783_v53 = vmul.f32 %v11370_v5, %v566_v15  ;;  %v852_v27 = vmax.f32 %v820_v21, 0.0 }
  0x76   : > { %14456 = vst [vmem:[#allocation16_spill] sm:$0xff] %v11757_v30  ;;  %v11772_v19 = vsel %vm1232_vm3, %v1398_v12, %v1400_v11  ;;  %v993_v46 = vmax.f32 %v961_v49, 0.0  ;;  %v963_v12 = vadd.f32 %v11397_v8, %v924_v13  ;;  %v1407_v11 = vrot.slane %v11751_v36, 7  ;;  %884 = vst.msk [vmem:[#allocation2 + $0x150] sm:$0xff] %vm608_vm2, %v851_v28  ;;  %v599_v13 = vld [vmem:[%s11392_s28 + $0xb8] sm:$0xff] }
  0x77   : > { %9630 = vmatmul.mubr.msk.f32.gmra.mrb[12].mxu0 %vm608_vm2, %v11719_v52  ;;  %9230 = vmatmul.mubr.msk.f32.gmra.mrb[12].mxu1 %vm681_vm1, %v11738_v26  ;;  %v782_v26 = vmul.f32 %v11370_v5, %v565_v20  ;;  %14457 = vst [vmem:[#allocation17_spill] sm:$0xff] %v11772_v19  ;;  %v1403_v20 = vrot.slane %v11776_v43, 7  ;;  %1027 = vst.msk [vmem:[#allocation3 + $0x150] sm:$0xff] %vm681_vm1, %v994_v1  ;;  %v925_v49 = vmul.f32 %v11375_v6, %v597_v39  ;;  %v11800_v36 = vld [vmem:[#allocation3 + $0x110] sm:$0xff] }
  0x78   : > { %9632 = vmatprep.mubr.msk.f32.mxu0 %vm608_vm2, %v11749_v31  ;;  %9232 = vmatprep.mubr.msk.f32.mxu1 %vm681_vm1, %v11757_v30  ;;  %1026 = vst.msk [vmem:[#allocation3 + $0x148] sm:$0xff] %vm681_vm1, %v993_v46  ;;  %v11802_v28 = vld [vmem:[#allocation2 + $0x128] sm:$0xff]  ;;  %v11804_v46 = vld [vmem:[#allocation2 + $0x130] sm:$0xff]  ;;  %v995_v1 = vmax.f32 %v963_v12, 0.0 }
  0x79   : > { %v821_v30 = vadd.f32 %v11386_v7, %v782_v26  ;;  %v784_v26 = vmul.f32 %v11370_v5, %v567_v61  ;;  %v1405_v61 = vrot.slane %v11800_v36, 7  ;;  %v11811_v39 = vld [vmem:[#allocation3 + $0x128] sm:$0xff]  ;;  %v964_v15 = vadd.f32 %v11397_v8, %v925_v49  ;;  %885 = vst.msk [vmem:[#allocation2 + $0x168] sm:$0xff] %vm608_vm2, %v852_v27 }
  0x7a   : > { %v1408_v12 = vrot.slane %v11811_v39, 7  ;;  %1028 = vst.msk [vmem:[#allocation3 + $0x168] sm:$0xff] %vm681_vm1, %v995_v1  ;;  %v926_v49 = vmul.f32 %v11375_v6, %v598_v60  ;;  %v11833_v10 = vld [vmem:[#allocation3 + $0x130] sm:$0xff] }
  0x7b   : > { %9633 = vmatmul.mubr.msk.f32.gmra.mrb[14].mxu0 %vm608_vm2, %v11774_v18  ;;  %9233 = vmatmul.mubr.msk.f32.gmra.mrb[14].mxu1 %vm681_vm1, %v11772_v19  ;;  %v11798_v19 = vsel %vm1232_vm3, %v1402_v9, %v1403_v20  ;;  %v853_v54 = vmax.f32 %v821_v30, 0.0  ;;  %v11813_v9 = vld [vmem:[#allocation3 + $0x160] sm:$0xff]  ;;  %v822_v30 = vadd.f32 %v11386_v7, %v783_v53  ;;  %v823_v21 = vadd.f32 %v11386_v7, %v784_v26  ;;  %v569_v26 = vld [vmem:[%s11381_s23 + $0xc8] sm:$0xff] }
  0x7c   : > { %14458 = vst [vmem:[#allocation18_spill] sm:$0xff] %v11798_v19  ;;  %9235 = vmatprep.mubr.msk.f32.mxu1 %vm681_vm1, %v11798_v19  ;;  %9635 = vmatprep.mubr.msk.f32.mxu0 %vm608_vm2, %v11802_v28  ;;  %v1412_v19 = vrot.slane %v11789_v4, 7  ;;  %v927_v53 = vmul.f32 %v11375_v6, %v599_v13  ;;  %v11831_v16 = vsel %vm1232_vm3, %v1403_v20, %v1405_v61  ;;  %14460 = vst [vmem:[#allocation20_spill] sm:$0xff] %v11833_v10  ;;  %v11835_v55 = vld [vmem:[#allocation2 + $0x148] sm:$0xff] }
  0x7d   : > { %886 = vst.msk [vmem:[#allocation2 + $0x170] sm:$0xff] %vm608_vm2, %v853_v54  ;;  %14459 = vst [vmem:[#allocation19_spill] sm:$0xff] %v11831_v16  ;;  %v996_v4 = vmax.f32 %v964_v15, 0.0  ;;  %v854_v27 = vmax.f32 %v822_v30, 0.0  ;;  %v855_v44 = vmax.f32 %v823_v21, 0.0  ;;  %v601_v54 = vld [vmem:[%s11392_s28 + $0xc8] sm:$0xff]  ;;  %v11841_v60 = vsel %vm1232_vm3, %v1407_v11, %v1408_v12 }
  0x7e   : > { %14461 = vst [vmem:[#allocation21_spill] sm:$0xff] %v11841_v60  ;;  %v1410_v13 = vrot.slane %v11833_v10, 7  ;;  %v965_v20 = vadd.f32 %v11397_v8, %v926_v49  ;;  %v966_v1 = vadd.f32 %v11397_v8, %v927_v53  ;;  %v1417_v61 = vrot.slane %v11813_v9, 7  ;;  %v570_v21 = vld [vmem:[%s11381_s23 + $0xd0] sm:$0xff]  ;;  %v571_v49 = vld [vmem:[%s11381_s23 + $0xd8] sm:$0xff]  ;;  %v1160_v10 = vld [vmem:[#allocation3 + $0x180] sm:$0xff] }
  0x7f   : > { %9636 = vmatmul.mubr.msk.f32.gmra.mrb[16].mxu0 %vm608_vm2, %v11804_v46  ;;  %9236 = vmatmul.mubr.msk.f32.gmra.mrb[16].mxu1 %vm681_vm1, %v11831_v16  ;;  %1029 = vst.msk [vmem:[#allocation3 + $0x170] sm:$0xff] %vm681_vm1, %v996_v4  ;;  %v785_v11 = vmul.f32 %v11370_v5, %v568_v42  ;;  %v786_v15 = vmul.f32 %v11370_v5, %v569_v26  ;;  %v11864_v9 = vld [vmem:[#allocation3 + $0x148] sm:$0xff]  ;;  %v11866_v4 = vld [vmem:[#allocation3 + $0x150] sm:$0xff] }
  0x80   : > { %9638 = vmatprep.mubr.msk.f32.mxu0 %vm608_vm2, %v11835_v55  ;;  %9238 = vmatprep.mubr.msk.f32.mxu1 %vm681_vm1, %v11841_v60  ;;  %887 = vst.msk [vmem:[#allocation2 + $0x188] sm:$0xff] %vm608_vm2, %v854_v27  ;;  %888 = vst.msk [vmem:[#allocation2 + $0x190] sm:$0xff] %vm608_vm2, %v855_v44  ;;  %v928_v30 = vmul.f32 %v11375_v6, %v600_v25  ;;  %v11860_v53 = vsel %vm1232_vm3, %v1408_v12, %v1410_v13  ;;  %v11862_v60 = vld [vmem:[#allocation2 + $0x150] sm:$0xff]  ;;  %v997_v27 = vmax.f32 %v965_v20, 0.0 }
  0x81   : > { %14462 = vst [vmem:[#allocation22_spill] sm:$0xff] %v11860_v53  ;;  %14463 = vst [vmem:[#allocation23_spill] sm:$0xff] %v11862_v60  ;;  %v998_v44 = vmax.f32 %v966_v1, 0.0  ;;  %v929_v42 = vmul.f32 %v11375_v6, %v601_v54  ;;  %v1413_v25 = vrot.slane %v11864_v9, 7  ;;  %v1415_v12 = vrot.slane %v11866_v4, 7  ;;  %v602_v16 = vld [vmem:[%s11392_s28 + $0xd0] sm:$0xff] }
  0x82   : > { %14464 = vst [vmem:[#allocation24_spill] sm:$0xff] %v11864_v9  ;;  %14465 = vst [vmem:[#allocation25_spill] sm:$0xff] %v11866_v4  ;;  %v824_v26 = vadd.f32 %v11386_v7, %v785_v11  ;;  %v825_v13 = vadd.f32 %v11386_v7, %v786_v15  ;;  %v967_v54 = vadd.f32 %v11397_v8, %v928_v30  ;;  %v572_v11 = vld [vmem:[%s11381_s23 + $0xe0] sm:$0xff]  ;;  %v573_v9 = vld [vmem:[%s11381_s23 + $0xe8] sm:$0xff] }
  0x83   : > { %9639 = vmatmul.mubr.msk.f32.gmra.mrb[18].mxu0 %vm608_vm2, %v11862_v60  ;;  %9239 = vmatmul.mubr.msk.f32.gmra.mrb[18].mxu1 %vm681_vm1, %v11860_v53  ;;  %1030 = vst.msk [vmem:[#allocation3 + $0x188] sm:$0xff] %vm681_vm1, %v997_v27  ;;  %1031 = vst.msk [vmem:[#allocation3 + $0x190] sm:$0xff] %vm681_vm1, %v998_v44  ;;  %v968_v20 = vadd.f32 %v11397_v8, %v929_v42  ;;  %v787_v1 = vmul.f32 %v11370_v5, %v570_v21  ;;  %v603_v60 = vld [vmem:[%s11392_s28 + $0xd8] sm:$0xff]  ;;  %v11893_v27 = vld [vmem:[#allocation2 + $0x168] sm:$0xff] }
  0x84   : > { %v788_v4 = vmul.f32 %v11370_v5, %v571_v49  ;;  %v11888_v15 = vsel %vm1232_vm3, %v1412_v19, %v1413_v25  ;;  %v11891_v53 = vsel %vm1232_vm3, %v1413_v25, %v1415_v12  ;;  %14468 = vst [vmem:[#allocation28_spill] sm:$0xff] %v11893_v27  ;;  %v11895_v44 = vld [vmem:[#allocation2 + $0x170] sm:$0xff]  ;;  %v11897_v30 = vld [vmem:[#allocation3 + $0x168] sm:$0xff]  ;;  %v856_v42 = vmax.f32 %v824_v26, 0.0  ;;  %9641 = vmatprep.mubr.msk.f32.mxu0 %vm608_vm2, %v11893_v27  ;;  %v604_v27 = vld [vmem:[%s11392_s28 + $0xe0] sm:$0xff] }
  0x85   : > { %14466 = vst [vmem:[#allocation26_spill] sm:$0xff] %v11888_v15  ;;  %14467 = vst [vmem:[#allocation27_spill] sm:$0xff] %v11891_v53  ;;  %v857_v21 = vmax.f32 %v825_v13, 0.0  ;;  %9241 = vmatprep.mubr.msk.f32.mxu1 %vm681_vm1, %v11888_v15  ;;  %v1418_v19 = vrot.slane %v11897_v30, 7  ;;  %v999_v49 = vmax.f32 %v967_v54, 0.0  ;;  %v1000_v25 = vmax.f32 %v968_v20, 0.0 }
  0x86   : > { %14469 = vst [vmem:[#allocation29_spill] sm:$0xff] %v11895_v44  ;;  %14470 = vst [vmem:[#allocation30_spill] sm:$0xff] %v11897_v30  ;;  %v826_v12 = vadd.f32 %v11386_v7, %v787_v1  ;;  %v827_v26 = vadd.f32 %v11386_v7, %v788_v4  ;;  %v930_v13 = vmul.f32 %v11375_v6, %v602_v16  ;;  %v605_v30 = vld [vmem:[%s11392_s28 + $0xe8] sm:$0xff]  ;;  %v11919_v20 = vld [vmem:[#allocation3 + $0x170] sm:$0xff] }
  0x87   : > { %9642 = vmatmul.mubr.msk.f32.gmra.mrb[20].mxu0 %vm608_vm2, %v11895_v44  ;;  %889 = vst.msk [vmem:[#allocation2 + $0x1a8] sm:$0xff] %vm608_vm2, %v856_v42  ;;  %890 = vst.msk [vmem:[#allocation2 + $0x1b0] sm:$0xff] %vm608_vm2, %v857_v21  ;;  %v931_v15 = vmul.f32 %v11375_v6, %v603_v60  ;;  %9242 = vmatmul.mubr.msk.f32.gmra.mrb[20].mxu1 %vm681_vm1, %v11891_v53  ;;  %v11917_v54 = vsel %vm1232_vm3, %v1417_v61, %v1418_v19  ;;  %v11921_v1 = vld [vmem:[#allocation2 + $0x188] sm:$0xff]  ;;  %v11923_v42 = vld [vmem:[#allocation2 + $0x190] sm:$0xff]  ;;  %v1420_v61 = vrot.slane %v11919_v20, 7 }
  0x88   : > { %14471 = vst [vmem:[#allocation31_spill] sm:$0xff] %v11917_v54  ;;  %14472 = vst [vmem:[#allocation32_spill] sm:$0xff] %v11919_v20  ;;  %v858_v16 = vmax.f32 %v826_v12, 0.0  ;;  %v789_v60 = vmul.f32 %v11370_v5, %v572_v11  ;;  %v790_v4 = vmul.f32 %v11370_v5, %v573_v9  ;;  %9244 = vmatprep.mubr.msk.f32.mxu1 %vm681_vm1, %v11917_v54  ;;  %9644 = vmatprep.mubr.msk.f32.mxu0 %vm608_vm2, %v11921_v1  ;;  %v574_v54 = vld [vmem:[%s11381_s23 + $0xf0] sm:$0xff]  ;;  %v575_v44 = vld [vmem:[%s11381_s23 + $0xf8] sm:$0xff] }
  0x89   : > { %14473 = vst [vmem:[#allocation33_spill] sm:$0xff] %v11923_v42  ;;  %1032 = vst.msk [vmem:[#allocation3 + $0x1a8] sm:$0xff] %vm681_vm1, %v999_v49  ;;  %v859_v21 = vmax.f32 %v827_v26, 0.0  ;;  %v969_v49 = vadd.f32 %v11397_v8, %v930_v13  ;;  %v970_v53 = vadd.f32 %v11397_v8, %v931_v15  ;;  %v932_v12 = vmul.f32 %v11375_v6, %v604_v27 }
  0x8a   : > { %1033 = vst.msk [vmem:[#allocation3 + $0x1b0] sm:$0xff] %vm681_vm1, %v1000_v25  ;;  %v1422_v25 = vrot.slane %v1160_v10, 7  ;;  %v828_v11 = vadd.f32 %v11386_v7, %v789_v60  ;;  %v829_v9 = vadd.f32 %v11386_v7, %v790_v4  ;;  %v11943_v20 = vsel %vm1232_vm3, %v1418_v19, %v1420_v61  ;;  %v11947_v26 = vld [vmem:[#allocation3 + $0x188] sm:$0xff]  ;;  %v11949_v15 = vld [vmem:[#allocation3 + $0x190] sm:$0xff]  ;;  %v1164_v10 = vld [vmem:[#allocation3 + $0x1a0] sm:$0xff] }
  0x8b   : > { %891 = vst.msk [vmem:[#allocation2 + $0x1c8] sm:$0xff] %vm608_vm2, %v858_v16  ;;  %14474 = vst [vmem:[#allocation34_spill] sm:$0xff] %v11943_v20  ;;  %9645 = vmatmul.mubr.msk.f32.gmra.mrb[22].mxu0 %vm608_vm2, %v11923_v42  ;;  %v1001_v13 = vmax.f32 %v969_v49, 0.0  ;;  %v1002_v16 = vmax.f32 %v970_v53, 0.0  ;;  %v933_v60 = vmul.f32 %v11375_v6, %v605_v30  ;;  %9245 = vmatmul.mubr.msk.f32.gmra.mrb[22].mxu1 %vm681_vm1, %v11943_v20  ;;  %v1423_v27 = vrot.slane %v11947_v26, 7 }
  0x8c   : > { %14475 = vst [vmem:[#allocation35_spill] sm:$0xff] %v11947_v26  ;;  %14476 = vst [vmem:[#allocation36_spill] sm:$0xff] %v11949_v15  ;;  %v1425_v19 = vrot.slane %v11949_v15, 7  ;;  %v860_v4 = vmax.f32 %v828_v11, 0.0  ;;  %v861_v61 = vmax.f32 %v829_v9, 0.0  ;;  %v971_v42 = vadd.f32 %v11397_v8, %v932_v12 }
  0x8d   : > { %892 = vst.msk [vmem:[#allocation2 + $0x1d0] sm:$0xff] %vm608_vm2, %v859_v21  ;;  %v972_v21 = vadd.f32 %v11397_v8, %v933_v60  ;;  %v791_v53 = vmul.f32 %v11370_v5, %v574_v54  ;;  %v792_v6 = vmul.f32 %v11370_v5, %v575_v44  ;;  %v11964_v30 = vsel %vm1232_vm3, %v1422_v25, %v1423_v27  ;;  %v1168_v60 = vld [vmem:[#allocation3 + $0x1c0] sm:$0xff] }
  0x8e   : > { %1034 = vst.msk [vmem:[#allocation3 + $0x1c8] sm:$0xff] %vm681_vm1, %v1001_v13  ;;  %1035 = vst.msk [vmem:[#allocation3 + $0x1d0] sm:$0xff] %vm681_vm1, %v1002_v16  ;;  %v11967_v49 = vsel %vm1232_vm3, %v1423_v27, %v1425_v19  ;;  %v11969_v11 = vld [vmem:[#allocation2 + $0x1a8] sm:$0xff]  ;;  %v11971_v9 = vld [vmem:[#allocation2 + $0x1b0] sm:$0xff]  ;;  %v1427_v13 = vrot.slane %v1164_v10, 7  ;;  %9247 = vmatprep.mubr.msk.f32.mxu1 %vm681_vm1, %v11964_v30  ;;  %v1003_v44 = vmax.f32 %v971_v42, 0.0 }
  0x8f   : > { %14477 = vst [vmem:[#allocation37_spill] sm:$0xff] %v11964_v30  ;;  %14478 = vst [vmem:[#allocation38_spill] sm:$0xff] %v11967_v49  ;;  %9647 = vmatprep.mubr.msk.f32.mxu0 %vm608_vm2, %v11969_v11  ;;  %v1004_v54 = vmax.f32 %v972_v21, 0.0  ;;  %v830_v25 = vadd.f32 %v11386_v7, %v791_v53  ;;  %v831_v12 = vadd.f32 %v11386_v7, %v792_v6  ;;  %9248 = vmatmul.mubr.msk.f32.gmra.mrb[24].mxu1 %vm681_vm1, %v11967_v49  ;;  %v1172_v53 = vld [vmem:[#allocation3 + $0x1e0] sm:$0xff]  ;;  %v12034_v49 = vld [vmem:[#allocation2 + $0x10] sm:$0xff] }
  0x90   : > { %893 = vst.msk [vmem:[#allocation2 + $0x1e8] sm:$0xff] %vm608_vm2, %v860_v4  ;;  %894 = vst.msk [vmem:[#allocation2 + $0x1f0] sm:$0xff] %vm608_vm2, %v861_v61  ;;  %v11979_v5 = vld [vmem:[#allocation3 + $0x1a8] sm:$0xff]  ;;  %9648 = vmatmul.mubr.msk.f32.gmra.mrb[24].mxu0 %vm608_vm2, %v11971_v9  ;;  %v1432_v21 = vrot.slane %v1168_v60, 7  ;;  %v1040_v6 = vld [vmem:[#allocation2] sm:$0xff]  ;;  %v1437_v60 = vrot.slane %v1172_v53, 7 }
  0x91   : > { %14479 = vst [vmem:[#allocation39_spill] sm:$0xff] %v11979_v5  ;;  %v11981_v8 = vld [vmem:[#allocation3 + $0x1b0] sm:$0xff]  ;;  %v1428_v10 = vrot.slane %v11979_v5, 7  ;;  %1036 = vst.msk [vmem:[#allocation3 + $0x1e8] sm:$0xff] %vm681_vm1, %v1003_v44  ;;  %v862_v42 = vmax.f32 %v830_v25, 0.0  ;;  %v863_v19 = vmax.f32 %v831_v12, 0.0 }
  0x92   : > { %14480 = vst [vmem:[#allocation40_spill] sm:$0xff] %v11981_v8  ;;  %v1430_v16 = vrot.slane %v11981_v8, 7  ;;  %v11991_v27 = vld [vmem:[#allocation2 + $0x1c8] sm:$0xff]  ;;  %1037 = vst.msk [vmem:[#allocation3 + $0x1f0] sm:$0xff] %vm681_vm1, %v1004_v54  ;;  %v1236_v20 = vrot.slane %v12034_v49, 7 }
  0x93   : > { %v11996_v7 = vsel %vm1232_vm3, %v1427_v13, %v1428_v10  ;;  %9650 = vmatprep.mubr.msk.f32.mxu0 %vm608_vm2, %v11991_v27  ;;  %895 = vst.msk [vmem:[#allocation2 + $0x208] sm:$0xff] %vm608_vm2, %v862_v42  ;;  %896 = vst.msk [vmem:[#allocation2 + $0x210] sm:$0xff] %vm608_vm2, %v863_v19  ;;  %v12017_v54 = vld [vmem:[#allocation2 + $0x8] sm:$0xff] }
  0x94   : > { %14481 = vst [vmem:[#allocation41_spill] sm:$0xff] %v11996_v7  ;;  %v11999_v4 = vsel %vm1232_vm3, %v1428_v10, %v1430_v16  ;;  %v12003_v61 = vld [vmem:[#allocation2 + $0x1d0] sm:$0xff]  ;;  %9250 = vmatprep.mubr.msk.f32.mxu1 %vm681_vm1, %v11996_v7  ;;  %14485 = vst [vmem:[#allocation45_spill] sm:$0xff] %v12017_v54  ;;  %v1234_v7 = vrot.slane %v12017_v54, 7 }
  0x95   : > { %14482 = vst [vmem:[#allocation42_spill] sm:$0xff] %v11999_v4  ;;  %9251 = vmatmul.mubr.msk.f32.gmra.mrb[26].mxu1 %vm681_vm1, %v11999_v4  ;;  %9651 = vmatmul.mubr.msk.f32.gmra.mrb[26].mxu0 %vm608_vm2, %v12003_v61  ;;  %v12013_v13 = vld [vmem:[#allocation3 + $0x1c8] sm:$0xff]  ;;  %v12015_v44 = vld [vmem:[#allocation3 + $0x1d0] sm:$0xff]  ;;  %v1233_v4 = vrot.slane %v1040_v6, 7  ;;  %14489 = vst [vmem:[#allocation49_spill] sm:$0xff] %v12034_v49 }
  0x96   : > { %14483 = vst [vmem:[#allocation43_spill] sm:$0xff] %v12013_v13  ;;  %14484 = vst [vmem:[#allocation44_spill] sm:$0xff] %v12015_v44  ;;  %v1433_v25 = vrot.slane %v12013_v13, 7  ;;  %v1435_v12 = vrot.slane %v12015_v44, 7 }
  0x97   : > { %v12021_v10 = vld [vmem:[#allocation2 + $0x1e8] sm:$0xff]  ;;  %v12023_v16 = vld [vmem:[#allocation2 + $0x1f0] sm:$0xff] }
  0x98   : > { %14486 = vst [vmem:[#allocation46_spill] sm:$0xff] %v12023_v16  ;;  %9653 = vmatprep.mubr.msk.f32.mxu0 %vm608_vm2, %v12021_v10  ;;  %v12028_v42 = vsel %vm1232_vm3, %v1432_v21, %v1433_v25  ;;  %v12031_v19 = vsel %vm1232_vm3, %v1433_v25, %v1435_v12  ;;  %v12040_v30 = vld [vmem:[#allocation3 + $0x1e8] sm:$0xff]  ;;  %v1044_v21 = vld [vmem:[#allocation2 + $0x20] sm:$0xff]  ;;  %v1239_v12 = vrot.slane %v11468_v22, 7 }
  0x99   : > { %14487 = vst [vmem:[#allocation47_spill] sm:$0xff] %v12028_v42  ;;  %14488 = vst [vmem:[#allocation48_spill] sm:$0xff] %v12031_v19  ;;  %9253 = vmatprep.mubr.msk.f32.mxu1 %vm681_vm1, %v12028_v42  ;;  %9654 = vmatmul.mubr.msk.f32.gmra.mrb[28].mxu0 %vm608_vm2, %v12023_v16  ;;  %v12042_v53 = vld [vmem:[#allocation3 + $0x1f0] sm:$0xff]  ;;  %v1438_v6 = vrot.slane %v12040_v30, 7  ;;  %v1048_v22 = vld [vmem:[#allocation2 + $0x40] sm:$0xff] }
  0x9a   : > { %14490 = vst [vmem:[#allocation50_spill] sm:$0xff] %v12040_v30  ;;  %14491 = vst [vmem:[#allocation51_spill] sm:$0xff] %v12042_v53  ;;  %9254 = vmatmul.mubr.msk.f32.gmra.mrb[28].mxu1 %vm681_vm1, %v12031_v19  ;;  %v1440_v25 = vrot.slane %v12042_v53, 7  ;;  %v12049_v54 = vld [vmem:[#allocation2 + $0x208] sm:$0xff]  ;;  %v12051_v42 = vld [vmem:[#allocation2 + $0x210] sm:$0xff]  ;;  %v1235_v19 = vsel %vm1232_vm3, %v1233_v4, %v1234_v7  ;;  %v1238_v53 = vrot.slane %v1044_v21, 7  ;;  %v1237_v4 = vsel %vm1232_vm3, %v1234_v7, %v1236_v20 }
  0x9b   : > { %v12055_v16 = vsel %vm1232_vm3, %v1437_v60, %v1438_v6  ;;  %9656 = vmatprep.mubr.msk.f32.mxu0 %vm608_vm2, %v12049_v54  ;;  %v1241_v60 = vrot.slane %v11470_v23, 7  ;;  %v12090_v23 = vld [vmem:[%s14243_s7 + $0xc] sm:$0xf]  ;;  %v1249_v7 = vrot.slane %v11533_v58, 7 }
  0x9c   : > { %14492 = vst [vmem:[#allocation52_spill] sm:$0xff] %v12055_v16  ;;  %v12058_v44 = vsel %vm1232_vm3, %v1438_v6, %v1440_v25  ;;  %9256 = vmatprep.mubr.msk.f32.mxu1 %vm681_vm1, %v12055_v16  ;;  %v12075_v21 = vsel %vm1232_vm3, %v1238_v53, %v1239_v12  ;;  %v1243_v6 = vrot.slane %v1048_v22, 7  ;;  %v1244_v25 = vrot.slane %v11497_v38, 7  ;;  %v606_v53 = vld [vmem:[%s11392_s28 + $0xf0] sm:$0xff] }
  0x9d   : > { %14493 = vst [vmem:[#allocation53_spill] sm:$0xff] %v12058_v44  ;;  %9657 = vmatmul.mubr.msk.f32.gmra.mrb[30].mxu0 %vm608_vm2, %v12051_v42  ;;  %v1246_v38 = vrot.slane %v11510_v45, 7  ;;  %v607_v45 = vld [vmem:[%s11392_s28 + $0xf8] sm:$0xff]  ;;  %v1294_v16 = vrot.slane %v11921_v1, 7 }
  0x9e   : > { %9257 = vmatmul.mubr.msk.f32.gmra.mrb[30].mxu1 %vm681_vm1, %v12058_v44  ;;  %9661 = vmatprep.mubr.msk.f32.mxu0 %vm681_vm1, %v11472_v24  ;;  %v1052_v44 = vld [vmem:[#allocation2 + $0x60] sm:$0xff]  ;;  %v12083_v24 = vld [vmem:[%s14243_s7 + $0x1c] sm:$0xf]  ;;  %v12101_v20 = vsel %vm1232_vm3, %v1243_v6, %v1244_v25 }
  0x9f   : > { %9261 = vmatprep.mubr.msk.f32.mxu1 %vm608_vm2, %v1235_v19  ;;  %v10794_v19 = vld [vmem:[%s14242_s6 + $0x18] sm:$0xff]  ;;  %v12122_v58 = vsel %vm1232_vm3, %v1244_v25, %v1246_v38  ;;  %v1060_v6 = vld [vmem:[#allocation2 + $0xa0] sm:$0xff] }
  0xa1   : > { %9662 = vmatmul.mubr.msk.f32.vlgmr.msra.gmra.mrb[0].mxu0 %vm681_vm1, %v11495_v37  ;;  %v12095_v37 = vsel %vm1232_vm3, %v1239_v12, %v1241_v60 }
  0xa2   : > { %9262 = vmatmul.mubr.msk.f32.vlgmr.msra.gmra.mrb[0].mxu1 %vm608_vm2, %v1237_v4  ;;  %9710 = vmatpush3.msra.mxu0 %v11487_v32  ;;  %v1248_v32 = vrot.slane %v1052_v44, 7  ;;  %v1251_v44 = vrot.slane %v11544_v63, 7  ;;  %v1254_v4 = vrot.slane %v11587_v33, 7  ;;  %v10796_v63 = vld [vmem:[%s14241_s5] ss:$0 sm:$0xff] }
  0xa3   : > { %9264 = vmatprep.mubr.msk.f32.mxu1 %vm608_vm2, %v12075_v21  ;;  %9664 = vmatprep.mubr.msk.f32.mxu0 %vm681_vm1, %v11522_v50  ;;  %v1056_v50 = vld [vmem:[#allocation2 + $0x80] sm:$0xff] }
  0xa4   : > { %9310 = vmatpush3.msra.mxu1 %v10794_v19  ;;  %9759 = vmatprep.subr.msk.mxu0 %vm1507_vm0, %v12083_v24  ;;  %v12129_v22 = vsel %vm1232_vm3, %v1248_v32, %v1249_v7  ;;  %v1253_v60 = vrot.slane %v1056_v50, 7  ;;  %v12144_v33 = vsel %vm1232_vm3, %v1249_v7, %v1251_v44  ;;  %v1259_v50 = vrot.slane %v11621_v59, 7 }
  0xa5   : > { %9665 = vmatmul.mubr.msk.f32.gmra.mrb[2].mxu0 %vm681_vm1, %v11531_v57  ;;  %9359 = vmatprep.subr.msk.mxu1 %vm1507_vm0, %v12090_v23  ;;  %v10795_v57 = vld [vmem:[%s14240_s4] ss:$0 sm:$0xff]  ;;  %v1261_v59 = vrot.slane %v11632_v3, 7  ;;  %v1264_v44 = vrot.slane %v11669_v48, 7 }
  0xa6   : > { %9265 = vmatmul.mubr.msk.f32.gmra.mrb[2].mxu1 %vm608_vm2, %v12095_v37  ;;  %9667 = vmatprep.mubr.msk.f32.mxu0 %vm681_vm1, %v11546_v0  ;;  %v934_v12 = vmul.f32 %v10795_v57, %v606_v53  ;;  %v935_v0 = vmul.f32 %v10795_v57, %v607_v45  ;;  %v12148_v19 = vsel %vm1232_vm3, %v1253_v60, %v1254_v4  ;;  %v1258_v53 = vrot.slane %v1060_v6, 7 }
  0xa7   : > { %9267 = vmatprep.mubr.msk.f32.mxu1 %vm608_vm2, %v12101_v20  ;;  %v12178_v3 = vsel %vm1232_vm3, %v1259_v50, %v1261_v59  ;;  %v1266_v57 = vrot.slane %v11684_v47, 7 }
  0xa8   : > { %v973_v25 = vadd.f32 %v10796_v63, %v934_v12  ;;  %v974_v38 = vadd.f32 %v10796_v63, %v935_v0  ;;  %v1271_v0 = vrot.slane %v11719_v52, 7 }
  0xa9   : > { %9668 = vmatmul.mubr.msk.f32.gmra.mrb[4].mxu0 %vm681_vm1, %v11566_v17  ;;  %v1256_v17 = vrot.slane %v11589_v34, 7 }
  0xaa   : > { %9268 = vmatmul.mubr.msk.f32.gmra.mrb[4].mxu1 %vm608_vm2, %v12122_v58  ;;  %9670 = vmatprep.mubr.msk.f32.mxu0 %vm681_vm1, %v11591_v35  ;;  %v1005_v32 = vmax.f32 %v973_v25, 0.0  ;;  %v1006_v45 = vmax.f32 %v974_v38, 0.0  ;;  %v1064_v35 = vld [vmem:[#allocation2 + $0xc0] sm:$0xff]  ;;  %v1276_v38 = vrot.slane %v11774_v18, 7 }
  0xab   : > { %9270 = vmatprep.mubr.msk.f32.mxu1 %vm608_vm2, %v12129_v22  ;;  %v12162_v34 = vsel %vm1232_vm3, %v1254_v4, %v1256_v17  ;;  %v1263_v7 = vrot.slane %v1064_v35, 7  ;;  %v1072_v4 = vld [vmem:[#allocation2 + $0x100] sm:$0xff] }
  0xac   : > { %1038 = vst.msk [vmem:[#allocation3 + $0x208] sm:$0xff] %vm681_vm1, %v1005_v32  ;;  %1039 = vst.msk [vmem:[#allocation3 + $0x210] sm:$0xff] %vm681_vm1, %v1006_v45  ;;  %v1273_v63 = vrot.slane %v1072_v4, 7  ;;  %v1076_v25 = vld [vmem:[#allocation2 + $0x120] sm:$0xff]  ;;  %v1281_v45 = vrot.slane %v11804_v46, 7 }
  0xad   : > { %9671 = vmatmul.mubr.msk.f32.gmra.mrb[6].mxu0 %vm681_vm1, %v11619_v56  ;;  %v12166_v56 = vsel %vm1232_vm3, %v1258_v53, %v1259_v50  ;;  %v12182_v12 = vsel %vm1232_vm3, %v1263_v7, %v1264_v44  ;;  %v1278_v32 = vrot.slane %v1076_v25, 7  ;;  %v1080_v53 = vld [vmem:[#allocation2 + $0x140] sm:$0xff]  ;;  %v1284_v7 = vrot.slane %v11835_v55, 7 }
  0xae   : > { %9271 = vmatmul.mubr.msk.f32.gmra.mrb[6].mxu1 %vm608_vm2, %v12144_v33  ;;  %9673 = vmatprep.mubr.msk.f32.mxu0 %vm681_vm1, %v11638_v14  ;;  %v1068_v14 = vld [vmem:[#allocation2 + $0xe0] sm:$0xff]  ;;  %v1283_v59 = vrot.slane %v1080_v53, 7  ;;  %v14499_v53 = vld [vmem:[#allocation30_spill] sm:$0xff] }
  0xaf   : > { %9273 = vmatprep.mubr.msk.f32.mxu1 %vm608_vm2, %v12148_v19  ;;  %v1268_v60 = vrot.slane %v1068_v14, 7  ;;  %v1084_v14 = vld [vmem:[#allocation2 + $0x160] sm:$0xff] }
  0xb1   : > { %9674 = vmatmul.mubr.msk.f32.gmra.mrb[8].mxu0 %vm681_vm1, %v11650_v29  ;;  %v1269_v29 = vrot.slane %v11717_v51, 7 }
  0xb2   : > { %9274 = vmatmul.mubr.msk.f32.gmra.mrb[8].mxu1 %vm608_vm2, %v12162_v34  ;;  %9676 = vmatprep.mubr.msk.f32.mxu0 %vm681_vm1, %v11686_v62  ;;  %v12194_v62 = vsel %vm1232_vm3, %v1264_v44, %v1266_v57  ;;  %v14494_v44 = vld [vmem:[#allocation20_spill] sm:$0xff] }
  0xb3   : > { %9276 = vmatprep.mubr.msk.f32.mxu1 %vm608_vm2, %v12166_v56  ;;  %v12198_v6 = vsel %vm1232_vm3, %v1268_v60, %v1269_v29  ;;  %v14495_v57 = vld [vmem:[#allocation24_spill] sm:$0xff] }
  0xb5   : > { %9677 = vmatmul.mubr.msk.f32.gmra.mrb[10].mxu0 %vm681_vm1, %v11712_v40  ;;  %v1274_v40 = vrot.slane %v11749_v31, 7 }
  0xb6   : > { %9277 = vmatmul.mubr.msk.f32.gmra.mrb[10].mxu1 %vm608_vm2, %v12178_v3  ;;  %9679 = vmatprep.mubr.msk.f32.mxu0 %vm681_vm1, %v11726_v2  ;;  %v12210_v2 = vsel %vm1232_vm3, %v1269_v29, %v1271_v0  ;;  %v14496_v29 = vld [vmem:[#allocation23_spill] sm:$0xff]  ;;  %v12246_v0 = vsel %vm1232_vm3, %v1283_v59, %v1284_v7 }
  0xb7   : > { %9279 = vmatprep.mubr.msk.f32.mxu1 %vm608_vm2, %v12182_v12  ;;  %v12214_v17 = vsel %vm1232_vm3, %v1273_v63, %v1274_v40  ;;  %v12226_v50 = vsel %vm1232_vm3, %v1274_v40, %v1276_v38  ;;  %v1286_v4 = vrot.slane %v14496_v29, 7  ;;  %v1288_v63 = vrot.slane %v1084_v14, 7  ;;  %v14497_v40 = vld [vmem:[#allocation28_spill] sm:$0xff]  ;;  %v14498_v38 = vld [vmem:[#allocation25_spill] sm:$0xff] }
  0xb8   : > { %v1289_v25 = vrot.slane %v14497_v40, 7 }
  0xb9   : > { %9680 = vmatmul.mubr.msk.f32.gmra.mrb[12].mxu0 %vm681_vm1, %v11743_v41  ;;  %v1279_v41 = vrot.slane %v11802_v28, 7 }
  0xba   : > { %9280 = vmatmul.mubr.msk.f32.gmra.mrb[12].mxu1 %vm608_vm2, %v12194_v62  ;;  %9682 = vmatprep.mubr.msk.f32.mxu0 %vm681_vm1, %v11776_v43  ;;  %v12262_v14 = vsel %vm1232_vm3, %v1288_v63, %v1289_v25 }
  0xbb   : > { %9282 = vmatprep.mubr.msk.f32.mxu1 %vm608_vm2, %v12198_v6  ;;  %v12230_v35 = vsel %vm1232_vm3, %v1278_v32, %v1279_v41  ;;  %v12242_v60 = vsel %vm1232_vm3, %v1279_v41, %v1281_v45  ;;  %v1088_v32 = vld [vmem:[#allocation2 + $0x180] sm:$0xff]  ;;  %v12258_v41 = vsel %vm1232_vm3, %v1284_v7, %v1286_v4  ;;  %v14500_v45 = vld [vmem:[#allocation29_spill] sm:$0xff] }
  0xbc   : > { %v1291_v59 = vrot.slane %v14500_v45, 7  ;;  %v1293_v49 = vrot.slane %v1088_v32, 7  ;;  %v14502_v4 = vld [vmem:[#allocation33_spill] sm:$0xff] }
  0xbd   : > { %9683 = vmatmul.mubr.msk.f32.gmra.mrb[14].mxu0 %vm681_vm1, %v11800_v36  ;;  %v1296_v63 = vrot.slane %v14502_v4, 7 }
  0xbe   : > { %9283 = vmatmul.mubr.msk.f32.gmra.mrb[14].mxu1 %vm608_vm2, %v12210_v2  ;;  %9685 = vmatprep.mubr.msk.f32.mxu0 %vm681_vm1, %v11811_v39  ;;  %v12274_v7 = vsel %vm1232_vm3, %v1289_v25, %v1291_v59  ;;  %v12278_v32 = vsel %vm1232_vm3, %v1293_v49, %v1294_v16  ;;  %v1301_v49 = vrot.slane %v11971_v9, 7 }
  0xbf   : > { %9285 = vmatprep.mubr.msk.f32.mxu1 %vm608_vm2, %v12214_v17  ;;  %v12290_v25 = vsel %vm1232_vm3, %v1294_v16, %v1296_v63 }
  0xc1   : > { %9686 = vmatmul.mubr.msk.f32.gmra.mrb[16].mxu0 %vm681_vm1, %v14494_v44  ;;  %v1096_v44 = vld [vmem:[#allocation2 + $0x1c0] sm:$0xff] }
  0xc2   : > { %9286 = vmatmul.mubr.msk.f32.gmra.mrb[16].mxu1 %vm608_vm2, %v12226_v50  ;;  %9688 = vmatprep.mubr.msk.f32.mxu0 %vm681_vm1, %v14495_v57  ;;  %v1092_v57 = vld [vmem:[#allocation2 + $0x1a0] sm:$0xff]  ;;  %v1303_v59 = vrot.slane %v1096_v44, 7  ;;  %v1306_v44 = vrot.slane %v12003_v61, 7 }
  0xc3   : > { %9288 = vmatprep.mubr.msk.f32.mxu1 %vm608_vm2, %v12230_v35 }
  0xc5   : > { %9689 = vmatmul.mubr.msk.f32.gmra.mrb[18].mxu0 %vm681_vm1, %v14498_v38  ;;  %v14501_v38 = vld [vmem:[#allocation32_spill] sm:$0xff] }
  0xc6   : > { %9289 = vmatmul.mubr.msk.f32.gmra.mrb[18].mxu1 %vm608_vm2, %v12242_v60  ;;  %9691 = vmatprep.mubr.msk.f32.mxu0 %vm681_vm1, %v14499_v53  ;;  %v1298_v53 = vrot.slane %v1092_v57, 7 }
  0xc7   : > { %9291 = vmatprep.mubr.msk.f32.mxu1 %vm608_vm2, %v12246_v0 }
  0xc9   : > { %9692 = vmatmul.mubr.msk.f32.gmra.mrb[20].mxu0 %vm681_vm1, %v14501_v38  ;;  %v1299_v38 = vrot.slane %v11969_v11, 7 }
  0xca   : > { %9292 = vmatmul.mubr.msk.f32.gmra.mrb[20].mxu1 %vm608_vm2, %v12258_v41  ;;  %9694 = vmatprep.mubr.msk.f32.mxu0 %vm681_vm1, %v11947_v26  ;;  %v1100_v26 = vld [vmem:[#allocation2 + $0x1e0] sm:$0xff] }
  0xcb   : > { %9294 = vmatprep.mubr.msk.f32.mxu1 %vm608_vm2, %v12262_v14  ;;  %v12294_v57 = vsel %vm1232_vm3, %v1298_v53, %v1299_v38  ;;  %v12306_v16 = vsel %vm1232_vm3, %v1299_v38, %v1301_v49  ;;  %v1308_v63 = vrot.slane %v1100_v26, 7  ;;  %v14504_v49 = vld [vmem:[#allocation46_spill] sm:$0xff]  ;;  %v12325_v26 = vld [vmem:[#allocation3 + $0x208] sm:$0xff] }
  0xcd   : > { %9695 = vmatmul.mubr.msk.f32.gmra.mrb[22].mxu0 %vm681_vm1, %v11949_v15  ;;  %v1304_v15 = vrot.slane %v11991_v27, 7 }
  0xce   : > { %9295 = vmatmul.mubr.msk.f32.gmra.mrb[22].mxu1 %vm608_vm2, %v12274_v7  ;;  %9697 = vmatprep.mubr.msk.f32.mxu0 %vm681_vm1, %v11979_v5  ;;  %v14503_v5 = vld [vmem:[#allocation44_spill] sm:$0xff] }
  0xcf   : > { %9297 = vmatprep.mubr.msk.f32.mxu1 %vm608_vm2, %v12278_v32  ;;  %v12310_v53 = vsel %vm1232_vm3, %v1303_v59, %v1304_v15  ;;  %v12322_v38 = vsel %vm1232_vm3, %v1304_v15, %v1306_v44  ;;  %v1311_v59 = vrot.slane %v14504_v49, 7  ;;  %v12347_v44 = vld [vmem:[#allocation2 + $0x48] sm:$0xff] }
  0xd1   : > { %9698 = vmatmul.mubr.msk.f32.gmra.mrb[24].mxu0 %vm681_vm1, %v11981_v8  ;;  %v1309_v8 = vrot.slane %v12021_v10, 7 }
  0xd2   : > { %9298 = vmatmul.mubr.msk.f32.gmra.mrb[24].mxu1 %vm608_vm2, %v12290_v25  ;;  %9700 = vmatprep.mubr.msk.f32.mxu0 %vm681_vm1, %v12013_v13 }
  0xd3   : > { %9300 = vmatprep.mubr.msk.f32.mxu1 %vm608_vm2, %v12294_v57  ;;  %v12328_v13 = vsel %vm1232_vm3, %v1308_v63, %v1309_v8  ;;  %v12341_v15 = vsel %vm1232_vm3, %v1309_v8, %v1311_v59  ;;  %v12353_v63 = vld [vmem:[#allocation2 + $0x50] sm:$0xff]  ;;  %v12373_v59 = vld [vmem:[#allocation2 + $0x68] sm:$0xff] }
  0xd4   : > { %v12360_v8 = vld [vmem:[%s14242_s6 + $0x10] sm:$0xff] }
  0xd5   : > { %9701 = vmatmul.mubr.msk.f32.gmra.mrb[26].mxu0 %vm681_vm1, %v14503_v5  ;;  %v14505_v5 = vld [vmem:[#allocation51_spill] sm:$0xff] }
  0xd6   : > { %9301 = vmatmul.mubr.msk.f32.gmra.mrb[26].mxu1 %vm608_vm2, %v12306_v16  ;;  %9703 = vmatprep.mubr.msk.f32.mxu0 %vm681_vm1, %v12040_v30  ;;  %v12336_v30 = vld [vmem:[#allocation3 + $0x210] sm:$0xff] }
  0xd7   : > { %9303 = vmatprep.mubr.msk.f32.mxu1 %vm608_vm2, %v12310_v53 }
  0xd9   : > { %9704 = vmatmul.mubr.msk.f32.gmra.mrb[28].mxu0 %vm681_vm1, %v14505_v5 }
  0xda   : > { %9304 = vmatmul.mubr.msk.f32.gmra.mrb[28].mxu1 %vm608_vm2, %v12322_v38  ;;  %9706 = vmatprep.mubr.msk.f32.mxu0 %vm681_vm1, %v12325_v26 }
  0xdb   : > { %9306 = vmatprep.mubr.msk.f32.mxu1 %vm608_vm2, %v12328_v13 }
  0xdd   : > { %9707 = vmatmul.mubr.msk.f32.gmra.mrb[30].mxu0 %vm681_vm1, %v12336_v30 }
  0xde   : > { %9307 = vmatmul.mubr.msk.f32.gmra.mrb[30].mxu1 %vm608_vm2, %v12341_v15  ;;  %9711 = vmatprep.mubr.msk.f32.mxu0 %vm608_vm2, %v12347_v44 }
  0xdf   : > { %9311 = vmatprep.mubr.msk.f32.mxu1 %vm608_vm2, %v12075_v21  ;;  %v12369_v21 = vld [vmem:[%s14242_s6 + $0x30] sm:$0xff] }
  0xe1   : > { %9712 = vmatmul.mubr.msk.f32.vlgmr.msra.gmra.mrb[0].mxu0 %vm608_vm2, %v12353_v63 }
  0xe2   : > { %9312 = vmatmul.mubr.msk.f32.vlgmr.msra.gmra.mrb[0].mxu1 %vm608_vm2, %v12095_v37  ;;  %9760 = vmatpush3.msk.msra.mxu0 %vm1507_vm0, %v12083_v24  ;;  %v12380_v37 = vld [vmem:[#allocation2 + $0x70] sm:$0xff]  ;;  %v12387_v24 = vld [vmem:[#allocation2 + $0x88] sm:$0xff] }
  0xe3   : > { %9314 = vmatprep.mubr.msk.f32.mxu1 %vm608_vm2, %v12101_v20  ;;  %9714 = vmatprep.mubr.msk.f32.mxu0 %vm608_vm2, %v12373_v59  ;;  %14506 = vst [vmem:[#allocation23_spill] sm:$0xff] %v12380_v37  ;;  %14507 = vst [vmem:[#allocation28_spill] sm:$0xff] %v12387_v24 }
  0xe4   : > { %9360 = vmatpush3.msk.msra.mxu1 %vm1507_vm0, %v12090_v23  ;;  %9809 = vmatprep.subr.mxu0 %v12360_v8  ;;  %v12393_v23 = vld [vmem:[#allocation2 + $0x90] sm:$0xff] }
  0xe5   : > { %9715 = vmatmul.mubr.msk.f32.gmra.mrb[2].mxu0 %vm608_vm2, %v12380_v37  ;;  %9409 = vmatprep.subr.mxu1 %v12369_v21  ;;  %v12399_v37 = vld [vmem:[#allocation2 + $0xa8] sm:$0xff] }
  0xe6   : > { %9315 = vmatmul.mubr.msk.f32.gmra.mrb[2].mxu1 %vm608_vm2, %v12122_v58  ;;  %9717 = vmatprep.mubr.msk.f32.mxu0 %vm608_vm2, %v12387_v24  ;;  %v12405_v24 = vld [vmem:[#allocation2 + $0xb0] sm:$0xff] }
  0xe7   : > { %9317 = vmatprep.mubr.msk.f32.mxu1 %vm608_vm2, %v12129_v22 }
  0xe9   : > { %9718 = vmatmul.mubr.msk.f32.gmra.mrb[4].mxu0 %vm608_vm2, %v12393_v23 }
  0xea   : > { %9318 = vmatmul.mubr.msk.f32.gmra.mrb[4].mxu1 %vm608_vm2, %v12144_v33  ;;  %9720 = vmatprep.mubr.msk.f32.mxu0 %vm608_vm2, %v12399_v37 }
  0xeb   : > { %9320 = vmatprep.mubr.msk.f32.mxu1 %vm608_vm2, %v12148_v19 }
  0xed   : > { %9721 = vmatmul.mubr.msk.f32.gmra.mrb[6].mxu0 %vm608_vm2, %v12405_v24 }
  0xee   : > { %9321 = vmatmul.mubr.msk.f32.gmra.mrb[6].mxu1 %vm608_vm2, %v12162_v34  ;;  %9723 = vmatprep.mubr.msk.f32.mxu0 %vm608_vm2, %v11669_v48  ;;  %v2029_v48 = vrot.slane %v12049_v54, 7 }
  0xef   : > { %9323 = vmatprep.mubr.msk.f32.mxu1 %vm608_vm2, %v12166_v56 }
  0xf1   : > { %9724 = vmatmul.mubr.msk.f32.gmra.mrb[8].mxu0 %vm608_vm2, %v11684_v47 }
  0xf2   : > { %9324 = vmatmul.mubr.msk.f32.gmra.mrb[8].mxu1 %vm608_vm2, %v12178_v3  ;;  %9726 = vmatprep.mubr.msk.f32.mxu0 %vm608_vm2, %v11717_v51  ;;  %v2031_v51 = vrot.slane %v12051_v42, 7 }
  0xf3   : > { %9326 = vmatprep.mubr.msk.f32.mxu1 %vm608_vm2, %v12182_v12 }
  0xf5   : > { %9727 = vmatmul.mubr.msk.f32.gmra.mrb[10].mxu0 %vm608_vm2, %v11719_v52  ;;  %v12497_v52 = vld [vmem:[#allocation2 + $0x228] sm:$0xff] }
  0xf6   : > { %9327 = vmatmul.mubr.msk.f32.gmra.mrb[10].mxu1 %vm608_vm2, %v12194_v62  ;;  %9729 = vmatprep.mubr.msk.f32.mxu0 %vm608_vm2, %v11749_v31 }
  0xf7   : > { %9329 = vmatprep.mubr.msk.f32.mxu1 %vm608_vm2, %v12198_v6 }
  0xf9   : > { %9730 = vmatmul.mubr.msk.f32.gmra.mrb[12].mxu0 %vm608_vm2, %v11774_v18  ;;  %v12508_v18 = vld [vmem:[#allocation2 + $0x230] sm:$0xff] }
  0xfa   : > { %9330 = vmatmul.mubr.msk.f32.gmra.mrb[12].mxu1 %vm608_vm2, %v12210_v2  ;;  %9732 = vmatprep.mubr.msk.f32.mxu0 %vm608_vm2, %v11802_v28  ;;  %v12513_v28 = vsel %vm1232_vm3, %v2029_v48, %v2031_v51  ;;  %v12577_v51 = vld [vmem:[#allocation3 + $0xb0] sm:$0xff] }
  0xfb   : > { %9332 = vmatprep.mubr.msk.f32.mxu1 %vm608_vm2, %v12214_v17 }
  0xfd   : > { %9733 = vmatmul.mubr.msk.f32.gmra.mrb[14].mxu0 %vm608_vm2, %v11804_v46  ;;  %v12519_v46 = vld [vmem:[#allocation3 + $0x48] sm:$0xff] }
  0xfe   : > { %9333 = vmatmul.mubr.msk.f32.gmra.mrb[14].mxu1 %vm608_vm2, %v12226_v50  ;;  %9735 = vmatprep.mubr.msk.f32.mxu0 %vm608_vm2, %v11835_v55  ;;  %v1104_v55 = vld [vmem:[#allocation2 + $0x200] sm:$0xff] }
  0xff   : > { %9335 = vmatprep.mubr.msk.f32.mxu1 %vm608_vm2, %v12230_v35  ;;  %v2028_v47 = vrot.slane %v1104_v55, 7  ;;  %v14517_v55 = vld [vmem:[#allocation9_spill] sm:$0xff] }
 0x101   : > { %9736 = vmatmul.mubr.msk.f32.gmra.mrb[16].mxu0 %vm608_vm2, %v14496_v29  ;;  %v12500_v31 = vsel %vm1232_vm3, %v2028_v47, %v2029_v48  ;;  %v12544_v29 = vld [vmem:[#allocation3 + $0x68] sm:$0xff]  ;;  %v14519_v47 = vld [vmem:[#allocation10_spill] sm:$0xff] }
 0x102   : > { %9336 = vmatmul.mubr.msk.f32.gmra.mrb[16].mxu1 %vm608_vm2, %v12242_v60  ;;  %9738 = vmatprep.mubr.msk.f32.mxu0 %vm608_vm2, %v14497_v40  ;;  %14511 = vst [vmem:[#allocation29_spill] sm:$0xff] %v12544_v29  ;;  %v12551_v40 = vld [vmem:[#allocation3 + $0x70] sm:$0xff]  ;;  %v12571_v48 = vld [vmem:[#allocation3 + $0xa8] sm:$0xff] }
 0x103   : > { %9338 = vmatprep.mubr.msk.f32.mxu1 %vm608_vm2, %v12246_v0  ;;  %14512 = vst [vmem:[#allocation33_spill] sm:$0xff] %v12551_v40 }
 0x105   : > { %9739 = vmatmul.mubr.msk.f32.gmra.mrb[18].mxu0 %vm608_vm2, %v14500_v45  ;;  %v14513_v45 = vld [vmem:[#allocation7_spill] sm:$0xff] }
 0x106   : > { %9339 = vmatmul.mubr.msk.f32.gmra.mrb[18].mxu1 %vm608_vm2, %v12258_v41  ;;  %9741 = vmatprep.mubr.msk.f32.mxu0 %vm608_vm2, %v11921_v1  ;;  %v14508_v1 = vld [vmem:[#allocation4_spill] sm:$0xff] }
 0x107   : > { %9341 = vmatprep.mubr.msk.f32.mxu1 %vm608_vm2, %v12262_v14  ;;  %14518 = vst [vmem:[#allocation4_spill] sm:$0xff] %v12571_v48 }
 0x109   : > { %9742 = vmatmul.mubr.msk.f32.gmra.mrb[20].mxu0 %vm608_vm2, %v14502_v4  ;;  %v12559_v4 = vld [vmem:[#allocation3 + $0x88] sm:$0xff] }
 0x10a   : > { %9342 = vmatmul.mubr.msk.f32.gmra.mrb[20].mxu1 %vm608_vm2, %v12274_v7  ;;  %9744 = vmatprep.mubr.msk.f32.mxu0 %vm608_vm2, %v11969_v11  ;;  %v12525_v11 = vld [vmem:[#allocation3 + $0x50] sm:$0xff]  ;;  %14514 = vst [vmem:[#allocation46_spill] sm:$0xff] %v12559_v4 }
 0x10b   : > { %9344 = vmatprep.mubr.msk.f32.mxu1 %vm608_vm2, %v12278_v32 }
 0x10d   : > { %9745 = vmatmul.mubr.msk.f32.gmra.mrb[22].mxu0 %vm608_vm2, %v11971_v9  ;;  %v12532_v9 = vld [vmem:[%s14243_s7 + $0x8] sm:$0xf] }
 0x10e   : > { %9345 = vmatmul.mubr.msk.f32.gmra.mrb[22].mxu1 %vm608_vm2, %v12290_v25  ;;  %9747 = vmatprep.mubr.msk.f32.mxu0 %vm608_vm2, %v11991_v27  ;;  %v14509_v27 = vld [vmem:[#allocation5_spill] sm:$0xff] }
 0x10f   : > { %9347 = vmatprep.mubr.msk.f32.mxu1 %vm608_vm2, %v12294_v57  ;;  %14520 = vst [vmem:[#allocation5_spill] sm:$0xff] %v12577_v51 }
 0x111   : > { %9748 = vmatmul.mubr.msk.f32.gmra.mrb[24].mxu0 %vm608_vm2, %v12003_v61 }
 0x112   : > { %9348 = vmatmul.mubr.msk.f32.gmra.mrb[24].mxu1 %vm608_vm2, %v12306_v16  ;;  %9750 = vmatprep.mubr.msk.f32.mxu0 %vm608_vm2, %v12021_v10 }
 0x113   : > { %9350 = vmatprep.mubr.msk.f32.mxu1 %vm608_vm2, %v12310_v53 }
 0x115   : > { %9751 = vmatmul.mubr.msk.f32.gmra.mrb[26].mxu0 %vm608_vm2, %v14504_v49 }
 0x116   : > { %9351 = vmatmul.mubr.msk.f32.gmra.mrb[26].mxu1 %vm608_vm2, %v12322_v38  ;;  %9753 = vmatprep.mubr.msk.f32.mxu0 %vm608_vm2, %v12049_v54  ;;  %v12540_v54 = vld [vmem:[%s14243_s7 + $0x18] sm:$0xf] }
 0x117   : > { %9353 = vmatprep.mubr.msk.f32.mxu1 %vm608_vm2, %v12328_v13 }
 0x119   : > { %9754 = vmatmul.mubr.msk.f32.gmra.mrb[28].mxu0 %vm608_vm2, %v12051_v42  ;;  %v14510_v42 = vld [vmem:[#allocation6_spill] sm:$0xff] }
 0x11a   : > { %9354 = vmatmul.mubr.msk.f32.gmra.mrb[28].mxu1 %vm608_vm2, %v12341_v15  ;;  %9756 = vmatprep.mubr.msk.f32.mxu0 %vm608_vm2, %v12497_v52 }
 0x11b   : > { %9356 = vmatprep.mubr.msk.f32.mxu1 %vm608_vm2, %v12500_v31 }
 0x11d   : > { %9757 = vmatmul.mubr.msk.f32.gmra.mrb[30].mxu0 %vm608_vm2, %v12508_v18 }
 0x11e   : > { %9357 = vmatmul.mubr.msk.f32.gmra.mrb[30].mxu1 %vm608_vm2, %v12513_v28  ;;  %9761 = vmatprep.mubr.msk.f32.mxu0 %vm681_vm1, %v12519_v46 }
 0x11f   : > { %9361 = vmatprep.mubr.msk.f32.mxu1 %vm681_vm1, %v14508_v1  ;;  %v14521_v1 = vld [vmem:[#allocation11_spill] sm:$0xff] }
 0x121   : > { %9762 = vmatmul.mubr.msk.f32.vlgmr.msra.gmra.mrb[0].mxu0 %vm681_vm1, %v12525_v11 }
 0x122   : > { %9362 = vmatmul.mubr.msk.f32.vlgmr.msra.gmra.mrb[0].mxu1 %vm681_vm1, %v14509_v27  ;;  %9810 = vmatpush3.msra.mxu0 %v12360_v8  ;;  %v14515_v8 = vld [vmem:[#allocation8_spill] sm:$0xff]  ;;  %v12583_v27 = vld [vmem:[#allocation3 + $0xc8] sm:$0xff] }
 0x123   : > { %9364 = vmatprep.mubr.msk.f32.mxu1 %vm681_vm1, %v14510_v42  ;;  %9764 = vmatprep.mubr.msk.f32.mxu0 %vm681_vm1, %v12544_v29  ;;  %14522 = vst [vmem:[#allocation6_spill] sm:$0xff] %v12583_v27 }
 0x124   : > { %9410 = vmatpush3.msra.mxu1 %v12369_v21  ;;  %9859 = vmatprep.subr.msk.mxu0 %vm1507_vm0, %v12532_v9  ;;  %v12565_v21 = vld [vmem:[#allocation3 + $0x90] sm:$0xff] }
 0x125   : > { %9765 = vmatmul.mubr.msk.f32.gmra.mrb[2].mxu0 %vm681_vm1, %v12551_v40  ;;  %9459 = vmatprep.subr.msk.mxu1 %vm1507_vm0, %v12540_v54  ;;  %14516 = vst [vmem:[#allocation51_spill] sm:$0xff] %v12565_v21  ;;  %v12698_v40 = vld [vmem:[#allocation2 + $0x28] sm:$0xff] }
 0x126   : > { %9365 = vmatmul.mubr.msk.f32.gmra.mrb[2].mxu1 %vm681_vm1, %v14513_v45  ;;  %9767 = vmatprep.mubr.msk.f32.mxu0 %vm681_vm1, %v12559_v4  ;;  %v14525_v4 = vld [vmem:[#allocation13_spill] sm:$0xff] }
 0x127   : > { %9367 = vmatprep.mubr.msk.f32.mxu1 %vm681_vm1, %v14515_v8 }
 0x129   : > { %9768 = vmatmul.mubr.msk.f32.gmra.mrb[4].mxu0 %vm681_vm1, %v12565_v21  ;;  %v14523_v21 = vld [vmem:[#allocation12_spill] sm:$0xff] }
 0x12a   : > { %9368 = vmatmul.mubr.msk.f32.gmra.mrb[4].mxu1 %vm681_vm1, %v14517_v55  ;;  %9770 = vmatprep.mubr.msk.f32.mxu0 %vm681_vm1, %v12571_v48  ;;  %v12589_v48 = vld [vmem:[#allocation3 + $0xd0] sm:$0xff]  ;;  %v1043_v55 = vld [vmem:[#allocation2 + $0x18] sm:$0xff] }
 0x12b   : > { %9370 = vmatprep.mubr.msk.f32.mxu1 %vm681_vm1, %v14519_v47  ;;  %14524 = vst [vmem:[#allocation7_spill] sm:$0xff] %v12589_v48  ;;  %v14561_v47 = vld [vmem:[#allocation49_spill] sm:$0xff] }
 0x12d   : > { %9771 = vmatmul.mubr.msk.f32.gmra.mrb[6].mxu0 %vm681_vm1, %v12577_v51  ;;  %v12595_v51 = vld [vmem:[#allocation3 + $0xe8] sm:$0xff] }
 0x12e   : > { %9371 = vmatmul.mubr.msk.f32.gmra.mrb[6].mxu1 %vm681_vm1, %v14521_v1  ;;  %9773 = vmatprep.mubr.msk.f32.mxu0 %vm681_vm1, %v12583_v27  ;;  %14526 = vst [vmem:[#allocation8_spill] sm:$0xff] %v12595_v51  ;;  %v14527_v1 = vld [vmem:[#allocation14_spill] sm:$0xff] }
 0x12f   : > { %9373 = vmatprep.mubr.msk.f32.mxu1 %vm681_vm1, %v14523_v21  ;;  %v12601_v27 = vld [vmem:[#allocation3 + $0xf0] sm:$0xff]  ;;  %v14529_v21 = vld [vmem:[#allocation15_spill] sm:$0xff] }
 0x130   : > { %14528 = vst [vmem:[#allocation54_spill] sm:$0xff] %v12601_v27 }
 0x131   : > { %9774 = vmatmul.mubr.msk.f32.gmra.mrb[8].mxu0 %vm681_vm1, %v12589_v48  ;;  %v14530_v48 = vld [vmem:[#allocation16_spill] sm:$0xff] }
 0x132   : > { %9374 = vmatmul.mubr.msk.f32.gmra.mrb[8].mxu1 %vm681_vm1, %v14525_v4  ;;  %9776 = vmatprep.mubr.msk.f32.mxu0 %vm681_vm1, %v12595_v51  ;;  %v14531_v51 = vld [vmem:[#allocation17_spill] sm:$0xff] }
 0x133   : > { %9376 = vmatprep.mubr.msk.f32.mxu1 %vm681_vm1, %v14527_v1  ;;  %v14532_v1 = vld [vmem:[#allocation18_spill] sm:$0xff] }
 0x135   : > { %9777 = vmatmul.mubr.msk.f32.gmra.mrb[10].mxu0 %vm681_vm1, %v12601_v27  ;;  %v14533_v27 = vld [vmem:[#allocation20_spill] sm:$0xff] }
 0x136   : > { %9377 = vmatmul.mubr.msk.f32.gmra.mrb[10].mxu1 %vm681_vm1, %v14529_v21  ;;  %9779 = vmatprep.mubr.msk.f32.mxu0 %vm681_vm1, %v11776_v43  ;;  %v14534_v21 = vld [vmem:[#allocation19_spill] sm:$0xff]  ;;  %v14535_v43 = vld [vmem:[#allocation24_spill] sm:$0xff] }
 0x137   : > { %9379 = vmatprep.mubr.msk.f32.mxu1 %vm681_vm1, %v14530_v48  ;;  %v14536_v48 = vld [vmem:[#allocation21_spill] sm:$0xff]  ;;  %14563 = vst [vmem:[#allocation24_spill] sm:$0xff] %v12698_v40 }
 0x139   : > { %9780 = vmatmul.mubr.msk.f32.gmra.mrb[12].mxu0 %vm681_vm1, %v11800_v36  ;;  %v14537_v36 = vld [vmem:[#allocation25_spill] sm:$0xff] }
 0x13a   : > { %9380 = vmatmul.mubr.msk.f32.gmra.mrb[12].mxu1 %vm681_vm1, %v14531_v51  ;;  %9782 = vmatprep.mubr.msk.f32.mxu0 %vm681_vm1, %v11811_v39  ;;  %v14538_v51 = vld [vmem:[#allocation22_spill] sm:$0xff] }
 0x13b   : > { %9382 = vmatprep.mubr.msk.f32.mxu1 %vm681_vm1, %v14532_v1  ;;  %v14539_v39 = vld [vmem:[#allocation30_spill] sm:$0xff] }
 0x13c   : > { %v14540_v1 = vld [vmem:[#allocation26_spill] sm:$0xff] }
 0x13d   : > { %9783 = vmatmul.mubr.msk.f32.gmra.mrb[14].mxu0 %vm681_vm1, %v14533_v27  ;;  %v14541_v27 = vld [vmem:[#allocation32_spill] sm:$0xff] }
 0x13e   : > { %9383 = vmatmul.mubr.msk.f32.gmra.mrb[14].mxu1 %vm681_vm1, %v14534_v21  ;;  %9785 = vmatprep.mubr.msk.f32.mxu0 %vm681_vm1, %v14535_v43  ;;  %v14542_v21 = vld [vmem:[#allocation27_spill] sm:$0xff] }
 0x13f   : > { %9385 = vmatprep.mubr.msk.f32.mxu1 %vm681_vm1, %v14536_v48  ;;  %v14543_v43 = vld [vmem:[#allocation35_spill] sm:$0xff] }
 0x140   : > { %v14544_v48 = vld [vmem:[#allocation31_spill] sm:$0xff] }
 0x141   : > { %9786 = vmatmul.mubr.msk.f32.gmra.mrb[16].mxu0 %vm681_vm1, %v14537_v36  ;;  %v14545_v36 = vld [vmem:[#allocation36_spill] sm:$0xff] }
 0x142   : > { %9386 = vmatmul.mubr.msk.f32.gmra.mrb[16].mxu1 %vm681_vm1, %v14538_v51  ;;  %9788 = vmatprep.mubr.msk.f32.mxu0 %vm681_vm1, %v14539_v39  ;;  %v14546_v51 = vld [vmem:[#allocation34_spill] sm:$0xff]  ;;  %v14547_v39 = vld [vmem:[#allocation39_spill] sm:$0xff] }
 0x143   : > { %9388 = vmatprep.mubr.msk.f32.mxu1 %vm681_vm1, %v14540_v1  ;;  %v14548_v1 = vld [vmem:[#allocation37_spill] sm:$0xff] }
 0x145   : > { %9789 = vmatmul.mubr.msk.f32.gmra.mrb[18].mxu0 %vm681_vm1, %v14541_v27  ;;  %v14549_v27 = vld [vmem:[#allocation40_spill] sm:$0xff] }
 0x146   : > { %9389 = vmatmul.mubr.msk.f32.gmra.mrb[18].mxu1 %vm681_vm1, %v14542_v21  ;;  %9791 = vmatprep.mubr.msk.f32.mxu0 %vm681_vm1, %v14543_v43  ;;  %v14550_v21 = vld [vmem:[#allocation38_spill] sm:$0xff]  ;;  %v14551_v43 = vld [vmem:[#allocation43_spill] sm:$0xff] }
 0x147   : > { %9391 = vmatprep.mubr.msk.f32.mxu1 %vm681_vm1, %v14544_v48  ;;  %v14552_v48 = vld [vmem:[#allocation41_spill] sm:$0xff] }
 0x149   : > { %9792 = vmatmul.mubr.msk.f32.gmra.mrb[20].mxu0 %vm681_vm1, %v14545_v36  ;;  %v14553_v36 = vld [vmem:[#allocation44_spill] sm:$0xff] }
 0x14a   : > { %9392 = vmatmul.mubr.msk.f32.gmra.mrb[20].mxu1 %vm681_vm1, %v14546_v51  ;;  %9794 = vmatprep.mubr.msk.f32.mxu0 %vm681_vm1, %v14547_v39  ;;  %v1176_v51 = vld [vmem:[#allocation3 + $0x200] sm:$0xff]  ;;  %v14554_v39 = vld [vmem:[#allocation42_spill] sm:$0xff] }
 0x14b   : > { %9394 = vmatprep.mubr.msk.f32.mxu1 %vm681_vm1, %v14548_v1  ;;  %v14555_v1 = vld [vmem:[#allocation50_spill] sm:$0xff]  ;;  %v2299_v4 = vrot.slane %v1176_v51, 7  ;;  %v4840_v51 = vrot.slane %v14561_v47, 1 }
 0x14d   : > { %9795 = vmatmul.mubr.msk.f32.gmra.mrb[22].mxu0 %vm681_vm1, %v14549_v27  ;;  %v14556_v27 = vld [vmem:[#allocation47_spill] sm:$0xff] }
 0x14e   : > { %9395 = vmatmul.mubr.msk.f32.gmra.mrb[22].mxu1 %vm681_vm1, %v14550_v21  ;;  %9797 = vmatprep.mubr.msk.f32.mxu0 %vm681_vm1, %v14551_v43  ;;  %v2300_v21 = vrot.slane %v12325_v26, 7  ;;  %v14557_v43 = vld [vmem:[#allocation48_spill] sm:$0xff] }
 0x14f   : > { %9397 = vmatprep.mubr.msk.f32.mxu1 %vm681_vm1, %v14552_v48 }
 0x151   : > { %9798 = vmatmul.mubr.msk.f32.gmra.mrb[24].mxu0 %vm681_vm1, %v14553_v36  ;;  %v2302_v36 = vrot.slane %v12336_v30, 7 }
 0x152   : > { %9398 = vmatmul.mubr.msk.f32.gmra.mrb[24].mxu1 %vm681_vm1, %v14554_v39  ;;  %9800 = vmatprep.mubr.msk.f32.mxu0 %vm681_vm1, %v14555_v1  ;;  %v14558_v39 = vld [vmem:[#allocation52_spill] sm:$0xff]  ;;  %v12677_v1 = vld [vmem:[#allocation3 + $0x228] sm:$0xff] }
 0x153   : > { %9400 = vmatprep.mubr.msk.f32.mxu1 %vm681_vm1, %v14556_v27  ;;  %14559 = vst [vmem:[#allocation20_spill] sm:$0xff] %v12677_v1  ;;  %v14560_v27 = vld [vmem:[#allocation45_spill] sm:$0xff]  ;;  %v12695_v47 = vsel %vm1232_vm3, %v2300_v21, %v2302_v36  ;;  %v4850_v36 = vrot.slane %v12353_v63, 1 }
 0x154   : > { %v4839_v48 = vrot.slane %v14560_v27, 1  ;;  %v1047_v27 = vld [vmem:[#allocation2 + $0x38] sm:$0xff]  ;;  %v12733_v63 = vld [vmem:[%s14242_s6 + $0x8] sm:$0xff] }
 0x155   : > { %9801 = vmatmul.mubr.msk.f32.gmra.mrb[26].mxu0 %vm681_vm1, %v14505_v5  ;;  %v12682_v5 = vsel %vm1232_vm3, %v2299_v4, %v2300_v21 }
 0x156   : > { %9401 = vmatmul.mubr.msk.f32.gmra.mrb[26].mxu1 %vm681_vm1, %v14557_v43  ;;  %9803 = vmatprep.mubr.msk.f32.mxu0 %vm681_vm1, %v12325_v26  ;;  %v14562_v26 = vld [vmem:[#allocation53_spill] sm:$0xff]  ;;  %v4842_v43 = vrot.slane %v1043_v55, 1  ;;  %v4841_v4 = vsel %vm4838_vm4, %v4839_v48, %v4840_v51  ;;  %v4847_v55 = vrot.slane %v1047_v27, 1  ;;  %v4849_v48 = vrot.slane %v12347_v44, 1 }
 0x157   : > { %9403 = vmatprep.mubr.msk.f32.mxu1 %vm681_vm1, %v14558_v39  ;;  %v12690_v39 = vld [vmem:[#allocation3 + $0x230] sm:$0xff] }
 0x158   : > { %v4843_v21 = vsel %vm4838_vm4, %v4840_v51, %v4842_v43  ;;  %v14565_v43 = vld [vmem:[#allocation23_spill] sm:$0xff] }
 0x159   : > { %9804 = vmatmul.mubr.msk.f32.gmra.mrb[28].mxu0 %vm681_vm1, %v12336_v30  ;;  %v4844_v30 = vrot.slane %v12698_v40, 1  ;;  %v1051_v40 = vld [vmem:[#allocation2 + $0x58] sm:$0xff] }
 0x15a   : > { %9404 = vmatmul.mubr.msk.f32.gmra.mrb[28].mxu1 %vm681_vm1, %v14562_v26  ;;  %9806 = vmatprep.mubr.msk.f32.mxu0 %vm681_vm1, %v12677_v1  ;;  %v12701_v26 = vld [vmem:[#allocation2 + $0x30] sm:$0xff]  ;;  %v4852_v44 = vrot.slane %v1051_v40, 1  ;;  %v1055_v51 = vld [vmem:[#allocation2 + $0x78] sm:$0xff]  ;;  %v14566_v40 = vld [vmem:[#allocation28_spill] sm:$0xff] }
 0x15b   : > { %9406 = vmatprep.mubr.msk.f32.mxu1 %vm681_vm1, %v12682_v5  ;;  %14564 = vst [vmem:[#allocation25_spill] sm:$0xff] %v12701_v26  ;;  %v4845_v1 = vrot.slane %v12701_v26, 1  ;;  %v4859_v27 = vrot.slane %v14566_v40, 1 }
 0x15d   : > { %9807 = vmatmul.mubr.msk.f32.gmra.mrb[30].mxu0 %vm681_vm1, %v12690_v39  ;;  %v12715_v26 = vsel %vm4838_vm4, %v4844_v30, %v4845_v1  ;;  %v4860_v30 = vrot.slane %v12393_v23, 1 }
 0x15e   : > { %9407 = vmatmul.mubr.msk.f32.gmra.mrb[30].mxu1 %vm681_vm1, %v12695_v47  ;;  %9811 = vmatprep.mubr.msk.f32.mxu0 %vm608_vm2, %v4841_v4  ;;  %v12721_v4 = vld [vmem:[%s14242_s6 + $0x28] sm:$0xff] }
 0x15f   : > { %9411 = vmatprep.mubr.msk.f32.mxu1 %vm608_vm2, %v12101_v20  ;;  %v12728_v20 = vsel %vm4838_vm4, %v4845_v1, %v4847_v55  ;;  %v4855_v1 = vrot.slane %v14565_v43, 1  ;;  %v12776_v55 = vsel %vm4838_vm4, %v4859_v27, %v4860_v30  ;;  %v1067_v27 = vld [vmem:[#allocation2 + $0xd8] sm:$0xff] }
 0x161   : > { %9812 = vmatmul.mubr.msk.f32.vlgmr.msra.gmra.mrb[0].mxu0 %vm608_vm2, %v4843_v21  ;;  %v1059_v21 = vld [vmem:[#allocation2 + $0x98] sm:$0xff] }
 0x162   : > { %9412 = vmatmul.mubr.msk.f32.vlgmr.msra.gmra.mrb[0].mxu1 %vm608_vm2, %v12122_v58  ;;  %9860 = vmatpush3.msk.msra.mxu0 %vm1507_vm0, %v12532_v9  ;;  %v12740_v58 = vsel %vm4838_vm4, %v4849_v48, %v4850_v36  ;;  %v4854_v9 = vrot.slane %v12373_v59, 1  ;;  %v4857_v59 = vrot.slane %v1055_v51, 1  ;;  %v4864_v48 = vrot.slane %v12399_v37, 1 }
 0x163   : > { %9414 = vmatprep.mubr.msk.f32.mxu1 %vm608_vm2, %v12129_v22  ;;  %9814 = vmatprep.mubr.msk.f32.mxu0 %vm608_vm2, %v12715_v26  ;;  %v12755_v22 = vsel %vm4838_vm4, %v4850_v36, %v4852_v44  ;;  %v4865_v36 = vrot.slane %v12405_v24, 1  ;;  %v1063_v44 = vld [vmem:[#allocation2 + $0xb8] sm:$0xff] }
 0x164   : > { %9460 = vmatpush3.msk.msra.mxu1 %vm1507_vm0, %v12540_v54  ;;  %9909 = vmatprep.subr.mxu0 %v12721_v4  ;;  %v12760_v54 = vsel %vm4838_vm4, %v4854_v9, %v4855_v1 }
 0x165   : > { %9815 = vmatmul.mubr.msk.f32.gmra.mrb[2].mxu0 %vm608_vm2, %v12728_v20  ;;  %9509 = vmatprep.subr.mxu1 %v12733_v63  ;;  %v12792_v9 = vsel %vm4838_vm4, %v4864_v48, %v4865_v36 }
 0x166   : > { %9415 = vmatmul.mubr.msk.f32.gmra.mrb[2].mxu1 %vm608_vm2, %v12144_v33  ;;  %9817 = vmatprep.mubr.msk.f32.mxu0 %vm608_vm2, %v12740_v58  ;;  %v12771_v33 = vsel %vm4838_vm4, %v4855_v1, %v4857_v59  ;;  %v12794_v1 = vld [vmem:[#allocation2 + $0xc8] sm:$0xff]  ;;  %v12797_v59 = vld [vmem:[#allocation2 + $0xd0] sm:$0xff] }
 0x167   : > { %9417 = vmatprep.mubr.msk.f32.mxu1 %vm608_vm2, %v12148_v19  ;;  %v4862_v19 = vrot.slane %v1059_v21, 1  ;;  %v4869_v51 = vrot.slane %v12794_v1, 1  ;;  %14567 = vst [vmem:[#allocation30_spill] sm:$0xff] %v12797_v59 }
 0x169   : > { %9818 = vmatmul.mubr.msk.f32.gmra.mrb[4].mxu0 %vm608_vm2, %v12755_v22 }
 0x16a   : > { %9418 = vmatmul.mubr.msk.f32.gmra.mrb[4].mxu1 %vm608_vm2, %v12162_v34  ;;  %9820 = vmatprep.mubr.msk.f32.mxu0 %vm608_vm2, %v12760_v54  ;;  %v12787_v34 = vsel %vm4838_vm4, %v4860_v30, %v4862_v19  ;;  %v4872_v30 = vrot.slane %v1067_v27, 1  ;;  %v12814_v19 = vld [vmem:[#allocation2 + $0xe8] sm:$0xff] }
 0x16b   : > { %9420 = vmatprep.mubr.msk.f32.mxu1 %vm608_vm2, %v12166_v56  ;;  %v4867_v56 = vrot.slane %v1063_v44, 1  ;;  %14568 = vst [vmem:[#allocation32_spill] sm:$0xff] %v12814_v19  ;;  %v4874_v48 = vrot.slane %v12814_v19, 1  ;;  %v12817_v44 = vld [vmem:[#allocation2 + $0xf0] sm:$0xff]  ;;  %v1075_v19 = vld [vmem:[#allocation2 + $0x118] sm:$0xff] }
 0x16c   : > { %14569 = vst [vmem:[#allocation35_spill] sm:$0xff] %v12817_v44 }
 0x16d   : > { %9821 = vmatmul.mubr.msk.f32.gmra.mrb[6].mxu0 %vm608_vm2, %v12771_v33 }
 0x16e   : > { %9421 = vmatmul.mubr.msk.f32.gmra.mrb[6].mxu1 %vm608_vm2, %v12178_v3  ;;  %9823 = vmatprep.mubr.msk.f32.mxu0 %vm608_vm2, %v12776_v55  ;;  %v4870_v3 = vrot.slane %v12797_v59, 1  ;;  %v1071_v59 = vld [vmem:[#allocation2 + $0xf8] sm:$0xff] }
 0x16f   : > { %9423 = vmatprep.mubr.msk.f32.mxu1 %vm608_vm2, %v12182_v12  ;;  %v12807_v12 = vsel %vm4838_vm4, %v4865_v36, %v4867_v56  ;;  %v4877_v36 = vrot.slane %v1071_v59, 1  ;;  %v4882_v59 = vrot.slane %v1075_v19, 1 }
 0x170   : > { %v12812_v21 = vsel %vm4838_vm4, %v4869_v51, %v4870_v3  ;;  %v12834_v51 = vld [vmem:[#allocation2 + $0x108] sm:$0xff] }
 0x171   : > { %9824 = vmatmul.mubr.msk.f32.gmra.mrb[8].mxu0 %vm608_vm2, %v12787_v34  ;;  %14570 = vst [vmem:[#allocation36_spill] sm:$0xff] %v12834_v51  ;;  %v4879_v27 = vrot.slane %v12834_v51, 1  ;;  %v1079_v51 = vld [vmem:[#allocation2 + $0x138] sm:$0xff] }
 0x172   : > { %9424 = vmatmul.mubr.msk.f32.gmra.mrb[8].mxu1 %vm608_vm2, %v12194_v62  ;;  %9826 = vmatprep.mubr.msk.f32.mxu0 %vm608_vm2, %v12792_v9  ;;  %v4875_v62 = vrot.slane %v12817_v44, 1  ;;  %v12837_v44 = vld [vmem:[#allocation2 + $0x110] sm:$0xff]  ;;  %v4887_v19 = vrot.slane %v1079_v51, 1 }
 0x173   : > { %9426 = vmatprep.mubr.msk.f32.mxu1 %vm608_vm2, %v12198_v6  ;;  %v12827_v6 = vsel %vm4838_vm4, %v4870_v3, %v4872_v30  ;;  %14571 = vst [vmem:[#allocation39_spill] sm:$0xff] %v12837_v44  ;;  %v12854_v30 = vld [vmem:[#allocation2 + $0x128] sm:$0xff] }
 0x174   : > { %v12832_v56 = vsel %vm4838_vm4, %v4874_v48, %v4875_v62  ;;  %14572 = vst [vmem:[#allocation40_spill] sm:$0xff] %v12854_v30  ;;  %v4884_v48 = vrot.slane %v12854_v30, 1  ;;  %v1083_v30 = vld [vmem:[#allocation2 + $0x158] sm:$0xff] }
 0x175   : > { %9827 = vmatmul.mubr.msk.f32.gmra.mrb[10].mxu0 %vm608_vm2, %v12807_v12  ;;  %v4892_v51 = vrot.slane %v1083_v30, 1 }
 0x176   : > { %9427 = vmatmul.mubr.msk.f32.gmra.mrb[10].mxu1 %vm608_vm2, %v12210_v2  ;;  %9829 = vmatprep.mubr.msk.f32.mxu0 %vm608_vm2, %v12812_v21  ;;  %v4880_v2 = vrot.slane %v12837_v44, 1  ;;  %v12857_v44 = vld [vmem:[#allocation2 + $0x130] sm:$0xff] }
 0x177   : > { %9429 = vmatprep.mubr.msk.f32.mxu1 %vm608_vm2, %v12214_v17  ;;  %v12847_v17 = vsel %vm4838_vm4, %v4875_v62, %v4877_v36  ;;  %14573 = vst [vmem:[#allocation43_spill] sm:$0xff] %v12857_v44  ;;  %v12874_v36 = vld [vmem:[#allocation2 + $0x148] sm:$0xff] }
 0x178   : > { %v12852_v3 = vsel %vm4838_vm4, %v4879_v27, %v4880_v2  ;;  %14574 = vst [vmem:[#allocation44_spill] sm:$0xff] %v12874_v36  ;;  %v4889_v27 = vrot.slane %v12874_v36, 1  ;;  %v1087_v36 = vld [vmem:[#allocation2 + $0x178] sm:$0xff] }
 0x179   : > { %9830 = vmatmul.mubr.msk.f32.gmra.mrb[12].mxu0 %vm608_vm2, %v12827_v6  ;;  %v4897_v30 = vrot.slane %v1087_v36, 1 }
 0x17a   : > { %9430 = vmatmul.mubr.msk.f32.gmra.mrb[12].mxu1 %vm608_vm2, %v12226_v50  ;;  %9832 = vmatprep.mubr.msk.f32.mxu0 %vm608_vm2, %v12832_v56  ;;  %v4885_v50 = vrot.slane %v12857_v44, 1  ;;  %v12877_v44 = vld [vmem:[#allocation2 + $0x150] sm:$0xff] }
 0x17b   : > { %9432 = vmatprep.mubr.msk.f32.mxu1 %vm608_vm2, %v12230_v35  ;;  %v12867_v35 = vsel %vm4838_vm4, %v4880_v2, %v4882_v59  ;;  %14575 = vst [vmem:[#allocation50_spill] sm:$0xff] %v12877_v44  ;;  %v12894_v59 = vld [vmem:[#allocation2 + $0x168] sm:$0xff] }
 0x17c   : > { %v12872_v62 = vsel %vm4838_vm4, %v4884_v48, %v4885_v50  ;;  %14576 = vst [vmem:[#allocation45_spill] sm:$0xff] %v12894_v59  ;;  %v4894_v48 = vrot.slane %v12894_v59, 1  ;;  %v1091_v59 = vld [vmem:[#allocation2 + $0x198] sm:$0xff] }
 0x17d   : > { %9833 = vmatmul.mubr.msk.f32.gmra.mrb[14].mxu0 %vm608_vm2, %v12847_v17  ;;  %v4902_v36 = vrot.slane %v1091_v59, 1 }
 0x17e   : > { %9433 = vmatmul.mubr.msk.f32.gmra.mrb[14].mxu1 %vm608_vm2, %v12242_v60  ;;  %9835 = vmatprep.mubr.msk.f32.mxu0 %vm608_vm2, %v12852_v3  ;;  %v4890_v60 = vrot.slane %v12877_v44, 1  ;;  %v12897_v44 = vld [vmem:[#allocation2 + $0x170] sm:$0xff] }
 0x17f   : > { %9435 = vmatprep.mubr.msk.f32.mxu1 %vm608_vm2, %v12246_v0  ;;  %v12887_v0 = vsel %vm4838_vm4, %v4885_v50, %v4887_v19  ;;  %14577 = vst [vmem:[#allocation49_spill] sm:$0xff] %v12897_v44  ;;  %v12914_v19 = vld [vmem:[#allocation2 + $0x188] sm:$0xff] }
 0x180   : > { %v12892_v2 = vsel %vm4838_vm4, %v4889_v27, %v4890_v60  ;;  %14578 = vst [vmem:[#allocation23_spill] sm:$0xff] %v12914_v19  ;;  %v4899_v27 = vrot.slane %v12914_v19, 1  ;;  %v1095_v19 = vld [vmem:[#allocation2 + $0x1b8] sm:$0xff] }
 0x181   : > { %9836 = vmatmul.mubr.msk.f32.gmra.mrb[16].mxu0 %vm608_vm2, %v12867_v35  ;;  %v4907_v59 = vrot.slane %v1095_v19, 1 }
 0x182   : > { %9436 = vmatmul.mubr.msk.f32.gmra.mrb[16].mxu1 %vm608_vm2, %v12258_v41  ;;  %9838 = vmatprep.mubr.msk.f32.mxu0 %vm608_vm2, %v12872_v62  ;;  %v4895_v41 = vrot.slane %v12897_v44, 1  ;;  %v12917_v44 = vld [vmem:[#allocation2 + $0x190] sm:$0xff] }
 0x183   : > { %9438 = vmatprep.mubr.msk.f32.mxu1 %vm608_vm2, %v12262_v14  ;;  %v12907_v14 = vsel %vm4838_vm4, %v4890_v60, %v4892_v51  ;;  %14579 = vst [vmem:[#allocation28_spill] sm:$0xff] %v12917_v44  ;;  %v12934_v51 = vld [vmem:[#allocation2 + $0x1a8] sm:$0xff] }
 0x184   : > { %v12912_v50 = vsel %vm4838_vm4, %v4894_v48, %v4895_v41  ;;  %14580 = vst [vmem:[#allocation55_spill] sm:$0xff] %v12934_v51  ;;  %v4904_v48 = vrot.slane %v12934_v51, 1  ;;  %v1108_v51 = vld [vmem:[#allocation2 + $0x220] sm:$0xff] }
 0x185   : > { %9839 = vmatmul.mubr.msk.f32.gmra.mrb[18].mxu0 %vm608_vm2, %v12887_v0 }
 0x186   : > { %9439 = vmatmul.mubr.msk.f32.gmra.mrb[18].mxu1 %vm608_vm2, %v12274_v7  ;;  %9841 = vmatprep.mubr.msk.f32.mxu0 %vm608_vm2, %v12892_v2  ;;  %v4900_v7 = vrot.slane %v12917_v44, 1  ;;  %v12937_v44 = vld [vmem:[#allocation2 + $0x1b0] sm:$0xff] }
 0x187   : > { %9441 = vmatprep.mubr.msk.f32.mxu1 %vm608_vm2, %v12278_v32  ;;  %v12927_v32 = vsel %vm4838_vm4, %v4895_v41, %v4897_v30  ;;  %14581 = vst [vmem:[#allocation56_spill] sm:$0xff] %v12937_v44  ;;  %v12954_v30 = vld [vmem:[#allocation2 + $0x1c8] sm:$0xff] }
 0x188   : > { %v12932_v60 = vsel %vm4838_vm4, %v4899_v27, %v4900_v7  ;;  %14582 = vst [vmem:[#allocation57_spill] sm:$0xff] %v12954_v30  ;;  %v4909_v27 = vrot.slane %v12954_v30, 1  ;;  %v2573_v30 = vrot.slane %v1108_v51, 7 }
 0x189   : > { %9842 = vmatmul.mubr.msk.f32.gmra.mrb[20].mxu0 %vm608_vm2, %v12907_v14 }
 0x18a   : > { %9442 = vmatmul.mubr.msk.f32.gmra.mrb[20].mxu1 %vm608_vm2, %v12290_v25  ;;  %9844 = vmatprep.mubr.msk.f32.mxu0 %vm608_vm2, %v12912_v50  ;;  %v4905_v25 = vrot.slane %v12937_v44, 1  ;;  %v4910_v44 = vrot.slane %v12003_v61, 1 }
 0x18b   : > { %9444 = vmatprep.mubr.msk.f32.mxu1 %vm608_vm2, %v12294_v57  ;;  %v12947_v57 = vsel %vm4838_vm4, %v4900_v7, %v4902_v36  ;;  %v4914_v7 = vrot.slane %v12021_v10, 1  ;;  %v4915_v36 = vrot.slane %v14504_v49, 1  ;;  %v2576_v10 = vrot.slane %v12508_v18, 7 }
 0x18c   : > { %v12952_v41 = vsel %vm4838_vm4, %v4904_v48, %v4905_v25  ;;  %v12970_v61 = vsel %vm4838_vm4, %v4909_v27, %v4910_v44  ;;  %v1103_v48 = vld [vmem:[#allocation2 + $0x1f8] sm:$0xff] }
 0x18d   : > { %9845 = vmatmul.mubr.msk.f32.gmra.mrb[22].mxu0 %vm608_vm2, %v12927_v32  ;;  %v12988_v49 = vsel %vm4838_vm4, %v4914_v7, %v4915_v36  ;;  %v1115_v27 = vld [vmem:[#allocation3 + $0x18] sm:$0xff]  ;;  %v13009_v7 = vld [vmem:[#allocation3 + $0x28] sm:$0xff] }
 0x18e   : > { %9445 = vmatmul.mubr.msk.f32.gmra.mrb[22].mxu1 %vm608_vm2, %v12306_v16  ;;  %9847 = vmatprep.mubr.msk.f32.mxu0 %vm608_vm2, %v12932_v60  ;;  %v1099_v16 = vld [vmem:[#allocation2 + $0x1d8] sm:$0xff]  ;;  %v5261_v18 = vrot.slane %v1115_v27, 1 }
 0x18f   : > { %9447 = vmatprep.mubr.msk.f32.mxu1 %vm608_vm2, %v12310_v53  ;;  %v12965_v53 = vsel %vm4838_vm4, %v4905_v25, %v4907_v59  ;;  %v4912_v19 = vrot.slane %v1099_v16, 1  ;;  %v4917_v25 = vrot.slane %v1103_v48, 1  ;;  %v5263_v48 = vrot.slane %v13009_v7, 1 }
 0x191   : > { %9848 = vmatmul.mubr.msk.f32.gmra.mrb[24].mxu0 %vm608_vm2, %v12947_v57 }
 0x192   : > { %9448 = vmatmul.mubr.msk.f32.gmra.mrb[24].mxu1 %vm608_vm2, %v12322_v38  ;;  %9850 = vmatprep.mubr.msk.f32.mxu0 %vm608_vm2, %v12952_v41  ;;  %v2574_v38 = vrot.slane %v12497_v52, 7  ;;  %v12990_v52 = vld [vmem:[#allocation3 + $0x8] sm:$0xff] }
 0x193   : > { %9450 = vmatprep.mubr.msk.f32.mxu1 %vm608_vm2, %v12328_v13  ;;  %v12982_v13 = vsel %vm4838_vm4, %v4910_v44, %v4912_v19  ;;  %v5258_v51 = vrot.slane %v12990_v52, 1 }
 0x194   : > { %v2575_v44 = vsel %vm1232_vm3, %v2573_v30, %v2574_v38  ;;  %v2577_v16 = vsel %vm1232_vm3, %v2574_v38, %v2576_v10  ;;  %v1119_v30 = vld [vmem:[#allocation3 + $0x38] sm:$0xff]  ;;  %v5269_v10 = vrot.slane %v12525_v11, 1 }
 0x195   : > { %9851 = vmatmul.mubr.msk.f32.gmra.mrb[26].mxu0 %vm608_vm2, %v12965_v53  ;;  %v5266_v38 = vrot.slane %v1119_v30, 1 }
 0x196   : > { %9451 = vmatmul.mubr.msk.f32.gmra.mrb[26].mxu1 %vm608_vm2, %v12341_v15  ;;  %9853 = vmatprep.mubr.msk.f32.mxu0 %vm608_vm2, %v12970_v61  ;;  %v12993_v15 = vld [vmem:[#allocation3 + $0x10] sm:$0xff] }
 0x197   : > { %9453 = vmatprep.mubr.msk.f32.mxu1 %vm608_vm2, %v12500_v31  ;;  %14583 = vst [vmem:[#allocation58_spill] sm:$0xff] %v12993_v15  ;;  %v5259_v59 = vrot.slane %v12993_v15, 1  ;;  %v13004_v31 = vsel %vm4838_vm4, %v4915_v36, %v4917_v25  ;;  %v13012_v15 = vld [vmem:[#allocation3 + $0x30] sm:$0xff]  ;;  %v5268_v25 = vrot.slane %v12519_v46, 1 }
 0x198   : > { %14584 = vst [vmem:[#allocation59_spill] sm:$0xff] %v13012_v15 }
 0x199   : > { %9854 = vmatmul.mubr.msk.f32.gmra.mrb[28].mxu0 %vm608_vm2, %v12982_v13  ;;  %v5260_v19 = vsel %vm4838_vm4, %v5258_v51, %v5259_v59  ;;  %v5262_v36 = vsel %vm4838_vm4, %v5259_v59, %v5261_v18  ;;  %v1123_v51 = vld [vmem:[#allocation3 + $0x58] sm:$0xff]  ;;  %v13049_v59 = vsel %vm4838_vm4, %v5268_v25, %v5269_v10 }
 0x19a   : > { %9454 = vmatmul.mubr.msk.f32.gmra.mrb[28].mxu1 %vm608_vm2, %v12513_v28  ;;  %9856 = vmatprep.mubr.msk.f32.mxu0 %vm608_vm2, %v12988_v49  ;;  %v5264_v28 = vrot.slane %v13012_v15, 1  ;;  %v5271_v11 = vrot.slane %v1123_v51, 1  ;;  %v1131_v51 = vld [vmem:[#allocation3 + $0x98] sm:$0xff] }
 0x19b   : > { %9456 = vmatprep.mubr.msk.f32.mxu1 %vm608_vm2, %v2575_v44  ;;  %v13031_v44 = vld [vmem:[%s14243_s7 + $0x14] sm:$0xf] }
 0x19c   : > { %v13025_v27 = vsel %vm4838_vm4, %v5263_v48, %v5264_v28  ;;  %v13037_v46 = vsel %vm4838_vm4, %v5264_v28, %v5266_v38  ;;  %v14589_v28 = vld [vmem:[#allocation46_spill] sm:$0xff]  ;;  %v14590_v38 = vld [vmem:[#allocation51_spill] sm:$0xff] }
 0x19d   : > { %9857 = vmatmul.mubr.msk.f32.gmra.mrb[30].mxu0 %vm608_vm2, %v13004_v31  ;;  %v5279_v25 = vrot.slane %v14590_v38, 1 }
 0x19e   : > { %9457 = vmatmul.mubr.msk.f32.gmra.mrb[30].mxu1 %vm608_vm2, %v2577_v16  ;;  %9861 = vmatprep.mubr.msk.f32.mxu0 %vm681_vm1, %v5260_v19  ;;  %v1127_v16 = vld [vmem:[#allocation3 + $0x78] sm:$0xff]  ;;  %v13065_v19 = vsel %vm4838_vm4, %v5269_v10, %v5271_v11  ;;  %v5281_v11 = vrot.slane %v1131_v51, 1 }
 0x19f   : > { %9461 = vmatprep.mubr.msk.f32.mxu1 %vm681_vm1, %v14510_v42  ;;  %v13042_v42 = vld [vmem:[%s14243_s7 + $0x4] sm:$0xf]  ;;  %v5276_v30 = vrot.slane %v1127_v16, 1 }
 0x1a1   : > { %9862 = vmatmul.mubr.msk.f32.vlgmr.msra.gmra.mrb[0].mxu0 %vm681_vm1, %v5262_v36  ;;  %v5278_v36 = vrot.slane %v14589_v28, 1  ;;  %v14596_v28 = vld [vmem:[#allocation5_spill] sm:$0xff] }
 0x1a2   : > { %9462 = vmatmul.mubr.msk.f32.vlgmr.msra.gmra.mrb[0].mxu1 %vm681_vm1, %v14513_v45  ;;  %9910 = vmatpush3.msra.mxu0 %v12721_v4  ;;  %v5273_v45 = vrot.slane %v12544_v29, 1  ;;  %v14585_v4 = vld [vmem:[#allocation33_spill] sm:$0xff]  ;;  %v1135_v29 = vld [vmem:[#allocation3 + $0xb8] sm:$0xff] }
 0x1a3   : > { %9464 = vmatprep.mubr.msk.f32.mxu1 %vm681_vm1, %v14515_v8  ;;  %9864 = vmatprep.mubr.msk.f32.mxu0 %vm681_vm1, %v13025_v27  ;;  %v5274_v18 = vrot.slane %v14585_v4, 1  ;;  %v14586_v8 = vld [vmem:[#allocation9_spill] sm:$0xff]  ;;  %v13086_v16 = vsel %vm4838_vm4, %v5278_v36, %v5279_v25  ;;  %v5284_v4 = vrot.slane %v14596_v28, 1  ;;  %v14599_v36 = vld [vmem:[#allocation14_spill] sm:$0xff] }
 0x1a4   : > { %9510 = vmatpush3.msra.mxu1 %v12733_v63  ;;  %9959 = vmatprep.subr.msk.mxu0 %vm1507_vm0, %v13031_v44  ;;  %v14587_v63 = vld [vmem:[#allocation10_spill] sm:$0xff] }
 0x1a5   : > { %9865 = vmatmul.mubr.msk.f32.gmra.mrb[2].mxu0 %vm681_vm1, %v13037_v46  ;;  %9559 = vmatprep.subr.msk.mxu1 %vm1507_vm0, %v13042_v42  ;;  %v13070_v48 = vsel %vm4838_vm4, %v5273_v45, %v5274_v18  ;;  %v13081_v10 = vsel %vm4838_vm4, %v5274_v18, %v5276_v30  ;;  %v14593_v45 = vld [vmem:[#allocation12_spill] sm:$0xff]  ;;  %v13097_v18 = vsel %vm4838_vm4, %v5279_v25, %v5281_v11  ;;  %v5286_v30 = vrot.slane %v1135_v29, 1 }
 0x1a6   : > { %9465 = vmatmul.mubr.msk.f32.gmra.mrb[2].mxu1 %vm681_vm1, %v14586_v8  ;;  %9867 = vmatprep.mubr.msk.f32.mxu0 %vm681_vm1, %v13049_v59  ;;  %14588 = vst [vmem:[#allocation9_spill] sm:$0xff] %v13070_v48  ;;  %v14591_v8 = vld [vmem:[#allocation11_spill] sm:$0xff]  ;;  %14592 = vst [vmem:[#allocation10_spill] sm:$0xff] %v13081_v10 }
 0x1a7   : > { %9467 = vmatprep.mubr.msk.f32.mxu1 %vm681_vm1, %v14587_v63  ;;  %14594 = vst [vmem:[#allocation11_spill] sm:$0xff] %v13086_v16  ;;  %v14595_v63 = vld [vmem:[#allocation4_spill] sm:$0xff]  ;;  %14598 = vst [vmem:[#allocation12_spill] sm:$0xff] %v13097_v18  ;;  %v13113_v29 = vsel %vm4838_vm4, %v5284_v4, %v5286_v30 }
 0x1a8   : > { %v5283_v38 = vrot.slane %v14595_v63, 1  ;;  %v14602_v63 = vld [vmem:[#allocation7_spill] sm:$0xff]  ;;  %14604 = vst [vmem:[#allocation14_spill] sm:$0xff] %v13113_v29 }
 0x1a9   : > { %9868 = vmatmul.mubr.msk.f32.gmra.mrb[4].mxu0 %vm681_vm1, %v13065_v19 }
 0x1aa   : > { %9468 = vmatmul.mubr.msk.f32.gmra.mrb[4].mxu1 %vm681_vm1, %v14591_v8  ;;  %9870 = vmatprep.mubr.msk.f32.mxu0 %vm681_vm1, %v13070_v48  ;;  %v14597_v8 = vld [vmem:[#allocation13_spill] sm:$0xff]  ;;  %v13102_v51 = vsel %vm4838_vm4, %v5283_v38, %v5284_v4  ;;  %v1139_v48 = vld [vmem:[#allocation3 + $0xd8] sm:$0xff]  ;;  %v14605_v38 = vld [vmem:[#allocation16_spill] sm:$0xff] }
 0x1ab   : > { %9470 = vmatprep.mubr.msk.f32.mxu1 %vm681_vm1, %v14593_v45  ;;  %14600 = vst [vmem:[#allocation13_spill] sm:$0xff] %v13102_v51  ;;  %v14601_v45 = vld [vmem:[#allocation6_spill] sm:$0xff]  ;;  %v5291_v25 = vrot.slane %v1139_v48, 1 }
 0x1ac   : > { %v5288_v28 = vrot.slane %v14601_v45, 1  ;;  %v14608_v45 = vld [vmem:[#allocation54_spill] sm:$0xff] }
 0x1ad   : > { %9871 = vmatmul.mubr.msk.f32.gmra.mrb[6].mxu0 %vm681_vm1, %v13081_v10  ;;  %v5289_v10 = vrot.slane %v14602_v63, 1 }
 0x1ae   : > { %9471 = vmatmul.mubr.msk.f32.gmra.mrb[6].mxu1 %vm681_vm1, %v14597_v8  ;;  %9873 = vmatprep.mubr.msk.f32.mxu0 %vm681_vm1, %v13086_v16  ;;  %v14603_v8 = vld [vmem:[#allocation15_spill] sm:$0xff] }
 0x1af   : > { %9473 = vmatprep.mubr.msk.f32.mxu1 %vm681_vm1, %v14599_v36  ;;  %v13118_v11 = vsel %vm4838_vm4, %v5288_v28, %v5289_v10  ;;  %v14607_v36 = vld [vmem:[#allocation8_spill] sm:$0xff]  ;;  %v1143_v16 = vld [vmem:[#allocation3 + $0xf8] sm:$0xff]  ;;  %v13129_v4 = vsel %vm4838_vm4, %v5289_v10, %v5291_v25  ;;  %v14611_v28 = vld [vmem:[#allocation18_spill] sm:$0xff] }
 0x1b0   : > { %14606 = vst [vmem:[#allocation15_spill] sm:$0xff] %v13118_v11  ;;  %v5293_v63 = vrot.slane %v14607_v36, 1  ;;  %14610 = vst [vmem:[#allocation16_spill] sm:$0xff] %v13129_v4  ;;  %v5296_v48 = vrot.slane %v1143_v16, 1  ;;  %v13139_v36 = vld [vmem:[#allocation3 + $0x110] sm:$0xff]  ;;  %v14615_v10 = vld [vmem:[#allocation19_spill] sm:$0xff] }
 0x1b1   : > { %9874 = vmatmul.mubr.msk.f32.gmra.mrb[8].mxu0 %vm681_vm1, %v13097_v18  ;;  %v5294_v18 = vrot.slane %v14608_v45, 1  ;;  %14614 = vst [vmem:[#allocation60_spill] sm:$0xff] %v13139_v36  ;;  %v14617_v25 = vld [vmem:[#allocation21_spill] sm:$0xff] }
 0x1b2   : > { %9474 = vmatmul.mubr.msk.f32.gmra.mrb[8].mxu1 %vm681_vm1, %v14603_v8  ;;  %9876 = vmatprep.mubr.msk.f32.mxu0 %vm681_vm1, %v13102_v51  ;;  %v14609_v8 = vld [vmem:[#allocation17_spill] sm:$0xff]  ;;  %v1175_v51 = vld [vmem:[#allocation3 + $0x1f8] sm:$0xff] }
 0x1b3   : > { %9476 = vmatprep.mubr.msk.f32.mxu1 %vm681_vm1, %v14605_v38  ;;  %v13134_v30 = vsel %vm4838_vm4, %v5293_v63, %v5294_v18  ;;  %v13136_v38 = vld [vmem:[#allocation3 + $0x108] sm:$0xff]  ;;  %v13149_v16 = vsel %vm4838_vm4, %v5294_v18, %v5296_v48  ;;  %v14621_v18 = vld [vmem:[#allocation22_spill] sm:$0xff] }
 0x1b4   : > { %14612 = vst [vmem:[#allocation17_spill] sm:$0xff] %v13134_v30  ;;  %14613 = vst [vmem:[#allocation18_spill] sm:$0xff] %v13136_v38  ;;  %v5298_v45 = vrot.slane %v13136_v38, 1  ;;  %v14623_v48 = vld [vmem:[#allocation26_spill] sm:$0xff] }
 0x1b5   : > { %9877 = vmatmul.mubr.msk.f32.gmra.mrb[10].mxu0 %vm681_vm1, %v13113_v29  ;;  %v1147_v29 = vld [vmem:[#allocation3 + $0x118] sm:$0xff]  ;;  %14616 = vst [vmem:[#allocation19_spill] sm:$0xff] %v13149_v16 }
 0x1b6   : > { %9477 = vmatmul.mubr.msk.f32.gmra.mrb[10].mxu1 %vm681_vm1, %v14609_v8  ;;  %9879 = vmatprep.mubr.msk.f32.mxu0 %vm681_vm1, %v13118_v11  ;;  %v5299_v8 = vrot.slane %v13139_v36, 1  ;;  %v5301_v63 = vrot.slane %v1147_v29, 1  ;;  %v13156_v36 = vld [vmem:[#allocation3 + $0x128] sm:$0xff]  ;;  %v1151_v11 = vld [vmem:[#allocation3 + $0x138] sm:$0xff] }
 0x1b7   : > { %9479 = vmatprep.mubr.msk.f32.mxu1 %vm681_vm1, %v14611_v28  ;;  %14619 = vst [vmem:[#allocation61_spill] sm:$0xff] %v13156_v36  ;;  %v5303_v38 = vrot.slane %v13156_v36, 1  ;;  %v5306_v29 = vrot.slane %v1151_v11, 1 }
 0x1b8   : > { %v13154_v28 = vsel %vm4838_vm4, %v5298_v45, %v5299_v8  ;;  %v13169_v45 = vsel %vm4838_vm4, %v5299_v8, %v5301_v63  ;;  %v14627_v8 = vld [vmem:[#allocation27_spill] sm:$0xff] }
 0x1b9   : > { %9880 = vmatmul.mubr.msk.f32.gmra.mrb[12].mxu0 %vm681_vm1, %v13129_v4  ;;  %14618 = vst [vmem:[#allocation21_spill] sm:$0xff] %v13154_v28  ;;  %v13159_v4 = vld [vmem:[#allocation3 + $0x130] sm:$0xff]  ;;  %14622 = vst [vmem:[#allocation22_spill] sm:$0xff] %v13169_v45  ;;  %v14629_v63 = vld [vmem:[#allocation31_spill] sm:$0xff] }
 0x1ba   : > { %9480 = vmatmul.mubr.msk.f32.gmra.mrb[12].mxu1 %vm681_vm1, %v14615_v10  ;;  %9882 = vmatprep.mubr.msk.f32.mxu0 %vm681_vm1, %v13134_v30  ;;  %14620 = vst [vmem:[#allocation62_spill] sm:$0xff] %v13159_v4  ;;  %v5304_v10 = vrot.slane %v13159_v4, 1  ;;  %v13176_v4 = vld [vmem:[#allocation3 + $0x148] sm:$0xff]  ;;  %v1155_v30 = vld [vmem:[#allocation3 + $0x158] sm:$0xff] }
 0x1bb   : > { %9482 = vmatprep.mubr.msk.f32.mxu1 %vm681_vm1, %v14617_v25  ;;  %14625 = vst [vmem:[#allocation63_spill] sm:$0xff] %v13176_v4  ;;  %v5308_v36 = vrot.slane %v13176_v4, 1 }
 0x1bc   : > { %v13174_v25 = vsel %vm4838_vm4, %v5303_v38, %v5304_v10  ;;  %v13189_v11 = vsel %vm4838_vm4, %v5304_v10, %v5306_v29  ;;  %v5311_v38 = vrot.slane %v1155_v30, 1  ;;  %v14633_v10 = vld [vmem:[#allocation34_spill] sm:$0xff]  ;;  %v14635_v29 = vld [vmem:[#allocation37_spill] sm:$0xff] }
 0x1bd   : > { %9883 = vmatmul.mubr.msk.f32.gmra.mrb[14].mxu0 %vm681_vm1, %v13149_v16  ;;  %14624 = vst [vmem:[#allocation26_spill] sm:$0xff] %v13174_v25  ;;  %v13179_v16 = vld [vmem:[#allocation3 + $0x150] sm:$0xff]  ;;  %14628 = vst [vmem:[#allocation27_spill] sm:$0xff] %v13189_v11 }
 0x1be   : > { %9483 = vmatmul.mubr.msk.f32.gmra.mrb[14].mxu1 %vm681_vm1, %v14621_v18  ;;  %9885 = vmatprep.mubr.msk.f32.mxu0 %vm681_vm1, %v13154_v28  ;;  %14626 = vst [vmem:[#allocation64_spill] sm:$0xff] %v13179_v16  ;;  %v5309_v18 = vrot.slane %v13179_v16, 1  ;;  %v13196_v16 = vld [vmem:[#allocation3 + $0x168] sm:$0xff]  ;;  %v1159_v28 = vld [vmem:[#allocation3 + $0x178] sm:$0xff] }
 0x1bf   : > { %9485 = vmatprep.mubr.msk.f32.mxu1 %vm681_vm1, %v14623_v48  ;;  %14631 = vst [vmem:[#allocation65_spill] sm:$0xff] %v13196_v16  ;;  %v5313_v4 = vrot.slane %v13196_v16, 1  ;;  %v5316_v30 = vrot.slane %v1159_v28, 1 }
 0x1c0   : > { %v13194_v48 = vsel %vm4838_vm4, %v5308_v36, %v5309_v18  ;;  %v13209_v36 = vsel %vm4838_vm4, %v5309_v18, %v5311_v38  ;;  %v14639_v18 = vld [vmem:[#allocation38_spill] sm:$0xff]  ;;  %v14641_v38 = vld [vmem:[#allocation41_spill] sm:$0xff] }
 0x1c1   : > { %9886 = vmatmul.mubr.msk.f32.gmra.mrb[16].mxu0 %vm681_vm1, %v13169_v45  ;;  %14630 = vst [vmem:[#allocation31_spill] sm:$0xff] %v13194_v48  ;;  %v13199_v45 = vld [vmem:[#allocation3 + $0x170] sm:$0xff]  ;;  %14634 = vst [vmem:[#allocation34_spill] sm:$0xff] %v13209_v36 }
 0x1c2   : > { %9486 = vmatmul.mubr.msk.f32.gmra.mrb[16].mxu1 %vm681_vm1, %v14627_v8  ;;  %9888 = vmatprep.mubr.msk.f32.mxu0 %vm681_vm1, %v13174_v25  ;;  %14632 = vst [vmem:[#allocation66_spill] sm:$0xff] %v13199_v45  ;;  %v5314_v8 = vrot.slane %v13199_v45, 1  ;;  %v13216_v45 = vld [vmem:[#allocation3 + $0x188] sm:$0xff]  ;;  %v1163_v25 = vld [vmem:[#allocation3 + $0x198] sm:$0xff] }
 0x1c3   : > { %9488 = vmatprep.mubr.msk.f32.mxu1 %vm681_vm1, %v14629_v63  ;;  %14637 = vst [vmem:[#allocation67_spill] sm:$0xff] %v13216_v45  ;;  %v5318_v16 = vrot.slane %v13216_v45, 1  ;;  %v5321_v28 = vrot.slane %v1163_v25, 1 }
 0x1c4   : > { %v13214_v63 = vsel %vm4838_vm4, %v5313_v4, %v5314_v8  ;;  %v13229_v4 = vsel %vm4838_vm4, %v5314_v8, %v5316_v30  ;;  %v14645_v8 = vld [vmem:[#allocation42_spill] sm:$0xff]  ;;  %v14647_v30 = vld [vmem:[#allocation47_spill] sm:$0xff] }
 0x1c5   : > { %9889 = vmatmul.mubr.msk.f32.gmra.mrb[18].mxu0 %vm681_vm1, %v13189_v11  ;;  %14636 = vst [vmem:[#allocation37_spill] sm:$0xff] %v13214_v63  ;;  %v13219_v11 = vld [vmem:[#allocation3 + $0x190] sm:$0xff]  ;;  %14640 = vst [vmem:[#allocation38_spill] sm:$0xff] %v13229_v4 }
 0x1c6   : > { %9489 = vmatmul.mubr.msk.f32.gmra.mrb[18].mxu1 %vm681_vm1, %v14633_v10  ;;  %9891 = vmatprep.mubr.msk.f32.mxu0 %vm681_vm1, %v13194_v48  ;;  %14638 = vst [vmem:[#allocation68_spill] sm:$0xff] %v13219_v11  ;;  %v5319_v10 = vrot.slane %v13219_v11, 1  ;;  %v13236_v11 = vld [vmem:[#allocation3 + $0x1a8] sm:$0xff]  ;;  %v1167_v48 = vld [vmem:[#allocation3 + $0x1b8] sm:$0xff] }
 0x1c7   : > { %9491 = vmatprep.mubr.msk.f32.mxu1 %vm681_vm1, %v14635_v29  ;;  %14643 = vst [vmem:[#allocation69_spill] sm:$0xff] %v13236_v11  ;;  %v5323_v45 = vrot.slane %v13236_v11, 1  ;;  %v5326_v25 = vrot.slane %v1167_v48, 1  ;;  %v14651_v48 = vld [vmem:[#allocation48_spill] sm:$0xff] }
 0x1c8   : > { %v13234_v29 = vsel %vm4838_vm4, %v5318_v16, %v5319_v10  ;;  %v13249_v16 = vsel %vm4838_vm4, %v5319_v10, %v5321_v28  ;;  %v1180_v10 = vld [vmem:[#allocation3 + $0x220] sm:$0xff] }
 0x1c9   : > { %9892 = vmatmul.mubr.msk.f32.gmra.mrb[20].mxu0 %vm681_vm1, %v13209_v36  ;;  %14642 = vst [vmem:[#allocation41_spill] sm:$0xff] %v13234_v29  ;;  %v13239_v36 = vld [vmem:[#allocation3 + $0x1b0] sm:$0xff]  ;;  %14646 = vst [vmem:[#allocation42_spill] sm:$0xff] %v13249_v16 }
 0x1ca   : > { %9492 = vmatmul.mubr.msk.f32.gmra.mrb[20].mxu1 %vm681_vm1, %v14639_v18  ;;  %9894 = vmatprep.mubr.msk.f32.mxu0 %vm681_vm1, %v13214_v63  ;;  %14644 = vst [vmem:[#allocation70_spill] sm:$0xff] %v13239_v36  ;;  %v5324_v18 = vrot.slane %v13239_v36, 1  ;;  %v13256_v36 = vld [vmem:[#allocation3 + $0x1c8] sm:$0xff]  ;;  %v1171_v63 = vld [vmem:[#allocation3 + $0x1d8] sm:$0xff] }
 0x1cb   : > { %9494 = vmatprep.mubr.msk.f32.mxu1 %vm681_vm1, %v14641_v38  ;;  %14649 = vst [vmem:[#allocation71_spill] sm:$0xff] %v13256_v36  ;;  %v5328_v11 = vrot.slane %v13256_v36, 1  ;;  %v5331_v28 = vrot.slane %v1171_v63, 1  ;;  %v13276_v36 = vld [vmem:[#allocation3 + $0x1e8] sm:$0xff] }
 0x1cc   : > { %v13254_v38 = vsel %vm4838_vm4, %v5323_v45, %v5324_v18  ;;  %v13269_v45 = vsel %vm4838_vm4, %v5324_v18, %v5326_v25  ;;  %v2844_v18 = vrot.slane %v1180_v10, 7  ;;  %v14655_v63 = vld [vmem:[#allocation53_spill] sm:$0xff]  ;;  %v5336_v25 = vrot.slane %v1175_v51, 1 }
 0x1cd   : > { %9895 = vmatmul.mubr.msk.f32.gmra.mrb[22].mxu0 %vm681_vm1, %v13229_v4  ;;  %14648 = vst [vmem:[#allocation47_spill] sm:$0xff] %v13254_v38  ;;  %v13259_v4 = vld [vmem:[#allocation3 + $0x1d0] sm:$0xff] }
 0x1ce   : > { %9495 = vmatmul.mubr.msk.f32.gmra.mrb[22].mxu1 %vm681_vm1, %v14645_v8  ;;  %9897 = vmatprep.mubr.msk.f32.mxu0 %vm681_vm1, %v13234_v29  ;;  %14650 = vst [vmem:[#allocation72_spill] sm:$0xff] %v13259_v4  ;;  %v5329_v8 = vrot.slane %v13259_v4, 1  ;;  %v13279_v29 = vld [vmem:[#allocation3 + $0x1f0] sm:$0xff] }
 0x1cf   : > { %9497 = vmatprep.mubr.msk.f32.mxu1 %vm681_vm1, %v14647_v30  ;;  %v14652_v30 = vld [vmem:[#allocation52_spill] sm:$0xff] }
 0x1d0   : > { %v13274_v4 = vsel %vm4838_vm4, %v5328_v11, %v5329_v8  ;;  %v13290_v11 = vsel %vm4838_vm4, %v5329_v8, %v5331_v28  ;;  %v10860_v8 = vld [vmem:[#allocation2 + $0x68] sm:$0xff]  ;;  %v14664_v28 = vld [vmem:[#allocation43_spill] sm:$0xff] }
 0x1d1   : > { %9898 = vmatmul.mubr.msk.f32.gmra.mrb[24].mxu0 %vm681_vm1, %v13249_v16  ;;  %14653 = vst [vmem:[#allocation48_spill] sm:$0xff] %v13274_v4  ;;  %v5333_v16 = vrot.slane %v13276_v36, 1 }
 0x1d2   : > { %9498 = vmatmul.mubr.msk.f32.gmra.mrb[24].mxu1 %vm681_vm1, %v14651_v48  ;;  %9900 = vmatprep.mubr.msk.f32.mxu0 %vm681_vm1, %v13254_v38  ;;  %v5334_v48 = vrot.slane %v13279_v29, 1  ;;  %v14654_v38 = vld [vmem:[#allocation20_spill] sm:$0xff] }
 0x1d3   : > { %9500 = vmatprep.mubr.msk.f32.mxu1 %vm681_vm1, %v14652_v30  ;;  %v2845_v15 = vrot.slane %v14654_v38, 7  ;;  %v2847_v30 = vrot.slane %v12690_v39, 7 }
 0x1d4   : > { %v13296_v38 = vsel %vm4838_vm4, %v5333_v16, %v5334_v48  ;;  %v13306_v51 = vsel %vm4838_vm4, %v5334_v48, %v5336_v25  ;;  %v14656_v16 = vld [vmem:[#allocation24_spill] sm:$0xff]  ;;  %v14668_v25 = vld [vmem:[#allocation49_spill] sm:$0xff] }
 0x1d5   : > { %9901 = vmatmul.mubr.msk.f32.gmra.mrb[26].mxu0 %vm681_vm1, %v13269_v45  ;;  %v2846_v10 = vsel %vm1232_vm3, %v2844_v18, %v2845_v15  ;;  %v2848_v39 = vsel %vm1232_vm3, %v2845_v15, %v2847_v30  ;;  %v10857_v15 = vld [vmem:[#allocation2 + $0x10] sm:$0xff]  ;;  %v14665_v48 = vld [vmem:[#allocation44_spill] sm:$0xff]  ;;  %v14669_v30 = vld [vmem:[#allocation23_spill] sm:$0xff] }
 0x1d6   : > { %9501 = vmatmul.mubr.msk.f32.gmra.mrb[26].mxu1 %vm681_vm1, %v14655_v63  ;;  %9903 = vmatprep.mubr.msk.f32.mxu0 %vm681_vm1, %v13274_v4  ;;  %v14666_v18 = vld [vmem:[#allocation50_spill] sm:$0xff]  ;;  %v14667_v63 = vld [vmem:[#allocation45_spill] sm:$0xff] }
 0x1d7   : > { %9503 = vmatprep.mubr.msk.f32.mxu1 %vm681_vm1, %v12682_v5  ;;  %v10856_v5 = vld [vmem:[#allocation2 + $0x8] sm:$0xff] }
 0x1d9   : > { %9904 = vmatmul.mubr.msk.f32.gmra.mrb[28].mxu0 %vm681_vm1, %v13290_v11 }
 0x1da   : > { %9504 = vmatmul.mubr.msk.f32.gmra.mrb[28].mxu1 %vm681_vm1, %v12695_v47  ;;  %9906 = vmatprep.mubr.msk.f32.mxu0 %vm681_vm1, %v13296_v38  ;;  %v13321_v47 = vld [vmem:[%s14242_s6 + $0x40] sm:$0xff] }
 0x1db   : > { %9506 = vmatprep.mubr.msk.f32.mxu1 %vm681_vm1, %v2846_v10  ;;  %v14670_v10 = vld [vmem:[#allocation28_spill] sm:$0xff] }
 0x1dd   : > { %9907 = vmatmul.mubr.msk.f32.gmra.mrb[30].mxu0 %vm681_vm1, %v13306_v51 }
 0x1de   : > { %9507 = vmatmul.mubr.msk.f32.gmra.mrb[30].mxu1 %vm681_vm1, %v2848_v39  ;;  %9911 = vmatprep.mubr.msk.f32.mxu0 %vm608_vm2, %v12715_v26  ;;  %v13329_v26 = vld [vmem:[%s14246_s10] sm:$0xf]  ;;  %v10861_v39 = vld [vmem:[#allocation2 + $0x208] sm:$0xff] }
 0x1df   : > { %9511 = vmatprep.mubr.msk.f32.mxu1 %vm608_vm2, %v10856_v5  ;;  %v5665_v5 = vrot.slane %v10861_v39, 1  ;;  %v14683_v39 = vld [vmem:[#allocation46_spill] sm:$0xff] }
 0x1e1   : > { %9912 = vmatmul.mubr.msk.f32.vlgmr.msra.gmra.mrb[0].mxu0 %vm608_vm2, %v12728_v20  ;;  %v14657_v20 = vld [vmem:[#allocation25_spill] sm:$0xff] }
 0x1e2   : > { %9512 = vmatmul.mubr.msk.f32.vlgmr.msra.gmra.mrb[0].mxu1 %vm608_vm2, %v10857_v15  ;;  %9960 = vmatpush3.msk.msra.mxu0 %vm1507_vm0, %v13031_v44  ;;  %v10858_v44 = vld [vmem:[#allocation2 + $0x48] sm:$0xff]  ;;  %v10862_v15 = vld [vmem:[#allocation2 + $0x210] sm:$0xff] }
 0x1e3   : > { %9514 = vmatprep.mubr.msk.f32.mxu1 %vm608_vm2, %v14656_v16  ;;  %9914 = vmatprep.mubr.msk.f32.mxu0 %vm608_vm2, %v12740_v58  ;;  %v5666_v16 = vrot.slane %v10862_v15, 1  ;;  %v14685_v15 = vld [vmem:[#allocation51_spill] sm:$0xff] }
 0x1e4   : > { %9560 = vmatpush3.msk.msra.mxu1 %vm1507_vm0, %v13042_v42  ;;  %10009 = vmatprep.subr.mxu0 %v13321_v47  ;;  %v10859_v42 = vld [vmem:[#allocation2 + $0x50] sm:$0xff] }
 0x1e5   : > { %9915 = vmatmul.mubr.msk.f32.gmra.mrb[2].mxu0 %vm608_vm2, %v12755_v22  ;;  %10109 = vmatprep.subr.msk.mxu1 %vm1507_vm0, %v13329_v26 }
 0x1e6   : > { %9515 = vmatmul.mubr.msk.f32.gmra.mrb[2].mxu1 %vm608_vm2, %v14657_v20  ;;  %9917 = vmatprep.mubr.msk.f32.mxu0 %vm608_vm2, %v12760_v54  ;;  %v14671_v20 = vld [vmem:[#allocation55_spill] sm:$0xff] }
 0x1e7   : > { %9517 = vmatprep.mubr.msk.f32.mxu1 %vm608_vm2, %v10858_v44  ;;  %v1107_v44 = vld [vmem:[#allocation2 + $0x218] sm:$0xff] }
 0x1e9   : > { %9918 = vmatmul.mubr.msk.f32.gmra.mrb[4].mxu0 %vm608_vm2, %v12771_v33 }
 0x1ea   : > { %9518 = vmatmul.mubr.msk.f32.gmra.mrb[4].mxu1 %vm608_vm2, %v10859_v42  ;;  %9920 = vmatprep.mubr.msk.f32.mxu0 %vm608_vm2, %v12776_v55  ;;  %v14672_v42 = vld [vmem:[#allocation56_spill] sm:$0xff] }
 0x1eb   : > { %9520 = vmatprep.mubr.msk.f32.mxu1 %vm608_vm2, %v10860_v8  ;;  %v5668_v8 = vrot.slane %v1107_v44, 1  ;;  %v14688_v44 = vld [vmem:[#allocation16_spill] sm:$0xff] }
 0x1ed   : > { %9921 = vmatmul.mubr.msk.f32.gmra.mrb[6].mxu0 %vm608_vm2, %v12787_v34 }
 0x1ee   : > { %9521 = vmatmul.mubr.msk.f32.gmra.mrb[6].mxu1 %vm608_vm2, %v14565_v43  ;;  %9923 = vmatprep.mubr.msk.f32.mxu0 %vm608_vm2, %v12792_v9  ;;  %v14661_v43 = vld [vmem:[#allocation36_spill] sm:$0xff] }
 0x1ef   : > { %9523 = vmatprep.mubr.msk.f32.mxu1 %vm608_vm2, %v14566_v40  ;;  %v14662_v40 = vld [vmem:[#allocation39_spill] sm:$0xff] }
 0x1f1   : > { %9924 = vmatmul.mubr.msk.f32.gmra.mrb[8].mxu0 %vm608_vm2, %v12807_v12 }
 0x1f2   : > { %9524 = vmatmul.mubr.msk.f32.gmra.mrb[8].mxu1 %vm608_vm2, %v12393_v23  ;;  %9926 = vmatprep.mubr.msk.f32.mxu0 %vm608_vm2, %v12812_v21  ;;  %v14658_v23 = vld [vmem:[#allocation30_spill] sm:$0xff] }
 0x1f3   : > { %9526 = vmatprep.mubr.msk.f32.mxu1 %vm608_vm2, %v12399_v37  ;;  %v14659_v37 = vld [vmem:[#allocation32_spill] sm:$0xff] }
 0x1f5   : > { %9927 = vmatmul.mubr.msk.f32.gmra.mrb[10].mxu0 %vm608_vm2, %v12827_v6 }
 0x1f6   : > { %9527 = vmatmul.mubr.msk.f32.gmra.mrb[10].mxu1 %vm608_vm2, %v12405_v24  ;;  %9929 = vmatprep.mubr.msk.f32.mxu0 %vm608_vm2, %v12832_v56  ;;  %v14660_v24 = vld [vmem:[#allocation35_spill] sm:$0xff] }
 0x1f7   : > { %9529 = vmatprep.mubr.msk.f32.mxu1 %vm608_vm2, %v12794_v1  ;;  %v14663_v1 = vld [vmem:[#allocation40_spill] sm:$0xff] }
 0x1f9   : > { %9930 = vmatmul.mubr.msk.f32.gmra.mrb[12].mxu0 %vm608_vm2, %v12847_v17 }
 0x1fa   : > { %9530 = vmatmul.mubr.msk.f32.gmra.mrb[12].mxu1 %vm608_vm2, %v14658_v23  ;;  %9932 = vmatprep.mubr.msk.f32.mxu0 %vm608_vm2, %v12852_v3  ;;  %v14673_v23 = vld [vmem:[#allocation57_spill] sm:$0xff] }
 0x1fb   : > { %9532 = vmatprep.mubr.msk.f32.mxu1 %vm608_vm2, %v14659_v37  ;;  %v13442_v37 = vsel %vm4838_vm4, %v5665_v5, %v5666_v16  ;;  %v14684_v5 = vld [vmem:[#allocation14_spill] sm:$0xff] }
 0x1fd   : > { %9933 = vmatmul.mubr.msk.f32.gmra.mrb[14].mxu0 %vm608_vm2, %v12867_v35 }
 0x1fe   : > { %9533 = vmatmul.mubr.msk.f32.gmra.mrb[14].mxu1 %vm608_vm2, %v14660_v24  ;;  %9935 = vmatprep.mubr.msk.f32.mxu0 %vm608_vm2, %v12872_v62  ;;  %v10863_v24 = vld [vmem:[#allocation2 + $0x1d0] sm:$0xff] }
 0x1ff   : > { %9535 = vmatprep.mubr.msk.f32.mxu1 %vm608_vm2, %v14661_v43  ;;  %v13450_v43 = vsel %vm4838_vm4, %v5666_v16, %v5668_v8  ;;  %v14686_v16 = vld [vmem:[#allocation15_spill] sm:$0xff]  ;;  %v14690_v8 = vld [vmem:[#allocation17_spill] sm:$0xff] }
 0x201   : > { %9936 = vmatmul.mubr.msk.f32.gmra.mrb[16].mxu0 %vm608_vm2, %v12887_v0 }
 0x202   : > { %9536 = vmatmul.mubr.msk.f32.gmra.mrb[16].mxu1 %vm608_vm2, %v14662_v40  ;;  %9938 = vmatprep.mubr.msk.f32.mxu0 %vm608_vm2, %v12892_v2  ;;  %v10864_v40 = vld [vmem:[#allocation2 + $0x1e8] sm:$0xff] }
 0x203   : > { %9538 = vmatprep.mubr.msk.f32.mxu1 %vm608_vm2, %v14663_v1  ;;  %v10865_v1 = vld [vmem:[#allocation2 + $0x1f0] sm:$0xff] }
 0x205   : > { %9939 = vmatmul.mubr.msk.f32.gmra.mrb[18].mxu0 %vm608_vm2, %v12907_v14 }
 0x206   : > { %9539 = vmatmul.mubr.msk.f32.gmra.mrb[18].mxu1 %vm608_vm2, %v14664_v28  ;;  %9941 = vmatprep.mubr.msk.f32.mxu0 %vm608_vm2, %v12912_v50  ;;  %v13465_v28 = vld [vmem:[%s14243_s7 + $0x20] sm:$0xf] }
 0x207   : > { %9541 = vmatprep.mubr.msk.f32.mxu1 %vm608_vm2, %v14665_v48  ;;  %v14674_v48 = vld [vmem:[#allocation58_spill] sm:$0xff] }
 0x209   : > { %9942 = vmatmul.mubr.msk.f32.gmra.mrb[20].mxu0 %vm608_vm2, %v12927_v32 }
 0x20a   : > { %9542 = vmatmul.mubr.msk.f32.gmra.mrb[20].mxu1 %vm608_vm2, %v14666_v18  ;;  %9944 = vmatprep.mubr.msk.f32.mxu0 %vm608_vm2, %v12932_v60  ;;  %v14678_v18 = vld [vmem:[#allocation11_spill] sm:$0xff] }
 0x20b   : > { %9544 = vmatprep.mubr.msk.f32.mxu1 %vm608_vm2, %v14667_v63  ;;  %v14679_v63 = vld [vmem:[#allocation29_spill] sm:$0xff] }
 0x20d   : > { %9945 = vmatmul.mubr.msk.f32.gmra.mrb[22].mxu0 %vm608_vm2, %v12947_v57 }
 0x20e   : > { %9545 = vmatmul.mubr.msk.f32.gmra.mrb[22].mxu1 %vm608_vm2, %v14668_v25  ;;  %9947 = vmatprep.mubr.msk.f32.mxu0 %vm608_vm2, %v12952_v41  ;;  %v14680_v25 = vld [vmem:[#allocation12_spill] sm:$0xff] }
 0x20f   : > { %9547 = vmatprep.mubr.msk.f32.mxu1 %vm608_vm2, %v14669_v30  ;;  %v14681_v30 = vld [vmem:[#allocation33_spill] sm:$0xff] }
 0x211   : > { %9948 = vmatmul.mubr.msk.f32.gmra.mrb[24].mxu0 %vm608_vm2, %v12965_v53 }
 0x212   : > { %9548 = vmatmul.mubr.msk.f32.gmra.mrb[24].mxu1 %vm608_vm2, %v14670_v10  ;;  %9950 = vmatprep.mubr.msk.f32.mxu0 %vm608_vm2, %v12970_v61  ;;  %v14682_v10 = vld [vmem:[#allocation13_spill] sm:$0xff] }
 0x213   : > { %9550 = vmatprep.mubr.msk.f32.mxu1 %vm608_vm2, %v14671_v20  ;;  %v14687_v20 = vld [vmem:[#allocation4_spill] sm:$0xff] }
 0x215   : > { %9951 = vmatmul.mubr.msk.f32.gmra.mrb[26].mxu0 %vm608_vm2, %v12982_v13 }
 0x216   : > { %9551 = vmatmul.mubr.msk.f32.gmra.mrb[26].mxu1 %vm608_vm2, %v14672_v42  ;;  %9953 = vmatprep.mubr.msk.f32.mxu0 %vm608_vm2, %v12988_v49  ;;  %v14689_v42 = vld [vmem:[#allocation5_spill] sm:$0xff] }
 0x217   : > { %9553 = vmatprep.mubr.msk.f32.mxu1 %vm608_vm2, %v14673_v23  ;;  %v14691_v23 = vld [vmem:[#allocation6_spill] sm:$0xff] }
 0x219   : > { %9954 = vmatmul.mubr.msk.f32.gmra.mrb[28].mxu0 %vm608_vm2, %v13004_v31 }
 0x21a   : > { %9554 = vmatmul.mubr.msk.f32.gmra.mrb[28].mxu1 %vm608_vm2, %v10863_v24  ;;  %9956 = vmatprep.mubr.msk.f32.mxu0 %vm608_vm2, %v13442_v37  ;;  %v14692_v24 = vld [vmem:[#allocation19_spill] sm:$0xff] }
 0x21b   : > { %9556 = vmatprep.mubr.msk.f32.mxu1 %vm608_vm2, %v10864_v40  ;;  %v14693_v40 = vld [vmem:[#allocation7_spill] sm:$0xff] }
 0x21d   : > { %9957 = vmatmul.mubr.msk.f32.gmra.mrb[30].mxu0 %vm608_vm2, %v13450_v43 }
 0x21e   : > { %9557 = vmatmul.mubr.msk.f32.gmra.mrb[30].mxu1 %vm608_vm2, %v10865_v1  ;;  %9961 = vmatprep.mubr.msk.f32.mxu0 %vm681_vm1, %v13025_v27  ;;  %v13473_v27 = vld [vmem:[%s14245_s9] sm:$0xff]  ;;  %v14694_v1 = vld [vmem:[#allocation21_spill] sm:$0xff] }
 0x21f   : > { %9561 = vmatprep.mubr.msk.f32.mxu1 %vm681_vm1, %v12990_v52  ;;  %v14675_v52 = vld [vmem:[#allocation59_spill] sm:$0xff] }
 0x221   : > { %9962 = vmatmul.mubr.msk.f32.vlgmr.msra.gmra.mrb[0].mxu0 %vm681_vm1, %v13037_v46  ;;  %v14676_v46 = vld [vmem:[#allocation9_spill] sm:$0xff] }
 0x222   : > { %9562 = vmatmul.mubr.msk.f32.vlgmr.msra.gmra.mrb[0].mxu1 %vm681_vm1, %v14674_v48  ;;  %10010 = vmatpush3.msra.mxu0 %v13321_v47  ;;  %v14677_v47 = vld [vmem:[#allocation10_spill] sm:$0xff]  ;;  %v14695_v48 = vld [vmem:[#allocation8_spill] sm:$0xff] }
 0x223   : > { %9564 = vmatprep.mubr.msk.f32.mxu1 %vm681_vm1, %v13009_v7  ;;  %9964 = vmatprep.mubr.msk.f32.mxu0 %vm681_vm1, %v13049_v59  ;;  %v10866_v7 = vld [vmem:[#allocation3 + $0x48] sm:$0xff] }
 0x224   : > { %10110 = vmatpush3.msk.msra.mxu1 %vm1507_vm0, %v13329_v26  ;;  %10059 = vmatprep.subr.msk.mxu0 %vm1507_vm0, %v13465_v28  ;;  %v10867_v26 = vld [vmem:[#allocation3 + $0x50] sm:$0xff] }
 0x225   : > { %9965 = vmatmul.mubr.msk.f32.gmra.mrb[2].mxu0 %vm681_vm1, %v13065_v19  ;;  %10159 = vmatprep.subr.mxu1 %v13473_v27 }
 0x226   : > { %9565 = vmatmul.mubr.msk.f32.gmra.mrb[2].mxu1 %vm681_vm1, %v14675_v52  ;;  %9967 = vmatprep.mubr.msk.f32.mxu0 %vm681_vm1, %v14676_v46  ;;  %v14696_v52 = vld [vmem:[#allocation22_spill] sm:$0xff] }
 0x227   : > { %9567 = vmatprep.mubr.msk.f32.mxu1 %vm681_vm1, %v10866_v7  ;;  %v14697_v7 = vld [vmem:[#allocation54_spill] sm:$0xff] }
 0x229   : > { %9968 = vmatmul.mubr.msk.f32.gmra.mrb[4].mxu0 %vm681_vm1, %v14677_v47 }
 0x22a   : > { %9568 = vmatmul.mubr.msk.f32.gmra.mrb[4].mxu1 %vm681_vm1, %v10867_v26  ;;  %9970 = vmatprep.mubr.msk.f32.mxu0 %vm681_vm1, %v14678_v18  ;;  %v14698_v26 = vld [vmem:[#allocation26_spill] sm:$0xff] }
 0x22b   : > { %9570 = vmatprep.mubr.msk.f32.mxu1 %vm681_vm1, %v14679_v63  ;;  %v14699_v63 = vld [vmem:[#allocation18_spill] sm:$0xff] }
 0x22d   : > { %9971 = vmatmul.mubr.msk.f32.gmra.mrb[6].mxu0 %vm681_vm1, %v14680_v25 }
 0x22e   : > { %9571 = vmatmul.mubr.msk.f32.gmra.mrb[6].mxu1 %vm681_vm1, %v14681_v30  ;;  %9973 = vmatprep.mubr.msk.f32.mxu0 %vm681_vm1, %v14682_v10  ;;  %v14700_v30 = vld [vmem:[#allocation27_spill] sm:$0xff] }
 0x22f   : > { %9573 = vmatprep.mubr.msk.f32.mxu1 %vm681_vm1, %v14683_v39  ;;  %v14701_v39 = vld [vmem:[#allocation60_spill] sm:$0xff] }
 0x231   : > { %9974 = vmatmul.mubr.msk.f32.gmra.mrb[8].mxu0 %vm681_vm1, %v14684_v5 }
 0x232   : > { %9574 = vmatmul.mubr.msk.f32.gmra.mrb[8].mxu1 %vm681_vm1, %v14685_v15  ;;  %9976 = vmatprep.mubr.msk.f32.mxu0 %vm681_vm1, %v14686_v16  ;;  %v14702_v15 = vld [vmem:[#allocation31_spill] sm:$0xff] }
 0x233   : > { %9576 = vmatprep.mubr.msk.f32.mxu1 %vm681_vm1, %v14687_v20  ;;  %v14703_v20 = vld [vmem:[#allocation61_spill] sm:$0xff] }
 0x235   : > { %9977 = vmatmul.mubr.msk.f32.gmra.mrb[10].mxu0 %vm681_vm1, %v14688_v44 }
 0x236   : > { %9577 = vmatmul.mubr.msk.f32.gmra.mrb[10].mxu1 %vm681_vm1, %v14689_v42  ;;  %9979 = vmatprep.mubr.msk.f32.mxu0 %vm681_vm1, %v14690_v8  ;;  %v14704_v42 = vld [vmem:[#allocation34_spill] sm:$0xff] }
 0x237   : > { %9579 = vmatprep.mubr.msk.f32.mxu1 %vm681_vm1, %v14691_v23  ;;  %v14705_v23 = vld [vmem:[#allocation62_spill] sm:$0xff] }
 0x239   : > { %9980 = vmatmul.mubr.msk.f32.gmra.mrb[12].mxu0 %vm681_vm1, %v14692_v24 }
 0x23a   : > { %9580 = vmatmul.mubr.msk.f32.gmra.mrb[12].mxu1 %vm681_vm1, %v14693_v40  ;;  %9982 = vmatprep.mubr.msk.f32.mxu0 %vm681_vm1, %v14694_v1  ;;  %v14706_v40 = vld [vmem:[#allocation37_spill] sm:$0xff] }
 0x23b   : > { %9582 = vmatprep.mubr.msk.f32.mxu1 %vm681_vm1, %v14695_v48  ;;  %v14707_v48 = vld [vmem:[#allocation63_spill] sm:$0xff] }
 0x23d   : > { %9983 = vmatmul.mubr.msk.f32.gmra.mrb[14].mxu0 %vm681_vm1, %v14696_v52 }
 0x23e   : > { %9583 = vmatmul.mubr.msk.f32.gmra.mrb[14].mxu1 %vm681_vm1, %v14697_v7  ;;  %9985 = vmatprep.mubr.msk.f32.mxu0 %vm681_vm1, %v14698_v26  ;;  %v14708_v7 = vld [vmem:[#allocation38_spill] sm:$0xff] }
 0x23f   : > { %9585 = vmatprep.mubr.msk.f32.mxu1 %vm681_vm1, %v14699_v63  ;;  %v14709_v63 = vld [vmem:[#allocation64_spill] sm:$0xff] }
 0x241   : > { %9986 = vmatmul.mubr.msk.f32.gmra.mrb[16].mxu0 %vm681_vm1, %v14700_v30 }
 0x242   : > { %9586 = vmatmul.mubr.msk.f32.gmra.mrb[16].mxu1 %vm681_vm1, %v14701_v39  ;;  %9988 = vmatprep.mubr.msk.f32.mxu0 %vm681_vm1, %v14702_v15  ;;  %v14710_v39 = vld [vmem:[#allocation41_spill] sm:$0xff] }
 0x243   : > { %9588 = vmatprep.mubr.msk.f32.mxu1 %vm681_vm1, %v14703_v20  ;;  %v14711_v20 = vld [vmem:[#allocation65_spill] sm:$0xff] }
 0x245   : > { %9989 = vmatmul.mubr.msk.f32.gmra.mrb[18].mxu0 %vm681_vm1, %v14704_v42  ;;  %v14712_v42 = vld [vmem:[#allocation42_spill] sm:$0xff] }
 0x246   : > { %9589 = vmatmul.mubr.msk.f32.gmra.mrb[18].mxu1 %vm681_vm1, %v14705_v23  ;;  %9991 = vmatprep.mubr.msk.f32.mxu0 %vm681_vm1, %v14706_v40  ;;  %v14713_v23 = vld [vmem:[#allocation66_spill] sm:$0xff]  ;;  %v14714_v40 = vld [vmem:[#allocation47_spill] sm:$0xff] }
 0x247   : > { %9591 = vmatprep.mubr.msk.f32.mxu1 %vm681_vm1, %v14707_v48  ;;  %v14715_v48 = vld [vmem:[#allocation67_spill] sm:$0xff] }
 0x249   : > { %9992 = vmatmul.mubr.msk.f32.gmra.mrb[20].mxu0 %vm681_vm1, %v14708_v7 }
 0x24a   : > { %9592 = vmatmul.mubr.msk.f32.gmra.mrb[20].mxu1 %vm681_vm1, %v14709_v63  ;;  %9994 = vmatprep.mubr.msk.f32.mxu0 %vm681_vm1, %v14710_v39  ;;  %v14716_v63 = vld [vmem:[#allocation68_spill] sm:$0xff]  ;;  %v10869_v39 = vld [vmem:[#allocation3 + $0x210] sm:$0xff] }
 0x24b   : > { %9594 = vmatprep.mubr.msk.f32.mxu1 %vm681_vm1, %v14711_v20  ;;  %v10868_v20 = vld [vmem:[#allocation3 + $0x208] sm:$0xff]  ;;  %v5935_v7 = vrot.slane %v10869_v39, 1 }
 0x24d   : > { %9995 = vmatmul.mubr.msk.f32.gmra.mrb[22].mxu0 %vm681_vm1, %v14712_v42  ;;  %v5934_v42 = vrot.slane %v10868_v20, 1  ;;  %v14720_v20 = vld [vmem:[#allocation72_spill] sm:$0xff] }
 0x24e   : > { %9595 = vmatmul.mubr.msk.f32.gmra.mrb[22].mxu1 %vm681_vm1, %v14713_v23  ;;  %9997 = vmatprep.mubr.msk.f32.mxu0 %vm681_vm1, %v14714_v40  ;;  %v14717_v23 = vld [vmem:[#allocation69_spill] sm:$0xff]  ;;  %v1179_v40 = vld [vmem:[#allocation3 + $0x218] sm:$0xff] }
 0x24f   : > { %9597 = vmatprep.mubr.msk.f32.mxu1 %vm681_vm1, %v14715_v48  ;;  %v14718_v48 = vld [vmem:[#allocation70_spill] sm:$0xff]  ;;  %v13587_v39 = vsel %vm4838_vm4, %v5934_v42, %v5935_v7  ;;  %v10871_v42 = vld [vmem:[%s11392_s28 + $0x8] sm:$0xff] }
 0x251   : > { %9998 = vmatmul.mubr.msk.f32.gmra.mrb[24].mxu0 %vm681_vm1, %v13269_v45 }
 0x252   : > { %9598 = vmatmul.mubr.msk.f32.gmra.mrb[24].mxu1 %vm681_vm1, %v14716_v63  ;;  %10000 = vmatprep.mubr.msk.f32.mxu0 %vm681_vm1, %v13274_v4  ;;  %v5937_v63 = vrot.slane %v1179_v40, 1  ;;  %v14719_v4 = vld [vmem:[#allocation71_spill] sm:$0xff]  ;;  %v10898_v40 = vld [vmem:[%s11392_s28 + $0xd0] sm:$0xff] }
 0x253   : > { %9600 = vmatprep.mubr.msk.f32.mxu1 %vm681_vm1, %v14717_v23 }
 0x254   : > { %v13596_v23 = vsel %vm4838_vm4, %v5935_v7, %v5937_v63  ;;  %v10900_v7 = vld [vmem:[%s11392_s28 + $0xe0] sm:$0xff]  ;;  %v10901_v63 = vld [vmem:[%s11392_s28 + $0xe8] sm:$0xff] }
 0x255   : > { %10001 = vmatmul.mubr.msk.f32.gmra.mrb[26].mxu0 %vm681_vm1, %v13290_v11 }
 0x256   : > { %9601 = vmatmul.mubr.msk.f32.gmra.mrb[26].mxu1 %vm681_vm1, %v14718_v48  ;;  %10003 = vmatprep.mubr.msk.f32.mxu0 %vm681_vm1, %v13296_v38 }
 0x257   : > { %9603 = vmatprep.mubr.msk.f32.mxu1 %vm681_vm1, %v14719_v4  ;;  %v10870_v4 = vld [vmem:[%s11392_s28] sm:$0xff] }
 0x259   : > { %10004 = vmatmul.mubr.msk.f32.gmra.mrb[28].mxu0 %vm681_vm1, %v13306_v51 }
 0x25a   : > { %9604 = vmatmul.mubr.msk.f32.gmra.mrb[28].mxu1 %vm681_vm1, %v14720_v20  ;;  %10006 = vmatprep.mubr.msk.f32.mxu0 %vm681_vm1, %v13587_v39  ;;  %v10903_v20 = vld [vmem:[%s11392_s28 + $0xf8] sm:$0xff] }
 0x25b   : > { %9606 = vmatprep.mubr.msk.f32.mxu1 %vm681_vm1, %v13276_v36  ;;  %v10872_v36 = vld [vmem:[%s11392_s28 + $0x10] sm:$0xff] }
 0x25d   : > { %10007 = vmatmul.mubr.msk.f32.gmra.mrb[30].mxu0 %vm681_vm1, %v13596_v23 }
 0x25e   : > { %9607 = vmatmul.mubr.msk.f32.gmra.mrb[30].mxu1 %vm681_vm1, %v13279_v29  ;;  %10011 = vmatprep.mubr.msk.f32.mxu0 %vm608_vm2, %v12740_v58  ;;  %v10873_v58 = vld [vmem:[%s11392_s28 + $0x18] sm:$0xff] }
 0x25f   : > { %10111 = vmatprep.mubr.msk.f32.mxu1 %vm681_vm1, %v10870_v4  ;;  %v10905_v4 = vld [vmem:[%s11381_s23 + $0x8] sm:$0xff] }
 0x261   : > { %10012 = vmatmul.mubr.msk.f32.vlgmr.msra.gmra.mrb[0].mxu0 %vm608_vm2, %v12755_v22  ;;  %v10874_v22 = vld [vmem:[%s11392_s28 + $0x20] sm:$0xff] }
 0x262   : > { %10112 = vmatmul.mubr.msk.f32.vlgmr.msra.gmra.mrb[32].mxu1 %vm681_vm1, %v10871_v42  ;;  %10060 = vmatpush3.msk.msra.mxu0 %vm1507_vm0, %v13465_v28  ;;  %v10897_v28 = vld [vmem:[#allocation2 + $0x230] sm:$0xff] }
 0x263   : > { %10114 = vmatprep.mubr.msk.f32.mxu1 %vm681_vm1, %v10872_v36  ;;  %10014 = vmatprep.mubr.msk.f32.mxu0 %vm608_vm2, %v12760_v54  ;;  %v10875_v54 = vld [vmem:[%s11392_s28 + $0x28] sm:$0xff]  ;;  %v10906_v42 = vld [vmem:[%s11381_s23 + $0x10] sm:$0xff] }
 0x264   : > { %10160 = vmatpush3.msra.mxu1 %v13473_v27  ;;  %v6207_v27 = vrot.slane %v10897_v28, 1  ;;  %v14721_v36 = vld [vmem:[#allocation34_spill] sm:$0xff] }
 0x265   : > { %10015 = vmatmul.mubr.msk.f32.gmra.mrb[2].mxu0 %vm608_vm2, %v12771_v33  ;;  %v10876_v33 = vld [vmem:[%s11392_s28 + $0x30] sm:$0xff] }
 0x266   : > { %10115 = vmatmul.mubr.msk.f32.gmra.mrb[34].mxu1 %vm681_vm1, %v10873_v58  ;;  %10017 = vmatprep.mubr.msk.f32.mxu0 %vm608_vm2, %v12776_v55  ;;  %v10877_v55 = vld [vmem:[%s11392_s28 + $0x38] sm:$0xff]  ;;  %v14722_v58 = vld [vmem:[#allocation37_spill] sm:$0xff] }
 0x267   : > { %10117 = vmatprep.mubr.msk.f32.mxu1 %vm681_vm1, %v10874_v22  ;;  %v14723_v22 = vld [vmem:[#allocation38_spill] sm:$0xff] }
 0x269   : > { %10018 = vmatmul.mubr.msk.f32.gmra.mrb[4].mxu0 %vm608_vm2, %v12787_v34  ;;  %v10878_v34 = vld [vmem:[%s11392_s28 + $0x40] sm:$0xff] }
 0x26a   : > { %10118 = vmatmul.mubr.msk.f32.gmra.mrb[36].mxu1 %vm681_vm1, %v10875_v54  ;;  %10020 = vmatprep.mubr.msk.f32.mxu0 %vm608_vm2, %v12792_v9  ;;  %v10879_v9 = vld [vmem:[%s11392_s28 + $0x48] sm:$0xff] }
 0x26b   : > { %10120 = vmatprep.mubr.msk.f32.mxu1 %vm681_vm1, %v10876_v33  ;;  %v14724_v54 = vld [vmem:[#allocation41_spill] sm:$0xff]  ;;  %v10924_v33 = vld [vmem:[%s11381_s23 + $0xa0] sm:$0xff] }
 0x26d   : > { %10021 = vmatmul.mubr.msk.f32.gmra.mrb[6].mxu0 %vm608_vm2, %v12807_v12  ;;  %v10880_v12 = vld [vmem:[%s11392_s28 + $0x50] sm:$0xff] }
 0x26e   : > { %10121 = vmatmul.mubr.msk.f32.gmra.mrb[38].mxu1 %vm681_vm1, %v10877_v55  ;;  %10023 = vmatprep.mubr.msk.f32.mxu0 %vm608_vm2, %v12812_v21  ;;  %v10881_v21 = vld [vmem:[%s11392_s28 + $0x58] sm:$0xff]  ;;  %v14725_v55 = vld [vmem:[#allocation42_spill] sm:$0xff] }
 0x26f   : > { %10123 = vmatprep.mubr.msk.f32.mxu1 %vm681_vm1, %v10878_v34  ;;  %v10925_v34 = vld [vmem:[%s11381_s23 + $0xa8] sm:$0xff] }
 0x271   : > { %10024 = vmatmul.mubr.msk.f32.gmra.mrb[8].mxu0 %vm608_vm2, %v12827_v6  ;;  %v10882_v6 = vld [vmem:[%s11392_s28 + $0x60] sm:$0xff] }
 0x272   : > { %10124 = vmatmul.mubr.msk.f32.gmra.mrb[40].mxu1 %vm681_vm1, %v10879_v9  ;;  %10026 = vmatprep.mubr.msk.f32.mxu0 %vm608_vm2, %v12832_v56  ;;  %v10883_v56 = vld [vmem:[%s11392_s28 + $0x68] sm:$0xff]  ;;  %v14726_v9 = vld [vmem:[#allocation47_spill] sm:$0xff] }
 0x273   : > { %10126 = vmatprep.mubr.msk.f32.mxu1 %vm681_vm1, %v10880_v12  ;;  %v10926_v12 = vld [vmem:[%s11381_s23 + $0xb0] sm:$0xff] }
 0x275   : > { %10027 = vmatmul.mubr.msk.f32.gmra.mrb[10].mxu0 %vm608_vm2, %v12847_v17  ;;  %v10884_v17 = vld [vmem:[%s11392_s28 + $0x70] sm:$0xff] }
 0x276   : > { %10127 = vmatmul.mubr.msk.f32.gmra.mrb[42].mxu1 %vm681_vm1, %v10881_v21  ;;  %10029 = vmatprep.mubr.msk.f32.mxu0 %vm608_vm2, %v12852_v3  ;;  %v10885_v3 = vld [vmem:[%s11392_s28 + $0x78] sm:$0xff] }
 0x277   : > { %10129 = vmatprep.mubr.msk.f32.mxu1 %vm681_vm1, %v10882_v6  ;;  %v10927_v21 = vld [vmem:[%s11381_s23 + $0xb8] sm:$0xff]  ;;  %v14727_v6 = vld [vmem:[#allocation48_spill] sm:$0xff] }
 0x279   : > { %10030 = vmatmul.mubr.msk.f32.gmra.mrb[12].mxu0 %vm608_vm2, %v12867_v35  ;;  %v10886_v35 = vld [vmem:[%s11392_s28 + $0x80] sm:$0xff] }
 0x27a   : > { %10130 = vmatmul.mubr.msk.f32.gmra.mrb[44].mxu1 %vm681_vm1, %v10883_v56  ;;  %10032 = vmatprep.mubr.msk.f32.mxu0 %vm608_vm2, %v12872_v62  ;;  %v10887_v62 = vld [vmem:[%s11392_s28 + $0x88] sm:$0xff]  ;;  %v10928_v56 = vld [vmem:[%s11381_s23 + $0xc0] sm:$0xff] }
 0x27b   : > { %10132 = vmatprep.mubr.msk.f32.mxu1 %vm681_vm1, %v10884_v17  ;;  %v10929_v17 = vld [vmem:[%s11381_s23 + $0xc8] sm:$0xff] }
 0x27d   : > { %10033 = vmatmul.mubr.msk.f32.gmra.mrb[14].mxu0 %vm608_vm2, %v12887_v0  ;;  %v10888_v0 = vld [vmem:[%s11392_s28 + $0x90] sm:$0xff] }
 0x27e   : > { %10133 = vmatmul.mubr.msk.f32.gmra.mrb[46].mxu1 %vm681_vm1, %v10885_v3  ;;  %10035 = vmatprep.mubr.msk.f32.mxu0 %vm608_vm2, %v12892_v2  ;;  %v10889_v2 = vld [vmem:[%s11392_s28 + $0x98] sm:$0xff] }
 0x27f   : > { %10135 = vmatprep.mubr.msk.f32.mxu1 %vm681_vm1, %v10886_v35  ;;  %v10931_v35 = vld [vmem:[#allocation3 + $0x230] sm:$0xff] }
 0x281   : > { %10036 = vmatmul.mubr.msk.f32.gmra.mrb[16].mxu0 %vm608_vm2, %v12907_v14  ;;  %v10890_v14 = vld [vmem:[%s11392_s28 + $0xa0] sm:$0xff] }
 0x282   : > { %10136 = vmatmul.mubr.msk.f32.gmra.mrb[48].mxu1 %vm681_vm1, %v10887_v62  ;;  %10038 = vmatprep.mubr.msk.f32.mxu0 %vm608_vm2, %v12912_v50  ;;  %v10891_v50 = vld [vmem:[%s11392_s28 + $0xa8] sm:$0xff]  ;;  %v6476_v62 = vrot.slane %v10931_v35, 1 }
 0x283   : > { %10138 = vmatprep.mubr.msk.f32.mxu1 %vm681_vm1, %v10888_v0  ;;  %v10932_v0 = vld [vmem:[%s11381_s23 + $0xd0] sm:$0xff] }
 0x285   : > { %10039 = vmatmul.mubr.msk.f32.gmra.mrb[18].mxu0 %vm608_vm2, %v12927_v32  ;;  %v10892_v32 = vld [vmem:[%s11392_s28 + $0xb0] sm:$0xff] }
 0x286   : > { %10139 = vmatmul.mubr.msk.f32.gmra.mrb[50].mxu1 %vm681_vm1, %v10889_v2  ;;  %10041 = vmatprep.mubr.msk.f32.mxu0 %vm608_vm2, %v12932_v60  ;;  %v10893_v60 = vld [vmem:[%s11392_s28 + $0xb8] sm:$0xff] }
 0x287   : > { %10141 = vmatprep.mubr.msk.f32.mxu1 %vm681_vm1, %v10890_v14  ;;  %v1183_v2 = vld [vmem:[#allocation3 + $0x238] sm:$0xff]  ;;  %v10934_v14 = vld [vmem:[%s11381_s23 + $0xe0] sm:$0xff] }
 0x289   : > { %10042 = vmatmul.mubr.msk.f32.gmra.mrb[20].mxu0 %vm608_vm2, %v12947_v57  ;;  %v10894_v57 = vld [vmem:[%s11392_s28 + $0xc0] sm:$0xff] }
 0x28a   : > { %10142 = vmatmul.mubr.msk.f32.gmra.mrb[52].mxu1 %vm681_vm1, %v10891_v50  ;;  %10044 = vmatprep.mubr.msk.f32.mxu0 %vm608_vm2, %v12952_v41  ;;  %v10895_v41 = vld [vmem:[%s11392_s28 + $0xc8] sm:$0xff] }
 0x28b   : > { %10144 = vmatprep.mubr.msk.f32.mxu1 %vm681_vm1, %v10892_v32  ;;  %v10935_v32 = vld [vmem:[%s11381_s23 + $0xe8] sm:$0xff] }
 0x28d   : > { %10045 = vmatmul.mubr.msk.f32.gmra.mrb[22].mxu0 %vm608_vm2, %v12965_v53  ;;  %v10896_v53 = vld [vmem:[#allocation2 + $0x228] sm:$0xff] }
 0x28e   : > { %10145 = vmatmul.mubr.msk.f32.gmra.mrb[54].mxu1 %vm681_vm1, %v10893_v60  ;;  %10047 = vmatprep.mubr.msk.f32.mxu0 %vm608_vm2, %v12970_v61  ;;  %v6206_v29 = vrot.slane %v10896_v53, 1  ;;  %v1111_v61 = vld [vmem:[#allocation2 + $0x238] sm:$0xff]  ;;  %v10936_v60 = vld [vmem:[%s11381_s23 + $0xf0] sm:$0xff] }
 0x28f   : > { %10147 = vmatprep.mubr.msk.f32.mxu1 %vm681_vm1, %v10894_v57 }
 0x290   : > { %v6208_v48 = vsel %vm4838_vm4, %v6206_v29, %v6207_v27 }
 0x291   : > { %10048 = vmatmul.mubr.msk.f32.gmra.mrb[24].mxu0 %vm608_vm2, %v12982_v13  ;;  %v10899_v13 = vld [vmem:[%s11392_s28 + $0xd8] sm:$0xff] }
 0x292   : > { %10148 = vmatmul.mubr.msk.f32.gmra.mrb[56].mxu1 %vm681_vm1, %v10895_v41  ;;  %10050 = vmatprep.mubr.msk.f32.mxu0 %vm608_vm2, %v12988_v49  ;;  %v6209_v49 = vrot.slane %v1111_v61, 1 }
 0x293   : > { %10150 = vmatprep.mubr.msk.f32.mxu1 %vm681_vm1, %v10898_v40 }
 0x295   : > { %10051 = vmatmul.mubr.msk.f32.gmra.mrb[26].mxu0 %vm608_vm2, %v13004_v31  ;;  %v6210_v31 = vsel %vm4838_vm4, %v6207_v27, %v6209_v49 }
 0x296   : > { %10151 = vmatmul.mubr.msk.f32.gmra.mrb[58].mxu1 %vm681_vm1, %v10899_v13  ;;  %10053 = vmatprep.mubr.msk.f32.mxu0 %vm608_vm2, %v13442_v37  ;;  %v10902_v37 = vld [vmem:[%s11392_s28 + $0xf0] sm:$0xff] }
 0x297   : > { %10153 = vmatprep.mubr.msk.f32.mxu1 %vm681_vm1, %v10900_v7 }
 0x299   : > { %10054 = vmatmul.mubr.msk.f32.gmra.mrb[28].mxu0 %vm608_vm2, %v13450_v43  ;;  %v10904_v43 = vld [vmem:[%s11381_s23] sm:$0xff] }
 0x29a   : > { %10154 = vmatmul.mubr.msk.f32.gmra.mrb[60].mxu1 %vm681_vm1, %v10901_v63  ;;  %10056 = vmatprep.mubr.msk.f32.mxu0 %vm608_vm2, %v6208_v48 }
 0x29b   : > { %10156 = vmatprep.mubr.msk.f32.mxu1 %vm681_vm1, %v10902_v37 }
 0x29d   : > { %10057 = vmatmul.mubr.msk.f32.gmra.mrb[30].mxu0 %vm608_vm2, %v6210_v31 }
 0x29e   : > { %10157 = vmatmul.mubr.msk.f32.gmra.mrb[62].mxu1 %vm681_vm1, %v10903_v20  ;;  %10061 = vmatprep.mubr.msk.f32.mxu0 %vm681_vm1, %v13049_v59  ;;  %v10907_v59 = vld [vmem:[%s11381_s23 + $0x18] sm:$0xff] }
 0x29f   : > { %10161 = vmatprep.mubr.msk.f32.mxu1 %vm608_vm2, %v10904_v43 }
 0x2a1   : > { %10062 = vmatmul.mubr.msk.f32.vlgmr.msra.gmra.mrb[0].mxu0 %vm681_vm1, %v13065_v19  ;;  %v10908_v19 = vld [vmem:[%s11381_s23 + $0x20] sm:$0xff] }
 0x2a2   : > { %10162 = vmatmul.mubr.msk.f32.vlgmr.msra.gmra.mrb[32].mxu1 %vm608_vm2, %v10905_v4  ;;  %10064 = vmatprep.mubr.msk.f32.mxu0 %vm681_vm1, %v14676_v46  ;;  %v10909_v46 = vld [vmem:[%s11381_s23 + $0x28] sm:$0xff] }
 0x2a3   : > { %10164 = vmatprep.mubr.msk.f32.mxu1 %vm608_vm2, %v10906_v42 }
 0x2a5   : > { %10065 = vmatmul.mubr.msk.f32.gmra.mrb[2].mxu0 %vm681_vm1, %v14677_v47  ;;  %v10910_v47 = vld [vmem:[%s11381_s23 + $0x30] sm:$0xff] }
 0x2a6   : > { %10165 = vmatmul.mubr.msk.f32.gmra.mrb[34].mxu1 %vm608_vm2, %v10907_v59  ;;  %10067 = vmatprep.mubr.msk.f32.mxu0 %vm681_vm1, %v14678_v18  ;;  %v10911_v18 = vld [vmem:[%s11381_s23 + $0x38] sm:$0xff] }
 0x2a7   : > { %10167 = vmatprep.mubr.msk.f32.mxu1 %vm608_vm2, %v10908_v19 }
 0x2a9   : > { %10068 = vmatmul.mubr.msk.f32.gmra.mrb[4].mxu0 %vm681_vm1, %v14680_v25  ;;  %v10912_v25 = vld [vmem:[%s11381_s23 + $0x40] sm:$0xff] }
 0x2aa   : > { %10168 = vmatmul.mubr.msk.f32.gmra.mrb[36].mxu1 %vm608_vm2, %v10909_v46  ;;  %10070 = vmatprep.mubr.msk.f32.mxu0 %vm681_vm1, %v14682_v10  ;;  %v10913_v10 = vld [vmem:[%s11381_s23 + $0x48] sm:$0xff] }
 0x2ab   : > { %10170 = vmatprep.mubr.msk.f32.mxu1 %vm608_vm2, %v10910_v47 }
 0x2ad   : > { %10071 = vmatmul.mubr.msk.f32.gmra.mrb[6].mxu0 %vm681_vm1, %v14684_v5  ;;  %v10914_v5 = vld [vmem:[%s11381_s23 + $0x50] sm:$0xff] }
 0x2ae   : > { %10171 = vmatmul.mubr.msk.f32.gmra.mrb[38].mxu1 %vm608_vm2, %v10911_v18  ;;  %10073 = vmatprep.mubr.msk.f32.mxu0 %vm681_vm1, %v14686_v16  ;;  %v10915_v16 = vld [vmem:[%s11381_s23 + $0x58] sm:$0xff] }
 0x2af   : > { %10173 = vmatprep.mubr.msk.f32.mxu1 %vm608_vm2, %v10912_v25 }
 0x2b1   : > { %10074 = vmatmul.mubr.msk.f32.gmra.mrb[8].mxu0 %vm681_vm1, %v14688_v44  ;;  %v10916_v44 = vld [vmem:[%s11381_s23 + $0x60] sm:$0xff] }
 0x2b2   : > { %10174 = vmatmul.mubr.msk.f32.gmra.mrb[40].mxu1 %vm608_vm2, %v10913_v10  ;;  %10076 = vmatprep.mubr.msk.f32.mxu0 %vm681_vm1, %v14690_v8  ;;  %v10917_v8 = vld [vmem:[%s11381_s23 + $0x68] sm:$0xff] }
 0x2b3   : > { %10176 = vmatprep.mubr.msk.f32.mxu1 %vm608_vm2, %v10914_v5 }
 0x2b5   : > { %10077 = vmatmul.mubr.msk.f32.gmra.mrb[10].mxu0 %vm681_vm1, %v14692_v24  ;;  %v10918_v24 = vld [vmem:[%s11381_s23 + $0x70] sm:$0xff] }
 0x2b6   : > { %10177 = vmatmul.mubr.msk.f32.gmra.mrb[42].mxu1 %vm608_vm2, %v10915_v16  ;;  %10079 = vmatprep.mubr.msk.f32.mxu0 %vm681_vm1, %v14694_v1  ;;  %v10919_v1 = vld [vmem:[%s11381_s23 + $0x78] sm:$0xff] }
 0x2b7   : > { %10179 = vmatprep.mubr.msk.f32.mxu1 %vm608_vm2, %v10916_v44 }
 0x2b9   : > { %10080 = vmatmul.mubr.msk.f32.gmra.mrb[12].mxu0 %vm681_vm1, %v14696_v52  ;;  %v10920_v52 = vld [vmem:[%s11381_s23 + $0x80] sm:$0xff] }
 0x2ba   : > { %10180 = vmatmul.mubr.msk.f32.gmra.mrb[44].mxu1 %vm608_vm2, %v10917_v8  ;;  %10082 = vmatprep.mubr.msk.f32.mxu0 %vm681_vm1, %v14698_v26  ;;  %v10921_v26 = vld [vmem:[%s11381_s23 + $0x88] sm:$0xff] }
 0x2bb   : > { %10182 = vmatprep.mubr.msk.f32.mxu1 %vm608_vm2, %v10918_v24 }
 0x2bd   : > { %10083 = vmatmul.mubr.msk.f32.gmra.mrb[14].mxu0 %vm681_vm1, %v14700_v30  ;;  %v10922_v30 = vld [vmem:[%s11381_s23 + $0x90] sm:$0xff] }
 0x2be   : > { %10183 = vmatmul.mubr.msk.f32.gmra.mrb[46].mxu1 %vm608_vm2, %v10919_v1  ;;  %10085 = vmatprep.mubr.msk.f32.mxu0 %vm681_vm1, %v14702_v15  ;;  %v10923_v15 = vld [vmem:[%s11381_s23 + $0x98] sm:$0xff]  ;;  %v13922_v1 = vld [vmem:[%s14247_s11] ss:$0 sm:$0xff] }
 0x2bf   : > { %10185 = vmatprep.mubr.msk.f32.mxu1 %vm608_vm2, %v10920_v52 }
 0x2c1   : > { %10086 = vmatmul.mubr.msk.f32.gmra.mrb[16].mxu0 %vm681_vm1, %v14721_v36  ;;  %v13927_v36 = vld [vmem:[%s14244_s8] ss:$0 sm:$0xff] }
 0x2c2   : > { %10186 = vmatmul.mubr.msk.f32.gmra.mrb[48].mxu1 %vm608_vm2, %v10921_v26  ;;  %10088 = vmatprep.mubr.msk.f32.mxu0 %vm681_vm1, %v14722_v58 }
 0x2c3   : > { %10188 = vmatprep.mubr.msk.f32.mxu1 %vm608_vm2, %v10922_v30 }
 0x2c5   : > { %10089 = vmatmul.mubr.msk.f32.gmra.mrb[18].mxu0 %vm681_vm1, %v14723_v22 }
 0x2c6   : > { %10189 = vmatmul.mubr.msk.f32.gmra.mrb[50].mxu1 %vm608_vm2, %v10923_v15  ;;  %10091 = vmatprep.mubr.msk.f32.mxu0 %vm681_vm1, %v14724_v54 }
 0x2c7   : > { %10191 = vmatprep.mubr.msk.f32.mxu1 %vm608_vm2, %v10924_v33 }
 0x2c9   : > { %10092 = vmatmul.mubr.msk.f32.gmra.mrb[20].mxu0 %vm681_vm1, %v14725_v55 }
 0x2ca   : > { %10192 = vmatmul.mubr.msk.f32.gmra.mrb[52].mxu1 %vm608_vm2, %v10925_v34  ;;  %10094 = vmatprep.mubr.msk.f32.mxu0 %vm681_vm1, %v14726_v9 }
 0x2cb   : > { %10194 = vmatprep.mubr.msk.f32.mxu1 %vm608_vm2, %v10926_v12 }
 0x2cd   : > { %10095 = vmatmul.mubr.msk.f32.gmra.mrb[22].mxu0 %vm681_vm1, %v13269_v45  ;;  %v10930_v45 = vld [vmem:[#allocation3 + $0x228] sm:$0xff] }
 0x2ce   : > { %10195 = vmatmul.mubr.msk.f32.gmra.mrb[54].mxu1 %vm608_vm2, %v10927_v21  ;;  %10097 = vmatprep.mubr.msk.f32.mxu0 %vm681_vm1, %v14727_v6  ;;  %v6475_v3 = vrot.slane %v10930_v45, 1 }
 0x2cf   : > { %10197 = vmatprep.mubr.msk.f32.mxu1 %vm608_vm2, %v10928_v56 }
 0x2d0   : > { %v6477_v50 = vsel %vm4838_vm4, %v6475_v3, %v6476_v62 }
 0x2d1   : > { %10098 = vmatmul.mubr.msk.f32.gmra.mrb[24].mxu0 %vm681_vm1, %v13290_v11  ;;  %v10933_v11 = vld [vmem:[%s11381_s23 + $0xd8] sm:$0xff] }
 0x2d2   : > { %10198 = vmatmul.mubr.msk.f32.gmra.mrb[56].mxu1 %vm608_vm2, %v10929_v17  ;;  %10100 = vmatprep.mubr.msk.f32.mxu0 %vm681_vm1, %v13296_v38  ;;  %v6478_v38 = vrot.slane %v1183_v2, 1 }
 0x2d3   : > { %10200 = vmatprep.mubr.msk.f32.mxu1 %vm608_vm2, %v10932_v0 }
 0x2d5   : > { %10101 = vmatmul.mubr.msk.f32.gmra.mrb[26].mxu0 %vm681_vm1, %v13306_v51  ;;  %v6479_v51 = vsel %vm4838_vm4, %v6476_v62, %v6478_v38 }
 0x2d6   : > { %10201 = vmatmul.mubr.msk.f32.gmra.mrb[58].mxu1 %vm608_vm2, %v10933_v11  ;;  %10103 = vmatprep.mubr.msk.f32.mxu0 %vm681_vm1, %v13587_v39  ;;  %v10937_v39 = vld [vmem:[%s11381_s23 + $0xf8] sm:$0xff] }
 0x2d7   : > { %10203 = vmatprep.mubr.msk.f32.mxu1 %vm608_vm2, %v10934_v14 }
 0x2d9   : > { %10104 = vmatmul.mubr.msk.f32.gmra.mrb[28].mxu0 %vm681_vm1, %v13596_v23 }
 0x2da   : > { %10204 = vmatmul.mubr.msk.f32.gmra.mrb[60].mxu1 %vm608_vm2, %v10935_v32  ;;  %10106 = vmatprep.mubr.msk.f32.mxu0 %vm681_vm1, %v6477_v50 }
 0x2db   : > { %10206 = vmatprep.mubr.msk.f32.mxu1 %vm608_vm2, %v10936_v60 }
 0x2dd   : > { %10107 = vmatmul.mubr.msk.f32.gmra.mrb[30].mxu0 %vm681_vm1, %v6479_v51 }
 0x2de   : > { %10207 = vmatmul.mubr.msk.f32.gmra.mrb[62].mxu1 %vm608_vm2, %v10937_v39 }
 0x2f5   : > { %v9563_v57 = vpop.f32.mrb[0].mxu1 }
 0x2f6   : > { %v3573_v41 = vpop.f32.mrb[1].mxu1 }
 0x2f9   : > { %v9566_v53 = vpop.f32.mrb[2].mxu1 }
 0x2fa   : > { %v3583_v29 = vpop.f32.mrb[3].mxu1 }
 0x2fd   : > { %v13863_v23 = vpop.f32.mrb[4].mxu1 }
 0x2fe   : > { %v13865_v28 = vpop.f32.mrb[5].mxu1 }
 0x301   : > { %v13867_v27 = vpop.f32.mrb[6].mxu1 }
 0x302   : > { %v13869_v40 = vpop.f32.mrb[7].mxu1 }
 0x305   : > { %v13871_v61 = vpop.f32.mrb[8].mxu1 }
 0x306   : > { %v13873_v13 = vpop.f32.mrb[9].mxu1 }
 0x309   : > { %v13875_v49 = vpop.f32.mrb[10].mxu1 }
 0x30a   : > { %v13877_v7 = vpop.f32.mrb[11].mxu1 }
 0x30d   : > { %v13879_v48 = vpop.f32.mrb[12].mxu1 }
 0x30e   : > { %v13881_v63 = vpop.f32.mrb[13].mxu1 }
 0x311   : > { %v13883_v31 = vpop.f32.mrb[14].mxu1 }
 0x312   : > { %v13885_v37 = vpop.f32.mrb[15].mxu1 }
 0x315   : > { %v13887_v20 = vpop.f32.mrb[16].mxu1 }
 0x316   : > { %v13889_v43 = vpop.f32.mrb[17].mxu1 }
 0x319   : > { %v13891_v4 = vpop.f32.mrb[18].mxu1 }
 0x31a   : > { %v13893_v42 = vpop.f32.mrb[19].mxu1 }
 0x31d   : > { %v13895_v59 = vpop.f32.mrb[20].mxu1 }
 0x31e   : > { %v13897_v19 = vpop.f32.mrb[21].mxu1 }
 0x321   : > { %v13899_v46 = vpop.f32.mrb[22].mxu1 }
 0x322   : > { %v13901_v47 = vpop.f32.mrb[23].mxu1 }
 0x325   : > { %v13903_v18 = vpop.f32.mrb[24].mxu1 }
 0x326   : > { %v13905_v25 = vpop.f32.mrb[25].mxu1 }
 0x329   : > { %v13907_v10 = vpop.f32.mrb[26].mxu1 }
 0x32a   : > { %v13909_v5 = vpop.f32.mrb[27].mxu1 }
 0x32d   : > { %v13911_v16 = vpop.f32.mrb[28].mxu1 }
 0x32e   : > { %v13913_v44 = vpop.f32.mrb[29].mxu1 }
 0x331   : > { %v13915_v8 = vpop.f32.mrb[30].mxu1 }
 0x332   : > { %v13917_v24 = vpop.f32.mrb[31].mxu1 }
 0x374   : > { %v10063_v52 = vpop.f32.mrb[0].mxu0 }
 0x375   : > { %v10163_v26 = vpop.f32.mrb[32].mxu1  ;;  %v10209_v58 = vadd.f32 %v10063_v52, %v9563_v57  ;;  %v6555_v30 = vpop.f32.mrb[1].mxu0 }
 0x376   : > { %v7645_v22 = vadd.f32 %v10163_v26, %v13922_v1  ;;  %v7478_v15 = vpop.f32.mrb[33].mxu1  ;;  %v10210_v54 = vadd.f32 %v6555_v30, %v3573_v41 }
 0x377   : > { %v6754_v33 = vadd.f32 %v10209_v58, %v13927_v36  ;;  %v7644_v55 = vadd.f32 %v13922_v1, %v7478_v15 }
 0x378   : > { %7677 = vst.msk [vmem:[%s13933_s21 + $0x8] sm:$0xff] %vm681_vm1, %v7645_v22  ;;  %v6753_v34 = vadd.f32 %v10210_v54, %v13927_v36  ;;  %v10066_v9 = vpop.f32.mrb[2].mxu0 }
 0x379   : > { %6786 = vst.msk [vmem:[%s13940_s25 + $0x8] sm:$0xff] %vm681_vm1, %v6754_v33  ;;  %v6818_v12 = vsel %vm681_vm1, %v6754_v33, 0.0  ;;  %v6889_v21 = vmul.f32 %v6754_v33, %v6754_v33  ;;  %7676 = vst.msk [vmem:[%s13933_s21] sm:$0xff] %vm681_vm1, %v7644_v55  ;;  %v10166_v6 = vpop.f32.mrb[34].mxu1  ;;  %v10211_v56 = vadd.f32 %v10066_v9, %v9566_v53  ;;  %v6565_v17 = vpop.f32.mrb[3].mxu0 }
 0x37a   : > { %6785 = vst.msk [vmem:[%s13940_s25] sm:$0xff] %vm681_vm1, %v6753_v34  ;;  %v6817_v45 = vsel %vm681_vm1, %v6753_v34, 0.0  ;;  %v6888_v3 = vmul.f32 %v6753_v34, %v6753_v34  ;;  %v7647_v35 = vadd.f32 %v10166_v6, %v13922_v1  ;;  %v7488_v62 = vpop.f32.mrb[35].mxu1  ;;  %v10212_v0 = vadd.f32 %v6565_v17, %v3583_v29 }
 0x37b   : > { %v6921_v2 = vsel %vm681_vm1, %v6889_v21, 0.0  ;;  %v6819_v11 = vadd.f32 %v6818_v12, %v6817_v45  ;;  %v6756_v38 = vadd.f32 %v10211_v56, %v13927_v36  ;;  %v7646_v14 = vadd.f32 %v13922_v1, %v7488_v62 }
 0x37c   : > { %v6920_v50 = vsel %vm681_vm1, %v6888_v3, 0.0  ;;  %7679 = vst.msk [vmem:[%s13933_s21 + $0x18] sm:$0xff] %vm681_vm1, %v7647_v35  ;;  %v6755_v32 = vadd.f32 %v10212_v0, %v13927_v36  ;;  %v10069_v51 = vpop.f32.mrb[4].mxu0 }
 0x37d   : > { %v6922_v60 = vadd.f32 %v6921_v2, %v6920_v50  ;;  %6788 = vst.msk [vmem:[%s13940_s25 + $0x18] sm:$0xff] %vm681_vm1, %v6756_v38  ;;  %v6891_v39 = vmul.f32 %v6756_v38, %v6756_v38  ;;  %7678 = vst.msk [vmem:[%s13933_s21 + $0x10] sm:$0xff] %vm681_vm1, %v7646_v14  ;;  %v10169_v57 = vpop.f32.mrb[36].mxu1  ;;  %v10213_v41 = vadd.f32 %v10069_v51, %v13863_v23  ;;  %v6575_v53 = vpop.f32.mrb[5].mxu0  ;;  %v6822_v23 = vsel %vm681_vm1, %v6756_v38, 0.0 }
 0x37e   : > { %6787 = vst.msk [vmem:[%s13940_s25 + $0x10] sm:$0xff] %vm681_vm1, %v6755_v32  ;;  %v6820_v29 = vsel %vm681_vm1, %v6755_v32, 0.0  ;;  %v6890_v52 = vmul.f32 %v6755_v32, %v6755_v32  ;;  %v7649_v26 = vadd.f32 %v10169_v57, %v13922_v1  ;;  %v7498_v58 = vpop.f32.mrb[37].mxu1  ;;  %v10214_v30 = vadd.f32 %v6575_v53, %v13865_v28 }
 0x37f   : > { %v6821_v22 = vadd.f32 %v6820_v29, %v6819_v11  ;;  %v6758_v15 = vadd.f32 %v10213_v41, %v13927_v36  ;;  %v7648_v54 = vadd.f32 %v13922_v1, %v7498_v58  ;;  %v6925_v9 = vsel %vm681_vm1, %v6891_v39, 0.0 }
 0x380   : > { %v6923_v33 = vsel %vm681_vm1, %v6890_v52, 0.0  ;;  %7681 = vst.msk [vmem:[%s13933_s21 + $0x28] sm:$0xff] %vm681_vm1, %v7649_v26  ;;  %v6757_v55 = vadd.f32 %v10214_v30, %v13927_v36  ;;  %v10072_v34 = vpop.f32.mrb[6].mxu0 }
 0x381   : > { %v6924_v12 = vadd.f32 %v6923_v33, %v6922_v60  ;;  %6790 = vst.msk [vmem:[%s13940_s25 + $0x28] sm:$0xff] %vm681_vm1, %v6758_v15  ;;  %v6893_v28 = vmul.f32 %v6758_v15, %v6758_v15  ;;  %7680 = vst.msk [vmem:[%s13933_s21 + $0x20] sm:$0xff] %vm681_vm1, %v7648_v54  ;;  %v6823_v21 = vadd.f32 %v6822_v23, %v6821_v22  ;;  %v10172_v6 = vpop.f32.mrb[38].mxu1  ;;  %v6585_v56 = vpop.f32.mrb[7].mxu0  ;;  %v6826_v38 = vsel %vm681_vm1, %v6758_v15, 0.0 }
 0x382   : > { %6789 = vst.msk [vmem:[%s13940_s25 + $0x20] sm:$0xff] %vm681_vm1, %v6757_v55  ;;  %v6824_v17 = vsel %vm681_vm1, %v6757_v55, 0.0  ;;  %v6892_v45 = vmul.f32 %v6757_v55, %v6757_v55  ;;  %v7651_v3 = vadd.f32 %v10172_v6, %v13922_v1  ;;  %v10215_v35 = vadd.f32 %v10072_v34, %v13867_v27  ;;  %v7508_v62 = vpop.f32.mrb[39].mxu1 }
 0x383   : > { %v6825_v0 = vadd.f32 %v6824_v17, %v6823_v21  ;;  %v6926_v2 = vadd.f32 %v6925_v9, %v6924_v12  ;;  %v7650_v11 = vadd.f32 %v13922_v1, %v7508_v62  ;;  %v10216_v32 = vadd.f32 %v6585_v56, %v13869_v40 }
 0x384   : > { %v6927_v14 = vsel %vm681_vm1, %v6892_v45, 0.0  ;;  %7683 = vst.msk [vmem:[%s13933_s21 + $0x38] sm:$0xff] %vm681_vm1, %v7651_v3  ;;  %v6760_v50 = vadd.f32 %v10215_v35, %v13927_v36  ;;  %v10075_v51 = vpop.f32.mrb[8].mxu0  ;;  %v6929_v53 = vsel %vm681_vm1, %v6893_v28, 0.0 }
 0x385   : > { %v6928_v60 = vadd.f32 %v6927_v14, %v6926_v2  ;;  %7682 = vst.msk [vmem:[%s13933_s21 + $0x30] sm:$0xff] %vm681_vm1, %v7650_v11  ;;  %v6827_v27 = vadd.f32 %v6826_v38, %v6825_v0  ;;  %v10175_v39 = vpop.f32.mrb[40].mxu1  ;;  %v10217_v57 = vadd.f32 %v10075_v51, %v13871_v61  ;;  %v6595_v41 = vpop.f32.mrb[9].mxu0  ;;  %v6759_v52 = vadd.f32 %v10216_v32, %v13927_v36 }
 0x386   : > { %6792 = vst.msk [vmem:[%s13940_s25 + $0x38] sm:$0xff] %vm681_vm1, %v6760_v50  ;;  %v6895_v29 = vmul.f32 %v6760_v50, %v6760_v50  ;;  %v7653_v40 = vadd.f32 %v10175_v39, %v13922_v1  ;;  %v7518_v26 = vpop.f32.mrb[41].mxu1  ;;  %v10218_v61 = vadd.f32 %v6595_v41, %v13873_v13  ;;  %v6830_v33 = vsel %vm681_vm1, %v6760_v50, 0.0 }
 0x387   : > { %v6930_v58 = vadd.f32 %v6929_v53, %v6928_v60  ;;  %v6762_v30 = vadd.f32 %v10217_v57, %v13927_v36  ;;  %v7652_v22 = vadd.f32 %v13922_v1, %v7518_v26  ;;  %6791 = vst.msk [vmem:[%s13940_s25 + $0x30] sm:$0xff] %vm681_vm1, %v6759_v52  ;;  %v6828_v15 = vsel %vm681_vm1, %v6759_v52, 0.0 }
 0x388   : > { %v6894_v54 = vmul.f32 %v6759_v52, %v6759_v52  ;;  %7685 = vst.msk [vmem:[%s13933_s21 + $0x48] sm:$0xff] %vm681_vm1, %v7653_v40  ;;  %v10078_v23 = vpop.f32.mrb[10].mxu0  ;;  %v6829_v55 = vadd.f32 %v6828_v15, %v6827_v27  ;;  %v6761_v13 = vadd.f32 %v10218_v61, %v13927_v36  ;;  %v6933_v45 = vsel %vm681_vm1, %v6895_v29, 0.0 }
 0x389   : > { %6794 = vst.msk [vmem:[%s13940_s25 + $0x48] sm:$0xff] %vm681_vm1, %v6762_v30  ;;  %v6897_v34 = vmul.f32 %v6762_v30, %v6762_v30  ;;  %7684 = vst.msk [vmem:[%s13933_s21 + $0x40] sm:$0xff] %vm681_vm1, %v7652_v22  ;;  %v10178_v9 = vpop.f32.mrb[42].mxu1  ;;  %v6605_v12 = vpop.f32.mrb[11].mxu0  ;;  %v10219_v6 = vadd.f32 %v10078_v23, %v13875_v49  ;;  %v6834_v60 = vsel %vm681_vm1, %v6762_v30, 0.0 }
 0x38a   : > { %v6931_v28 = vsel %vm681_vm1, %v6894_v54, 0.0  ;;  %v7655_v21 = vadd.f32 %v10178_v9, %v13922_v1  ;;  %v7528_v56 = vpop.f32.mrb[43].mxu1  ;;  %v10220_v17 = vadd.f32 %v6605_v12, %v13877_v7  ;;  %6793 = vst.msk [vmem:[%s13940_s25 + $0x40] sm:$0xff] %vm681_vm1, %v6761_v13  ;;  %v6831_v35 = vadd.f32 %v6830_v33, %v6829_v55 }
 0x38b   : > { %v6932_v3 = vadd.f32 %v6931_v28, %v6930_v58  ;;  %v6832_v62 = vsel %vm681_vm1, %v6761_v13, 0.0  ;;  %v6896_v0 = vmul.f32 %v6761_v13, %v6761_v13  ;;  %v6764_v2 = vadd.f32 %v10219_v6, %v13927_v36 }
 0x38c   : > { %7687 = vst.msk [vmem:[%s13933_s21 + $0x58] sm:$0xff] %vm681_vm1, %v7655_v21  ;;  %v7654_v49 = vadd.f32 %v13922_v1, %v7528_v56  ;;  %v6763_v7 = vadd.f32 %v10220_v17, %v13927_v36  ;;  %v10081_v11 = vpop.f32.mrb[12].mxu0  ;;  %v6833_v38 = vadd.f32 %v6832_v62, %v6831_v35  ;;  %v6937_v27 = vsel %vm681_vm1, %v6897_v34, 0.0 }
 0x38d   : > { %v6934_v14 = vadd.f32 %v6933_v45, %v6932_v3  ;;  %v10181_v50 = vpop.f32.mrb[44].mxu1  ;;  %v10221_v32 = vadd.f32 %v10081_v11, %v13879_v48  ;;  %v6615_v51 = vpop.f32.mrb[13].mxu0  ;;  %v6935_v39 = vsel %vm681_vm1, %v6896_v0, 0.0  ;;  %6796 = vst.msk [vmem:[%s13940_s25 + $0x58] sm:$0xff] %vm681_vm1, %v6764_v2  ;;  %v6899_v40 = vmul.f32 %v6764_v2, %v6764_v2 }
 0x38e   : > { %7686 = vst.msk [vmem:[%s13933_s21 + $0x50] sm:$0xff] %vm681_vm1, %v7654_v49  ;;  %6795 = vst.msk [vmem:[%s13940_s25 + $0x50] sm:$0xff] %vm681_vm1, %v6763_v7  ;;  %v6836_v57 = vsel %vm681_vm1, %v6763_v7, 0.0  ;;  %v7538_v41 = vpop.f32.mrb[45].mxu1  ;;  %v6835_v29 = vadd.f32 %v6834_v60, %v6833_v38  ;;  %v6898_v48 = vmul.f32 %v6763_v7, %v6763_v7  ;;  %v7657_v52 = vadd.f32 %v10181_v50, %v13922_v1 }
 0x38f   : > { %v6936_v53 = vadd.f32 %v6935_v39, %v6934_v14  ;;  %v6766_v26 = vadd.f32 %v10221_v32, %v13927_v36  ;;  %v7656_v58 = vadd.f32 %v13922_v1, %v7538_v41  ;;  %v10222_v30 = vadd.f32 %v6615_v51, %v13881_v63 }
 0x390   : > { %v10084_v22 = vpop.f32.mrb[14].mxu0  ;;  %v6837_v61 = vadd.f32 %v6836_v57, %v6835_v29  ;;  %v6939_v54 = vsel %vm681_vm1, %v6898_v48, 0.0  ;;  %7689 = vst.msk [vmem:[%s13933_s21 + $0x68] sm:$0xff] %vm681_vm1, %v7657_v52  ;;  %v6838_v34 = vsel %vm681_vm1, %v6764_v2, 0.0  ;;  %v6941_v56 = vsel %vm681_vm1, %v6899_v40, 0.0 }
 0x391   : > { %v6938_v15 = vadd.f32 %v6937_v27, %v6936_v53  ;;  %v10184_v23 = vpop.f32.mrb[46].mxu1  ;;  %v10223_v33 = vadd.f32 %v10084_v22, %v13883_v31  ;;  %v6625_v55 = vpop.f32.mrb[15].mxu0  ;;  %6798 = vst.msk [vmem:[%s13940_s25 + $0x68] sm:$0xff] %vm681_vm1, %v6766_v26  ;;  %v6901_v13 = vmul.f32 %v6766_v26, %v6766_v26  ;;  %7688 = vst.msk [vmem:[%s13933_s21 + $0x60] sm:$0xff] %vm681_vm1, %v7656_v58  ;;  %v6842_v62 = vsel %vm681_vm1, %v6766_v26, 0.0 }
 0x392   : > { %v6765_v63 = vadd.f32 %v10222_v30, %v13927_v36  ;;  %v7659_v9 = vadd.f32 %v10184_v23, %v13922_v1  ;;  %v7548_v12 = vpop.f32.mrb[47].mxu1  ;;  %v6839_v21 = vadd.f32 %v6838_v34, %v6837_v61  ;;  %v10224_v3 = vadd.f32 %v6625_v55, %v13885_v37 }
 0x393   : > { %v6940_v28 = vadd.f32 %v6939_v54, %v6938_v15  ;;  %v6768_v31 = vadd.f32 %v10223_v33, %v13927_v36  ;;  %v7658_v6 = vadd.f32 %v13922_v1, %v7548_v12  ;;  %v6945_v0 = vsel %vm681_vm1, %v6901_v13, 0.0 }
 0x394   : > { %6797 = vst.msk [vmem:[%s13940_s25 + $0x60] sm:$0xff] %vm681_vm1, %v6765_v63  ;;  %v6840_v17 = vsel %vm681_vm1, %v6765_v63, 0.0  ;;  %v6900_v45 = vmul.f32 %v6765_v63, %v6765_v63  ;;  %7691 = vst.msk [vmem:[%s13933_s21 + $0x78] sm:$0xff] %vm681_vm1, %v7659_v9  ;;  %v10087_v35 = vpop.f32.mrb[16].mxu0  ;;  %v6767_v14 = vadd.f32 %v10224_v3, %v13927_v36 }
 0x395   : > { %v6841_v2 = vadd.f32 %v6840_v17, %v6839_v21  ;;  %v6942_v49 = vadd.f32 %v6941_v56, %v6940_v28  ;;  %6800 = vst.msk [vmem:[%s13940_s25 + $0x78] sm:$0xff] %vm681_vm1, %v6768_v31  ;;  %7690 = vst.msk [vmem:[%s13933_s21 + $0x70] sm:$0xff] %vm681_vm1, %v7658_v6  ;;  %v10187_v7 = vpop.f32.mrb[48].mxu1  ;;  %v6635_v11 = vpop.f32.mrb[17].mxu0  ;;  %v10225_v50 = vadd.f32 %v10087_v35, %v13887_v20  ;;  %v6846_v30 = vsel %vm681_vm1, %v6768_v31, 0.0 }
 0x396   : > { %v6943_v38 = vsel %vm681_vm1, %v6900_v45, 0.0  ;;  %v7661_v37 = vadd.f32 %v10187_v7, %v13922_v1  ;;  %v7558_v32 = vpop.f32.mrb[49].mxu1  ;;  %v6903_v60 = vmul.f32 %v6768_v31, %v6768_v31  ;;  %6799 = vst.msk [vmem:[%s13940_s25 + $0x70] sm:$0xff] %vm681_vm1, %v6767_v14  ;;  %v6844_v57 = vsel %vm681_vm1, %v6767_v14, 0.0 }
 0x397   : > { %v6944_v51 = vadd.f32 %v6943_v38, %v6942_v49  ;;  %v6843_v27 = vadd.f32 %v6842_v62, %v6841_v2  ;;  %v7660_v39 = vadd.f32 %v13922_v1, %v7558_v32  ;;  %v6902_v41 = vmul.f32 %v6767_v14, %v6767_v14 }
 0x398   : > { %7693 = vst.msk [vmem:[%s13933_s21 + $0x88] sm:$0xff] %vm681_vm1, %v7661_v37  ;;  %v6770_v53 = vadd.f32 %v10225_v50, %v13927_v36  ;;  %v10226_v29 = vadd.f32 %v6635_v11, %v13889_v43  ;;  %v10090_v48 = vpop.f32.mrb[18].mxu0  ;;  %v6949_v55 = vsel %vm681_vm1, %v6903_v60, 0.0 }
 0x399   : > { %v6845_v20 = vadd.f32 %v6844_v57, %v6843_v27  ;;  %v6946_v52 = vadd.f32 %v6945_v0, %v6944_v51  ;;  %7692 = vst.msk [vmem:[%s13933_s21 + $0x80] sm:$0xff] %vm681_vm1, %v7660_v39  ;;  %v10190_v40 = vpop.f32.mrb[50].mxu1  ;;  %v10227_v26 = vadd.f32 %v10090_v48, %v13891_v4  ;;  %v6645_v58 = vpop.f32.mrb[19].mxu0  ;;  %v6947_v22 = vsel %vm681_vm1, %v6902_v41, 0.0 }
 0x39a   : > { %6802 = vst.msk [vmem:[%s13940_s25 + $0x88] sm:$0xff] %vm681_vm1, %v6770_v53  ;;  %v6905_v61 = vmul.f32 %v6770_v53, %v6770_v53  ;;  %v6769_v43 = vadd.f32 %v10226_v29, %v13927_v36  ;;  %v7568_v15 = vpop.f32.mrb[51].mxu1  ;;  %v7663_v33 = vadd.f32 %v10190_v40, %v13922_v1  ;;  %v6850_v12 = vsel %vm681_vm1, %v6770_v53, 0.0 }
 0x39b   : > { %v6948_v54 = vadd.f32 %v6947_v22, %v6946_v52  ;;  %v6847_v23 = vadd.f32 %v6846_v30, %v6845_v20  ;;  %v6772_v4 = vadd.f32 %v10227_v26, %v13927_v36  ;;  %v7662_v63 = vadd.f32 %v13922_v1, %v7568_v15 }
 0x39c   : > { %6801 = vst.msk [vmem:[%s13940_s25 + $0x80] sm:$0xff] %vm681_vm1, %v6769_v43  ;;  %v6848_v34 = vsel %vm681_vm1, %v6769_v43, 0.0  ;;  %v6904_v13 = vmul.f32 %v6769_v43, %v6769_v43  ;;  %v10093_v9 = vpop.f32.mrb[20].mxu0  ;;  %7695 = vst.msk [vmem:[%s13933_s21 + $0x98] sm:$0xff] %vm681_vm1, %v7663_v33  ;;  %v10228_v17 = vadd.f32 %v6645_v58, %v13893_v42  ;;  %v6953_v62 = vsel %vm681_vm1, %v6905_v61, 0.0 }
 0x39d   : > { %v6849_v28 = vadd.f32 %v6848_v34, %v6847_v23  ;;  %v6950_v21 = vadd.f32 %v6949_v55, %v6948_v54  ;;  %6804 = vst.msk [vmem:[%s13940_s25 + $0x98] sm:$0xff] %vm681_vm1, %v6772_v4  ;;  %v10193_v31 = vpop.f32.mrb[52].mxu1  ;;  %v6655_v6 = vpop.f32.mrb[21].mxu0  ;;  %7694 = vst.msk [vmem:[%s13933_s21 + $0x90] sm:$0xff] %vm681_vm1, %v7662_v63  ;;  %v10229_v3 = vadd.f32 %v10093_v9, %v13895_v59  ;;  %v6854_v51 = vsel %vm681_vm1, %v6772_v4, 0.0 }
 0x39e   : > { %v6951_v56 = vsel %vm681_vm1, %v6904_v13, 0.0  ;;  %v7665_v45 = vadd.f32 %v10193_v31, %v13922_v1  ;;  %v7578_v35 = vpop.f32.mrb[53].mxu1  ;;  %v6907_v7 = vmul.f32 %v6772_v4, %v6772_v4  ;;  %v6771_v11 = vadd.f32 %v10228_v17, %v13927_v36 }
 0x39f   : > { %v6952_v0 = vadd.f32 %v6951_v56, %v6950_v21  ;;  %v6851_v2 = vadd.f32 %v6850_v12, %v6849_v28  ;;  %v7664_v49 = vadd.f32 %v13922_v1, %v7578_v35  ;;  %v6774_v42 = vadd.f32 %v10229_v3, %v13927_v36 }
 0x3a0   : > { %7697 = vst.msk [vmem:[%s13933_s21 + $0xa8] sm:$0xff] %vm681_vm1, %v7665_v45  ;;  %v10230_v38 = vadd.f32 %v6655_v6, %v13897_v19  ;;  %v10096_v14 = vpop.f32.mrb[22].mxu0  ;;  %6803 = vst.msk [vmem:[%s13940_s25 + $0x90] sm:$0xff] %vm681_vm1, %v6771_v11  ;;  %v6852_v60 = vsel %vm681_vm1, %v6771_v11, 0.0  ;;  %v6906_v27 = vmul.f32 %v6771_v11, %v6771_v11  ;;  %v6957_v29 = vsel %vm681_vm1, %v6907_v7, 0.0 }
 0x3a1   : > { %v6954_v59 = vadd.f32 %v6953_v62, %v6952_v0  ;;  %7696 = vst.msk [vmem:[%s13933_s21 + $0xa0] sm:$0xff] %vm681_vm1, %v7664_v49  ;;  %v10196_v37 = vpop.f32.mrb[54].mxu1  ;;  %v10231_v50 = vadd.f32 %v10096_v14, %v13899_v46  ;;  %v6665_v32 = vpop.f32.mrb[23].mxu0  ;;  %6806 = vst.msk [vmem:[%s13940_s25 + $0xa8] sm:$0xff] %vm681_vm1, %v6774_v42  ;;  %v6909_v39 = vmul.f32 %v6774_v42, %v6774_v42  ;;  %v6858_v15 = vsel %vm681_vm1, %v6774_v42, 0.0 }
 0x3a2   : > { %v7588_v19 = vpop.f32.mrb[55].mxu1  ;;  %v6853_v57 = vadd.f32 %v6852_v60, %v6851_v2  ;;  %v6773_v41 = vadd.f32 %v10230_v38, %v13927_v36  ;;  %v7667_v46 = vadd.f32 %v10196_v37, %v13922_v1  ;;  %v6955_v48 = vsel %vm681_vm1, %v6906_v27, 0.0 }
 0x3a3   : > { %v6776_v53 = vadd.f32 %v10231_v50, %v13927_v36  ;;  %v7666_v20 = vadd.f32 %v13922_v1, %v7588_v19  ;;  %v10232_v52 = vadd.f32 %v6665_v32, %v13901_v47  ;;  %v6956_v26 = vadd.f32 %v6955_v48, %v6954_v59 }
 0x3a4   : > { %v10099_v40 = vpop.f32.mrb[24].mxu0  ;;  %6805 = vst.msk [vmem:[%s13940_s25 + $0xa0] sm:$0xff] %vm681_vm1, %v6773_v41  ;;  %v6855_v58 = vadd.f32 %v6854_v51, %v6853_v57  ;;  %v6856_v30 = vsel %vm681_vm1, %v6773_v41, 0.0  ;;  %v6908_v22 = vmul.f32 %v6773_v41, %v6773_v41  ;;  %7699 = vst.msk [vmem:[%s13933_s21 + $0xb8] sm:$0xff] %vm681_vm1, %v7667_v46  ;;  %v6961_v47 = vsel %vm681_vm1, %v6909_v39, 0.0 }
 0x3a5   : > { %6808 = vst.msk [vmem:[%s13940_s25 + $0xb8] sm:$0xff] %vm681_vm1, %v6776_v53  ;;  %v10199_v61 = vpop.f32.mrb[56].mxu1  ;;  %v6675_v43 = vpop.f32.mrb[25].mxu0  ;;  %7698 = vst.msk [vmem:[%s13933_s21 + $0xb0] sm:$0xff] %vm681_vm1, %v7666_v20  ;;  %v6775_v54 = vadd.f32 %v10232_v52, %v13927_v36  ;;  %v6958_v55 = vadd.f32 %v6957_v29, %v6956_v26  ;;  %v10233_v13 = vadd.f32 %v10099_v40, %v13903_v18  ;;  %v6862_v49 = vsel %vm681_vm1, %v6776_v53, 0.0 }
 0x3a6   : > { %v7669_v23 = vadd.f32 %v10199_v61, %v13922_v1  ;;  %v7598_v33 = vpop.f32.mrb[57].mxu1  ;;  %v6857_v4 = vadd.f32 %v6856_v30, %v6855_v58  ;;  %v6959_v34 = vsel %vm681_vm1, %v6908_v22, 0.0  ;;  %v6911_v63 = vmul.f32 %v6776_v53, %v6776_v53 }
 0x3a7   : > { %6807 = vst.msk [vmem:[%s13940_s25 + $0xb0] sm:$0xff] %vm681_vm1, %v6775_v54  ;;  %v6860_v9 = vsel %vm681_vm1, %v6775_v54, 0.0  ;;  %v6910_v12 = vmul.f32 %v6775_v54, %v6775_v54  ;;  %v7668_v28 = vadd.f32 %v13922_v1, %v7598_v33  ;;  %v6960_v31 = vadd.f32 %v6959_v34, %v6958_v55 }
 0x3a8   : > { %7701 = vst.msk [vmem:[%s13933_s21 + $0xc8] sm:$0xff] %vm681_vm1, %v7669_v23  ;;  %v10102_v21 = vpop.f32.mrb[26].mxu0  ;;  %v6859_v6 = vadd.f32 %v6858_v15, %v6857_v4  ;;  %v6778_v56 = vadd.f32 %v10233_v13, %v13927_v36  ;;  %v10234_v17 = vadd.f32 %v6675_v43, %v13905_v25  ;;  %v6965_v51 = vsel %vm681_vm1, %v6911_v63, 0.0 }
 0x3a9   : > { %v10202_v18 = vpop.f32.mrb[58].mxu1  ;;  %v6685_v45 = vpop.f32.mrb[27].mxu0  ;;  %v6963_v3 = vsel %vm681_vm1, %v6910_v12, 0.0  ;;  %7700 = vst.msk [vmem:[%s13933_s21 + $0xc0] sm:$0xff] %vm681_vm1, %v7668_v28  ;;  %v10235_v62 = vadd.f32 %v10102_v21, %v13907_v10  ;;  %v6962_v11 = vadd.f32 %v6961_v47, %v6960_v31 }
 0x3aa   : > { %v7671_v35 = vadd.f32 %v10202_v18, %v13922_v1  ;;  %v7608_v0 = vpop.f32.mrb[59].mxu1  ;;  %v10236_v2 = vadd.f32 %v6685_v45, %v13909_v5  ;;  %v6861_v7 = vadd.f32 %v6860_v9, %v6859_v6  ;;  %6810 = vst.msk [vmem:[%s13940_s25 + $0xc8] sm:$0xff] %vm681_vm1, %v6778_v56  ;;  %v6777_v25 = vadd.f32 %v10234_v17, %v13927_v36 }
 0x3ab   : > { %v6780_v42 = vadd.f32 %v10235_v62, %v13927_v36  ;;  %v7670_v10 = vadd.f32 %v13922_v1, %v7608_v0  ;;  %v6964_v14 = vadd.f32 %v6963_v3, %v6962_v11  ;;  %v6913_v60 = vmul.f32 %v6778_v56, %v6778_v56 }
 0x3ac   : > { %7703 = vst.msk [vmem:[%s13933_s21 + $0xd8] sm:$0xff] %vm681_vm1, %v7671_v35  ;;  %v6779_v5 = vadd.f32 %v10236_v2, %v13927_v36  ;;  %v10105_v38 = vpop.f32.mrb[28].mxu0  ;;  %v6863_v59 = vadd.f32 %v6862_v49, %v6861_v7  ;;  %6809 = vst.msk [vmem:[%s13940_s25 + $0xc0] sm:$0xff] %vm681_vm1, %v6777_v25  ;;  %v6864_v27 = vsel %vm681_vm1, %v6777_v25, 0.0  ;;  %v6912_v39 = vmul.f32 %v6777_v25, %v6777_v25 }
 0x3ad   : > { %v10205_v37 = vpop.f32.mrb[60].mxu1  ;;  %v10237_v50 = vadd.f32 %v10105_v38, %v13911_v16  ;;  %v6695_v32 = vpop.f32.mrb[29].mxu0  ;;  %6812 = vst.msk [vmem:[%s13940_s25 + $0xd8] sm:$0xff] %vm681_vm1, %v6780_v42  ;;  %7702 = vst.msk [vmem:[%s13933_s21 + $0xd0] sm:$0xff] %vm681_vm1, %v7670_v10  ;;  %v6866_v57 = vsel %vm681_vm1, %v6778_v56, 0.0  ;;  %v6966_v16 = vadd.f32 %v6965_v51, %v6964_v14  ;;  %v6915_v26 = vmul.f32 %v6780_v42, %v6780_v42 }
 0x3ae   : > { %6811 = vst.msk [vmem:[%s13940_s25 + $0xd0] sm:$0xff] %vm681_vm1, %v6779_v5  ;;  %v7618_v19 = vpop.f32.mrb[61].mxu1  ;;  %v6865_v41 = vadd.f32 %v6864_v27, %v6863_v59  ;;  %v6914_v46 = vmul.f32 %v6779_v5, %v6779_v5  ;;  %v6967_v53 = vsel %vm681_vm1, %v6912_v39, 0.0  ;;  %v6868_v29 = vsel %vm681_vm1, %v6779_v5, 0.0 }
 0x3af   : > { %v7673_v48 = vadd.f32 %v10205_v37, %v13922_v1  ;;  %v6782_v20 = vadd.f32 %v10237_v50, %v13927_v36  ;;  %v6968_v40 = vadd.f32 %v6967_v53, %v6966_v16  ;;  %v7672_v30 = vadd.f32 %v13922_v1, %v7618_v19 }
 0x3b0   : > { %v10108_v52 = vpop.f32.mrb[30].mxu0  ;;  %v6867_v58 = vadd.f32 %v6866_v57, %v6865_v41  ;;  %v6969_v43 = vsel %vm681_vm1, %v6913_v60, 0.0  ;;  %v6971_v15 = vsel %vm681_vm1, %v6914_v46, 0.0  ;;  %v10238_v47 = vadd.f32 %v6695_v32, %v13913_v44 }
 0x3b1   : > { %v10208_v22 = vpop.f32.mrb[62].mxu1  ;;  %v6705_v61 = vpop.f32.mrb[31].mxu0  ;;  %7705 = vst.msk [vmem:[%s13933_s21 + $0xe8] sm:$0xff] %vm681_vm1, %v7673_v48  ;;  %6814 = vst.msk [vmem:[%s13940_s25 + $0xe8] sm:$0xff] %vm681_vm1, %v6782_v20  ;;  %v6970_v4 = vadd.f32 %v6969_v43, %v6968_v40  ;;  %v10239_v55 = vadd.f32 %v10108_v52, %v13915_v8  ;;  %v6870_v13 = vsel %vm681_vm1, %v6780_v42, 0.0  ;;  %v6973_v9 = vsel %vm681_vm1, %v6915_v26, 0.0 }
 0x3b2   : > { %v7675_v54 = vadd.f32 %v10208_v22, %v13922_v1  ;;  %v7628_v23 = vpop.f32.mrb[63].mxu1  ;;  %v6869_v33 = vadd.f32 %v6868_v29, %v6867_v58  ;;  %7704 = vst.msk [vmem:[%s13933_s21 + $0xe0] sm:$0xff] %vm681_vm1, %v7672_v30  ;;  %v6781_v63 = vadd.f32 %v10238_v47, %v13927_v36  ;;  %v10240_v44 = vadd.f32 %v6705_v61, %v13917_v24 }
 0x3b3   : > { %v7674_v34 = vadd.f32 %v13922_v1, %v7628_v23  ;;  %v6972_v12 = vadd.f32 %v6971_v15, %v6970_v4  ;;  %v6784_v21 = vadd.f32 %v10239_v55, %v13927_v36  ;;  %v6917_v8 = vmul.f32 %v6782_v20, %v6782_v20 }
 0x3b4   : > { %7707 = vst.msk [vmem:[%s13933_s21 + $0xf8] sm:$0xff] %vm681_vm1, %v7675_v54  ;;  %v6871_v28 = vadd.f32 %v6870_v13, %v6869_v33  ;;  %6813 = vst.msk [vmem:[%s13940_s25 + $0xe0] sm:$0xff] %vm681_vm1, %v6781_v63  ;;  %v6872_v1 = vsel %vm681_vm1, %v6781_v63, 0.0  ;;  %v6916_v31 = vmul.f32 %v6781_v63, %v6781_v63  ;;  %v6783_v6 = vadd.f32 %v10240_v44, %v13927_v36 }
 0x3b5   : > { %7706 = vst.msk [vmem:[%s13933_s21 + $0xf0] sm:$0xff] %vm681_vm1, %v7674_v34  ;;  %v6974_v17 = vadd.f32 %v6973_v9, %v6972_v12  ;;  %6816 = vst.msk [vmem:[%s13940_s25 + $0xf8] sm:$0xff] %vm681_vm1, %v6784_v21  ;;  %v6874_v24 = vsel %vm681_vm1, %v6782_v20, 0.0  ;;  %v6977_v0 = vsel %vm681_vm1, %v6917_v8, 0.0  ;;  %v6919_v2 = vmul.f32 %v6784_v21, %v6784_v21 }
 0x3b6   : > { %v6873_v56 = vadd.f32 %v6872_v1, %v6871_v28  ;;  %v6975_v18 = vsel %vm681_vm1, %v6916_v31, 0.0  ;;  %6815 = vst.msk [vmem:[%s13940_s25 + $0xf0] sm:$0xff] %vm681_vm1, %v6783_v6  ;;  %v6876_v45 = vsel %vm681_vm1, %v6783_v6, 0.0  ;;  %v6918_v3 = vmul.f32 %v6783_v6, %v6783_v6 }
 0x3b7   : > { %v6976_v35 = vadd.f32 %v6975_v18, %v6974_v17  ;;  %v6878_v11 = vsel %vm681_vm1, %v6784_v21, 0.0  ;;  %v6981_v10 = vsel %vm681_vm1, %v6919_v2, 0.0 }
 0x3b8   : > { %v6875_v62 = vadd.f32 %v6874_v24, %v6873_v56  ;;  %v6979_v36 = vsel %vm681_vm1, %v6918_v3, 0.0 }
 0x3b9   : > { %v6978_v7 = vadd.f32 %v6977_v0, %v6976_v35 }
 0x3ba   : > { %v6877_v49 = vadd.f32 %v6876_v45, %v6875_v62 }
 0x3bb   : > { %v6980_v42 = vadd.f32 %v6979_v36, %v6978_v7 }
 0x3bc   : > { %v6879_v25 = vadd.f32 %v6878_v11, %v6877_v49 }
 0x3bd   : > { %v6982_v38 = vadd.f32 %v6981_v10, %v6980_v42 }
 0x3be   : > { %v6880_v5 = vrot.slane %v6879_v25, 4 }
 0x3bf   : > { %v6983_v59 = vrot.slane %v6982_v38, 4 }
 0x3c0   : > { %v6881_v14 = vadd.f32 %v6880_v5, %v6879_v25 }
 0x3c1   : > { %v6984_v50 = vadd.f32 %v6983_v59, %v6982_v38 }
 0x3c2   : > { %v6882_v37 = vrot.slane %v6881_v14, 2 }
 0x3c3   : > { %v6985_v51 = vrot.slane %v6984_v50, 2 }
 0x3c4   : > { %v6883_v32 = vadd.f32 %v6882_v37, %v6881_v14 }
 0x3c5   : > { %v6986_v27 = vadd.f32 %v6985_v51, %v6984_v50 }
 0x3c6   : > { %v6884_v60 = vrot.slane %v6883_v32, 1 }
 0x3c7   : > { %v6987_v19 = vrot.slane %v6986_v27, 1 }
 0x3c8   : > { %v6885_v39 = vadd.f32 %v6884_v60, %v6883_v32 }
 0x3c9   : > { %v6988_v57 = vadd.f32 %v6987_v19, %v6986_v27 }
 0x3ca   : > { %6887 = vst.msk [vmem:[%s540_s27] sm:$0x1] %vm6886_vm5, %v6885_v39 }
 0x3cb   : > { %6989 = vst.msk [vmem:[%s543_s30] sm:$0x1] %vm6886_vm5, %v6988_v57 }
 0x3cc PF: > { %s26_s18 = sadd.s32 1, %s10944_s18  }
 0x3cd   : > { %p23_p4 = scmp.ge.s32.totalorder %s26_s18, 4  }
 0x3cf   :  { %25 = sbr.rel (!%p23_p4) target bundleno = 1 (0x1), region = 155 }

</bundles_post_ra>
